<compile_context>
chip_gen: v7x
topology: tpu7x:2x2x1
jax: 0.10.0
libtpu: 0.0.40
codegen_flags: <defaults>
</compile_context>

<pallas_src>
import functools
import numpy as np
import jax
import jax.numpy as jnp
from jax.experimental import pallas as pl
from jax.experimental.pallas import tpu as pltpu

NEG_SLOPE = 0.2
BN_EPS = 1e-5


def _lrelu(v):
    # max(v, a*v) == leaky_relu(v) for slope a in (0, 1); single VPU op.
    return jnp.maximum(v, NEG_SLOPE * v)


def _mm(a, w):
    # bf16 MXU matmul with f32 accumulation (same recipe in kernel & wrapper/ref).
    return jnp.dot(a.astype(jnp.bfloat16), w, preferred_element_type=jnp.float32)


def _round_up(x, m):
    return ((x + m - 1) // m) * m


def _tnet_pool_kernel(K, x_ref, w1_ref, b1_ref, w2_ref, b2_ref, w3_ref, b3_ref,
                      pooled_ref):
    """Per grid step: one (K, TN, 8) bf16 point tile -> conv1 -> conv2 ->
    K-neighbor max -> conv3 -> fold into the resident (8, 1024) f32 max."""
    nt = pl.program_id(2)

    def conv12(k):
        xk = x_ref[k]                                                # (TN, 8) bf16
        h1 = _lrelu(jnp.dot(xk, w1_ref[...],
                            preferred_element_type=jnp.float32) + b1_ref[...])
        h2 = _lrelu(jnp.dot(h1.astype(jnp.bfloat16), w2_ref[...],
                            preferred_element_type=jnp.float32) + b2_ref[...])
        return h2                                                    # (TN, 128) f32

    # incremental K-neighbor max: only one (TN, 128) live at a time.
    h2m = conv12(0)
    for k in range(1, K):
        h2m = jnp.maximum(h2m, conv12(k))

    # conv3: 128 -> 1024 (BN folded), LeakyReLU
    h3 = _lrelu(jnp.dot(h2m.astype(jnp.bfloat16), w3_ref[...],
                        preferred_element_type=jnp.float32) + b3_ref[...])  # (TN, 1024)

    # fold the tile's N rows into an (8, 1024) partial with plain VPU maxima
    # (sublane-group split is layout preserving; no per-tile cross-sublane reduce).
    part = jnp.max(h3.reshape(-1, 8, h3.shape[-1]), axis=0)                 # (8, 1024)

    @pl.when(nt == 0)
    def _():
        pooled_ref[...] = part

    @pl.when(nt != 0)
    def _():
        pooled_ref[...] = jnp.maximum(pooled_ref[...], part)


def transform_net_forward(x_nchw, params, *, tn=512, n_split=None,
                          vmem_limit_bytes=None):
    """x_nchw: (B, 6, N, K) float32, same layout as the PyTorch module input."""
    (w1f, b1, w2f, b2, w3f, b3, w4f, b4, w5f, b5, wtf, bt) = params
    B, C, N, K = x_nchw.shape
    assert C == 6
    assert tn % 128 == 0, "tile must be a multiple of 128 rows"

    # channels-last / neighbor-major layout; pad channels 6->8 with zeros
    # (w1f has matching zero rows) and cast to bf16: the kernel ingests raw
    # points, conv1 is fused in-kernel.
    xt = jnp.transpose(x_nchw, (0, 3, 2, 1))                 # (B, K, N, 6)
    xt = jnp.pad(xt, ((0, 0), (0, 0), (0, 0), (0, 2)))       # (B, K, N, 8)
    xt = xt.astype(jnp.bfloat16)

    # N tiling: whole padded N if it fits under tn, else tn-row tiles.
    tn_eff = min(tn, _round_up(N, 128))
    nt_total = pl.cdiv(N, tn_eff)
    if n_split is None:
        # v7x megacore: with B == 1 split the N-tile range across two cores.
        n_split = 2 if (B == 1 and nt_total >= 2) else 1
    nt_total = _round_up(nt_total, n_split)
    tps = nt_total // n_split                                 # tiles per split
    n_pad = nt_total * tn_eff
    if n_pad != N:
        # edge replication is max-invariant
        xt = jnp.pad(xt, ((0, 0), (0, 0), (0, n_pad - N), (0, 0)), mode='edge')

    if vmem_limit_bytes is None:
        lane = 128
        in_tile = 2 * K * tn_eff * lane * 2                       # 2 bufs, lane-padded bf16 tile
        weights = 2 * ((8 * 64 + 64 * 128 + 128 * 1024) * 2       # bf16 conv weights (x2 bufs)
                       + (64 + 128 + 1024) * 4)                   # + f32 biases
        inter = tn_eff * (2 * 64 + 3 * 128 + 1024) * 4            # live f32 temporaries (bound)
        outb = 2 * 8 * 1024 * 4                                   # resident (8,1024) f32 output
        est = in_tile + weights + inter + outb
        vmem_limit_bytes = int(min(max(int(est * 1.5), 16 << 20), 56 << 20))

    kernel = functools.partial(_tnet_pool_kernel, K)

    def w_spec(shape):
        return pl.BlockSpec(shape, lambda b, s, n: (0,) * len(shape))  # resident

    x_spec = pl.BlockSpec((pl.Squeezed(), K, tn_eff, 8),
                          lambda b, s, n: (b, 0, s * tps + n, 0))
    out_spec = pl.BlockSpec((pl.Squeezed(), pl.Squeezed(), 8, 1024),
                            lambda b, s, n: (b, s, 0, 0))

    pooled = pl.pallas_call(
        kernel,
        out_shape=jax.ShapeDtypeStruct((B, n_split, 8, 1024), jnp.float32),
        grid_spec=pltpu.PrefetchScalarGridSpec(
            num_scalar_prefetch=0,
            grid=(B, n_split, tps),
            in_specs=[
                x_spec,
                w_spec((8, 64)),     w_spec((1, 64)),     # conv1 (folded) / bias
                w_spec((64, 128)),   w_spec((1, 128)),    # conv2 (folded) / bias
                w_spec((128, 1024)), w_spec((1, 1024)),   # conv3 (folded) / bias
            ],
            out_specs=out_spec,
        ),
        compiler_params=pltpu.CompilerParams(
            dimension_semantics=("parallel", "parallel", "arbitrary"),
            vmem_limit_bytes=vmem_limit_bytes),
    )(xt, w1f, b1, w2f, b2, w3f, b3)

    # single cross-sublane / cross-split collapse, then the MLP head in XLA
    # over all B rows at once (lane-dense, batched matmuls).
    g = jnp.max(pooled, axis=(1, 2))                          # (B, 1024) f32
    f1 = _lrelu(_mm(g, w4f) + b4)                             # (B, 512)
    f2 = _lrelu(_mm(f1, w5f) + b5)                            # (B, 256)
    out = _mm(f2, wtf) + bt                                   # (B, 9)
    return out.reshape(B, 3, 3)


def init_params(key):
    """Deterministic synthetic parameters matching Transform_Net.__init__ shapes."""
    ks = jax.random.split(key, 11)

    def w(k, shape, fan_in):
        return jax.random.normal(k, shape, jnp.float32) / np.sqrt(fan_in)

    def bn(k, c):
        kg, kb, km, kv = jax.random.split(k, 4)
        gamma = jax.random.uniform(kg, (c,), jnp.float32, 0.5, 1.5)
        beta = 0.1 * jax.random.normal(kb, (c,), jnp.float32)
        mean = 0.1 * jax.random.normal(km, (c,), jnp.float32)
        var = jax.random.uniform(kv, (c,), jnp.float32, 0.5, 1.5)
        scale = gamma / jnp.sqrt(var + BN_EPS)
        bias = beta - mean * scale
        return scale[None, :], bias[None, :]

    w1 = w(ks[0], (6, 64), 6);        s1, b1 = bn(ks[1], 64)      # conv1 / bn1
    w2 = w(ks[2], (64, 128), 64);     s2, b2 = bn(ks[3], 128)     # conv2 / bn2
    w3 = w(ks[4], (128, 1024), 128);  s3, b3 = bn(ks[5], 1024)    # conv3 / BN1d(1024)
    w4 = w(ks[6], (1024, 512), 1024); s4, b4 = bn(ks[7], 512)     # linear1 / bn3(512)
    w5 = w(ks[8], (512, 256), 512);   s5, b5 = bn(ks[9], 256)     # linear2 / bn4
    # PyTorch init is transform.weight = 0 / bias = eye(3); a zero weight would
    # leave the 256->9 path numerically unvalidated, so use a nonzero weight
    # for the synthetic test (forward semantics are value-independent).
    wt = 0.05 * jax.random.normal(ks[10], (256, 9), jnp.float32)
    bt = jnp.eye(3, dtype=jnp.float32).reshape(1, 9)
    return (w1, s1, b1, w2, s2, b2, w3, s3, b3,
            w4, s4, b4, w5, s5, b5, wt, bt)


def prepare_params(raw):
    """Fold eval-mode BN scales into weight columns; cast weights to bf16;
    zero-pad conv1's input channels 6 -> 8."""
    (w1, s1, b1, w2, s2, b2, w3, s3, b3,
     w4, s4, b4, w5, s5, b5, wt, bt) = raw

    def fold(wm, s):
        return (wm * s).astype(jnp.bfloat16)

    w1f = jnp.pad(fold(w1, s1), ((0, 2), (0, 0)))       # (8, 64) bf16, zero rows
    return (w1f, b1, fold(w2, s2), b2, fold(w3, s3), b3,
            fold(w4, s4), b4, fold(w5, s5), b5, wt.astype(jnp.bfloat16), bt)


def reference_forward(x_nchw, prepared):
    """Pure-JAX reference using the same folded bf16 params / f32 accumulation."""
    (w1f, b1, w2f, b2, w3f, b3, w4f, b4, w5f, b5, wtf, bt) = prepared
    B, C, N, K = x_nchw.shape
    xt = jnp.transpose(x_nchw, (0, 3, 2, 1))                       # (B, K, N, 6)
    xt = jnp.pad(xt, ((0, 0), (0, 0), (0, 0), (0, 2)))             # (B, K, N, 8)
    h1 = _lrelu(_mm(xt, w1f) + b1)                                 # (B, K, N, 64)
    h2 = _lrelu(_mm(h1, w2f) + b2)                                 # (B, K, N, 128)
    h2 = jnp.max(h2, axis=1)                                       # (B, N, 128)   max over K
    h3 = _lrelu(_mm(h2, w3f) + b3)                                 # (B, N, 1024)
    g = jnp.max(h3, axis=1)                                        # (B, 1024)     max over N
    f1 = _lrelu(_mm(g, w4f) + b4)                                  # (B, 512)
    f2 = _lrelu(_mm(f1, w5f) + b5)                                 # (B, 256)
    out = _mm(f2, wtf) + bt                                        # (B, 9)
    return out.reshape(B, 3, 3)


if __name__ == "__main__":
    key = jax.random.PRNGKey(0)
    kx, kp = jax.random.split(key)

    B, N, K = 2, 200, 8                      # batch, num_points, k-neighbors
    x = jax.random.normal(kx, (B, 6, N, K), dtype=jnp.float32)
    params = prepare_params(init_params(kp))

    fwd = jax.jit(functools.partial(transform_net_forward, tn=512))
    out = fwd(x, params)
    jax.block_until_ready(out)

    ref_out = jax.jit(reference_forward)(x, params)
    np.testing.assert_allclose(np.asarray(out), np.asarray(ref_out),
                               rtol=1e-2, atol=1e-2)

    # Exercise the B == 1 megacore-split path (two parallel N-tile halves).
    x1 = x[:1]
    out1 = jax.jit(functools.partial(transform_net_forward, tn=128))(x1, params)
    jax.block_until_ready(out1)
    ref1 = jax.jit(reference_forward)(x1, params)
    np.testing.assert_allclose(np.asarray(out1), np.asarray(ref1),
                               rtol=1e-2, atol=1e-2)

    print("KERNEL_OK")
</pallas_src>

<mosaic_0001>
module attributes {stable_mosaic.version = 11 : i64} {
  func.func @_tnet_pool_kernel(%arg0: i32, %arg1: i32, %arg2: i32, %arg3: memref<1x8x256x8xbf16, #tpu.memory_space<vmem>>, %arg4: memref<8x64xbf16, #tpu.memory_space<vmem>>, %arg5: memref<1x64xf32, #tpu.memory_space<vmem>>, %arg6: memref<64x128xbf16, #tpu.memory_space<vmem>>, %arg7: memref<1x128xf32, #tpu.memory_space<vmem>>, %arg8: memref<128x1024xbf16, #tpu.memory_space<vmem>>, %arg9: memref<1x1024xf32, #tpu.memory_space<vmem>>, %arg10: memref<1x1x8x1024xf32, #tpu.memory_space<vmem>>) attributes {dimension_semantics = [#tpu.dimension_semantics<parallel>, #tpu.dimension_semantics<parallel>, #tpu.dimension_semantics<arbitrary>], iteration_bounds = array<i64: 2, 1, 1>, scalar_prefetch = 0 : i64, scratch_operands = 0 : i64, tpu.core_type = #tpu.core_type<tc>, window_params = [{transform_indices = @transform_0, window_bounds = array<i64: 1, 8, 256, 8>}, {pipeline_mode = #tpu.pipeline_mode<synchronous>, transform_indices = @transform_1, window_bounds = array<i64: 8, 64>}, {pipeline_mode = #tpu.pipeline_mode<synchronous>, transform_indices = @transform_2, window_bounds = array<i64: 1, 64>}, {pipeline_mode = #tpu.pipeline_mode<synchronous>, transform_indices = @transform_3, window_bounds = array<i64: 64, 128>}, {pipeline_mode = #tpu.pipeline_mode<synchronous>, transform_indices = @transform_4, window_bounds = array<i64: 1, 128>}, {pipeline_mode = #tpu.pipeline_mode<synchronous>, transform_indices = @transform_5, window_bounds = array<i64: 128, 1024>}, {pipeline_mode = #tpu.pipeline_mode<synchronous>, transform_indices = @transform_6, window_bounds = array<i64: 1, 1024>}, {transform_indices = @transform_7, window_bounds = array<i64: 1, 1, 8, 1024>}]} {
    %c0 = arith.constant 0 : index
    %c0_0 = arith.constant 0 : index
    %c0_1 = arith.constant 0 : index
    %c0_2 = arith.constant 0 : index
    %0 = vector.load %arg3[%c0, %c0_0, %c0_1, %c0_2] : memref<1x8x256x8xbf16, #tpu.memory_space<vmem>>, vector<1x1x256x8xbf16>
    %1 = vector.shape_cast %0 : vector<1x1x256x8xbf16> to vector<256x8xbf16>
    %c0_3 = arith.constant 0 : index
    %c0_4 = arith.constant 0 : index
    %2 = vector.load %arg4[%c0_3, %c0_4] : memref<8x64xbf16, #tpu.memory_space<vmem>>, vector<8x64xbf16>
    %cst = arith.constant dense<0.000000e+00> : vector<256x64xf32>
    %3 = tpu.matmul %1, %2, %cst {dimension_numbers = #tpu.dot_dimension_numbers<[1], [0], [0], [1], [0, 0, 1, 1], [], []>} : vector<256x8xbf16>, vector<8x64xbf16>, vector<256x64xf32> -> vector<256x64xf32>
    %c0_5 = arith.constant 0 : index
    %c0_6 = arith.constant 0 : index
    %4 = vector.load %arg5[%c0_5, %c0_6] : memref<1x64xf32, #tpu.memory_space<vmem>>, vector<1x64xf32>
    %5 = vector.broadcast %4 : vector<1x64xf32> to vector<256x64xf32>
    %6 = arith.addf %3, %5 : vector<256x64xf32>
    %cst_7 = arith.constant 2.000000e-01 : f32
    %7 = vector.broadcast %cst_7 : f32 to vector<256x64xf32>
    %8 = arith.mulf %7, %6 : vector<256x64xf32>
    %9 = arith.maximumf %6, %8 : vector<256x64xf32>
    %10 = arith.truncf %9 : vector<256x64xf32> to vector<256x64xbf16>
    %c0_8 = arith.constant 0 : index
    %c0_9 = arith.constant 0 : index
    %11 = vector.load %arg6[%c0_8, %c0_9] : memref<64x128xbf16, #tpu.memory_space<vmem>>, vector<64x128xbf16>
    %cst_10 = arith.constant dense<0.000000e+00> : vector<256x128xf32>
    %12 = tpu.matmul %10, %11, %cst_10 {dimension_numbers = #tpu.dot_dimension_numbers<[1], [0], [0], [1], [0, 0, 1, 1], [], []>} : vector<256x64xbf16>, vector<64x128xbf16>, vector<256x128xf32> -> vector<256x128xf32>
    %c0_11 = arith.constant 0 : index
    %c0_12 = arith.constant 0 : index
    %13 = vector.load %arg7[%c0_11, %c0_12] : memref<1x128xf32, #tpu.memory_space<vmem>>, vector<1x128xf32>
    %14 = vector.broadcast %13 : vector<1x128xf32> to vector<256x128xf32>
    %15 = arith.addf %12, %14 : vector<256x128xf32>
    %cst_13 = arith.constant 2.000000e-01 : f32
    %16 = vector.broadcast %cst_13 : f32 to vector<256x128xf32>
    %17 = arith.mulf %16, %15 : vector<256x128xf32>
    %18 = arith.maximumf %15, %17 : vector<256x128xf32>
    %c0_14 = arith.constant 0 : index
    %c1 = arith.constant 1 : index
    %c0_15 = arith.constant 0 : index
    %c0_16 = arith.constant 0 : index
    %19 = vector.load %arg3[%c0_14, %c1, %c0_15, %c0_16] : memref<1x8x256x8xbf16, #tpu.memory_space<vmem>>, vector<1x1x256x8xbf16>
    %20 = vector.shape_cast %19 : vector<1x1x256x8xbf16> to vector<256x8xbf16>
    %c0_17 = arith.constant 0 : index
    %c0_18 = arith.constant 0 : index
    %21 = vector.load %arg4[%c0_17, %c0_18] : memref<8x64xbf16, #tpu.memory_space<vmem>>, vector<8x64xbf16>
    %cst_19 = arith.constant dense<0.000000e+00> : vector<256x64xf32>
    %22 = tpu.matmul %20, %21, %cst_19 {dimension_numbers = #tpu.dot_dimension_numbers<[1], [0], [0], [1], [0, 0, 1, 1], [], []>} : vector<256x8xbf16>, vector<8x64xbf16>, vector<256x64xf32> -> vector<256x64xf32>
    %c0_20 = arith.constant 0 : index
    %c0_21 = arith.constant 0 : index
    %23 = vector.load %arg5[%c0_20, %c0_21] : memref<1x64xf32, #tpu.memory_space<vmem>>, vector<1x64xf32>
    %24 = vector.broadcast %23 : vector<1x64xf32> to vector<256x64xf32>
    %25 = arith.addf %22, %24 : vector<256x64xf32>
    %cst_22 = arith.constant 2.000000e-01 : f32
    %26 = vector.broadcast %cst_22 : f32 to vector<256x64xf32>
    %27 = arith.mulf %26, %25 : vector<256x64xf32>
    %28 = arith.maximumf %25, %27 : vector<256x64xf32>
    %29 = arith.truncf %28 : vector<256x64xf32> to vector<256x64xbf16>
    %c0_23 = arith.constant 0 : index
    %c0_24 = arith.constant 0 : index
    %30 = vector.load %arg6[%c0_23, %c0_24] : memref<64x128xbf16, #tpu.memory_space<vmem>>, vector<64x128xbf16>
    %cst_25 = arith.constant dense<0.000000e+00> : vector<256x128xf32>
    %31 = tpu.matmul %29, %30, %cst_25 {dimension_numbers = #tpu.dot_dimension_numbers<[1], [0], [0], [1], [0, 0, 1, 1], [], []>} : vector<256x64xbf16>, vector<64x128xbf16>, vector<256x128xf32> -> vector<256x128xf32>
    %c0_26 = arith.constant 0 : index
    %c0_27 = arith.constant 0 : index
    %32 = vector.load %arg7[%c0_26, %c0_27] : memref<1x128xf32, #tpu.memory_space<vmem>>, vector<1x128xf32>
    %33 = vector.broadcast %32 : vector<1x128xf32> to vector<256x128xf32>
    %34 = arith.addf %31, %33 : vector<256x128xf32>
    %cst_28 = arith.constant 2.000000e-01 : f32
    %35 = vector.broadcast %cst_28 : f32 to vector<256x128xf32>
    %36 = arith.mulf %35, %34 : vector<256x128xf32>
    %37 = arith.maximumf %34, %36 : vector<256x128xf32>
    %38 = arith.maximumf %18, %37 : vector<256x128xf32>
    %c0_29 = arith.constant 0 : index
    %c2 = arith.constant 2 : index
    %c0_30 = arith.constant 0 : index
    %c0_31 = arith.constant 0 : index
    %39 = vector.load %arg3[%c0_29, %c2, %c0_30, %c0_31] : memref<1x8x256x8xbf16, #tpu.memory_space<vmem>>, vector<1x1x256x8xbf16>
    %40 = vector.shape_cast %39 : vector<1x1x256x8xbf16> to vector<256x8xbf16>
    %c0_32 = arith.constant 0 : index
    %c0_33 = arith.constant 0 : index
    %41 = vector.load %arg4[%c0_32, %c0_33] : memref<8x64xbf16, #tpu.memory_space<vmem>>, vector<8x64xbf16>
    %cst_34 = arith.constant dense<0.000000e+00> : vector<256x64xf32>
    %42 = tpu.matmul %40, %41, %cst_34 {dimension_numbers = #tpu.dot_dimension_numbers<[1], [0], [0], [1], [0, 0, 1, 1], [], []>} : vector<256x8xbf16>, vector<8x64xbf16>, vector<256x64xf32> -> vector<256x64xf32>
    %c0_35 = arith.constant 0 : index
    %c0_36 = arith.constant 0 : index
    %43 = vector.load %arg5[%c0_35, %c0_36] : memref<1x64xf32, #tpu.memory_space<vmem>>, vector<1x64xf32>
    %44 = vector.broadcast %43 : vector<1x64xf32> to vector<256x64xf32>
    %45 = arith.addf %42, %44 : vector<256x64xf32>
    %cst_37 = arith.constant 2.000000e-01 : f32
    %46 = vector.broadcast %cst_37 : f32 to vector<256x64xf32>
    %47 = arith.mulf %46, %45 : vector<256x64xf32>
    %48 = arith.maximumf %45, %47 : vector<256x64xf32>
    %49 = arith.truncf %48 : vector<256x64xf32> to vector<256x64xbf16>
    %c0_38 = arith.constant 0 : index
    %c0_39 = arith.constant 0 : index
    %50 = vector.load %arg6[%c0_38, %c0_39] : memref<64x128xbf16, #tpu.memory_space<vmem>>, vector<64x128xbf16>
    %cst_40 = arith.constant dense<0.000000e+00> : vector<256x128xf32>
    %51 = tpu.matmul %49, %50, %cst_40 {dimension_numbers = #tpu.dot_dimension_numbers<[1], [0], [0], [1], [0, 0, 1, 1], [], []>} : vector<256x64xbf16>, vector<64x128xbf16>, vector<256x128xf32> -> vector<256x128xf32>
    %c0_41 = arith.constant 0 : index
    %c0_42 = arith.constant 0 : index
    %52 = vector.load %arg7[%c0_41, %c0_42] : memref<1x128xf32, #tpu.memory_space<vmem>>, vector<1x128xf32>
    %53 = vector.broadcast %52 : vector<1x128xf32> to vector<256x128xf32>
    %54 = arith.addf %51, %53 : vector<256x128xf32>
    %cst_43 = arith.constant 2.000000e-01 : f32
    %55 = vector.broadcast %cst_43 : f32 to vector<256x128xf32>
    %56 = arith.mulf %55, %54 : vector<256x128xf32>
    %57 = arith.maximumf %54, %56 : vector<256x128xf32>
    %58 = arith.maximumf %38, %57 : vector<256x128xf32>
    %c0_44 = arith.constant 0 : index
    %c3 = arith.constant 3 : index
    %c0_45 = arith.constant 0 : index
    %c0_46 = arith.constant 0 : index
    %59 = vector.load %arg3[%c0_44, %c3, %c0_45, %c0_46] : memref<1x8x256x8xbf16, #tpu.memory_space<vmem>>, vector<1x1x256x8xbf16>
    %60 = vector.shape_cast %59 : vector<1x1x256x8xbf16> to vector<256x8xbf16>
    %c0_47 = arith.constant 0 : index
    %c0_48 = arith.constant 0 : index
    %61 = vector.load %arg4[%c0_47, %c0_48] : memref<8x64xbf16, #tpu.memory_space<vmem>>, vector<8x64xbf16>
    %cst_49 = arith.constant dense<0.000000e+00> : vector<256x64xf32>
    %62 = tpu.matmul %60, %61, %cst_49 {dimension_numbers = #tpu.dot_dimension_numbers<[1], [0], [0], [1], [0, 0, 1, 1], [], []>} : vector<256x8xbf16>, vector<8x64xbf16>, vector<256x64xf32> -> vector<256x64xf32>
    %c0_50 = arith.constant 0 : index
    %c0_51 = arith.constant 0 : index
    %63 = vector.load %arg5[%c0_50, %c0_51] : memref<1x64xf32, #tpu.memory_space<vmem>>, vector<1x64xf32>
    %64 = vector.broadcast %63 : vector<1x64xf32> to vector<256x64xf32>
    %65 = arith.addf %62, %64 : vector<256x64xf32>
    %cst_52 = arith.constant 2.000000e-01 : f32
    %66 = vector.broadcast %cst_52 : f32 to vector<256x64xf32>
    %67 = arith.mulf %66, %65 : vector<256x64xf32>
    %68 = arith.maximumf %65, %67 : vector<256x64xf32>
    %69 = arith.truncf %68 : vector<256x64xf32> to vector<256x64xbf16>
    %c0_53 = arith.constant 0 : index
    %c0_54 = arith.constant 0 : index
    %70 = vector.load %arg6[%c0_53, %c0_54] : memref<64x128xbf16, #tpu.memory_space<vmem>>, vector<64x128xbf16>
    %cst_55 = arith.constant dense<0.000000e+00> : vector<256x128xf32>
    %71 = tpu.matmul %69, %70, %cst_55 {dimension_numbers = #tpu.dot_dimension_numbers<[1], [0], [0], [1], [0, 0, 1, 1], [], []>} : vector<256x64xbf16>, vector<64x128xbf16>, vector<256x128xf32> -> vector<256x128xf32>
    %c0_56 = arith.constant 0 : index
    %c0_57 = arith.constant 0 : index
    %72 = vector.load %arg7[%c0_56, %c0_57] : memref<1x128xf32, #tpu.memory_space<vmem>>, vector<1x128xf32>
    %73 = vector.broadcast %72 : vector<1x128xf32> to vector<256x128xf32>
    %74 = arith.addf %71, %73 : vector<256x128xf32>
    %cst_58 = arith.constant 2.000000e-01 : f32
    %75 = vector.broadcast %cst_58 : f32 to vector<256x128xf32>
    %76 = arith.mulf %75, %74 : vector<256x128xf32>
    %77 = arith.maximumf %74, %76 : vector<256x128xf32>
    %78 = arith.maximumf %58, %77 : vector<256x128xf32>
    %c0_59 = arith.constant 0 : index
    %c4 = arith.constant 4 : index
    %c0_60 = arith.constant 0 : index
    %c0_61 = arith.constant 0 : index
    %79 = vector.load %arg3[%c0_59, %c4, %c0_60, %c0_61] : memref<1x8x256x8xbf16, #tpu.memory_space<vmem>>, vector<1x1x256x8xbf16>
    %80 = vector.shape_cast %79 : vector<1x1x256x8xbf16> to vector<256x8xbf16>
    %c0_62 = arith.constant 0 : index
    %c0_63 = arith.constant 0 : index
    %81 = vector.load %arg4[%c0_62, %c0_63] : memref<8x64xbf16, #tpu.memory_space<vmem>>, vector<8x64xbf16>
    %cst_64 = arith.constant dense<0.000000e+00> : vector<256x64xf32>
    %82 = tpu.matmul %80, %81, %cst_64 {dimension_numbers = #tpu.dot_dimension_numbers<[1], [0], [0], [1], [0, 0, 1, 1], [], []>} : vector<256x8xbf16>, vector<8x64xbf16>, vector<256x64xf32> -> vector<256x64xf32>
    %c0_65 = arith.constant 0 : index
    %c0_66 = arith.constant 0 : index
    %83 = vector.load %arg5[%c0_65, %c0_66] : memref<1x64xf32, #tpu.memory_space<vmem>>, vector<1x64xf32>
    %84 = vector.broadcast %83 : vector<1x64xf32> to vector<256x64xf32>
    %85 = arith.addf %82, %84 : vector<256x64xf32>
    %cst_67 = arith.constant 2.000000e-01 : f32
    %86 = vector.broadcast %cst_67 : f32 to vector<256x64xf32>
    %87 = arith.mulf %86, %85 : vector<256x64xf32>
    %88 = arith.maximumf %85, %87 : vector<256x64xf32>
    %89 = arith.truncf %88 : vector<256x64xf32> to vector<256x64xbf16>
    %c0_68 = arith.constant 0 : index
    %c0_69 = arith.constant 0 : index
    %90 = vector.load %arg6[%c0_68, %c0_69] : memref<64x128xbf16, #tpu.memory_space<vmem>>, vector<64x128xbf16>
    %cst_70 = arith.constant dense<0.000000e+00> : vector<256x128xf32>
    %91 = tpu.matmul %89, %90, %cst_70 {dimension_numbers = #tpu.dot_dimension_numbers<[1], [0], [0], [1], [0, 0, 1, 1], [], []>} : vector<256x64xbf16>, vector<64x128xbf16>, vector<256x128xf32> -> vector<256x128xf32>
    %c0_71 = arith.constant 0 : index
    %c0_72 = arith.constant 0 : index
    %92 = vector.load %arg7[%c0_71, %c0_72] : memref<1x128xf32, #tpu.memory_space<vmem>>, vector<1x128xf32>
    %93 = vector.broadcast %92 : vector<1x128xf32> to vector<256x128xf32>
    %94 = arith.addf %91, %93 : vector<256x128xf32>
    %cst_73 = arith.constant 2.000000e-01 : f32
    %95 = vector.broadcast %cst_73 : f32 to vector<256x128xf32>
    %96 = arith.mulf %95, %94 : vector<256x128xf32>
    %97 = arith.maximumf %94, %96 : vector<256x128xf32>
    %98 = arith.maximumf %78, %97 : vector<256x128xf32>
    %c0_74 = arith.constant 0 : index
    %c5 = arith.constant 5 : index
    %c0_75 = arith.constant 0 : index
    %c0_76 = arith.constant 0 : index
    %99 = vector.load %arg3[%c0_74, %c5, %c0_75, %c0_76] : memref<1x8x256x8xbf16, #tpu.memory_space<vmem>>, vector<1x1x256x8xbf16>
    %100 = vector.shape_cast %99 : vector<1x1x256x8xbf16> to vector<256x8xbf16>
    %c0_77 = arith.constant 0 : index
    %c0_78 = arith.constant 0 : index
    %101 = vector.load %arg4[%c0_77, %c0_78] : memref<8x64xbf16, #tpu.memory_space<vmem>>, vector<8x64xbf16>
    %cst_79 = arith.constant dense<0.000000e+00> : vector<256x64xf32>
    %102 = tpu.matmul %100, %101, %cst_79 {dimension_numbers = #tpu.dot_dimension_numbers<[1], [0], [0], [1], [0, 0, 1, 1], [], []>} : vector<256x8xbf16>, vector<8x64xbf16>, vector<256x64xf32> -> vector<256x64xf32>
    %c0_80 = arith.constant 0 : index
    %c0_81 = arith.constant 0 : index
    %103 = vector.load %arg5[%c0_80, %c0_81] : memref<1x64xf32, #tpu.memory_space<vmem>>, vector<1x64xf32>
    %104 = vector.broadcast %103 : vector<1x64xf32> to vector<256x64xf32>
    %105 = arith.addf %102, %104 : vector<256x64xf32>
    %cst_82 = arith.constant 2.000000e-01 : f32
    %106 = vector.broadcast %cst_82 : f32 to vector<256x64xf32>
    %107 = arith.mulf %106, %105 : vector<256x64xf32>
    %108 = arith.maximumf %105, %107 : vector<256x64xf32>
    %109 = arith.truncf %108 : vector<256x64xf32> to vector<256x64xbf16>
    %c0_83 = arith.constant 0 : index
    %c0_84 = arith.constant 0 : index
    %110 = vector.load %arg6[%c0_83, %c0_84] : memref<64x128xbf16, #tpu.memory_space<vmem>>, vector<64x128xbf16>
    %cst_85 = arith.constant dense<0.000000e+00> : vector<256x128xf32>
    %111 = tpu.matmul %109, %110, %cst_85 {dimension_numbers = #tpu.dot_dimension_numbers<[1], [0], [0], [1], [0, 0, 1, 1], [], []>} : vector<256x64xbf16>, vector<64x128xbf16>, vector<256x128xf32> -> vector<256x128xf32>
    %c0_86 = arith.constant 0 : index
    %c0_87 = arith.constant 0 : index
    %112 = vector.load %arg7[%c0_86, %c0_87] : memref<1x128xf32, #tpu.memory_space<vmem>>, vector<1x128xf32>
    %113 = vector.broadcast %112 : vector<1x128xf32> to vector<256x128xf32>
    %114 = arith.addf %111, %113 : vector<256x128xf32>
    %cst_88 = arith.constant 2.000000e-01 : f32
    %115 = vector.broadcast %cst_88 : f32 to vector<256x128xf32>
    %116 = arith.mulf %115, %114 : vector<256x128xf32>
    %117 = arith.maximumf %114, %116 : vector<256x128xf32>
    %118 = arith.maximumf %98, %117 : vector<256x128xf32>
    %c0_89 = arith.constant 0 : index
    %c6 = arith.constant 6 : index
    %c0_90 = arith.constant 0 : index
    %c0_91 = arith.constant 0 : index
    %119 = vector.load %arg3[%c0_89, %c6, %c0_90, %c0_91] : memref<1x8x256x8xbf16, #tpu.memory_space<vmem>>, vector<1x1x256x8xbf16>
    %120 = vector.shape_cast %119 : vector<1x1x256x8xbf16> to vector<256x8xbf16>
    %c0_92 = arith.constant 0 : index
    %c0_93 = arith.constant 0 : index
    %121 = vector.load %arg4[%c0_92, %c0_93] : memref<8x64xbf16, #tpu.memory_space<vmem>>, vector<8x64xbf16>
    %cst_94 = arith.constant dense<0.000000e+00> : vector<256x64xf32>
    %122 = tpu.matmul %120, %121, %cst_94 {dimension_numbers = #tpu.dot_dimension_numbers<[1], [0], [0], [1], [0, 0, 1, 1], [], []>} : vector<256x8xbf16>, vector<8x64xbf16>, vector<256x64xf32> -> vector<256x64xf32>
    %c0_95 = arith.constant 0 : index
    %c0_96 = arith.constant 0 : index
    %123 = vector.load %arg5[%c0_95, %c0_96] : memref<1x64xf32, #tpu.memory_space<vmem>>, vector<1x64xf32>
    %124 = vector.broadcast %123 : vector<1x64xf32> to vector<256x64xf32>
    %125 = arith.addf %122, %124 : vector<256x64xf32>
    %cst_97 = arith.constant 2.000000e-01 : f32
    %126 = vector.broadcast %cst_97 : f32 to vector<256x64xf32>
    %127 = arith.mulf %126, %125 : vector<256x64xf32>
    %128 = arith.maximumf %125, %127 : vector<256x64xf32>
    %129 = arith.truncf %128 : vector<256x64xf32> to vector<256x64xbf16>
    %c0_98 = arith.constant 0 : index
    %c0_99 = arith.constant 0 : index
    %130 = vector.load %arg6[%c0_98, %c0_99] : memref<64x128xbf16, #tpu.memory_space<vmem>>, vector<64x128xbf16>
    %cst_100 = arith.constant dense<0.000000e+00> : vector<256x128xf32>
    %131 = tpu.matmul %129, %130, %cst_100 {dimension_numbers = #tpu.dot_dimension_numbers<[1], [0], [0], [1], [0, 0, 1, 1], [], []>} : vector<256x64xbf16>, vector<64x128xbf16>, vector<256x128xf32> -> vector<256x128xf32>
    %c0_101 = arith.constant 0 : index
    %c0_102 = arith.constant 0 : index
    %132 = vector.load %arg7[%c0_101, %c0_102] : memref<1x128xf32, #tpu.memory_space<vmem>>, vector<1x128xf32>
    %133 = vector.broadcast %132 : vector<1x128xf32> to vector<256x128xf32>
    %134 = arith.addf %131, %133 : vector<256x128xf32>
    %cst_103 = arith.constant 2.000000e-01 : f32
    %135 = vector.broadcast %cst_103 : f32 to vector<256x128xf32>
    %136 = arith.mulf %135, %134 : vector<256x128xf32>
    %137 = arith.maximumf %134, %136 : vector<256x128xf32>
    %138 = arith.maximumf %118, %137 : vector<256x128xf32>
    %c0_104 = arith.constant 0 : index
    %c7 = arith.constant 7 : index
    %c0_105 = arith.constant 0 : index
    %c0_106 = arith.constant 0 : index
    %139 = vector.load %arg3[%c0_104, %c7, %c0_105, %c0_106] : memref<1x8x256x8xbf16, #tpu.memory_space<vmem>>, vector<1x1x256x8xbf16>
    %140 = vector.shape_cast %139 : vector<1x1x256x8xbf16> to vector<256x8xbf16>
    %c0_107 = arith.constant 0 : index
    %c0_108 = arith.constant 0 : index
    %141 = vector.load %arg4[%c0_107, %c0_108] : memref<8x64xbf16, #tpu.memory_space<vmem>>, vector<8x64xbf16>
    %cst_109 = arith.constant dense<0.000000e+00> : vector<256x64xf32>
    %142 = tpu.matmul %140, %141, %cst_109 {dimension_numbers = #tpu.dot_dimension_numbers<[1], [0], [0], [1], [0, 0, 1, 1], [], []>} : vector<256x8xbf16>, vector<8x64xbf16>, vector<256x64xf32> -> vector<256x64xf32>
    %c0_110 = arith.constant 0 : index
    %c0_111 = arith.constant 0 : index
    %143 = vector.load %arg5[%c0_110, %c0_111] : memref<1x64xf32, #tpu.memory_space<vmem>>, vector<1x64xf32>
    %144 = vector.broadcast %143 : vector<1x64xf32> to vector<256x64xf32>
    %145 = arith.addf %142, %144 : vector<256x64xf32>
    %cst_112 = arith.constant 2.000000e-01 : f32
    %146 = vector.broadcast %cst_112 : f32 to vector<256x64xf32>
    %147 = arith.mulf %146, %145 : vector<256x64xf32>
    %148 = arith.maximumf %145, %147 : vector<256x64xf32>
    %149 = arith.truncf %148 : vector<256x64xf32> to vector<256x64xbf16>
    %c0_113 = arith.constant 0 : index
    %c0_114 = arith.constant 0 : index
    %150 = vector.load %arg6[%c0_113, %c0_114] : memref<64x128xbf16, #tpu.memory_space<vmem>>, vector<64x128xbf16>
    %cst_115 = arith.constant dense<0.000000e+00> : vector<256x128xf32>
    %151 = tpu.matmul %149, %150, %cst_115 {dimension_numbers = #tpu.dot_dimension_numbers<[1], [0], [0], [1], [0, 0, 1, 1], [], []>} : vector<256x64xbf16>, vector<64x128xbf16>, vector<256x128xf32> -> vector<256x128xf32>
    %c0_116 = arith.constant 0 : index
    %c0_117 = arith.constant 0 : index
    %152 = vector.load %arg7[%c0_116, %c0_117] : memref<1x128xf32, #tpu.memory_space<vmem>>, vector<1x128xf32>
    %153 = vector.broadcast %152 : vector<1x128xf32> to vector<256x128xf32>
    %154 = arith.addf %151, %153 : vector<256x128xf32>
    %cst_118 = arith.constant 2.000000e-01 : f32
    %155 = vector.broadcast %cst_118 : f32 to vector<256x128xf32>
    %156 = arith.mulf %155, %154 : vector<256x128xf32>
    %157 = arith.maximumf %154, %156 : vector<256x128xf32>
    %158 = arith.maximumf %138, %157 : vector<256x128xf32>
    %159 = arith.truncf %158 : vector<256x128xf32> to vector<256x128xbf16>
    %c0_119 = arith.constant 0 : index
    %c0_120 = arith.constant 0 : index
    %160 = vector.load %arg8[%c0_119, %c0_120] : memref<128x1024xbf16, #tpu.memory_space<vmem>>, vector<128x1024xbf16>
    %cst_121 = arith.constant dense<0.000000e+00> : vector<256x1024xf32>
    %161 = tpu.matmul %159, %160, %cst_121 {dimension_numbers = #tpu.dot_dimension_numbers<[1], [0], [0], [1], [0, 0, 1, 1], [], []>} : vector<256x128xbf16>, vector<128x1024xbf16>, vector<256x1024xf32> -> vector<256x1024xf32>
    %c0_122 = arith.constant 0 : index
    %c0_123 = arith.constant 0 : index
    %162 = vector.load %arg9[%c0_122, %c0_123] : memref<1x1024xf32, #tpu.memory_space<vmem>>, vector<1x1024xf32>
    %163 = vector.broadcast %162 : vector<1x1024xf32> to vector<256x1024xf32>
    %164 = arith.addf %161, %163 : vector<256x1024xf32>
    %cst_124 = arith.constant 2.000000e-01 : f32
    %165 = vector.broadcast %cst_124 : f32 to vector<256x1024xf32>
    %166 = arith.mulf %165, %164 : vector<256x1024xf32>
    %167 = arith.maximumf %164, %166 : vector<256x1024xf32>
    %168 = vector.shape_cast %167 : vector<256x1024xf32> to vector<32x8x1024xf32>
    %cst_125 = arith.constant dense<0xFF800000> : vector<8x1024xf32>
    %169 = vector.multi_reduction <maximumf>, %168, %cst_125 [0] : vector<32x8x1024xf32> to vector<8x1024xf32>
    %c0_i32 = arith.constant 0 : i32
    %170 = arith.cmpi eq, %arg2, %c0_i32 : i32
    %171 = arith.extui %170 : i1 to i32
    %c0_i32_126 = arith.constant 0 : i32
    %172 = arith.cmpi ne, %171, %c0_i32_126 : i32
    scf.if %172 {
      %c0_129 = arith.constant 0 : index
      %c0_130 = arith.constant 0 : index
      %c0_131 = arith.constant 0 : index
      %c0_132 = arith.constant 0 : index
      %176 = vector.load %arg10[%c0_129, %c0_130, %c0_131, %c0_132] : memref<1x1x8x1024xf32, #tpu.memory_space<vmem>>, vector<1x1x8x1024xf32>
      %177 = vector.shape_cast %176 : vector<1x1x8x1024xf32> to vector<8x1024xf32>
      %178 = vector.shape_cast %169 : vector<8x1024xf32> to vector<1x1x8x1024xf32>
      tpu.vector_store %arg10[%c0_129, %c0_130, %c0_131, %c0_132], %178 {strides = array<i32>} : memref<1x1x8x1024xf32, #tpu.memory_space<vmem>>, vector<1x1x8x1024xf32>,
    } else {
    }
    %c0_i32_127 = arith.constant 0 : i32
    %173 = arith.cmpi ne, %arg2, %c0_i32_127 : i32
    %174 = arith.extui %173 : i1 to i32
    %c0_i32_128 = arith.constant 0 : i32
    %175 = arith.cmpi ne, %174, %c0_i32_128 : i32
    scf.if %175 {
      %c0_129 = arith.constant 0 : index
      %c0_130 = arith.constant 0 : index
      %c0_131 = arith.constant 0 : index
      %c0_132 = arith.constant 0 : index
      %176 = vector.load %arg10[%c0_129, %c0_130, %c0_131, %c0_132] : memref<1x1x8x1024xf32, #tpu.memory_space<vmem>>, vector<1x1x8x1024xf32>
      %177 = vector.shape_cast %176 : vector<1x1x8x1024xf32> to vector<8x1024xf32>
      %178 = arith.maximumf %177, %169 : vector<8x1024xf32>
      %c0_133 = arith.constant 0 : index
      %c0_134 = arith.constant 0 : index
      %c0_135 = arith.constant 0 : index
      %c0_136 = arith.constant 0 : index
      %179 = vector.load %arg10[%c0_133, %c0_134, %c0_135, %c0_136] : memref<1x1x8x1024xf32, #tpu.memory_space<vmem>>, vector<1x1x8x1024xf32>
      %180 = vector.shape_cast %179 : vector<1x1x8x1024xf32> to vector<8x1024xf32>
      %181 = vector.shape_cast %178 : vector<8x1024xf32> to vector<1x1x8x1024xf32>
      tpu.vector_store %arg10[%c0_133, %c0_134, %c0_135, %c0_136], %181 {strides = array<i32>} : memref<1x1x8x1024xf32, #tpu.memory_space<vmem>>, vector<1x1x8x1024xf32>,
    } else {
    }
    return
  }
  func.func @transform_0(%arg0: i32, %arg1: i32, %arg2: i32) -> (i32, i32, i32, i32) {
    %c1_i32 = arith.constant 1 : i32
    %0 = arith.muli %arg1, %c1_i32 : i32
    %1 = arith.addi %0, %arg2 : i32
    %c0_i32 = arith.constant 0 : i32
    %c0_i32_0 = arith.constant 0 : i32
    %c0_i32_1 = arith.constant 0 : i32
    return %arg0, %c0_i32, %1, %c0_i32_0 : i32, i32, i32, i32
  }
  func.func @transform_1(%arg0: i32, %arg1: i32, %arg2: i32) -> (i32, i32) {
    %c0_i32 = arith.constant 0 : i32
    %c0_i32_0 = arith.constant 0 : i32
    %c0_i32_1 = arith.constant 0 : i32
    return %c0_i32, %c0_i32_0 : i32, i32
  }
  func.func @transform_2(%arg0: i32, %arg1: i32, %arg2: i32) -> (i32, i32) {
    %c0_i32 = arith.constant 0 : i32
    %c0_i32_0 = arith.constant 0 : i32
    %c0_i32_1 = arith.constant 0 : i32
    return %c0_i32, %c0_i32_0 : i32, i32
  }
  func.func @transform_3(%arg0: i32, %arg1: i32, %arg2: i32) -> (i32, i32) {
    %c0_i32 = arith.constant 0 : i32
    %c0_i32_0 = arith.constant 0 : i32
    %c0_i32_1 = arith.constant 0 : i32
    return %c0_i32, %c0_i32_0 : i32, i32
  }
  func.func @transform_4(%arg0: i32, %arg1: i32, %arg2: i32) -> (i32, i32) {
    %c0_i32 = arith.constant 0 : i32
    %c0_i32_0 = arith.constant 0 : i32
    %c0_i32_1 = arith.constant 0 : i32
    return %c0_i32, %c0_i32_0 : i32, i32
  }
  func.func @transform_5(%arg0: i32, %arg1: i32, %arg2: i32) -> (i32, i32) {
    %c0_i32 = arith.constant 0 : i32
    %c0_i32_0 = arith.constant 0 : i32
    %c0_i32_1 = arith.constant 0 : i32
    return %c0_i32, %c0_i32_0 : i32, i32
  }
  func.func @transform_6(%arg0: i32, %arg1: i32, %arg2: i32) -> (i32, i32) {
    %c0_i32 = arith.constant 0 : i32
    %c0_i32_0 = arith.constant 0 : i32
    %c0_i32_1 = arith.constant 0 : i32
    return %c0_i32, %c0_i32_0 : i32, i32
  }
  func.func @transform_7(%arg0: i32, %arg1: i32, %arg2: i32) -> (i32, i32, i32, i32) {
    %c0_i32 = arith.constant 0 : i32
    %c0_i32_0 = arith.constant 0 : i32
    %c0_i32_1 = arith.constant 0 : i32
    return %arg0, %arg1, %c0_i32, %c0_i32_0 : i32, i32, i32, i32
  }
}

</mosaic_0001>

<bundles_post_ra>
// kernel: transform_net_forward.1
= control target key start
LH: loop header
LB: loop body
LE: loop exit
PB: predicated region body
PF: predicated region fallthrough
CT: control target
= control target key end

     0   :  { %s9941_s24 = smov 0   ;;  %s9943_s25 = smov 0   ;;  %s12761_s0 = inlined_call_operand.vmem [shape: bf16[2,8,256,8], index: 0, kind: input, shape index: {}]   ;;  %s12762_s1 = inlined_call_operand.vmem [shape: bf16[8,64], index: 1, kind: input, shape index: {}]   ;;  %s12763_s2 = inlined_call_operand.vmem [shape: f32[1,64], index: 2, kind: input, shape index: {}]   ;;  %s12764_s3 = inlined_call_operand.vmem [shape: bf16[64,128], index: 3, kind: input, shape index: {}]   ;;  %s12765_s4 = inlined_call_operand.vmem [shape: f32[1,128], index: 4, kind: input, shape index: {}]   ;;  %s12766_s5 = inlined_call_operand.vmem [shape: bf16[128,1024], index: 5, kind: input, shape index: {}]   ;;  %s12767_s6 = inlined_call_operand.vmem [shape: f32[1,1024], index: 6, kind: input, shape index: {}]   ;;  %s12768_s7 = inlined_call_operand.vmem [shape: f32[2,1,8,1024], index: 7, kind: output, shape index: {}]  }
   0x1   :  { %s9945_s26 = smov 0  }
   0x2 LB: > { %s36_s27 = sadd.s32 1, %s9894_s25  ;;  %p8118_p0 = scmp.ge.s32.totalorder %s9898_s26, 1  ;;  %s9898_s26 = sphi %s9945_s26, %s17_s26   ;;  %s9894_s25 = sphi %s9943_s25, %s12891_s25   ;;  %s9890_s24 = sphi %s9941_s24, %s12890_s24  }
   0x3   : > { %p38_p1 = scmp.ge.s32.totalorder %s36_s27, 2  ;;  %p269_p2 = scmp.lt.s32.totalorder %s9898_s26, 3 }
   0x5   : > { %s12893_s27 = smov (%p38_p1, %s36_s27), 0  ;;  %p270_p3 = pnand %p8118_p0, %p269_p2 }
   0x7   : > { %273 = sbr.rel (%p270_p3) target bundleno = 1398 (0x576), region = 48 }
   0xe   : > { %v9962_v0 = vld [vmem:[%s12762_s1] sm:$0xf]  ;;  %vm501_vm0 = vcmask 1043456   ;;  %p312_p4 = scmp.lt.s32.totalorder %s9890_s24, 1  ;;  %vm452_vm1 = vcmask 64512   ;;  %v10043_v26 = vld [vmem:[%s12764_s3 + $0x8] sm:$0xff]  }
   0xf   : > { %9693 = vmatprep.subr.msk.bf16.mxu0 %vm501_vm0, %v9962_v0  ;;  %v9968_v1 = vsel %vm501_vm0, %v9962_v0, 0  ;;  %v10031_v23 = vld [vmem:[%s12764_s3] sm:$0xff]   ;;  %v10052_v29 = vld [vmem:[%s12764_s3 + $0x10] sm:$0xff]   ;;  %v10062_v31 = vld [vmem:[%s12764_s3 + $0x18] sm:$0xff]   ;;  %vm785_vm2 = vcmask 523264  }
  0x10   : > { %9102 = vmatpush3.bf16.msra.mxu0 %v9968_v1  ;;  %s12895_s24 = smov (!%p312_p4, %s9890_s24), 1  ;;  %9135 = vmatprep.subr.bf16.mxu1 %v10031_v23  ;;  %v10134_v61 = vld [vmem:[%s12763_s2] ss:$0 sm:$0xff] }
  0x11   : > { %9694 = vmatprep.subr.msk.bf16.mxu0 %vm501_vm0, %v9962_v0  ;;  %s8803_s30 = sshll.u32 %s12895_s24, 10  ;;  %9136 = vmatpush3.bf16.msra.mxu1 %v10031_v23  ;;  %s8804_s19 = sshll.u32 %s12895_s24, 6 }
  0x12   : > { %s9979_s10 = scalar_lea.vmem %s12761_s0, %s8803_s30  ;;  %9137 = vmatprep.subr.bf16.mxu1 %v10043_v26  ;;  %s12614_s21 = scalar_lea.vmem %s12768_s7, %s8804_s19 }
  0x13   : > { %v9726_v2 = vld [vmem:[%s9979_s10] sm:$0xff]   ;;  %v9727_v3 = vld [vmem:[%s9979_s10 + $0x8] sm:$0xff]   ;;  %v9728_v4 = vld [vmem:[%s9979_s10 + $0x10] sm:$0xff]  }
  0x14   : > { %9103 = vmatprep.mubr.msk.bf16.mxu0 %vm452_vm1, %v9726_v2  ;;  %v9729_v5 = vld [vmem:[%s9979_s10 + $0x18] sm:$0xff]   ;;  %v9730_v6 = vld [vmem:[%s9979_s10 + $0x20] sm:$0xff]   ;;  %v9731_v7 = vld [vmem:[%s9979_s10 + $0x28] sm:$0xff]  }
  0x15   : > { %9104 = vmatmul.mubr.msk.bf16.vlgmr.msra.gmra.mrb[0].mxu0 %vm452_vm1, %v9727_v3  ;;  %v9732_v8 = vld [vmem:[%s9979_s10 + $0x30] sm:$0xff]   ;;  %v9733_v9 = vld [vmem:[%s9979_s10 + $0x38] sm:$0xff]   ;;  %v9734_v10 = vld [vmem:[%s9979_s10 + $0x40] sm:$0xff]   ;;  %9138 = vmatpush3.bf16.msra.mxu1 %v10043_v26 }
  0x16   : > { %9176 = vmatpush3.bf16.msra.mxu0 %v9968_v1  ;;  %9107 = vmatprep.mubr.msk.bf16.mxu0 %vm452_vm1, %v9728_v4  ;;  %v9735_v11 = vld [vmem:[%s9979_s10 + $0x48] sm:$0xff]   ;;  %v9736_v12 = vld [vmem:[%s9979_s10 + $0x50] sm:$0xff]   ;;  %v9737_v13 = vld [vmem:[%s9979_s10 + $0x58] sm:$0xff]  }
  0x17   : > { %9695 = vmatprep.subr.msk.bf16.mxu0 %vm501_vm0, %v9962_v0  ;;  %v9738_v14 = vld [vmem:[%s9979_s10 + $0x60] sm:$0xff]   ;;  %v9739_v15 = vld [vmem:[%s9979_s10 + $0x68] sm:$0xff]   ;;  %v9740_v16 = vld [vmem:[%s9979_s10 + $0x70] sm:$0xff]   ;;  %9139 = vmatprep.subr.bf16.mxu1 %v10052_v29 }
  0x18   : > { %v9741_v17 = vld [vmem:[%s9979_s10 + $0x78] sm:$0xff]   ;;  %v9742_v18 = vld [vmem:[%s9979_s10 + $0x80] sm:$0xff]   ;;  %v9743_v19 = vld [vmem:[%s9979_s10 + $0x88] sm:$0xff]  }
  0x19   : > { %v9744_v20 = vld [vmem:[%s9979_s10 + $0x90] sm:$0xff]   ;;  %v9745_v21 = vld [vmem:[%s9979_s10 + $0x98] sm:$0xff]   ;;  %v9746_v22 = vld [vmem:[%s9979_s10 + $0xa0] sm:$0xff]   ;;  %9140 = vmatpush3.bf16.msra.mxu1 %v10052_v29 }
  0x1a   : > { %v9747_v24 = vld [vmem:[%s9979_s10 + $0xa8] sm:$0xff]   ;;  %v9748_v25 = vld [vmem:[%s9979_s10 + $0xb0] sm:$0xff]   ;;  %v9749_v27 = vld [vmem:[%s9979_s10 + $0xb8] sm:$0xff]   ;;  %9141 = vmatprep.subr.bf16.mxu1 %v10062_v31 }
  0x1b   : > { %v9750_v28 = vld [vmem:[%s9979_s10 + $0xc0] sm:$0xff]   ;;  %v9751_v30 = vld [vmem:[%s9979_s10 + $0xc8] sm:$0xff]   ;;  %v9752_v32 = vld [vmem:[%s9979_s10 + $0xd0] sm:$0xff]  }
  0x1c   : > { %v9753_v33 = vld [vmem:[%s9979_s10 + $0xd8] sm:$0xff]   ;;  %v9754_v34 = vld [vmem:[%s9979_s10 + $0xe0] sm:$0xff]   ;;  %v9755_v35 = vld [vmem:[%s9979_s10 + $0xe8] sm:$0xff]  }
  0x1d   : > { %9108 = vmatmul.mubr.msk.bf16.gmra.mrb[4].mxu0 %vm452_vm1, %v9729_v5  ;;  %9142 = vmatpush3.bf16.msra.mxu1 %v10062_v31  ;;  %v9756_v36 = vld [vmem:[%s9979_s10 + $0xf0] sm:$0xff]   ;;  %v9757_v37 = vld [vmem:[%s9979_s10 + $0xf8] sm:$0xff]   ;;  %v9758_v38 = vld [vmem:[%s9979_s10 + $0x100] sm:$0xff]  }
  0x1e   : > { %9111 = vmatprep.mubr.msk.bf16.mxu0 %vm452_vm1, %v9730_v6  ;;  %9209 = vmatprep.subr.bf16.mxu1 %v10031_v23  ;;  %v9759_v39 = vld [vmem:[%s9979_s10 + $0x108] sm:$0xff]   ;;  %v9760_v40 = vld [vmem:[%s9979_s10 + $0x110] sm:$0xff]   ;;  %v9761_v41 = vld [vmem:[%s9979_s10 + $0x118] sm:$0xff]  }
  0x1f   : > { %v9762_v42 = vld [vmem:[%s9979_s10 + $0x120] sm:$0xff]   ;;  %v9763_v43 = vld [vmem:[%s9979_s10 + $0x128] sm:$0xff]   ;;  %v9764_v44 = vld [vmem:[%s9979_s10 + $0x130] sm:$0xff]  }
  0x20   : > { %v9765_v45 = vld [vmem:[%s9979_s10 + $0x138] sm:$0xff]   ;;  %v9766_v46 = vld [vmem:[%s9979_s10 + $0x140] sm:$0xff]   ;;  %v9767_v47 = vld [vmem:[%s9979_s10 + $0x148] sm:$0xff]  }
  0x21   : > { %v9768_v48 = vld [vmem:[%s9979_s10 + $0x150] sm:$0xff]   ;;  %v9769_v49 = vld [vmem:[%s9979_s10 + $0x158] sm:$0xff]   ;;  %v9770_v50 = vld [vmem:[%s9979_s10 + $0x160] sm:$0xff]  }
  0x22   : > { %v9771_v51 = vld [vmem:[%s9979_s10 + $0x168] sm:$0xff]   ;;  %v9772_v52 = vld [vmem:[%s9979_s10 + $0x170] sm:$0xff]   ;;  %v9773_v53 = vld [vmem:[%s9979_s10 + $0x178] sm:$0xff]  }
  0x23   : > { %v9774_v54 = vld [vmem:[%s9979_s10 + $0x180] sm:$0xff]   ;;  %v9775_v55 = vld [vmem:[%s9979_s10 + $0x188] sm:$0xff]   ;;  %v9776_v56 = vld [vmem:[%s9979_s10 + $0x190] sm:$0xff]  }
  0x24   : > { %v9777_v57 = vld [vmem:[%s9979_s10 + $0x198] sm:$0xff]   ;;  %v9779_v58 = vld [vmem:[%s9979_s10 + $0x1a0] sm:$0xff]   ;;  %v9780_v59 = vld [vmem:[%s9979_s10 + $0x1a8] sm:$0xff]  }
  0x25   : > { %9112 = vmatmul.mubr.msk.bf16.gmra.mrb[8].mxu0 %vm452_vm1, %v9731_v7  ;;  %v9783_v60 = vld [vmem:[%s9979_s10 + $0x1b0] sm:$0xff]   ;;  %v9784_v2 = vld [vmem:[%s9979_s10 + $0x1b8] sm:$0xff]   ;;  %v9786_v5 = vld [vmem:[%s9979_s10 + $0x1c0] sm:$0xff]  }
  0x26   : > { %9115 = vmatprep.mubr.msk.bf16.mxu0 %vm452_vm1, %v9732_v8 }
  0x2d   : > { %9116 = vmatmul.mubr.msk.bf16.gmra.mrb[12].mxu0 %vm452_vm1, %v9733_v9 }
  0x2e   : > { %9119 = vmatprep.mubr.msk.bf16.mxu0 %vm452_vm1, %v9734_v10 }
  0x35   : > { %9120 = vmatmul.mubr.msk.bf16.gmra.mrb[16].mxu0 %vm452_vm1, %v9735_v11 }
  0x36   : > { %9123 = vmatprep.mubr.msk.bf16.mxu0 %vm452_vm1, %v9736_v12 }
  0x3d   : > { %9124 = vmatmul.mubr.msk.bf16.gmra.mrb[20].mxu0 %vm452_vm1, %v9737_v13 }
  0x3e   : > { %9127 = vmatprep.mubr.msk.bf16.mxu0 %vm452_vm1, %v9738_v14 }
  0x45   : > { %9128 = vmatmul.mubr.msk.bf16.gmra.mrb[24].mxu0 %vm452_vm1, %v9739_v15 }
  0x46   : > { %9131 = vmatprep.mubr.msk.bf16.mxu0 %vm452_vm1, %v9740_v16 }
  0x4d   : > { %9132 = vmatmul.mubr.msk.bf16.gmra.mrb[28].mxu0 %vm452_vm1, %v9741_v17 }
  0x4e   : > { %9177 = vmatprep.mubr.msk.bf16.mxu0 %vm452_vm1, %v9742_v18 }
  0x55   : > { %9178 = vmatmul.mubr.msk.bf16.vlgmr.msra.gmra.mrb[32].mxu0 %vm452_vm1, %v9743_v19 }
  0x56   : > { %9250 = vmatpush3.bf16.msra.mxu0 %v9968_v1  ;;  %9181 = vmatprep.mubr.msk.bf16.mxu0 %vm452_vm1, %v9744_v20 }
  0x57   : > { %9696 = vmatprep.subr.msk.bf16.mxu0 %vm501_vm0, %v9962_v0 }
  0x5d   : > { %9182 = vmatmul.mubr.msk.bf16.gmra.mrb[36].mxu0 %vm452_vm1, %v9745_v21  ;;  %v9787_v21 = vld [vmem:[%s9979_s10 + $0x1c8] sm:$0xff]  }
  0x5e   : > { %9185 = vmatprep.mubr.msk.bf16.mxu0 %vm452_vm1, %v9746_v22 }
  0x65   : > { %9186 = vmatmul.mubr.msk.bf16.gmra.mrb[40].mxu0 %vm452_vm1, %v9747_v24 }
  0x66   : > { %9189 = vmatprep.mubr.msk.bf16.mxu0 %vm452_vm1, %v9748_v25 }
  0x6d   : > { %9190 = vmatmul.mubr.msk.bf16.gmra.mrb[44].mxu0 %vm452_vm1, %v9749_v27  ;;  %v9788_v27 = vld [vmem:[%s9979_s10 + $0x1d0] sm:$0xff]  }
  0x6e   : > { %9193 = vmatprep.mubr.msk.bf16.mxu0 %vm452_vm1, %v9750_v28 }
  0x75   : > { %9194 = vmatmul.mubr.msk.bf16.gmra.mrb[48].mxu0 %vm452_vm1, %v9751_v30 }
  0x76   : > { %9197 = vmatprep.mubr.msk.bf16.mxu0 %vm452_vm1, %v9752_v32 }
  0x7d   : > { %9198 = vmatmul.mubr.msk.bf16.gmra.mrb[52].mxu0 %vm452_vm1, %v9753_v33 }
  0x7e   : > { %9201 = vmatprep.mubr.msk.bf16.mxu0 %vm452_vm1, %v9754_v34 }
  0x85   : > { %9202 = vmatmul.mubr.msk.bf16.gmra.mrb[56].mxu0 %vm452_vm1, %v9755_v35 }
  0x86   : > { %9205 = vmatprep.mubr.msk.bf16.mxu0 %vm452_vm1, %v9756_v36 }
  0x8d   : > { %9206 = vmatmul.mubr.msk.bf16.gmra.mrb[60].mxu0 %vm452_vm1, %v9757_v37 }
  0x8e   : > { %9251 = vmatprep.mubr.msk.bf16.mxu0 %vm452_vm1, %v9758_v38 }
  0x95   : > { %9252 = vmatmul.mubr.msk.bf16.vlgmr.msra.gmra.mrb[64].mxu0 %vm452_vm1, %v9759_v39 }
  0x96   : > { %9324 = vmatpush3.bf16.msra.mxu0 %v9968_v1  ;;  %9255 = vmatprep.mubr.msk.bf16.mxu0 %vm452_vm1, %v9760_v40 }
  0x97   : > { %9697 = vmatprep.subr.msk.bf16.mxu0 %vm501_vm0, %v9962_v0 }
  0x9d   : > { %9256 = vmatmul.mubr.msk.bf16.gmra.mrb[68].mxu0 %vm452_vm1, %v9761_v41 }
  0x9e   : > { %9259 = vmatprep.mubr.msk.bf16.mxu0 %vm452_vm1, %v9762_v42 }
  0xa5   : > { %9260 = vmatmul.mubr.msk.bf16.gmra.mrb[72].mxu0 %vm452_vm1, %v9763_v43 }
  0xa6   : > { %9263 = vmatprep.mubr.msk.bf16.mxu0 %vm452_vm1, %v9764_v44 }
  0xad   : > { %9264 = vmatmul.mubr.msk.bf16.gmra.mrb[76].mxu0 %vm452_vm1, %v9765_v45  ;;  %v9789_v45 = vld [vmem:[%s9979_s10 + $0x1d8] sm:$0xff]  }
  0xae   : > { %9267 = vmatprep.mubr.msk.bf16.mxu0 %vm452_vm1, %v9766_v46 }
  0xb5   : > { %9268 = vmatmul.mubr.msk.bf16.gmra.mrb[80].mxu0 %vm452_vm1, %v9767_v47 }
  0xb6   : > { %9271 = vmatprep.mubr.msk.bf16.mxu0 %vm452_vm1, %v9768_v48 }
  0xbd   : > { %9272 = vmatmul.mubr.msk.bf16.gmra.mrb[84].mxu0 %vm452_vm1, %v9769_v49  ;;  %v9790_v49 = vld [vmem:[%s9979_s10 + $0x1e0] sm:$0xff]  }
  0xbe   : > { %9275 = vmatprep.mubr.msk.bf16.mxu0 %vm452_vm1, %v9770_v50 }
  0xc5   : > { %9276 = vmatmul.mubr.msk.bf16.gmra.mrb[88].mxu0 %vm452_vm1, %v9771_v51 }
  0xc6   : > { %9279 = vmatprep.mubr.msk.bf16.mxu0 %vm452_vm1, %v9772_v52 }
  0xcd   : > { %9280 = vmatmul.mubr.msk.bf16.gmra.mrb[92].mxu0 %vm452_vm1, %v9773_v53 }
  0xce   : > { %9325 = vmatprep.mubr.msk.bf16.mxu0 %vm452_vm1, %v9774_v54 }
  0xd5   : > { %9326 = vmatmul.mubr.msk.bf16.vlgmr.msra.gmra.mrb[96].mxu0 %vm452_vm1, %v9775_v55 }
  0xd6   : > { %9398 = vmatpush3.bf16.msra.mxu0 %v9968_v1  ;;  %9329 = vmatprep.mubr.msk.bf16.mxu0 %vm452_vm1, %v9776_v56 }
  0xd7   : > { %9698 = vmatprep.subr.msk.bf16.mxu0 %vm501_vm0, %v9962_v0 }
  0xdd   : > { %9330 = vmatmul.mubr.msk.bf16.gmra.mrb[100].mxu0 %vm452_vm1, %v9777_v57 }
  0xde   : > { %9333 = vmatprep.mubr.msk.bf16.mxu0 %vm452_vm1, %v9779_v58 }
  0xe5   : > { %9334 = vmatmul.mubr.msk.bf16.gmra.mrb[104].mxu0 %vm452_vm1, %v9780_v59 }
  0xe6   : > { %9337 = vmatprep.mubr.msk.bf16.mxu0 %vm452_vm1, %v9783_v60 }
  0xe8   : > { %v9105_v62 = vpop.f32.mrb[0].mxu0 }
  0xe9   : > { %v548_v63 = vadd.f32 %v9105_v62, %v10134_v61  ;;  %v539_v0 = vpop.f32.mrb[1].mxu0 }
  0xea   : > { %v540_v3 = vadd.f32 %v10134_v61, %v539_v0  ;;  %v9106_v4 = vpop.f32.mrb[2].mxu0 }
  0xeb   : > { %v668_v6 = vmul.f32 0.2, %v548_v63  ;;  %v551_v7 = vadd.f32 %v9106_v4, %v10134_v61  ;;  %v542_v8 = vpop.f32.mrb[3].mxu0 }
  0xec   : > { %v543_v9 = vadd.f32 %v10134_v61, %v542_v8  ;;  %v666_v10 = vmul.f32 0.2, %v540_v3 }
  0xed   : > { %v669_v11 = vmul.f32 0.2, %v551_v7  ;;  %9338 = vmatmul.mubr.msk.bf16.gmra.mrb[108].mxu0 %vm452_vm1, %v9784_v2  ;;  %v700_v13 = vmax.f32 %v548_v63, %v668_v6 }
  0xee   : > { %v667_v12 = vmul.f32 0.2, %v543_v9  ;;  %9341 = vmatprep.mubr.msk.bf16.mxu0 %vm452_vm1, %v9786_v5  ;;  %v698_v16 = vmax.f32 %v540_v3, %v666_v10  ;;  %v9791_v3 = vld [vmem:[%s9979_s10 + $0x1e8] sm:$0xff]  }
  0xef   : > { %v701_v14 = vmax.f32 %v551_v7, %v669_v11  ;;  %v9792_v7 = vld [vmem:[%s9979_s10 + $0x1f0] sm:$0xff]  }
  0xf0   : > { %v9109_v15 = vpop.f32.mrb[4].mxu0  ;;  %v699_v17 = vmax.f32 %v543_v9, %v667_v12 }
  0xf1   : > { %v564_v18 = vadd.f32 %v9109_v15, %v10134_v61  ;;  %v555_v19 = vpop.f32.mrb[5].mxu0  ;;  %v731_v20 = vpack.c.bf16 %v701_v14, %v700_v13 }
  0xf2   : > { %v556_v22 = vadd.f32 %v10134_v61, %v555_v19  ;;  %v9110_v24 = vpop.f32.mrb[6].mxu0  ;;  %v730_v25 = vpack.c.bf16 %v699_v17, %v698_v16 }
  0xf3   : > { %v672_v28 = vmul.f32 0.2, %v564_v18  ;;  %v567_v30 = vadd.f32 %v9110_v24, %v10134_v61  ;;  %v558_v32 = vpop.f32.mrb[7].mxu0  ;;  %v9793_v24 = vld [vmem:[%s9979_s10 + $0x1f8] sm:$0xff]  }
  0xf4   : > { %v670_v33 = vmul.f32 0.2, %v556_v22  ;;  %v559_v34 = vadd.f32 %v10134_v61, %v558_v32  ;;  %9143 = vmatprep.mubr.msk.bf16.mxu1 %vm785_vm2, %v730_v25 }
  0xf5   : > { %v673_v35 = vmul.f32 0.2, %v567_v30  ;;  %9144 = vmatmul.mubr.msk.bf16.vlgmr.msra.gmra.mrb[0].mxu1 %vm785_vm2, %v731_v20  ;;  %9342 = vmatmul.mubr.msk.bf16.gmra.mrb[112].mxu0 %vm452_vm1, %v9787_v21  ;;  %v704_v37 = vmax.f32 %v564_v18, %v672_v28 }
  0xf6   : > { %v671_v36 = vmul.f32 0.2, %v559_v34  ;;  %9210 = vmatpush3.bf16.msra.mxu1 %v10031_v23  ;;  %9345 = vmatprep.mubr.msk.bf16.mxu0 %vm452_vm1, %v9788_v27  ;;  %v702_v39 = vmax.f32 %v556_v22, %v670_v33 }
  0xf7   : > { %v705_v38 = vmax.f32 %v567_v30, %v673_v35  ;;  %9211 = vmatprep.subr.bf16.mxu1 %v10043_v26  ;;  %v9794_v30 = vld [vmem:[%s9979_s10 + $0x200] sm:$0xff]  }
  0xf8   : > { %v703_v40 = vmax.f32 %v559_v34, %v671_v36  ;;  %v9113_v41 = vpop.f32.mrb[8].mxu0 }
  0xf9   : > { %v580_v42 = vadd.f32 %v9113_v41, %v10134_v61  ;;  %v571_v43 = vpop.f32.mrb[9].mxu0  ;;  %v733_v44 = vpack.c.bf16 %v705_v38, %v704_v37 }
  0xfa   : > { %v572_v46 = vadd.f32 %v10134_v61, %v571_v43  ;;  %v9114_v47 = vpop.f32.mrb[10].mxu0  ;;  %v732_v48 = vpack.c.bf16 %v703_v40, %v702_v39  ;;  %9212 = vmatpush3.bf16.msra.mxu1 %v10043_v26 }
  0xfb   : > { %v676_v50 = vmul.f32 0.2, %v580_v42  ;;  %v583_v51 = vadd.f32 %v9114_v47, %v10134_v61  ;;  %v574_v52 = vpop.f32.mrb[11].mxu0  ;;  %9213 = vmatprep.subr.bf16.mxu1 %v10052_v29  ;;  %v9795_v47 = vld [vmem:[%s9979_s10 + $0x208] sm:$0xff]  }
  0xfc   : > { %v674_v53 = vmul.f32 0.2, %v572_v46  ;;  %v575_v54 = vadd.f32 %v10134_v61, %v574_v52  ;;  %9147 = vmatprep.mubr.msk.bf16.mxu1 %vm785_vm2, %v732_v48 }
  0xfd   : > { %v677_v55 = vmul.f32 0.2, %v583_v51  ;;  %9148 = vmatmul.mubr.msk.bf16.gmra.mrb[4].mxu1 %vm785_vm2, %v733_v44  ;;  %9346 = vmatmul.mubr.msk.bf16.gmra.mrb[116].mxu0 %vm452_vm1, %v9789_v45  ;;  %v708_v57 = vmax.f32 %v580_v42, %v676_v50 }
  0xfe   : > { %v675_v56 = vmul.f32 0.2, %v575_v54  ;;  %9349 = vmatprep.mubr.msk.bf16.mxu0 %vm452_vm1, %v9790_v49  ;;  %9214 = vmatpush3.bf16.msra.mxu1 %v10052_v29  ;;  %v706_v59 = vmax.f32 %v572_v46, %v674_v53 }
  0xff   : > { %v709_v58 = vmax.f32 %v583_v51, %v677_v55  ;;  %9215 = vmatprep.subr.bf16.mxu1 %v10062_v31  ;;  %v9796_v51 = vld [vmem:[%s9979_s10 + $0x210] sm:$0xff]  }
 0x100   : > { %v707_v60 = vmax.f32 %v575_v54, %v675_v56  ;;  %v9117_v62 = vpop.f32.mrb[12].mxu0 }
 0x101   : > { %v596_v63 = vadd.f32 %v9117_v62, %v10134_v61  ;;  %v587_v0 = vpop.f32.mrb[13].mxu0  ;;  %v735_v2 = vpack.c.bf16 %v709_v58, %v708_v57  ;;  %v10207_v62 = vld [vmem:[%s12762_s1] sm:$0xf] }
 0x102   : > { %v588_v4 = vadd.f32 %v10134_v61, %v587_v0  ;;  %v9118_v5 = vpop.f32.mrb[14].mxu0  ;;  %v734_v6 = vpack.c.bf16 %v707_v60, %v706_v59  ;;  %9216 = vmatpush3.bf16.msra.mxu1 %v10062_v31 }
 0x103   : > { %v680_v8 = vmul.f32 0.2, %v596_v63  ;;  %v599_v9 = vadd.f32 %v9118_v5, %v10134_v61  ;;  %v590_v10 = vpop.f32.mrb[15].mxu0  ;;  %9283 = vmatprep.subr.bf16.mxu1 %v10031_v23 }
 0x104   : > { %v678_v11 = vmul.f32 0.2, %v588_v4  ;;  %v591_v12 = vadd.f32 %v10134_v61, %v590_v10  ;;  %9151 = vmatprep.mubr.msk.bf16.mxu1 %vm785_vm2, %v734_v6  ;;  %v9797_v6 = vld [vmem:[%s9979_s10 + $0x218] sm:$0xff]   ;;  %v9798_v10 = vld [vmem:[%s9979_s10 + $0x220] sm:$0xff]  }
 0x105   : > { %v681_v13 = vmul.f32 0.2, %v599_v9  ;;  %9152 = vmatmul.mubr.msk.bf16.gmra.mrb[8].mxu1 %vm785_vm2, %v735_v2  ;;  %9350 = vmatmul.mubr.msk.bf16.gmra.mrb[120].mxu0 %vm452_vm1, %v9791_v3  ;;  %v712_v15 = vmax.f32 %v596_v63, %v680_v8 }
 0x106   : > { %v679_v14 = vmul.f32 0.2, %v591_v12  ;;  %9353 = vmatprep.mubr.msk.bf16.mxu0 %vm452_vm1, %v9792_v7  ;;  %v710_v17 = vmax.f32 %v588_v4, %v678_v11 }
 0x107   : > { %v713_v16 = vmax.f32 %v599_v9, %v681_v13 }
 0x108   : > { %v711_v18 = vmax.f32 %v591_v12, %v679_v14  ;;  %v9121_v19 = vpop.f32.mrb[16].mxu0 }
 0x109   : > { %v612_v20 = vadd.f32 %v9121_v19, %v10134_v61  ;;  %v603_v21 = vpop.f32.mrb[17].mxu0  ;;  %v737_v22 = vpack.c.bf16 %v713_v16, %v712_v15 }
 0x10a   : > { %v604_v25 = vadd.f32 %v10134_v61, %v603_v21  ;;  %v9122_v27 = vpop.f32.mrb[18].mxu0  ;;  %v736_v28 = vpack.c.bf16 %v711_v18, %v710_v17 }
 0x10b   : > { %v684_v32 = vmul.f32 0.2, %v612_v20  ;;  %v615_v33 = vadd.f32 %v9122_v27, %v10134_v61  ;;  %v606_v34 = vpop.f32.mrb[19].mxu0 }
 0x10c   : > { %v682_v35 = vmul.f32 0.2, %v604_v25  ;;  %v607_v36 = vadd.f32 %v10134_v61, %v606_v34  ;;  %9155 = vmatprep.mubr.msk.bf16.mxu1 %vm785_vm2, %v736_v28  ;;  %v9799_v28 = vld [vmem:[%s9979_s10 + $0x228] sm:$0xff]   ;;  %v9800_v34 = vld [vmem:[%s9979_s10 + $0x230] sm:$0xff]  }
 0x10d   : > { %v685_v37 = vmul.f32 0.2, %v615_v33  ;;  %9156 = vmatmul.mubr.msk.bf16.gmra.mrb[12].mxu1 %vm785_vm2, %v737_v22  ;;  %9354 = vmatmul.mubr.msk.bf16.gmra.mrb[124].mxu0 %vm452_vm1, %v9793_v24  ;;  %v716_v39 = vmax.f32 %v612_v20, %v684_v32 }
 0x10e   : > { %v683_v38 = vmul.f32 0.2, %v607_v36  ;;  %9399 = vmatprep.mubr.msk.bf16.mxu0 %vm452_vm1, %v9794_v30  ;;  %v714_v41 = vmax.f32 %v604_v25, %v682_v35 }
 0x10f   : > { %v717_v40 = vmax.f32 %v615_v33, %v685_v37 }
 0x110   : > { %v715_v42 = vmax.f32 %v607_v36, %v683_v38  ;;  %v9125_v43 = vpop.f32.mrb[20].mxu0 }
 0x111   : > { %v628_v44 = vadd.f32 %v9125_v43, %v10134_v61  ;;  %v619_v45 = vpop.f32.mrb[21].mxu0  ;;  %v739_v46 = vpack.c.bf16 %v717_v40, %v716_v39 }
 0x112   : > { %v620_v48 = vadd.f32 %v10134_v61, %v619_v45  ;;  %v9126_v49 = vpop.f32.mrb[22].mxu0  ;;  %v738_v50 = vpack.c.bf16 %v715_v42, %v714_v41 }
 0x113   : > { %v688_v52 = vmul.f32 0.2, %v628_v44  ;;  %v631_v53 = vadd.f32 %v9126_v49, %v10134_v61  ;;  %v622_v54 = vpop.f32.mrb[23].mxu0 }
 0x114   : > { %v686_v55 = vmul.f32 0.2, %v620_v48  ;;  %v623_v56 = vadd.f32 %v10134_v61, %v622_v54  ;;  %9159 = vmatprep.mubr.msk.bf16.mxu1 %vm785_vm2, %v738_v50  ;;  %v9801_v50 = vld [vmem:[%s9979_s10 + $0x238] sm:$0xff]   ;;  %v9802_v54 = vld [vmem:[%s9979_s10 + $0x240] sm:$0xff]  }
 0x115   : > { %v689_v57 = vmul.f32 0.2, %v631_v53  ;;  %9160 = vmatmul.mubr.msk.bf16.gmra.mrb[16].mxu1 %vm785_vm2, %v739_v46  ;;  %9400 = vmatmul.mubr.msk.bf16.vlgmr.msra.gmra.mrb[128].mxu0 %vm452_vm1, %v9795_v47  ;;  %v720_v59 = vmax.f32 %v628_v44, %v688_v52 }
 0x116   : > { %v687_v58 = vmul.f32 0.2, %v623_v56  ;;  %9472 = vmatpush3.bf16.msra.mxu0 %v9968_v1  ;;  %9403 = vmatprep.mubr.msk.bf16.mxu0 %vm452_vm1, %v9796_v51  ;;  %v718_v63 = vmax.f32 %v620_v48, %v686_v55 }
 0x117   : > { %v721_v60 = vmax.f32 %v631_v53, %v689_v57  ;;  %9699 = vmatprep.subr.msk.bf16.mxu0 %vm501_vm0, %v10207_v62 }
 0x118   : > { %v719_v0 = vmax.f32 %v623_v56, %v687_v58  ;;  %v9129_v2 = vpop.f32.mrb[24].mxu0 }
 0x119   : > { %v644_v3 = vadd.f32 %v9129_v2, %v10134_v61  ;;  %v635_v4 = vpop.f32.mrb[25].mxu0  ;;  %v741_v5 = vpack.c.bf16 %v721_v60, %v720_v59 }
 0x11a   : > { %v636_v7 = vadd.f32 %v10134_v61, %v635_v4  ;;  %v9130_v8 = vpop.f32.mrb[26].mxu0  ;;  %v740_v9 = vpack.c.bf16 %v719_v0, %v718_v63 }
 0x11b   : > { %v692_v11 = vmul.f32 0.2, %v644_v3  ;;  %v647_v12 = vadd.f32 %v9130_v8, %v10134_v61  ;;  %v638_v13 = vpop.f32.mrb[27].mxu0 }
 0x11c   : > { %v690_v14 = vmul.f32 0.2, %v636_v7  ;;  %v639_v15 = vadd.f32 %v10134_v61, %v638_v13  ;;  %9163 = vmatprep.mubr.msk.bf16.mxu1 %vm785_vm2, %v740_v9  ;;  %v9803_v9 = vld [vmem:[%s9979_s10 + $0x248] sm:$0xff]   ;;  %v9804_v13 = vld [vmem:[%s9979_s10 + $0x250] sm:$0xff]  }
 0x11d   : > { %v693_v16 = vmul.f32 0.2, %v647_v12  ;;  %9164 = vmatmul.mubr.msk.bf16.gmra.mrb[20].mxu1 %vm785_vm2, %v741_v5  ;;  %9404 = vmatmul.mubr.msk.bf16.gmra.mrb[132].mxu0 %vm452_vm1, %v9797_v6  ;;  %v724_v18 = vmax.f32 %v644_v3, %v692_v11 }
 0x11e   : > { %v691_v17 = vmul.f32 0.2, %v639_v15  ;;  %9407 = vmatprep.mubr.msk.bf16.mxu0 %vm452_vm1, %v9798_v10  ;;  %v722_v20 = vmax.f32 %v636_v7, %v690_v14 }
 0x11f   : > { %v725_v19 = vmax.f32 %v647_v12, %v693_v16 }
 0x120   : > { %v723_v21 = vmax.f32 %v639_v15, %v691_v17  ;;  %v9133_v22 = vpop.f32.mrb[28].mxu0 }
 0x121   : > { %v660_v24 = vadd.f32 %v9133_v22, %v10134_v61  ;;  %v651_v25 = vpop.f32.mrb[29].mxu0  ;;  %v743_v27 = vpack.c.bf16 %v725_v19, %v724_v18 }
 0x122   : > { %v652_v30 = vadd.f32 %v10134_v61, %v651_v25  ;;  %v9134_v32 = vpop.f32.mrb[30].mxu0  ;;  %v742_v33 = vpack.c.bf16 %v723_v21, %v722_v20 }
 0x123   : > { %v696_v35 = vmul.f32 0.2, %v660_v24  ;;  %v663_v36 = vadd.f32 %v9134_v32, %v10134_v61  ;;  %v654_v37 = vpop.f32.mrb[31].mxu0 }
 0x124   : > { %v694_v38 = vmul.f32 0.2, %v652_v30  ;;  %v655_v39 = vadd.f32 %v10134_v61, %v654_v37  ;;  %9167 = vmatprep.mubr.msk.bf16.mxu1 %vm785_vm2, %v742_v33  ;;  %v9805_v33 = vld [vmem:[%s9979_s10 + $0x258] sm:$0xff]   ;;  %v9806_v37 = vld [vmem:[%s9979_s10 + $0x260] sm:$0xff]  }
 0x125   : > { %v697_v40 = vmul.f32 0.2, %v663_v36  ;;  %9168 = vmatmul.mubr.msk.bf16.gmra.mrb[24].mxu1 %vm785_vm2, %v743_v27  ;;  %9408 = vmatmul.mubr.msk.bf16.gmra.mrb[136].mxu0 %vm452_vm1, %v9799_v28  ;;  %v728_v42 = vmax.f32 %v660_v24, %v696_v35 }
 0x126   : > { %v695_v41 = vmul.f32 0.2, %v655_v39  ;;  %9411 = vmatprep.mubr.msk.bf16.mxu0 %vm452_vm1, %v9800_v34  ;;  %v726_v44 = vmax.f32 %v652_v30, %v694_v38 }
 0x127   : > { %v729_v43 = vmax.f32 %v663_v36, %v697_v40 }
 0x128   : > { %v727_v45 = vmax.f32 %v655_v39, %v695_v41  ;;  %v9179_v46 = vpop.f32.mrb[32].mxu0 }
 0x129   : > { %v1263_v47 = vadd.f32 %v9179_v46, %v10134_v61  ;;  %v1254_v48 = vpop.f32.mrb[33].mxu0  ;;  %v745_v49 = vpack.c.bf16 %v729_v43, %v728_v42 }
 0x12a   : > { %v1255_v51 = vadd.f32 %v10134_v61, %v1254_v48  ;;  %v9180_v52 = vpop.f32.mrb[34].mxu0  ;;  %v744_v53 = vpack.c.bf16 %v727_v45, %v726_v44 }
 0x12b   : > { %v1383_v55 = vmul.f32 0.2, %v1263_v47  ;;  %v1266_v56 = vadd.f32 %v9180_v52, %v10134_v61  ;;  %v1257_v57 = vpop.f32.mrb[35].mxu0  ;;  %v9807_v52 = vld [vmem:[%s9979_s10 + $0x268] sm:$0xff]  }
 0x12c   : > { %v1381_v58 = vmul.f32 0.2, %v1255_v51  ;;  %v1258_v59 = vadd.f32 %v10134_v61, %v1257_v57  ;;  %9171 = vmatprep.mubr.msk.bf16.mxu1 %vm785_vm2, %v744_v53 }
 0x12d   : > { %v1384_v60 = vmul.f32 0.2, %v1266_v56  ;;  %9172 = vmatmul.mubr.msk.bf16.gmra.mrb[28].mxu1 %vm785_vm2, %v745_v49  ;;  %9412 = vmatmul.mubr.msk.bf16.gmra.mrb[140].mxu0 %vm452_vm1, %v9801_v50  ;;  %v1415_v0 = vmax.f32 %v1263_v47, %v1383_v55 }
 0x12e   : > { %v1382_v63 = vmul.f32 0.2, %v1258_v59  ;;  %9415 = vmatprep.mubr.msk.bf16.mxu0 %vm452_vm1, %v9802_v54  ;;  %v1413_v3 = vmax.f32 %v1255_v51, %v1381_v58 }
 0x12f   : > { %v1416_v2 = vmax.f32 %v1266_v56, %v1384_v60  ;;  %v9808_v56 = vld [vmem:[%s9979_s10 + $0x270] sm:$0xff]  }
 0x130   : > { %v1414_v4 = vmax.f32 %v1258_v59, %v1382_v63  ;;  %v9183_v5 = vpop.f32.mrb[36].mxu0 }
 0x131   : > { %v1446_v6 = vpack.c.bf16 %v1416_v2, %v1415_v0  ;;  %v1279_v7 = vadd.f32 %v9183_v5, %v10134_v61  ;;  %v1270_v8 = vpop.f32.mrb[37].mxu0 }
 0x132   : > { %v1271_v10 = vadd.f32 %v10134_v61, %v1270_v8  ;;  %v9184_v11 = vpop.f32.mrb[38].mxu0  ;;  %v1445_v12 = vpack.c.bf16 %v1414_v4, %v1413_v3  ;;  %v9809_v8 = vld [vmem:[%s9979_s10 + $0x278] sm:$0xff]  }
 0x133   : > { %v1387_v14 = vmul.f32 0.2, %v1279_v7  ;;  %v1282_v15 = vadd.f32 %v9184_v11, %v10134_v61  ;;  %v1273_v16 = vpop.f32.mrb[39].mxu0 }
 0x134   : > { %v1385_v17 = vmul.f32 0.2, %v1271_v10  ;;  %v1274_v18 = vadd.f32 %v10134_v61, %v1273_v16  ;;  %9217 = vmatprep.mubr.msk.bf16.mxu1 %vm785_vm2, %v1445_v12  ;;  %v9810_v12 = vld [vmem:[%s9979_s10 + $0x280] sm:$0xff]  }
 0x135   : > { %v1388_v19 = vmul.f32 0.2, %v1282_v15  ;;  %9218 = vmatmul.mubr.msk.bf16.vlgmr.msra.gmra.mrb[32].mxu1 %vm785_vm2, %v1446_v6  ;;  %9416 = vmatmul.mubr.msk.bf16.gmra.mrb[144].mxu0 %vm452_vm1, %v9803_v9  ;;  %v1419_v21 = vmax.f32 %v1279_v7, %v1387_v14 }
 0x136   : > { %v1386_v20 = vmul.f32 0.2, %v1274_v18  ;;  %9284 = vmatpush3.bf16.msra.mxu1 %v10031_v23  ;;  %9419 = vmatprep.mubr.msk.bf16.mxu0 %vm452_vm1, %v9804_v13  ;;  %v1417_v24 = vmax.f32 %v1271_v10, %v1385_v17 }
 0x137   : > { %v1420_v22 = vmax.f32 %v1282_v15, %v1388_v19  ;;  %9285 = vmatprep.subr.bf16.mxu1 %v10043_v26 }
 0x138   : > { %v1418_v25 = vmax.f32 %v1274_v18, %v1386_v20  ;;  %v9187_v27 = vpop.f32.mrb[40].mxu0 }
 0x139   : > { %v1295_v28 = vadd.f32 %v9187_v27, %v10134_v61  ;;  %v1286_v30 = vpop.f32.mrb[41].mxu0  ;;  %v1448_v32 = vpack.c.bf16 %v1420_v22, %v1419_v21 }
 0x13a   : > { %v1287_v34 = vadd.f32 %v10134_v61, %v1286_v30  ;;  %v9188_v35 = vpop.f32.mrb[42].mxu0  ;;  %v1447_v36 = vpack.c.bf16 %v1418_v25, %v1417_v24  ;;  %9286 = vmatpush3.bf16.msra.mxu1 %v10043_v26 }
 0x13b   : > { %v1391_v38 = vmul.f32 0.2, %v1295_v28  ;;  %v1298_v39 = vadd.f32 %v9188_v35, %v10134_v61  ;;  %v1289_v40 = vpop.f32.mrb[43].mxu0  ;;  %9287 = vmatprep.subr.bf16.mxu1 %v10052_v29 }
 0x13c   : > { %v1389_v41 = vmul.f32 0.2, %v1287_v34  ;;  %v1290_v42 = vadd.f32 %v10134_v61, %v1289_v40  ;;  %9221 = vmatprep.mubr.msk.bf16.mxu1 %vm785_vm2, %v1447_v36  ;;  %v9812_v36 = vld [vmem:[%s9979_s10 + $0x290] sm:$0xff]  }
 0x13d   : > { %v1392_v43 = vmul.f32 0.2, %v1298_v39  ;;  %9222 = vmatmul.mubr.msk.bf16.gmra.mrb[36].mxu1 %vm785_vm2, %v1448_v32  ;;  %9420 = vmatmul.mubr.msk.bf16.gmra.mrb[148].mxu0 %vm452_vm1, %v9805_v33  ;;  %v1423_v26 = vmax.f32 %v1295_v28, %v1391_v38  ;;  %v9811_v32 = vld [vmem:[%s9979_s10 + $0x288] sm:$0xff]  }
 0x13e   : > { %v1390_v44 = vmul.f32 0.2, %v1290_v42  ;;  %9423 = vmatprep.mubr.msk.bf16.mxu0 %vm452_vm1, %v9806_v37  ;;  %9288 = vmatpush3.bf16.msra.mxu1 %v10052_v29  ;;  %v1421_v46 = vmax.f32 %v1287_v34, %v1389_v41 }
 0x13f   : > { %v1424_v45 = vmax.f32 %v1298_v39, %v1392_v43  ;;  %9289 = vmatprep.subr.bf16.mxu1 %v10062_v31 }
 0x140   : > { %v1422_v47 = vmax.f32 %v1290_v42, %v1390_v44  ;;  %v9191_v48 = vpop.f32.mrb[44].mxu0 }
 0x141   : > { %v1311_v49 = vadd.f32 %v9191_v48, %v10134_v61  ;;  %v1302_v50 = vpop.f32.mrb[45].mxu0  ;;  %v1450_v51 = vpack.c.bf16 %v1424_v45, %v1423_v26 }
 0x142   : > { %v1303_v53 = vadd.f32 %v10134_v61, %v1302_v50  ;;  %v9192_v54 = vpop.f32.mrb[46].mxu0  ;;  %v1449_v55 = vpack.c.bf16 %v1422_v47, %v1421_v46  ;;  %9290 = vmatpush3.bf16.msra.mxu1 %v10062_v31 }
 0x143   : > { %v1395_v29 = vmul.f32 0.2, %v1311_v49  ;;  %v1314_v57 = vadd.f32 %v9192_v54, %v10134_v61  ;;  %v1305_v58 = vpop.f32.mrb[47].mxu0  ;;  %9357 = vmatprep.subr.bf16.mxu1 %v10031_v23 }
 0x144   : > { %v1393_v59 = vmul.f32 0.2, %v1303_v53  ;;  %v1306_v60 = vadd.f32 %v10134_v61, %v1305_v58  ;;  %9225 = vmatprep.mubr.msk.bf16.mxu1 %vm785_vm2, %v1449_v55  ;;  %v9814_v55 = vld [vmem:[%s9979_s10 + $0x2a0] sm:$0xff]  }
 0x145   : > { %v1396_v63 = vmul.f32 0.2, %v1314_v57  ;;  %9226 = vmatmul.mubr.msk.bf16.gmra.mrb[40].mxu1 %vm785_vm2, %v1450_v51  ;;  %9424 = vmatmul.mubr.msk.bf16.gmra.mrb[152].mxu0 %vm452_vm1, %v9807_v52  ;;  %v1427_v31 = vmax.f32 %v1311_v49, %v1395_v29  ;;  %v9813_v51 = vld [vmem:[%s9979_s10 + $0x298] sm:$0xff]  }
 0x146   : > { %v1394_v0 = vmul.f32 0.2, %v1306_v60  ;;  %9427 = vmatprep.mubr.msk.bf16.mxu0 %vm452_vm1, %v9808_v56  ;;  %v1425_v3 = vmax.f32 %v1303_v53, %v1393_v59 }
 0x147   : > { %v1428_v2 = vmax.f32 %v1314_v57, %v1396_v63 }
 0x148   : > { %v1426_v4 = vmax.f32 %v1306_v60, %v1394_v0  ;;  %v9195_v23 = vpop.f32.mrb[48].mxu0 }
 0x149   : > { %v1327_v5 = vadd.f32 %v9195_v23, %v10134_v61  ;;  %v1318_v6 = vpop.f32.mrb[49].mxu0  ;;  %v1452_v7 = vpack.c.bf16 %v1428_v2, %v1427_v31 }
 0x14a   : > { %v1319_v9 = vadd.f32 %v10134_v61, %v1318_v6  ;;  %v9196_v10 = vpop.f32.mrb[50].mxu0  ;;  %v1451_v11 = vpack.c.bf16 %v1426_v4, %v1425_v3  ;;  %v9815_v6 = vld [vmem:[%s9979_s10 + $0x2a8] sm:$0xff]  }
 0x14b   : > { %v1399_v13 = vmul.f32 0.2, %v1327_v5  ;;  %v1330_v14 = vadd.f32 %v9196_v10, %v10134_v61  ;;  %v1321_v15 = vpop.f32.mrb[51].mxu0  ;;  %v9816_v10 = vld [vmem:[%s9979_s10 + $0x2b0] sm:$0xff]  }
 0x14c   : > { %v1397_v16 = vmul.f32 0.2, %v1319_v9  ;;  %v1322_v17 = vadd.f32 %v10134_v61, %v1321_v15  ;;  %9229 = vmatprep.mubr.msk.bf16.mxu1 %vm785_vm2, %v1451_v11 }
 0x14d   : > { %v1400_v18 = vmul.f32 0.2, %v1330_v14  ;;  %9230 = vmatmul.mubr.msk.bf16.gmra.mrb[44].mxu1 %vm785_vm2, %v1452_v7  ;;  %9428 = vmatmul.mubr.msk.bf16.gmra.mrb[156].mxu0 %vm452_vm1, %v9809_v8  ;;  %v1431_v20 = vmax.f32 %v1327_v5, %v1399_v13 }
 0x14e   : > { %v1398_v19 = vmul.f32 0.2, %v1322_v17  ;;  %9473 = vmatprep.mubr.msk.bf16.mxu0 %vm452_vm1, %v9810_v12  ;;  %v1429_v22 = vmax.f32 %v1319_v9, %v1397_v16 }
 0x14f   : > { %v1432_v21 = vmax.f32 %v1330_v14, %v1400_v18 }
 0x150   : > { %v1430_v24 = vmax.f32 %v1322_v17, %v1398_v19  ;;  %v9199_v25 = vpop.f32.mrb[52].mxu0 }
 0x151   : > { %v1343_v27 = vadd.f32 %v9199_v25, %v10134_v61  ;;  %v1334_v28 = vpop.f32.mrb[53].mxu0  ;;  %v1454_v30 = vpack.c.bf16 %v1432_v21, %v1431_v20 }
 0x152   : > { %v1335_v33 = vadd.f32 %v10134_v61, %v1334_v28  ;;  %v9200_v34 = vpop.f32.mrb[54].mxu0  ;;  %v1453_v35 = vpack.c.bf16 %v1430_v24, %v1429_v22  ;;  %v9817_v28 = vld [vmem:[%s9979_s10 + $0x2b8] sm:$0xff]  }
 0x153   : > { %v1403_v37 = vmul.f32 0.2, %v1343_v27  ;;  %v1346_v38 = vadd.f32 %v9200_v34, %v10134_v61  ;;  %v1337_v39 = vpop.f32.mrb[55].mxu0  ;;  %v9818_v34 = vld [vmem:[%s9979_s10 + $0x2c0] sm:$0xff]  }
 0x154   : > { %v1401_v40 = vmul.f32 0.2, %v1335_v33  ;;  %v1338_v41 = vadd.f32 %v10134_v61, %v1337_v39  ;;  %9233 = vmatprep.mubr.msk.bf16.mxu1 %vm785_vm2, %v1453_v35 }
 0x155   : > { %v1404_v42 = vmul.f32 0.2, %v1346_v38  ;;  %9234 = vmatmul.mubr.msk.bf16.gmra.mrb[48].mxu1 %vm785_vm2, %v1454_v30  ;;  %9474 = vmatmul.mubr.msk.bf16.vlgmr.msra.gmra.mrb[160].mxu0 %vm452_vm1, %v9811_v32  ;;  %v1435_v44 = vmax.f32 %v1343_v27, %v1403_v37 }
 0x156   : > { %v1402_v43 = vmul.f32 0.2, %v1338_v41  ;;  %9546 = vmatpush3.bf16.msra.mxu0 %v9968_v1  ;;  %9477 = vmatprep.mubr.msk.bf16.mxu0 %vm452_vm1, %v9812_v36  ;;  %v1433_v45 = vmax.f32 %v1335_v33, %v1401_v40 }
 0x157   : > { %v1436_v26 = vmax.f32 %v1346_v38, %v1404_v42  ;;  %9700 = vmatprep.subr.msk.bf16.mxu0 %vm501_vm0, %v10207_v62 }
 0x158   : > { %v1434_v46 = vmax.f32 %v1338_v41, %v1402_v43  ;;  %v9203_v47 = vpop.f32.mrb[56].mxu0 }
 0x159   : > { %v1359_v48 = vadd.f32 %v9203_v47, %v10134_v61  ;;  %v1350_v49 = vpop.f32.mrb[57].mxu0  ;;  %v1456_v50 = vpack.c.bf16 %v1436_v26, %v1435_v44 }
 0x15a   : > { %v1351_v52 = vadd.f32 %v10134_v61, %v1350_v49  ;;  %v9204_v53 = vpop.f32.mrb[58].mxu0  ;;  %v1455_v54 = vpack.c.bf16 %v1434_v46, %v1433_v45  ;;  %v9819_v49 = vld [vmem:[%s9979_s10 + $0x2c8] sm:$0xff]  }
 0x15b   : > { %v1407_v56 = vmul.f32 0.2, %v1359_v48  ;;  %v1362_v29 = vadd.f32 %v9204_v53, %v10134_v61  ;;  %v1353_v57 = vpop.f32.mrb[59].mxu0  ;;  %v9820_v53 = vld [vmem:[%s9979_s10 + $0x2d0] sm:$0xff]  }
 0x15c   : > { %v1405_v58 = vmul.f32 0.2, %v1351_v52  ;;  %v1354_v62 = vadd.f32 %v10134_v61, %v1353_v57  ;;  %9237 = vmatprep.mubr.msk.bf16.mxu1 %vm785_vm2, %v1455_v54 }
 0x15d   : > { %v1408_v59 = vmul.f32 0.2, %v1362_v29  ;;  %9238 = vmatmul.mubr.msk.bf16.gmra.mrb[52].mxu1 %vm785_vm2, %v1456_v50  ;;  %9478 = vmatmul.mubr.msk.bf16.gmra.mrb[164].mxu0 %vm452_vm1, %v9813_v51  ;;  %v1439_v63 = vmax.f32 %v1359_v48, %v1407_v56 }
 0x15e   : > { %v1406_v60 = vmul.f32 0.2, %v1354_v62  ;;  %9481 = vmatprep.mubr.msk.bf16.mxu0 %vm452_vm1, %v9814_v55  ;;  %v1437_v31 = vmax.f32 %v1351_v52, %v1405_v58 }
 0x15f   : > { %v1440_v0 = vmax.f32 %v1362_v29, %v1408_v59  ;;  %v10344_v59 = vld [vmem:[%s12764_s3] sm:$0xff]  }
 0x160   : > { %v1438_v2 = vmax.f32 %v1354_v62, %v1406_v60  ;;  %v9207_v3 = vpop.f32.mrb[60].mxu0 }
 0x161   : > { %v1375_v4 = vadd.f32 %v9207_v3, %v10134_v61  ;;  %v1366_v23 = vpop.f32.mrb[61].mxu0  ;;  %v1458_v5 = vpack.c.bf16 %v1440_v0, %v1439_v63  ;;  %v10351_v0 = vld [vmem:[%s12764_s3 + $0x8] sm:$0xff]  }
 0x162   : > { %v1367_v7 = vadd.f32 %v10134_v61, %v1366_v23  ;;  %v9208_v8 = vpop.f32.mrb[62].mxu0  ;;  %v1457_v9 = vpack.c.bf16 %v1438_v2, %v1437_v31 }
 0x163   : > { %v1411_v11 = vmul.f32 0.2, %v1375_v4  ;;  %v1378_v12 = vadd.f32 %v9208_v8, %v10134_v61  ;;  %v1369_v13 = vpop.f32.mrb[63].mxu0 }
 0x164   : > { %v1409_v14 = vmul.f32 0.2, %v1367_v7  ;;  %v1370_v15 = vadd.f32 %v10134_v61, %v1369_v13  ;;  %9241 = vmatprep.mubr.msk.bf16.mxu1 %vm785_vm2, %v1457_v9 }
 0x165   : > { %v1412_v16 = vmul.f32 0.2, %v1378_v12  ;;  %9242 = vmatmul.mubr.msk.bf16.gmra.mrb[56].mxu1 %vm785_vm2, %v1458_v5  ;;  %9482 = vmatmul.mubr.msk.bf16.gmra.mrb[168].mxu0 %vm452_vm1, %v9815_v6  ;;  %v1443_v18 = vmax.f32 %v1375_v4, %v1411_v11  ;;  %v9821_v6 = vld [vmem:[%s9979_s10 + $0x2d8] sm:$0xff]  }
 0x166   : > { %v1410_v17 = vmul.f32 0.2, %v1370_v15  ;;  %9485 = vmatprep.mubr.msk.bf16.mxu0 %vm452_vm1, %v9816_v10  ;;  %v1441_v20 = vmax.f32 %v1367_v7, %v1409_v14  ;;  %v9822_v10 = vld [vmem:[%s9979_s10 + $0x2e0] sm:$0xff]   ;;  %v10363_v14 = vld [vmem:[%s12764_s3 + $0x10] sm:$0xff]  }
 0x167   : > { %v1444_v19 = vmax.f32 %v1378_v12, %v1412_v16 }
 0x168   : > { %v1442_v21 = vmax.f32 %v1370_v15, %v1410_v17  ;;  %v9253_v22 = vpop.f32.mrb[64].mxu0 }
 0x169   : > { %v1970_v24 = vadd.f32 %v9253_v22, %v10134_v61  ;;  %v1961_v25 = vpop.f32.mrb[65].mxu0  ;;  %v1460_v27 = vpack.c.bf16 %v1444_v19, %v1443_v18 }
 0x16a   : > { %v1962_v30 = vadd.f32 %v10134_v61, %v1961_v25  ;;  %v9254_v32 = vpop.f32.mrb[66].mxu0  ;;  %v1459_v33 = vpack.c.bf16 %v1442_v21, %v1441_v20  ;;  %v10375_v21 = vld [vmem:[%s12764_s3 + $0x18] sm:$0xff]  }
 0x16b   : > { %v2090_v35 = vmul.f32 0.2, %v1970_v24  ;;  %v1973_v36 = vadd.f32 %v9254_v32, %v10134_v61  ;;  %v1964_v37 = vpop.f32.mrb[67].mxu0  ;;  %v9823_v32 = vld [vmem:[%s9979_s10 + $0x2e8] sm:$0xff]  }
 0x16c   : > { %v2088_v38 = vmul.f32 0.2, %v1962_v30  ;;  %v1965_v39 = vadd.f32 %v10134_v61, %v1964_v37  ;;  %9245 = vmatprep.mubr.msk.bf16.mxu1 %vm785_vm2, %v1459_v33 }
 0x16d   : > { %v2091_v40 = vmul.f32 0.2, %v1973_v36  ;;  %9246 = vmatmul.mubr.msk.bf16.gmra.mrb[60].mxu1 %vm785_vm2, %v1460_v27  ;;  %9486 = vmatmul.mubr.msk.bf16.gmra.mrb[172].mxu0 %vm452_vm1, %v9817_v28  ;;  %v2122_v42 = vmax.f32 %v1970_v24, %v2090_v35 }
 0x16e   : > { %v2089_v41 = vmul.f32 0.2, %v1965_v39  ;;  %9489 = vmatprep.mubr.msk.bf16.mxu0 %vm452_vm1, %v9818_v34  ;;  %v2120_v44 = vmax.f32 %v1962_v30, %v2088_v38 }
 0x16f   : > { %v2123_v43 = vmax.f32 %v1973_v36, %v2091_v40  ;;  %v9824_v36 = vld [vmem:[%s9979_s10 + $0x2f0] sm:$0xff]  }
 0x170   : > { %v2121_v26 = vmax.f32 %v1965_v39, %v2089_v41  ;;  %v9257_v45 = vpop.f32.mrb[68].mxu0 }
 0x171   : > { %v2153_v46 = vpack.c.bf16 %v2123_v43, %v2122_v42  ;;  %v1986_v47 = vadd.f32 %v9257_v45, %v10134_v61  ;;  %v1977_v48 = vpop.f32.mrb[69].mxu0 }
 0x172   : > { %v1978_v50 = vadd.f32 %v10134_v61, %v1977_v48  ;;  %v9258_v51 = vpop.f32.mrb[70].mxu0  ;;  %v2152_v52 = vpack.c.bf16 %v2121_v26, %v2120_v44 }
 0x173   : > { %v2094_v54 = vmul.f32 0.2, %v1986_v47  ;;  %v1989_v55 = vadd.f32 %v9258_v51, %v10134_v61  ;;  %v1980_v56 = vpop.f32.mrb[71].mxu0  ;;  %v9825_v51 = vld [vmem:[%s9979_s10 + $0x2f8] sm:$0xff]  }
 0x174   : > { %v2092_v29 = vmul.f32 0.2, %v1978_v50  ;;  %v1981_v57 = vadd.f32 %v10134_v61, %v1980_v56  ;;  %9291 = vmatprep.mubr.msk.bf16.mxu1 %vm785_vm2, %v2152_v52  ;;  %v10395_v52 = vld [vmem:[%s12763_s2] ss:$0 sm:$0xff] }
 0x175   : > { %v2095_v58 = vmul.f32 0.2, %v1989_v55  ;;  %9292 = vmatmul.mubr.msk.bf16.vlgmr.msra.gmra.mrb[64].mxu1 %vm785_vm2, %v2153_v46  ;;  %9490 = vmatmul.mubr.msk.bf16.gmra.mrb[176].mxu0 %vm452_vm1, %v9819_v49  ;;  %v2126_v60 = vmax.f32 %v1986_v47, %v2094_v54  ;;  %v9826_v56 = vld [vmem:[%s9979_s10 + $0x300] sm:$0xff]  }
 0x176   : > { %v2093_v62 = vmul.f32 0.2, %v1981_v57  ;;  %9358 = vmatpush3.bf16.msra.mxu1 %v10344_v59  ;;  %9493 = vmatprep.mubr.msk.bf16.mxu0 %vm452_vm1, %v9820_v53  ;;  %v2124_v31 = vmax.f32 %v1978_v50, %v2092_v29 }
 0x177   : > { %v2127_v63 = vmax.f32 %v1989_v55, %v2095_v58  ;;  %9359 = vmatprep.subr.bf16.mxu1 %v10351_v0 }
 0x178   : > { %v2125_v2 = vmax.f32 %v1981_v57, %v2093_v62  ;;  %v9261_v3 = vpop.f32.mrb[72].mxu0 }
 0x179   : > { %v2002_v4 = vadd.f32 %v9261_v3, %v10134_v61  ;;  %v1993_v23 = vpop.f32.mrb[73].mxu0  ;;  %v2155_v5 = vpack.c.bf16 %v2127_v63, %v2126_v60 }
 0x17a   : > { %v1994_v7 = vadd.f32 %v10134_v61, %v1993_v23  ;;  %v9262_v8 = vpop.f32.mrb[74].mxu0  ;;  %v2154_v9 = vpack.c.bf16 %v2125_v2, %v2124_v31  ;;  %9360 = vmatpush3.bf16.msra.mxu1 %v10351_v0 }
 0x17b   : > { %v2098_v11 = vmul.f32 0.2, %v2002_v4  ;;  %v2005_v12 = vadd.f32 %v9262_v8, %v10134_v61  ;;  %v1996_v13 = vpop.f32.mrb[75].mxu0  ;;  %9361 = vmatprep.subr.bf16.mxu1 %v10363_v14  ;;  %v9827_v8 = vld [vmem:[%s9979_s10 + $0x308] sm:$0xff]  }
 0x17c   : > { %v2096_v15 = vmul.f32 0.2, %v1994_v7  ;;  %v1997_v16 = vadd.f32 %v10134_v61, %v1996_v13  ;;  %9295 = vmatprep.mubr.msk.bf16.mxu1 %vm785_vm2, %v2154_v9 }
 0x17d   : > { %v2099_v17 = vmul.f32 0.2, %v2005_v12  ;;  %9296 = vmatmul.mubr.msk.bf16.gmra.mrb[68].mxu1 %vm785_vm2, %v2155_v5  ;;  %9494 = vmatmul.mubr.msk.bf16.gmra.mrb[180].mxu0 %vm452_vm1, %v9821_v6  ;;  %v2130_v19 = vmax.f32 %v2002_v4, %v2098_v11 }
 0x17e   : > { %v2097_v18 = vmul.f32 0.2, %v1997_v16  ;;  %9497 = vmatprep.mubr.msk.bf16.mxu0 %vm452_vm1, %v9822_v10  ;;  %9362 = vmatpush3.bf16.msra.mxu1 %v10363_v14  ;;  %v2128_v22 = vmax.f32 %v1994_v7, %v2096_v15 }
 0x17f   : > { %v2131_v20 = vmax.f32 %v2005_v12, %v2099_v17  ;;  %9363 = vmatprep.subr.bf16.mxu1 %v10375_v21  ;;  %v9828_v12 = vld [vmem:[%s9979_s10 + $0x310] sm:$0xff]  }
 0x180   : > { %v2129_v24 = vmax.f32 %v1997_v16, %v2097_v18  ;;  %v9265_v25 = vpop.f32.mrb[76].mxu0 }
 0x181   : > { %v2018_v27 = vadd.f32 %v9265_v25, %v10134_v61  ;;  %v2009_v28 = vpop.f32.mrb[77].mxu0  ;;  %v2157_v30 = vpack.c.bf16 %v2131_v20, %v2130_v19 }
 0x182   : > { %v2010_v33 = vadd.f32 %v10134_v61, %v2009_v28  ;;  %v9266_v34 = vpop.f32.mrb[78].mxu0  ;;  %v2156_v35 = vpack.c.bf16 %v2129_v24, %v2128_v22  ;;  %9364 = vmatpush3.bf16.msra.mxu1 %v10375_v21 }
 0x183   : > { %v2102_v37 = vmul.f32 0.2, %v2018_v27  ;;  %v2021_v38 = vadd.f32 %v9266_v34, %v10134_v61  ;;  %v2012_v39 = vpop.f32.mrb[79].mxu0  ;;  %9431 = vmatprep.subr.bf16.mxu1 %v10344_v59  ;;  %v9829_v34 = vld [vmem:[%s9979_s10 + $0x318] sm:$0xff]  }
 0x184   : > { %v2100_v40 = vmul.f32 0.2, %v2010_v33  ;;  %v2013_v41 = vadd.f32 %v10134_v61, %v2012_v39  ;;  %9299 = vmatprep.mubr.msk.bf16.mxu1 %vm785_vm2, %v2156_v35 }
 0x185   : > { %v2103_v42 = vmul.f32 0.2, %v2021_v38  ;;  %9300 = vmatmul.mubr.msk.bf16.gmra.mrb[72].mxu1 %vm785_vm2, %v2157_v30  ;;  %9498 = vmatmul.mubr.msk.bf16.gmra.mrb[184].mxu0 %vm452_vm1, %v9823_v32  ;;  %v2134_v44 = vmax.f32 %v2018_v27, %v2102_v37 }
 0x186   : > { %v2101_v43 = vmul.f32 0.2, %v2013_v41  ;;  %9501 = vmatprep.mubr.msk.bf16.mxu0 %vm452_vm1, %v9824_v36  ;;  %v2132_v45 = vmax.f32 %v2010_v33, %v2100_v40 }
 0x187   : > { %v2135_v26 = vmax.f32 %v2021_v38, %v2103_v42  ;;  %v9830_v38 = vld [vmem:[%s9979_s10 + $0x320] sm:$0xff]  }
 0x188   : > { %v2133_v46 = vmax.f32 %v2013_v41, %v2101_v43  ;;  %v9269_v47 = vpop.f32.mrb[80].mxu0 }
 0x189   : > { %v2034_v48 = vadd.f32 %v9269_v47, %v10134_v61  ;;  %v2025_v49 = vpop.f32.mrb[81].mxu0  ;;  %v2159_v50 = vpack.c.bf16 %v2135_v26, %v2134_v44 }
 0x18a   : > { %v2026_v53 = vadd.f32 %v10395_v52, %v2025_v49  ;;  %v9270_v54 = vpop.f32.mrb[82].mxu0  ;;  %v2158_v55 = vpack.c.bf16 %v2133_v46, %v2132_v45 }
 0x18b   : > { %v2106_v29 = vmul.f32 0.2, %v2034_v48  ;;  %v2037_v57 = vadd.f32 %v10395_v52, %v9270_v54  ;;  %v2028_v58 = vpop.f32.mrb[83].mxu0 }
 0x18c   : > { %v2104_v62 = vmul.f32 0.2, %v2026_v53  ;;  %v2029_v61 = vadd.f32 %v10395_v52, %v2028_v58  ;;  %9303 = vmatprep.mubr.msk.bf16.mxu1 %vm785_vm2, %v2158_v55 }
 0x18d   : > { %v2107_v60 = vmul.f32 0.2, %v2037_v57  ;;  %9304 = vmatmul.mubr.msk.bf16.gmra.mrb[76].mxu1 %vm785_vm2, %v2159_v50  ;;  %9502 = vmatmul.mubr.msk.bf16.gmra.mrb[188].mxu0 %vm452_vm1, %v9825_v51  ;;  %v2138_v31 = vmax.f32 %v2034_v48, %v2106_v29  ;;  %v9832_v29 = vld [vmem:[%s9979_s10 + $0x330] sm:$0xff]  }
 0x18e   : > { %v2105_v63 = vmul.f32 0.2, %v2029_v61  ;;  %9547 = vmatprep.mubr.msk.bf16.mxu0 %vm452_vm1, %v9826_v56  ;;  %v2136_v3 = vmax.f32 %v2026_v53, %v2104_v62  ;;  %v9831_v53 = vld [vmem:[%s9979_s10 + $0x328] sm:$0xff]  }
 0x18f   : > { %v2139_v2 = vmax.f32 %v2037_v57, %v2107_v60 }
 0x190   : > { %v2137_v4 = vmax.f32 %v2029_v61, %v2105_v63  ;;  %v9273_v23 = vpop.f32.mrb[84].mxu0 }
 0x191   : > { %v2050_v5 = vadd.f32 %v10395_v52, %v9273_v23  ;;  %v2041_v6 = vpop.f32.mrb[85].mxu0  ;;  %v2161_v7 = vpack.c.bf16 %v2139_v2, %v2138_v31 }
 0x192   : > { %v2042_v9 = vadd.f32 %v10395_v52, %v2041_v6  ;;  %v9274_v10 = vpop.f32.mrb[86].mxu0  ;;  %v2160_v11 = vpack.c.bf16 %v2137_v4, %v2136_v3 }
 0x193   : > { %v2110_v13 = vmul.f32 0.2, %v2050_v5  ;;  %v2053_v15 = vadd.f32 %v10395_v52, %v9274_v10  ;;  %v2044_v16 = vpop.f32.mrb[87].mxu0 }
 0x194   : > { %v2108_v17 = vmul.f32 0.2, %v2042_v9  ;;  %v2045_v18 = vadd.f32 %v10395_v52, %v2044_v16  ;;  %9307 = vmatprep.mubr.msk.bf16.mxu1 %vm785_vm2, %v2160_v11 }
 0x195   : > { %v2111_v19 = vmul.f32 0.2, %v2053_v15  ;;  %9308 = vmatmul.mubr.msk.bf16.gmra.mrb[80].mxu1 %vm785_vm2, %v2161_v7  ;;  %9548 = vmatmul.mubr.msk.bf16.vlgmr.msra.gmra.mrb[192].mxu0 %vm452_vm1, %v9827_v8  ;;  %v2142_v22 = vmax.f32 %v2050_v5, %v2110_v13  ;;  %v9834_v13 = vld [vmem:[%s9979_s10 + $0x340] sm:$0xff]  }
 0x196   : > { %v2109_v20 = vmul.f32 0.2, %v2045_v18  ;;  %9620 = vmatpush3.bf16.msra.mxu0 %v9968_v1  ;;  %9551 = vmatprep.mubr.msk.bf16.mxu0 %vm452_vm1, %v9828_v12  ;;  %v2140_v25 = vmax.f32 %v2042_v9, %v2108_v17  ;;  %v9833_v9 = vld [vmem:[%s9979_s10 + $0x338] sm:$0xff]  }
 0x197   : > { %v2143_v24 = vmax.f32 %v2053_v15, %v2111_v19 }
 0x198   : > { %v2141_v27 = vmax.f32 %v2045_v18, %v2109_v20  ;;  %v9277_v28 = vpop.f32.mrb[88].mxu0 }
 0x199   : > { %v2066_v30 = vadd.f32 %v10395_v52, %v9277_v28  ;;  %v2057_v32 = vpop.f32.mrb[89].mxu0  ;;  %v2163_v33 = vpack.c.bf16 %v2143_v24, %v2142_v22 }
 0x19a   : > { %v2058_v35 = vadd.f32 %v10395_v52, %v2057_v32  ;;  %v9278_v36 = vpop.f32.mrb[90].mxu0  ;;  %v2162_v37 = vpack.c.bf16 %v2141_v27, %v2140_v25 }
 0x19b   : > { %v2114_v39 = vmul.f32 0.2, %v2066_v30  ;;  %v2069_v1 = vadd.f32 %v10395_v52, %v9278_v36  ;;  %v2060_v40 = vpop.f32.mrb[91].mxu0 }
 0x19c   : > { %v2112_v41 = vmul.f32 0.2, %v2058_v35  ;;  %v2061_v42 = vadd.f32 %v10395_v52, %v2060_v40  ;;  %9311 = vmatprep.mubr.msk.bf16.mxu1 %vm785_vm2, %v2162_v37 }
 0x19d   : > { %v2115_v43 = vmul.f32 0.2, %v2069_v1  ;;  %9312 = vmatmul.mubr.msk.bf16.gmra.mrb[84].mxu1 %vm785_vm2, %v2163_v33  ;;  %9552 = vmatmul.mubr.msk.bf16.gmra.mrb[196].mxu0 %vm452_vm1, %v9829_v34  ;;  %v2146_v26 = vmax.f32 %v2066_v30, %v2114_v39  ;;  %v9836_v39 = vld [vmem:[%s9979_s10 + $0x350] sm:$0xff]  }
 0x19e   : > { %v2113_v44 = vmul.f32 0.2, %v2061_v42  ;;  %9555 = vmatprep.mubr.msk.bf16.mxu0 %vm452_vm1, %v9830_v38  ;;  %v2144_v46 = vmax.f32 %v2058_v35, %v2112_v41  ;;  %v9835_v35 = vld [vmem:[%s9979_s10 + $0x348] sm:$0xff]  }
 0x19f   : > { %v2147_v45 = vmax.f32 %v2069_v1, %v2115_v43 }
 0x1a0   : > { %v2145_v47 = vmax.f32 %v2061_v42, %v2113_v44  ;;  %v9281_v48 = vpop.f32.mrb[92].mxu0 }
 0x1a1   : > { %v2082_v49 = vadd.f32 %v10395_v52, %v9281_v48  ;;  %v2073_v50 = vpop.f32.mrb[93].mxu0  ;;  %v2165_v51 = vpack.c.bf16 %v2147_v45, %v2146_v26 }
 0x1a2   : > { %v2074_v54 = vadd.f32 %v10395_v52, %v2073_v50  ;;  %v9282_v55 = vpop.f32.mrb[94].mxu0  ;;  %v2164_v56 = vpack.c.bf16 %v2145_v47, %v2144_v46 }
 0x1a3   : > { %v2118_v57 = vmul.f32 0.2, %v2082_v49  ;;  %v2085_v58 = vadd.f32 %v10395_v52, %v9282_v55  ;;  %v2076_v62 = vpop.f32.mrb[95].mxu0 }
 0x1a4   : > { %v2116_v61 = vmul.f32 0.2, %v2074_v54  ;;  %v2077_v60 = vadd.f32 %v10395_v52, %v2076_v62  ;;  %9315 = vmatprep.mubr.msk.bf16.mxu1 %vm785_vm2, %v2164_v56 }
 0x1a5   : > { %v2119_v63 = vmul.f32 0.2, %v2085_v58  ;;  %9316 = vmatmul.mubr.msk.bf16.gmra.mrb[88].mxu1 %vm785_vm2, %v2165_v51  ;;  %9556 = vmatmul.mubr.msk.bf16.gmra.mrb[200].mxu0 %vm452_vm1, %v9831_v53  ;;  %v2150_v2 = vmax.f32 %v2082_v49, %v2118_v57  ;;  %v9838_v57 = vld [vmem:[%s9979_s10 + $0x360] sm:$0xff]  }
 0x1a6   : > { %v2117_v31 = vmul.f32 0.2, %v2077_v60  ;;  %9559 = vmatprep.mubr.msk.bf16.mxu0 %vm452_vm1, %v9832_v29  ;;  %v2148_v4 = vmax.f32 %v2074_v54, %v2116_v61  ;;  %v9837_v54 = vld [vmem:[%s9979_s10 + $0x358] sm:$0xff]  }
 0x1a7   : > { %v2151_v3 = vmax.f32 %v2085_v58, %v2119_v63 }
 0x1a8   : > { %v2149_v23 = vmax.f32 %v2077_v60, %v2117_v31  ;;  %v9327_v5 = vpop.f32.mrb[96].mxu0 }
 0x1a9   : > { %v2677_v6 = vadd.f32 %v10395_v52, %v9327_v5  ;;  %v2668_v7 = vpop.f32.mrb[97].mxu0  ;;  %v2167_v8 = vpack.c.bf16 %v2151_v3, %v2150_v2 }
 0x1aa   : > { %v2669_v10 = vadd.f32 %v10395_v52, %v2668_v7  ;;  %v9328_v11 = vpop.f32.mrb[98].mxu0  ;;  %v2166_v12 = vpack.c.bf16 %v2149_v23, %v2148_v4 }
 0x1ab   : > { %v2797_v15 = vmul.f32 0.2, %v2677_v6  ;;  %v2680_v16 = vadd.f32 %v10395_v52, %v9328_v11  ;;  %v2671_v17 = vpop.f32.mrb[99].mxu0 }
 0x1ac   : > { %v2795_v18 = vmul.f32 0.2, %v2669_v10  ;;  %v2672_v19 = vadd.f32 %v10395_v52, %v2671_v17  ;;  %9319 = vmatprep.mubr.msk.bf16.mxu1 %vm785_vm2, %v2166_v12 }
 0x1ad   : > { %v2798_v20 = vmul.f32 0.2, %v2680_v16  ;;  %9320 = vmatmul.mubr.msk.bf16.gmra.mrb[92].mxu1 %vm785_vm2, %v2167_v8  ;;  %9560 = vmatmul.mubr.msk.bf16.gmra.mrb[204].mxu0 %vm452_vm1, %v9833_v9  ;;  %v2829_v24 = vmax.f32 %v2677_v6, %v2797_v15  ;;  %v9840_v15 = vld [vmem:[%s9979_s10 + $0x370] sm:$0xff]  }
 0x1ae   : > { %v2796_v22 = vmul.f32 0.2, %v2672_v19  ;;  %9563 = vmatprep.mubr.msk.bf16.mxu0 %vm452_vm1, %v9834_v13  ;;  %v2827_v27 = vmax.f32 %v2669_v10, %v2795_v18  ;;  %v9839_v10 = vld [vmem:[%s9979_s10 + $0x368] sm:$0xff]  }
 0x1af   : > { %v2830_v25 = vmax.f32 %v2680_v16, %v2798_v20 }
 0x1b0   : > { %v2828_v28 = vmax.f32 %v2672_v19, %v2796_v22  ;;  %v9331_v30 = vpop.f32.mrb[100].mxu0 }
 0x1b1   : > { %v2860_v32 = vpack.c.bf16 %v2830_v25, %v2829_v24  ;;  %v2693_v33 = vadd.f32 %v10395_v52, %v9331_v30  ;;  %v2684_v34 = vpop.f32.mrb[101].mxu0 }
 0x1b2   : > { %v2685_v36 = vadd.f32 %v10395_v52, %v2684_v34  ;;  %v9332_v37 = vpop.f32.mrb[102].mxu0  ;;  %v2859_v38 = vpack.c.bf16 %v2828_v28, %v2827_v27 }
 0x1b3   : > { %v2801_v1 = vmul.f32 0.2, %v2693_v33  ;;  %v2696_v40 = vadd.f32 %v10395_v52, %v9332_v37  ;;  %v2687_v41 = vpop.f32.mrb[103].mxu0 }
 0x1b4   : > { %v2799_v42 = vmul.f32 0.2, %v2685_v36  ;;  %v2688_v43 = vadd.f32 %v10395_v52, %v2687_v41  ;;  %9365 = vmatprep.mubr.msk.bf16.mxu1 %vm785_vm2, %v2859_v38  ;;  %v9841_v38 = vld [vmem:[%s9979_s10 + $0x378] sm:$0xff]  }
 0x1b5   : > { %v2802_v44 = vmul.f32 0.2, %v2696_v40  ;;  %9366 = vmatmul.mubr.msk.bf16.vlgmr.msra.gmra.mrb[96].mxu1 %vm785_vm2, %v2860_v32  ;;  %9564 = vmatmul.mubr.msk.bf16.gmra.mrb[208].mxu0 %vm452_vm1, %v9835_v35  ;;  %v2833_v45 = vmax.f32 %v2693_v33, %v2801_v1 }
 0x1b6   : > { %v2800_v26 = vmul.f32 0.2, %v2688_v43  ;;  %9432 = vmatpush3.bf16.msra.mxu1 %v10344_v59  ;;  %9567 = vmatprep.mubr.msk.bf16.mxu0 %vm452_vm1, %v9836_v39  ;;  %v2831_v47 = vmax.f32 %v2685_v36, %v2799_v42  ;;  %v9842_v42 = vld [vmem:[%s9979_s10 + $0x380] sm:$0xff]  }
 0x1b7   : > { %v2834_v46 = vmax.f32 %v2696_v40, %v2802_v44  ;;  %9433 = vmatprep.subr.bf16.mxu1 %v10351_v0 }
 0x1b8   : > { %v2832_v48 = vmax.f32 %v2688_v43, %v2800_v26  ;;  %v9335_v49 = vpop.f32.mrb[104].mxu0 }
 0x1b9   : > { %v2709_v50 = vadd.f32 %v10395_v52, %v9335_v49  ;;  %v2700_v51 = vpop.f32.mrb[105].mxu0  ;;  %v2862_v53 = vpack.c.bf16 %v2834_v46, %v2833_v45 }
 0x1ba   : > { %v2701_v55 = vadd.f32 %v10395_v52, %v2700_v51  ;;  %v9336_v56 = vpop.f32.mrb[106].mxu0  ;;  %v2861_v29 = vpack.c.bf16 %v2832_v48, %v2831_v47  ;;  %9434 = vmatpush3.bf16.msra.mxu1 %v10351_v0 }
 0x1bb   : > { %v2805_v58 = vmul.f32 0.2, %v2709_v50  ;;  %v2712_v62 = vadd.f32 %v10395_v52, %v9336_v56  ;;  %v2703_v61 = vpop.f32.mrb[107].mxu0  ;;  %9435 = vmatprep.subr.bf16.mxu1 %v10363_v14 }
 0x1bc   : > { %v2803_v60 = vmul.f32 0.2, %v2701_v55  ;;  %v2704_v63 = vadd.f32 %v10395_v52, %v2703_v61  ;;  %9369 = vmatprep.mubr.msk.bf16.mxu1 %vm785_vm2, %v2861_v29  ;;  %v9843_v61 = vld [vmem:[%s9979_s10 + $0x388] sm:$0xff]  }
 0x1bd   : > { %v2806_v31 = vmul.f32 0.2, %v2712_v62  ;;  %9370 = vmatmul.mubr.msk.bf16.gmra.mrb[100].mxu1 %vm785_vm2, %v2862_v53  ;;  %9568 = vmatmul.mubr.msk.bf16.gmra.mrb[212].mxu0 %vm452_vm1, %v9837_v54  ;;  %v2837_v3 = vmax.f32 %v2709_v50, %v2805_v58 }
 0x1be   : > { %v2804_v2 = vmul.f32 0.2, %v2704_v63  ;;  %9571 = vmatprep.mubr.msk.bf16.mxu0 %vm452_vm1, %v9838_v57  ;;  %9436 = vmatpush3.bf16.msra.mxu1 %v10363_v14  ;;  %v2835_v23 = vmax.f32 %v2701_v55, %v2803_v60 }
 0x1bf   : > { %v2838_v4 = vmax.f32 %v2712_v62, %v2806_v31  ;;  %9437 = vmatprep.subr.bf16.mxu1 %v10375_v21 }
 0x1c0   : > { %v2836_v5 = vmax.f32 %v2704_v63, %v2804_v2  ;;  %v9339_v6 = vpop.f32.mrb[108].mxu0 }
 0x1c1   : > { %v2725_v7 = vadd.f32 %v10395_v52, %v9339_v6  ;;  %v2716_v8 = vpop.f32.mrb[109].mxu0  ;;  %v2864_v9 = vpack.c.bf16 %v2838_v4, %v2837_v3  ;;  %v9844_v3 = vld [vmem:[%s9979_s10 + $0x390] sm:$0xff]  }
 0x1c2   : > { %v2717_v11 = vadd.f32 %v10395_v52, %v2716_v8  ;;  %v9340_v12 = vpop.f32.mrb[110].mxu0  ;;  %v2863_v13 = vpack.c.bf16 %v2836_v5, %v2835_v23  ;;  %9438 = vmatpush3.bf16.msra.mxu1 %v10375_v21 }
 0x1c3   : > { %v2809_v16 = vmul.f32 0.2, %v2725_v7  ;;  %v2728_v17 = vadd.f32 %v10395_v52, %v9340_v12  ;;  %v2719_v18 = vpop.f32.mrb[111].mxu0  ;;  %9505 = vmatprep.subr.bf16.mxu1 %v10344_v59 }
 0x1c4   : > { %v2807_v19 = vmul.f32 0.2, %v2717_v11  ;;  %v2720_v20 = vadd.f32 %v10395_v52, %v2719_v18  ;;  %9373 = vmatprep.mubr.msk.bf16.mxu1 %vm785_vm2, %v2863_v13 }
 0x1c5   : > { %v2810_v22 = vmul.f32 0.2, %v2728_v17  ;;  %9374 = vmatmul.mubr.msk.bf16.gmra.mrb[104].mxu1 %vm785_vm2, %v2864_v9  ;;  %9572 = vmatmul.mubr.msk.bf16.gmra.mrb[216].mxu0 %vm452_vm1, %v9839_v10  ;;  %v2841_v25 = vmax.f32 %v2725_v7, %v2809_v16 }
 0x1c6   : > { %v2808_v24 = vmul.f32 0.2, %v2720_v20  ;;  %9575 = vmatprep.mubr.msk.bf16.mxu0 %vm452_vm1, %v9840_v15  ;;  %v2839_v28 = vmax.f32 %v2717_v11, %v2807_v19 }
 0x1c7   : > { %v2842_v27 = vmax.f32 %v2728_v17, %v2810_v22 }
 0x1c8   : > { %v2840_v30 = vmax.f32 %v2720_v20, %v2808_v24  ;;  %v10484_v32 = vpop.f32.mrb[0].mxu1  ;;  %v9343_v33 = vpop.f32.mrb[112].mxu0  ;;  %v9845_v24 = vld [vmem:[%s9979_s10 + $0x398] sm:$0xff]  }
 0x1c9   : > { %v2741_v34 = vadd.f32 %v10395_v52, %v9343_v33  ;;  %v10487_v35 = vpop.f32.mrb[1].mxu1  ;;  %v2732_v36 = vpop.f32.mrb[113].mxu0  ;;  %v2866_v37 = vpack.c.bf16 %v2842_v27, %v2841_v25  ;;  %v9846_v33 = vld [vmem:[%s9979_s10 + $0x3a0] sm:$0xff]  }
 0x1ca   : > { %v2733_v39 = vadd.f32 %v10395_v52, %v2732_v36  ;;  %v10491_v1 = vpop.f32.mrb[2].mxu1  ;;  %v9344_v40 = vpop.f32.mrb[114].mxu0  ;;  %v2865_v41 = vpack.c.bf16 %v2840_v30, %v2839_v28 }
 0x1cb   : > { %v2813_v43 = vmul.f32 0.2, %v2741_v34  ;;  %v2744_v44 = vadd.f32 %v10395_v52, %v9344_v40  ;;  %v10495_v26 = vpop.f32.mrb[3].mxu1  ;;  %v2735_v45 = vpop.f32.mrb[115].mxu0 }
 0x1cc   : > { %v2811_v46 = vmul.f32 0.2, %v2733_v39  ;;  %v2736_v47 = vadd.f32 %v10395_v52, %v2735_v45  ;;  %9377 = vmatprep.mubr.msk.bf16.mxu1 %vm785_vm2, %v2865_v41 }
 0x1cd   : > { %v2814_v48 = vmul.f32 0.2, %v2744_v44  ;;  %9378 = vmatmul.mubr.msk.bf16.gmra.mrb[108].mxu1 %vm785_vm2, %v2866_v37  ;;  %9576 = vmatmul.mubr.msk.bf16.gmra.mrb[220].mxu0 %vm452_vm1, %v9841_v38  ;;  %v2845_v50 = vmax.f32 %v2741_v34, %v2813_v43 }
 0x1ce   : > { %v2812_v49 = vmul.f32 0.2, %v2736_v47  ;;  %9621 = vmatprep.mubr.msk.bf16.mxu0 %vm452_vm1, %v9842_v42  ;;  %v2843_v53 = vmax.f32 %v2733_v39, %v2811_v46 }
 0x1cf   : > { %v2846_v51 = vmax.f32 %v2744_v44, %v2814_v48 }
 0x1d0   : > { %v2844_v54 = vmax.f32 %v2736_v47, %v2812_v49  ;;  %v10502_v55 = vpop.f32.mrb[4].mxu1  ;;  %v9347_v56 = vpop.f32.mrb[116].mxu0  ;;  %v10543_v49 = vld [vmem:[%s12765_s4] ss:$0 sm:$0xff] }
 0x1d1   : > { %v2757_v29 = vadd.f32 %v10395_v52, %v9347_v56  ;;  %v10505_v57 = vpop.f32.mrb[5].mxu1  ;;  %v2748_v58 = vpop.f32.mrb[117].mxu0  ;;  %v2868_v62 = vpack.c.bf16 %v2846_v51, %v2845_v50  ;;  %v9847_v56 = vld [vmem:[%s9979_s10 + $0x3a8] sm:$0xff]  }
 0x1d2   : > { %v2749_v60 = vadd.f32 %v10395_v52, %v2748_v58  ;;  %v10509_v63 = vpop.f32.mrb[6].mxu1  ;;  %v9348_v31 = vpop.f32.mrb[118].mxu0  ;;  %v2867_v2 = vpack.c.bf16 %v2844_v54, %v2843_v53 }
 0x1d3   : > { %v2817_v4 = vmul.f32 0.2, %v2757_v29  ;;  %v2760_v23 = vadd.f32 %v10395_v52, %v9348_v31  ;;  %v10513_v5 = vpop.f32.mrb[7].mxu1  ;;  %v2751_v6 = vpop.f32.mrb[119].mxu0 }
 0x1d4   : > { %v2815_v7 = vmul.f32 0.2, %v2749_v60  ;;  %v2752_v8 = vadd.f32 %v10395_v52, %v2751_v6  ;;  %9381 = vmatprep.mubr.msk.bf16.mxu1 %vm785_vm2, %v2867_v2  ;;  %v10562_v6 = vadd.f32 %v10543_v49, %v10487_v35  ;;  %v10578_v35 = vadd.f32 %v10502_v55, %v10543_v49 }
 0x1d5   : > { %v2818_v9 = vmul.f32 0.2, %v2760_v23  ;;  %9382 = vmatmul.mubr.msk.bf16.gmra.mrb[112].mxu1 %vm785_vm2, %v2868_v62  ;;  %9622 = vmatmul.mubr.msk.bf16.vlgmr.msra.gmra.mrb[224].mxu0 %vm452_vm1, %v9843_v61  ;;  %v2849_v11 = vmax.f32 %v2757_v29, %v2817_v4 }
 0x1d6   : > { %v2816_v10 = vmul.f32 0.2, %v2752_v8  ;;  %9625 = vmatprep.mubr.msk.bf16.mxu0 %vm452_vm1, %v9844_v3  ;;  %v2847_v13 = vmax.f32 %v2749_v60, %v2815_v7  ;;  %v9848_v60 = vld [vmem:[%s9979_s10 + $0x3b0] sm:$0xff]  }
 0x1d7   : > { %v2850_v12 = vmax.f32 %v2760_v23, %v2818_v9  ;;  %v10558_v23 = vadd.f32 %v10484_v32, %v10543_v49  ;;  %v10568_v9 = vadd.f32 %v10491_v1, %v10543_v49  ;;  %v10574_v32 = vadd.f32 %v10543_v49, %v10495_v26 }
 0x1d8   : > { %v2848_v15 = vmax.f32 %v2752_v8, %v2816_v10  ;;  %v10520_v16 = vpop.f32.mrb[8].mxu1  ;;  %v9351_v17 = vpop.f32.mrb[120].mxu0 }
 0x1d9   : > { %v2773_v18 = vadd.f32 %v10395_v52, %v9351_v17  ;;  %v10523_v19 = vpop.f32.mrb[9].mxu1  ;;  %v2764_v20 = vpop.f32.mrb[121].mxu0  ;;  %v2870_v22 = vpack.c.bf16 %v2850_v12, %v2849_v11  ;;  %v10590_v55 = vmul.f32 0.2, %v10568_v9 }
 0x1da   : > { %v2765_v25 = vadd.f32 %v10395_v52, %v2764_v20  ;;  %v10527_v27 = vpop.f32.mrb[10].mxu1  ;;  %v9352_v28 = vpop.f32.mrb[122].mxu0  ;;  %v2869_v30 = vpack.c.bf16 %v2848_v15, %v2847_v13  ;;  %v10582_v13 = vmul.f32 0.2, %v10558_v23  ;;  %v10585_v15 = vmul.f32 0.2, %v10562_v6 }
 0x1db   : > { %v2821_v34 = vmul.f32 0.2, %v2773_v18  ;;  %v2776_v36 = vadd.f32 %v10395_v52, %v9352_v28  ;;  %v10531_v37 = vpop.f32.mrb[11].mxu1  ;;  %v2767_v38 = vpop.f32.mrb[123].mxu0 }
 0x1dc   : > { %v2819_v39 = vmul.f32 0.2, %v2765_v25  ;;  %v2768_v40 = vadd.f32 %v10395_v52, %v2767_v38  ;;  %9385 = vmatprep.mubr.msk.bf16.mxu1 %vm785_vm2, %v2869_v30  ;;  %v10605_v38 = vmul.f32 0.2, %v10578_v35 }
 0x1dd   : > { %v2822_v41 = vmul.f32 0.2, %v2776_v36  ;;  %9386 = vmatmul.mubr.msk.bf16.gmra.mrb[116].mxu1 %vm785_vm2, %v2870_v22  ;;  %9626 = vmatmul.mubr.msk.bf16.gmra.mrb[228].mxu0 %vm452_vm1, %v9845_v24  ;;  %v2853_v43 = vmax.f32 %v2773_v18, %v2821_v34  ;;  %v10594_v22 = vadd.f32 %v10543_v49, %v10505_v57  ;;  %v9850_v34 = vld [vmem:[%s9979_s10 + $0x3c0] sm:$0xff]  }
 0x1de   : > { %v2820_v42 = vmul.f32 0.2, %v2768_v40  ;;  %9629 = vmatprep.mubr.msk.bf16.mxu0 %vm452_vm1, %v9846_v33  ;;  %v2851_v45 = vmax.f32 %v2765_v25, %v2819_v39  ;;  %v9849_v33 = vld [vmem:[%s9979_s10 + $0x3b8] sm:$0xff]  }
 0x1df   : > { %v2854_v44 = vmax.f32 %v2776_v36, %v2822_v41  ;;  %v10602_v36 = vmul.f32 0.2, %v10574_v32 }
 0x1e0   : > { %v2852_v46 = vmax.f32 %v2768_v40, %v2820_v42  ;;  %v10538_v47 = vpop.f32.mrb[12].mxu1  ;;  %v9355_v48 = vpop.f32.mrb[124].mxu0  ;;  %v10612_v42 = vadd.f32 %v10509_v63, %v10543_v49 }
 0x1e1   : > { %v2789_v50 = vadd.f32 %v10395_v52, %v9355_v48  ;;  %v10546_v51 = vpop.f32.mrb[13].mxu1  ;;  %v2780_v53 = vpop.f32.mrb[125].mxu0  ;;  %v2872_v54 = vpack.c.bf16 %v2854_v44, %v2853_v43 }
 0x1e2   : > { %v2781_v29 = vadd.f32 %v10395_v52, %v2780_v53  ;;  %v10550_v58 = vpop.f32.mrb[14].mxu1  ;;  %v9356_v62 = vpop.f32.mrb[126].mxu0  ;;  %v2871_v61 = vpack.c.bf16 %v2852_v46, %v2851_v45 }
 0x1e3   : > { %v2825_v31 = vmul.f32 0.2, %v2789_v50  ;;  %v2792_v2 = vadd.f32 %v10395_v52, %v9356_v62  ;;  %v10554_v3 = vpop.f32.mrb[15].mxu1  ;;  %v2783_v4 = vpop.f32.mrb[127].mxu0 }
 0x1e4   : > { %v2823_v7 = vmul.f32 0.2, %v2781_v29  ;;  %v2784_v8 = vadd.f32 %v10395_v52, %v2783_v4  ;;  %9389 = vmatprep.mubr.msk.bf16.mxu1 %vm785_vm2, %v2871_v61  ;;  %v10648_v4 = vadd.f32 %v10543_v49, %v10523_v19  ;;  %v9853_v61 = vld [vmem:[%s9979_s10 + $0x3d8] sm:$0xff]  }
 0x1e5   : > { %v2826_v10 = vmul.f32 0.2, %v2792_v2  ;;  %9390 = vmatmul.mubr.msk.bf16.gmra.mrb[120].mxu1 %vm785_vm2, %v2872_v54  ;;  %9630 = vmatmul.mubr.msk.bf16.gmra.mrb[232].mxu0 %vm452_vm1, %v9847_v56  ;;  %v2857_v1 = vmax.f32 %v2789_v50, %v2825_v31  ;;  %v10626_v56 = vmul.f32 0.2, %v10594_v22  ;;  %v10640_v31 = vadd.f32 %v10520_v16, %v10543_v49  ;;  %v9854_v50 = vld [vmem:[%s9979_s10 + $0x3e0] sm:$0xff]  }
 0x1e6   : > { %v2824_v11 = vmul.f32 0.2, %v2784_v8  ;;  %9633 = vmatprep.mubr.msk.bf16.mxu0 %vm452_vm1, %v9848_v60  ;;  %v2855_v17 = vmax.f32 %v2781_v29, %v2823_v7  ;;  %v10630_v29 = vadd.f32 %v10543_v49, %v10513_v5  ;;  %v10644_v5 = vmul.f32 0.2, %v10612_v42 }
 0x1e7   : > { %v2858_v12 = vmax.f32 %v2792_v2, %v2826_v10  ;;  %v10652_v10 = vadd.f32 %v10527_v27, %v10543_v49  ;;  %v10656_v16 = vadd.f32 %v10543_v49, %v10531_v37  ;;  %v9851_v37 = vld [vmem:[%s9979_s10 + $0x3c8] sm:$0xff]  }
 0x1e8   : > { %v2856_v26 = vmax.f32 %v2784_v8, %v2824_v11  ;;  %v10587_v18 = vpop.f32.mrb[16].mxu1  ;;  %v9401_v20 = vpop.f32.mrb[128].mxu0 }
 0x1e9   : > { %v3384_v24 = vadd.f32 %v10395_v52, %v9401_v20  ;;  %v10597_v25 = vpop.f32.mrb[17].mxu1  ;;  %v3375_v28 = vpop.f32.mrb[129].mxu0  ;;  %v2874_v30 = vpack.c.bf16 %v2858_v12, %v2857_v1 }
 0x1ea   : > { %v3376_v39 = vadd.f32 %v10395_v52, %v3375_v28  ;;  %v10608_v40 = vpop.f32.mrb[18].mxu1  ;;  %v9402_v57 = vpop.f32.mrb[130].mxu0  ;;  %v2873_v41 = vpack.c.bf16 %v2856_v26, %v2855_v17  ;;  %v10663_v26 = vmul.f32 0.2, %v10630_v29 }
 0x1eb   : > { %v3504_v43 = vmul.f32 0.2, %v3384_v24  ;;  %v3387_v44 = vadd.f32 %v10395_v52, %v9402_v57  ;;  %v10615_v45 = vpop.f32.mrb[19].mxu1  ;;  %v3378_v46 = vpop.f32.mrb[131].mxu0 }
 0x1ec   : > { %v3502_v53 = vmul.f32 0.2, %v3376_v39  ;;  %v3379_v54 = vadd.f32 %v10395_v52, %v3378_v46  ;;  %9393 = vmatprep.mubr.msk.bf16.mxu1 %vm785_vm2, %v2873_v41  ;;  %v10685_v46 = vadd.f32 %v10543_v49, %v10546_v51 }
 0x1ed   : > { %v3505_v62 = vmul.f32 0.2, %v3387_v44  ;;  %9394 = vmatmul.mubr.msk.bf16.gmra.mrb[124].mxu1 %vm785_vm2, %v2874_v30  ;;  %9634 = vmatmul.mubr.msk.bf16.gmra.mrb[236].mxu0 %vm452_vm1, %v9849_v33  ;;  %v3536_v7 = vmax.f32 %v3384_v24, %v3504_v43  ;;  %v10670_v30 = vmul.f32 0.2, %v10640_v31  ;;  %v10674_v33 = vadd.f32 %v10538_v47, %v10543_v49  ;;  %v9852_v43 = vld [vmem:[%s9979_s10 + $0x3d0] sm:$0xff]  }
 0x1ee   : > { %v3503_v2 = vmul.f32 0.2, %v3379_v54  ;;  %9637 = vmatprep.mubr.msk.bf16.mxu0 %vm452_vm1, %v9850_v34  ;;  %v3534_v11 = vmax.f32 %v3376_v39, %v3502_v53  ;;  %12800 = vst [vmem:[#allocation3_spill] sm:$0xff] %v10685_v46 }
 0x1ef   : > { %v3537_v8 = vmax.f32 %v3387_v44, %v3505_v62  ;;  %12799 = vst [vmem:[#allocation2_spill] sm:$0xff] %v10674_v33  ;;  %v10681_v44 = vmul.f32 0.2, %v10648_v4 }
 0x1f0   : > { %v3535_v1 = vmax.f32 %v3379_v54, %v3503_v2  ;;  %v10658_v12 = vpop.f32.mrb[20].mxu1  ;;  %v9405_v17 = vpop.f32.mrb[132].mxu0  ;;  %v10691_v2 = vmul.f32 0.2, %v10652_v10 }
 0x1f1   : > { %v3567_v20 = vpack.c.bf16 %v3537_v8, %v3536_v7  ;;  %v3400_v27 = vadd.f32 %v10395_v52, %v9405_v17  ;;  %v10666_v24 = vpop.f32.mrb[21].mxu1  ;;  %v3391_v28 = vpop.f32.mrb[133].mxu0  ;;  %v10694_v7 = vmul.f32 0.2, %v10656_v16  ;;  %v10706_v17 = vadd.f32 %v10543_v49, %v10554_v3 }
 0x1f2   : > { %v3566_v34 = vpack.c.bf16 %v3535_v1, %v3534_v11  ;;  %v3392_v39 = vadd.f32 %v10395_v52, %v3391_v28  ;;  %v10677_v57 = vpop.f32.mrb[22].mxu1  ;;  %v9406_v41 = vpop.f32.mrb[134].mxu0  ;;  %v10702_v1 = vadd.f32 %v10550_v58, %v10543_v49  ;;  %v10776_v48 = vadd.f32 %v10658_v12, %v10543_v49 }
 0x1f3   : > { %v3508_v53 = vmul.f32 0.2, %v3400_v27  ;;  %v3403_v54 = vadd.f32 %v10395_v52, %v9406_v41  ;;  %v10688_v62 = vpop.f32.mrb[23].mxu1  ;;  %v3394_v47 = vpop.f32.mrb[135].mxu0  ;;  %12801 = vst [vmem:[#allocation4_spill] sm:$0xff] %v10694_v7  ;;  %12803 = vst [vmem:[#allocation6_spill] sm:$0xff] %v10706_v17 }
 0x1f4   : > { %v3506_v8 = vmul.f32 0.2, %v3392_v39  ;;  %v3395_v11 = vadd.f32 %v10395_v52, %v3394_v47  ;;  %9439 = vmatprep.mubr.msk.bf16.mxu1 %vm785_vm2, %v3566_v34  ;;  %12802 = vst [vmem:[#allocation5_spill] sm:$0xff] %v10702_v1  ;;  %v10715_v47 = vmul.f32 0.2, %v10674_v33  ;;  %12810 = vst [vmem:[#allocation13_spill] sm:$0xff] %v10776_v48 }
 0x1f5   : > { %v3509_v28 = vmul.f32 0.2, %v3403_v54  ;;  %9440 = vmatmul.mubr.msk.bf16.vlgmr.msra.gmra.mrb[128].mxu1 %vm785_vm2, %v3567_v20  ;;  %9638 = vmatmul.mubr.msk.bf16.gmra.mrb[240].mxu0 %vm452_vm1, %v9851_v37  ;;  %v10722_v20 = vmul.f32 0.2, %v10685_v46  ;;  %v3540_v37 = vmax.f32 %v3400_v27, %v3508_v53  ;;  %v10731_v3 = vmul.f32 0.2, %v10702_v1 }
 0x1f6   : > { %12804 = vst [vmem:[#allocation7_spill] sm:$0xff] %v10715_v47  ;;  %v3507_v58 = vmul.f32 0.2, %v3395_v11  ;;  %9506 = vmatpush3.bf16.msra.mxu1 %v10344_v59  ;;  %9641 = vmatprep.mubr.msk.bf16.mxu0 %vm452_vm1, %v9852_v43  ;;  %v3538_v19 = vmax.f32 %v3392_v39, %v3506_v8  ;;  %v10734_v27 = vmul.f32 0.2, %v10706_v17  ;;  %v10743_v8 = vadd.f32 %v10587_v18, %v10543_v49  ;;  %v9855_v1 = vld [vmem:[%s9979_s10 + $0x3e8] sm:$0xff]  }
 0x1f7   : > { %12805 = vst [vmem:[#allocation8_spill] sm:$0xff] %v10722_v20  ;;  %v3541_v41 = vmax.f32 %v3403_v54, %v3509_v28  ;;  %9507 = vmatprep.subr.bf16.mxu1 %v10351_v0  ;;  %12806 = vst [vmem:[#allocation9_spill] sm:$0xff] %v10731_v3  ;;  %v9856_v20 = vld [vmem:[%s9979_s10 + $0x3f0] sm:$0xff]  }
 0x1f8   : > { %v3539_v59 = vmax.f32 %v3395_v11, %v3507_v58  ;;  %v9169_v43 = vpop.f32.mrb[24].mxu1  ;;  %v9409_v60 = vpop.f32.mrb[136].mxu0  ;;  %12807 = vst [vmem:[#allocation10_spill] sm:$0xff] %v10734_v27  ;;  %12808 = vst [vmem:[#allocation11_spill] sm:$0xff] %v10743_v8 }
 0x1f9   : > { %v3569_v53 = vpack.c.bf16 %v3541_v41, %v3540_v37  ;;  %v3416_v54 = vadd.f32 %v10395_v52, %v9409_v60  ;;  %v10737_v28 = vpop.f32.mrb[25].mxu1  ;;  %v3407_v34 = vpop.f32.mrb[137].mxu0  ;;  %v10754_v41 = vadd.f32 %v10543_v49, %v10597_v25 }
 0x1fa   : > { %v3568_v11 = vpack.c.bf16 %v3539_v59, %v3538_v19  ;;  %v3408_v58 = vadd.f32 %v10395_v52, %v3407_v34  ;;  %v10746_v51 = vpop.f32.mrb[26].mxu1  ;;  %v9410_v63 = vpop.f32.mrb[138].mxu0  ;;  %9508 = vmatpush3.bf16.msra.mxu1 %v10351_v0  ;;  %v10762_v34 = vadd.f32 %v10608_v40, %v10543_v49  ;;  %v10766_v0 = vadd.f32 %v10543_v49, %v10615_v45 }
 0x1fb   : > { %v3512_v37 = vmul.f32 0.2, %v3416_v54  ;;  %v3419_v18 = vadd.f32 %v10395_v52, %v9410_v63  ;;  %v10757_v39 = vpop.f32.mrb[27].mxu1  ;;  %v3410_v19 = vpop.f32.mrb[139].mxu0  ;;  %9509 = vmatprep.subr.bf16.mxu1 %v10363_v14  ;;  %v10781_v45 = vmul.f32 0.2, %v10743_v8 }
 0x1fc   : > { %12809 = vst [vmem:[#allocation12_spill] sm:$0xff] %v10766_v0  ;;  %v3510_v59 = vmul.f32 0.2, %v3408_v58  ;;  %v3411_v25 = vadd.f32 %v10395_v52, %v3410_v19  ;;  %9443 = vmatprep.mubr.msk.bf16.mxu1 %vm785_vm2, %v3568_v11  ;;  %v10785_v11 = vadd.f32 %v10543_v49, %v10666_v24  ;;  %v10789_v19 = vadd.f32 %v10677_v57, %v10543_v49 }
 0x1fd   : > { %v3513_v40 = vmul.f32 0.2, %v3419_v18  ;;  %9444 = vmatmul.mubr.msk.bf16.gmra.mrb[132].mxu1 %vm785_vm2, %v3569_v53  ;;  %9642 = vmatmul.mubr.msk.bf16.gmra.mrb[244].mxu0 %vm452_vm1, %v9853_v61  ;;  %12811 = vst [vmem:[#allocation14_spill] sm:$0xff] %v10781_v45  ;;  %v10794_v12 = vmul.f32 0.2, %v10754_v41  ;;  %v10798_v61 = vadd.f32 %v10543_v49, %v10688_v62  ;;  %v3544_v53 = vmax.f32 %v3416_v54, %v3512_v37 }
 0x1fe   : > { %12812 = vst [vmem:[#allocation15_spill] sm:$0xff] %v10785_v11  ;;  %12813 = vst [vmem:[#allocation16_spill] sm:$0xff] %v10789_v19  ;;  %v3511_v60 = vmul.f32 0.2, %v3411_v25  ;;  %9645 = vmatprep.mubr.msk.bf16.mxu0 %vm452_vm1, %v9854_v50  ;;  %9510 = vmatpush3.bf16.msra.mxu1 %v10363_v14  ;;  %v10802_v57 = vmul.f32 0.2, %v10762_v34  ;;  %v3542_v14 = vmax.f32 %v3408_v58, %v3510_v59 }
 0x1ff   : > { %12814 = vst [vmem:[#allocation17_spill] sm:$0xff] %v10798_v61  ;;  %v3545_v24 = vmax.f32 %v3419_v18, %v3513_v40  ;;  %9511 = vmatprep.subr.bf16.mxu1 %v10375_v21  ;;  %v10805_v50 = vmul.f32 0.2, %v10766_v0  ;;  %v10810_v62 = vmul.f32 0.2, %v10776_v48  ;;  %v10813_v54 = vadd.f32 %v9169_v43, %v10543_v49 }
 0x200   : > { %12815 = vst [vmem:[#allocation18_spill] sm:$0xff] %v10802_v57  ;;  %v3543_v63 = vmax.f32 %v3411_v25, %v3511_v60  ;;  %v10807_v27 = vpop.f32.mrb[28].mxu1  ;;  %v9413_v17 = vpop.f32.mrb[140].mxu0  ;;  %v10821_v58 = vmul.f32 0.2, %v10785_v11 }
 0x201   : > { %12816 = vst [vmem:[#allocation19_spill] sm:$0xff] %v10805_v50  ;;  %12817 = vst [vmem:[#allocation20_spill] sm:$0xff] %v10810_v62  ;;  %v3571_v37 = vpack.c.bf16 %v3545_v24, %v3544_v53  ;;  %v3432_v18 = vadd.f32 %v10395_v52, %v9413_v17  ;;  %v10816_v40 = vpop.f32.mrb[29].mxu1  ;;  %v3423_v3 = vpop.f32.mrb[141].mxu0  ;;  %v10824_v60 = vmul.f32 0.2, %v10789_v19 }
 0x202   : > { %12818 = vst [vmem:[#allocation21_spill] sm:$0xff] %v10813_v54  ;;  %12819 = vst [vmem:[#allocation22_spill] sm:$0xff] %v10821_v58  ;;  %v3570_v59 = vpack.c.bf16 %v3543_v63, %v3542_v14  ;;  %v3424_v25 = vadd.f32 %v10395_v52, %v3423_v3  ;;  %v10827_v46 = vpop.f32.mrb[30].mxu1  ;;  %v9414_v43 = vpop.f32.mrb[142].mxu0  ;;  %9512 = vmatpush3.bf16.msra.mxu1 %v10375_v21  ;;  %v10833_v53 = vmul.f32 0.2, %v10798_v61 }
 0x203   : > { %12820 = vst [vmem:[#allocation23_spill] sm:$0xff] %v10824_v60  ;;  %v3516_v24 = vmul.f32 0.2, %v3432_v18  ;;  %v3435_v47 = vadd.f32 %v10395_v52, %v9414_v43  ;;  %v10836_v33 = vpop.f32.mrb[31].mxu1  ;;  %v3426_v7 = vpop.f32.mrb[143].mxu0  ;;  %v10841_v3 = vld [vmem:[%s12764_s3] sm:$0xff]   ;;  %v10848_v63 = vadd.f32 %v10543_v49, %v10737_v28 }
 0x204   : > { %12821 = vst [vmem:[#allocation24_spill] sm:$0xff] %v10833_v53  ;;  %12822 = vst [vmem:[#allocation25_spill] sm:$0xff] %v10841_v3  ;;  %9579 = vmatprep.subr.bf16.mxu1 %v10841_v3  ;;  %v3514_v14 = vmul.f32 0.2, %v3424_v25  ;;  %v3427_v43 = vadd.f32 %v10395_v52, %v3426_v7  ;;  %9447 = vmatprep.mubr.msk.bf16.mxu1 %vm785_vm2, %v3570_v59  ;;  %v10857_v3 = vmul.f32 0.2, %v10813_v54 }
 0x205   : > { %12823 = vst [vmem:[#allocation26_spill] sm:$0xff] %v10848_v63  ;;  %v3517_v8 = vmul.f32 0.2, %v3435_v47  ;;  %9448 = vmatmul.mubr.msk.bf16.gmra.mrb[136].mxu1 %vm785_vm2, %v3571_v37  ;;  %9646 = vmatmul.mubr.msk.bf16.gmra.mrb[248].mxu0 %vm452_vm1, %v9855_v1  ;;  %v10867_v7 = vadd.f32 %v10746_v51, %v10543_v49  ;;  %v3548_v1 = vmax.f32 %v3432_v18, %v3516_v24  ;;  %v10875_v28 = vmul.f32 0.2, %v10848_v63  ;;  %v9857_v24 = vld [vmem:[%s9979_s10 + $0x3f8] sm:$0xff]  }
 0x206   : > { %12824 = vst [vmem:[#allocation27_spill] sm:$0xff] %v10857_v3  ;;  %v3515_v59 = vmul.f32 0.2, %v3427_v43  ;;  %9649 = vmatprep.mubr.msk.bf16.mxu0 %vm452_vm1, %v9856_v20  ;;  %v10879_v52 = vadd.f32 %v10543_v49, %v10757_v39  ;;  %v3546_v51 = vmax.f32 %v3424_v25, %v3514_v14 }
 0x207   : > { %v3549_v17 = vmax.f32 %v3435_v47, %v3517_v8  ;;  %12825 = vst [vmem:[#allocation28_spill] sm:$0xff] %v10875_v28  ;;  %v10887_v47 = vld [vmem:[%s12763_s2] ss:$0 sm:$0xff]  ;;  %v10892_v25 = vmul.f32 0.2, %v10867_v7 }
 0x208   : > { %v3547_v21 = vmax.f32 %v3427_v43, %v3515_v59  ;;  %v9219_v58 = vpop.f32.mrb[32].mxu1  ;;  %v9417_v20 = vpop.f32.mrb[144].mxu0 }
 0x209   : > { %v3573_v60 = vpack.c.bf16 %v3549_v17, %v3548_v1  ;;  %v1552_v37 = vadd.f32 %v9219_v58, %v10543_v49  ;;  %v3448_v8 = vadd.f32 %v10887_v47, %v9417_v20  ;;  %v1543_v18 = vpop.f32.mrb[33].mxu1  ;;  %v3439_v39 = vpop.f32.mrb[145].mxu0 }
 0x20a   : > { %v3572_v14 = vpack.c.bf16 %v3547_v21, %v3546_v51  ;;  %v1544_v43 = vadd.f32 %v10543_v49, %v1543_v18  ;;  %v3440_v17 = vadd.f32 %v10887_v47, %v3439_v39  ;;  %v9220_v59 = vpop.f32.mrb[34].mxu1  ;;  %v9418_v58 = vpop.f32.mrb[146].mxu0 }
 0x20b   : > { %v1672_v1 = vmul.f32 0.2, %v1552_v37  ;;  %v3520_v45 = vmul.f32 0.2, %v3448_v8  ;;  %v1555_v3 = vadd.f32 %v9220_v59, %v10543_v49  ;;  %v3451_v54 = vadd.f32 %v10887_v47, %v9418_v58  ;;  %v1546_v20 = vpop.f32.mrb[35].mxu1  ;;  %v3442_v53 = vpop.f32.mrb[147].mxu0 }
 0x20c   : > { %v1670_v61 = vmul.f32 0.2, %v1544_v43  ;;  %v3518_v19 = vmul.f32 0.2, %v3440_v17  ;;  %v1547_v11 = vadd.f32 %v10543_v49, %v1546_v20  ;;  %v3443_v21 = vadd.f32 %v10887_v47, %v3442_v53  ;;  %9451 = vmatprep.mubr.msk.bf16.mxu1 %vm785_vm2, %v3572_v14 }
 0x20d   : > { %v1704_v18 = vmax.f32 %v1552_v37, %v1672_v1  ;;  %v1673_v39 = vmul.f32 0.2, %v1555_v3  ;;  %v3521_v62 = vmul.f32 0.2, %v3451_v54  ;;  %9452 = vmatmul.mubr.msk.bf16.gmra.mrb[140].mxu1 %vm785_vm2, %v3573_v60  ;;  %9650 = vmatmul.mubr.msk.bf16.gmra.mrb[252].mxu0 %vm452_vm1, %v9857_v24  ;;  %v10906_v59 = vmul.f32 0.2, %v10879_v52 }
 0x20e   : > { %v1702_v58 = vmax.f32 %v1544_v43, %v1670_v61  ;;  %v1671_v48 = vmul.f32 0.2, %v1547_v11  ;;  %v3519_v20 = vmul.f32 0.2, %v3443_v21  ;;  %v12826_v53 = vmax.f32 %v10558_v23, %v10582_v13 }
 0x20f   : > { %v3552_v50 = vmax.f32 %v3448_v8, %v3520_v45  ;;  %v1705_v51 = vmax.f32 %v1555_v3, %v1673_v39  ;;  %v3553_v37 = vmax.f32 %v3451_v54, %v3521_v62  ;;  %v12827_v1 = vmax.f32 %v10562_v6, %v10585_v15 }
 0x210   : > { %v10911_v14 = vmax.f32 %v12826_v53, %v1704_v18  ;;  %v3550_v24 = vmax.f32 %v3440_v17, %v3518_v19  ;;  %v1703_v28 = vmax.f32 %v1547_v11, %v1671_v48  ;;  %v3551_v63 = vmax.f32 %v3443_v21, %v3519_v20  ;;  %v9223_v0 = vpop.f32.mrb[36].mxu1  ;;  %v9421_v61 = vpop.f32.mrb[148].mxu0 }
 0x211   : > { %v10916_v60 = vmax.f32 %v12827_v1, %v1702_v58  ;;  %v12828_v43 = vmax.f32 %v10568_v9, %v10590_v55  ;;  %v3575_v23 = vpack.c.bf16 %v3553_v37, %v3552_v50  ;;  %v1568_v13 = vadd.f32 %v9223_v0, %v10543_v49  ;;  %v1559_v62 = vpop.f32.mrb[37].mxu1  ;;  %v3455_v54 = vpop.f32.mrb[149].mxu0 }
 0x212   : > { %v3464_v45 = vadd.f32 %v10887_v47, %v9421_v61  ;;  %v12829_v6 = vmax.f32 %v10574_v32, %v10602_v36  ;;  %v3574_v48 = vpack.c.bf16 %v3551_v63, %v3550_v24  ;;  %v1560_v11 = vadd.f32 %v10543_v49, %v1559_v62  ;;  %v9224_v9 = vpop.f32.mrb[38].mxu1  ;;  %v9422_v55 = vpop.f32.mrb[150].mxu0 }
 0x213   : > { %v10921_v57 = vmax.f32 %v12828_v43, %v1705_v51  ;;  %v3456_v19 = vadd.f32 %v10887_v47, %v3455_v54  ;;  %v1676_v3 = vmul.f32 0.2, %v1568_v13  ;;  %v1571_v0 = vadd.f32 %v9224_v9, %v10543_v49  ;;  %v1562_v17 = vpop.f32.mrb[39].mxu1  ;;  %v3458_v21 = vpop.f32.mrb[151].mxu0 }
 0x214   : > { %v10928_v15 = vmax.f32 %v12829_v6, %v1703_v28  ;;  %v3524_v50 = vmul.f32 0.2, %v3464_v45  ;;  %v3467_v8 = vadd.f32 %v10887_v47, %v9422_v55  ;;  %v1674_v51 = vmul.f32 0.2, %v1560_v11  ;;  %9455 = vmatprep.mubr.msk.bf16.mxu1 %vm785_vm2, %v3574_v48 }
 0x215   : > { %v3522_v18 = vmul.f32 0.2, %v3456_v19  ;;  %v1563_v32 = vadd.f32 %v10543_v49, %v1562_v17  ;;  %v3459_v36 = vadd.f32 %v10887_v47, %v3458_v21  ;;  %v1708_v28 = vmax.f32 %v1568_v13, %v1676_v3  ;;  %9456 = vmatmul.mubr.msk.bf16.gmra.mrb[144].mxu1 %vm785_vm2, %v3575_v23 }
 0x216   : > { %v1677_v39 = vmul.f32 0.2, %v1571_v0  ;;  %v3525_v58 = vmul.f32 0.2, %v3467_v8  ;;  %v1706_v53 = vmax.f32 %v1560_v11, %v1674_v51  ;;  %v12830_v24 = vmax.f32 %v10578_v35, %v10605_v38 }
 0x217   : > { %v1675_v37 = vmul.f32 0.2, %v1563_v32  ;;  %v3523_v1 = vmul.f32 0.2, %v3459_v36  ;;  %v3556_v43 = vmax.f32 %v3464_v45, %v3524_v50  ;;  %v12831_v13 = vmax.f32 %v10594_v22, %v10626_v56 }
 0x218   : > { %v10945_v61 = vmax.f32 %v12830_v24, %v1708_v28  ;;  %v1709_v62 = vmax.f32 %v1571_v0, %v1677_v39  ;;  %v3557_v54 = vmax.f32 %v3467_v8, %v3525_v58  ;;  %v3554_v23 = vmax.f32 %v3456_v19, %v3522_v18  ;;  %v9227_v55 = vpop.f32.mrb[40].mxu1  ;;  %v9425_v11 = vpop.f32.mrb[152].mxu0 }
 0x219   : > { %v10950_v6 = vmax.f32 %v12831_v13, %v1706_v53  ;;  %v1707_v48 = vmax.f32 %v1563_v32, %v1675_v37  ;;  %v3555_v9 = vmax.f32 %v3459_v36, %v3523_v1  ;;  %v12832_v3 = vmax.f32 %v10612_v42, %v10644_v5  ;;  %v1575_v50 = vpop.f32.mrb[41].mxu1  ;;  %v3471_v0 = vpop.f32.mrb[153].mxu0 }
 0x21a   : > { %v3577_v35 = vpack.c.bf16 %v3557_v54, %v3556_v43  ;;  %v1584_v38 = vadd.f32 %v9227_v55, %v10543_v49  ;;  %v3480_v45 = vadd.f32 %v10887_v47, %v9425_v11  ;;  %v12833_v22 = vmax.f32 %v10630_v29, %v10663_v26  ;;  %v9228_v42 = vpop.f32.mrb[42].mxu1  ;;  %v9426_v5 = vpop.f32.mrb[154].mxu0 }
 0x21b   : > { %v10955_v17 = vmax.f32 %v12832_v3, %v1709_v62  ;;  %v3576_v19 = vpack.c.bf16 %v3555_v9, %v3554_v23  ;;  %v1576_v8 = vadd.f32 %v10543_v49, %v1575_v50  ;;  %v3472_v21 = vadd.f32 %v10887_v47, %v3471_v0  ;;  %v1578_v28 = vpop.f32.mrb[43].mxu1  ;;  %v3474_v39 = vpop.f32.mrb[155].mxu0 }
 0x21c   : > { %v10962_v56 = vmax.f32 %v12833_v22, %v1707_v48  ;;  %v1680_v51 = vmul.f32 0.2, %v1584_v38  ;;  %v3528_v18 = vmul.f32 0.2, %v3480_v45  ;;  %v1587_v32 = vadd.f32 %v9228_v42, %v10543_v49 }
 0x21d   : > { %v3483_v36 = vadd.f32 %v10887_v47, %v9426_v5  ;;  %v1678_v58 = vmul.f32 0.2, %v1576_v8  ;;  %v3526_v53 = vmul.f32 0.2, %v3472_v21  ;;  %v1579_v29 = vadd.f32 %v10543_v49, %v1578_v28  ;;  %9459 = vmatprep.mubr.msk.bf16.mxu1 %vm785_vm2, %v3576_v19 }
 0x21e   : > { %v3475_v26 = vadd.f32 %v10887_v47, %v3474_v39  ;;  %v10973_v37 = vadd.f32 %v10807_v27, %v10543_v49  ;;  %v1712_v1 = vmax.f32 %v1584_v38, %v1680_v51  ;;  %v1681_v24 = vmul.f32 0.2, %v1587_v32  ;;  %9460 = vmatmul.mubr.msk.bf16.gmra.mrb[148].mxu1 %vm785_vm2, %v3577_v35 }
 0x21f   : > { %v3529_v43 = vmul.f32 0.2, %v3483_v36  ;;  %v10978_v62 = vadd.f32 %v10543_v49, %v10816_v40  ;;  %v1710_v54 = vmax.f32 %v1576_v8, %v1678_v58  ;;  %v1679_v13 = vmul.f32 0.2, %v1579_v29 }
 0x220   : > { %v3527_v23 = vmul.f32 0.2, %v3475_v26  ;;  %v12834_v48 = vmax.f32 %v10640_v31, %v10670_v30  ;;  %v3560_v55 = vmax.f32 %v3480_v45, %v3528_v18  ;;  %v1713_v27 = vmax.f32 %v1587_v32, %v1681_v24  ;;  %v9231_v0 = vpop.f32.mrb[44].mxu1  ;;  %v9429_v22 = vpop.f32.mrb[156].mxu0 }
 0x221   : > { %v3561_v11 = vmax.f32 %v3483_v36, %v3529_v43  ;;  %v12835_v3 = vmax.f32 %v10648_v4, %v10681_v44  ;;  %v3558_v35 = vmax.f32 %v3472_v21, %v3526_v53  ;;  %v1711_v50 = vmax.f32 %v1579_v29, %v1679_v13  ;;  %v1591_v42 = vpop.f32.mrb[45].mxu1  ;;  %v3487_v5 = vpop.f32.mrb[157].mxu0  ;;  %v12837_v4 = vld [vmem:[#allocation4_spill] sm:$0xff] }
 0x222   : > { %v10983_v9 = vmax.f32 %v12834_v48, %v1712_v1  ;;  %v3559_v40 = vmax.f32 %v3475_v26, %v3527_v23  ;;  %v12836_v19 = vmax.f32 %v10652_v10, %v10691_v2  ;;  %v1600_v30 = vadd.f32 %v9231_v0, %v10543_v49  ;;  %v9232_v10 = vpop.f32.mrb[46].mxu1  ;;  %v9430_v2 = vpop.f32.mrb[158].mxu0 }
 0x223   : > { %v10988_v38 = vmax.f32 %v12835_v3, %v1710_v54  ;;  %v3579_v31 = vpack.c.bf16 %v3561_v11, %v3560_v55  ;;  %v3496_v45 = vadd.f32 %v10887_v47, %v9429_v22  ;;  %v12838_v44 = vmax.f32 %v10656_v16, %v12837_v4  ;;  %v1594_v53 = vpop.f32.mrb[47].mxu1  ;;  %v3490_v29 = vpop.f32.mrb[159].mxu0  ;;  %v12839_v3 = vld [vmem:[#allocation2_spill] sm:$0xff] }
 0x224   : > { %v10993_v8 = vmax.f32 %v12836_v19, %v1713_v27  ;;  %v3578_v51 = vpack.c.bf16 %v3559_v40, %v3558_v35  ;;  %v1592_v18 = vadd.f32 %v10543_v49, %v1591_v42  ;;  %v3488_v32 = vadd.f32 %v10887_v47, %v3487_v5  ;;  %v12840_v35 = vld [vmem:[#allocation7_spill] sm:$0xff]  ;;  %v12843_v42 = vld [vmem:[#allocation8_spill] sm:$0xff] }
 0x225   : > { %v11000_v21 = vmax.f32 %v12838_v44, %v1711_v50  ;;  %v1684_v36 = vmul.f32 0.2, %v1600_v30  ;;  %v3532_v28 = vmul.f32 0.2, %v3496_v45  ;;  %v1603_v39 = vadd.f32 %v9232_v10, %v10543_v49  ;;  %v12845_v10 = vld [vmem:[#allocation5_spill] sm:$0xff] }
 0x226   : > { %v3499_v58 = vadd.f32 %v10887_v47, %v9430_v2  ;;  %v1682_v26 = vmul.f32 0.2, %v1592_v18  ;;  %v3530_v1 = vmul.f32 0.2, %v3488_v32  ;;  %v1595_v16 = vadd.f32 %v10543_v49, %v1594_v53  ;;  %9463 = vmatprep.mubr.msk.bf16.mxu1 %vm785_vm2, %v3578_v51  ;;  %v12846_v2 = vld [vmem:[#allocation9_spill] sm:$0xff] }
 0x227   : > { %v3491_v24 = vadd.f32 %v10887_v47, %v3490_v29  ;;  %v11010_v43 = vmul.f32 0.2, %v10973_v37  ;;  %v1716_v54 = vmax.f32 %v1600_v30, %v1684_v36  ;;  %v1685_v13 = vmul.f32 0.2, %v1603_v39  ;;  %9464 = vmatmul.mubr.msk.bf16.gmra.mrb[152].mxu1 %vm785_vm2, %v3579_v31  ;;  %v12842_v30 = vld [vmem:[#allocation3_spill] sm:$0xff] }
 0x228   : > { %v3533_v23 = vmul.f32 0.2, %v3499_v58  ;;  %v11015_v48 = vadd.f32 %v10827_v46, %v10543_v49  ;;  %v1714_v55 = vmax.f32 %v1592_v18, %v1682_v26  ;;  %v1683_v27 = vmul.f32 0.2, %v1595_v16  ;;  %v9235_v51 = vpop.f32.mrb[48].mxu1  ;;  %v9475_v18 = vpop.f32.mrb[160].mxu0 }
 0x229   : > { %v3531_v11 = vmul.f32 0.2, %v3491_v24  ;;  %v12841_v50 = vmax.f32 %v12839_v3, %v12840_v35  ;;  %v3564_v0 = vmax.f32 %v3496_v45, %v3532_v28  ;;  %v1717_v22 = vmax.f32 %v1603_v39, %v1685_v13  ;;  %v1607_v39 = vpop.f32.mrb[49].mxu1  ;;  %v12848_v26 = vld [vmem:[#allocation6_spill] sm:$0xff] }
 0x22a   : > { %v3565_v19 = vmax.f32 %v3499_v58, %v3533_v23  ;;  %v12844_v5 = vmax.f32 %v12842_v30, %v12843_v42  ;;  %v3562_v31 = vmax.f32 %v3488_v32, %v3530_v1  ;;  %v1715_v44 = vmax.f32 %v1595_v16, %v1683_v27  ;;  %v4082_v58 = vpop.f32.mrb[161].mxu0  ;;  %v9236_v23 = vpop.f32.mrb[50].mxu1 }
 0x22b   : > { %v11020_v40 = vmax.f32 %v12841_v50, %v1716_v54  ;;  %v3563_v46 = vmax.f32 %v3491_v24, %v3531_v11  ;;  %v12847_v36 = vmax.f32 %v12845_v10, %v12846_v2  ;;  %v1616_v45 = vadd.f32 %v9235_v51, %v10543_v49  ;;  %v12849_v54 = vld [vmem:[#allocation10_spill] sm:$0xff]  ;;  %v1610_v50 = vpop.f32.mrb[51].mxu1 }
 0x22c   : > { %v11025_v4 = vmax.f32 %v12844_v5, %v1714_v55  ;;  %v3581_v29 = vpack.c.bf16 %v3565_v19, %v3564_v0  ;;  %v4091_v28 = vadd.f32 %v10887_v47, %v9475_v18  ;;  %v12850_v13 = vmax.f32 %v12848_v26, %v12849_v54  ;;  %v9476_v55 = vpop.f32.mrb[162].mxu0 }
 0x22d   : > { %v11030_v53 = vmax.f32 %v12847_v36, %v1717_v22  ;;  %v3580_v1 = vpack.c.bf16 %v3563_v46, %v3562_v31  ;;  %v1608_v16 = vadd.f32 %v10543_v49, %v1607_v39  ;;  %v4083_v24 = vadd.f32 %v10887_v47, %v4082_v58  ;;  %v4085_v0 = vpop.f32.mrb[163].mxu0  ;;  %v12851_v36 = vld [vmem:[#allocation11_spill] sm:$0xff]  ;;  %v12852_v39 = vld [vmem:[#allocation14_spill] sm:$0xff] }
 0x22e   : > { %v11037_v32 = vmax.f32 %v12850_v13, %v1715_v44  ;;  %v1688_v27 = vmul.f32 0.2, %v1616_v45  ;;  %v4211_v11 = vmul.f32 0.2, %v4091_v28  ;;  %v1619_v3 = vadd.f32 %v9236_v23, %v10543_v49 }
 0x22f   : > { %v4094_v35 = vadd.f32 %v10887_v47, %v9476_v55  ;;  %v1686_v22 = vmul.f32 0.2, %v1608_v16  ;;  %v4209_v19 = vmul.f32 0.2, %v4083_v24  ;;  %v1611_v30 = vadd.f32 %v10543_v49, %v1610_v50  ;;  %9467 = vmatprep.mubr.msk.bf16.mxu1 %vm785_vm2, %v3580_v1  ;;  %v12855_v50 = vld [vmem:[#allocation18_spill] sm:$0xff] }
 0x230   : > { %v4086_v42 = vadd.f32 %v10887_v47, %v4085_v0  ;;  %v11047_v5 = vmul.f32 0.2, %v10978_v62  ;;  %v1720_v31 = vmax.f32 %v1616_v45, %v1688_v27  ;;  %v1689_v44 = vmul.f32 0.2, %v1619_v3  ;;  %9468 = vmatmul.mubr.msk.bf16.gmra.mrb[156].mxu1 %vm785_vm2, %v3581_v29  ;;  %v9239_v27 = vpop.f32.mrb[52].mxu1 }
 0x231   : > { %v4212_v46 = vmul.f32 0.2, %v4094_v35  ;;  %v11052_v51 = vadd.f32 %v10543_v49, %v10836_v33  ;;  %v1718_v18 = vmax.f32 %v1608_v16, %v1686_v22  ;;  %v1687_v10 = vmul.f32 0.2, %v1611_v30  ;;  %v9479_v16 = vpop.f32.mrb[164].mxu0 }
 0x232   : > { %v4210_v2 = vmul.f32 0.2, %v4086_v42  ;;  %v12853_v58 = vmax.f32 %v12851_v36, %v12852_v39  ;;  %v4243_v54 = vmax.f32 %v4091_v28, %v4211_v11  ;;  %v1721_v13 = vmax.f32 %v1619_v3, %v1689_v44  ;;  %v1623_v3 = vpop.f32.mrb[53].mxu1 }
 0x233   : > { %v4244_v1 = vmax.f32 %v4094_v35, %v4212_v46  ;;  %v12854_v45 = vmax.f32 %v10754_v41, %v10794_v12  ;;  %v4241_v29 = vmax.f32 %v4083_v24, %v4209_v19  ;;  %v1719_v55 = vmax.f32 %v1611_v30, %v1687_v10  ;;  %v4098_v35 = vpop.f32.mrb[165].mxu0  ;;  %v12857_v41 = vld [vmem:[#allocation12_spill] sm:$0xff]  ;;  %v12858_v12 = vld [vmem:[#allocation19_spill] sm:$0xff] }
 0x234   : > { %v11057_v26 = vmax.f32 %v12853_v58, %v1720_v31  ;;  %v4242_v33 = vmax.f32 %v4086_v42, %v4210_v2  ;;  %v12856_v0 = vmax.f32 %v10762_v34, %v12855_v50  ;;  %v1632_v28 = vadd.f32 %v9239_v27, %v10543_v49  ;;  %v9240_v34 = vpop.f32.mrb[54].mxu1  ;;  %v9480_v46 = vpop.f32.mrb[166].mxu0 }
 0x235   : > { %v11062_v23 = vmax.f32 %v12854_v45, %v1718_v18  ;;  %v4274_v31 = vpack.c.bf16 %v4244_v1, %v4243_v54  ;;  %v4107_v11 = vadd.f32 %v10887_v47, %v9479_v16  ;;  %v12859_v44 = vmax.f32 %v12857_v41, %v12858_v12  ;;  %v1626_v39 = vpop.f32.mrb[55].mxu1  ;;  %v4101_v58 = vpop.f32.mrb[167].mxu0  ;;  %v12861_v41 = vld [vmem:[#allocation13_spill] sm:$0xff]  ;;  %v12862_v12 = vld [vmem:[#allocation20_spill] sm:$0xff] }
 0x236   : > { %v11067_v22 = vmax.f32 %v12856_v0, %v1721_v13  ;;  %v4273_v19 = vpack.c.bf16 %v4242_v33, %v4241_v29  ;;  %v1624_v30 = vadd.f32 %v10543_v49, %v1623_v3  ;;  %v4099_v42 = vadd.f32 %v10887_v47, %v4098_v35  ;;  %v12860_v35 = vld [vmem:[#allocation25_spill] sm:$0xff] }
 0x237   : > { %v11074_v24 = vmax.f32 %v12859_v44, %v1719_v55  ;;  %v1692_v18 = vmul.f32 0.2, %v1632_v28  ;;  %v4215_v10 = vmul.f32 0.2, %v4107_v11  ;;  %v1635_v2 = vadd.f32 %v9240_v34, %v10543_v49 }
 0x238   : > { %v4110_v36 = vadd.f32 %v10887_v47, %v9480_v46  ;;  %v1690_v54 = vmul.f32 0.2, %v1624_v30  ;;  %v4213_v13 = vmul.f32 0.2, %v4099_v42  ;;  %v1627_v1 = vadd.f32 %v10543_v49, %v1626_v39  ;;  %9513 = vmatprep.mubr.msk.bf16.mxu1 %vm785_vm2, %v4273_v19 }
 0x239   : > { %v4102_v45 = vadd.f32 %v10887_v47, %v4101_v58  ;;  %v1724_v55 = vmax.f32 %v1632_v28, %v1692_v18  ;;  %v1693_v33 = vmul.f32 0.2, %v1635_v2  ;;  %9514 = vmatmul.mubr.msk.bf16.vlgmr.msra.gmra.mrb[160].mxu1 %vm785_vm2, %v4274_v31  ;;  %v11087_v16 = vmul.f32 0.2, %v11015_v48  ;;  %v11098_v31 = vld [vmem:[%s12764_s3 + $0x8] sm:$0xff]   ;;  %v12865_v18 = vld [vmem:[#allocation22_spill] sm:$0xff] }
 0x23a   : > { %v4216_v27 = vmul.f32 0.2, %v4110_v36  ;;  %v1722_v50 = vmax.f32 %v1624_v30, %v1690_v54  ;;  %v1691_v0 = vmul.f32 0.2, %v1627_v1  ;;  %9580 = vmatpush3.bf16.msra.mxu1 %v12860_v35  ;;  %v12863_v44 = vmax.f32 %v12861_v41, %v12862_v12  ;;  %v12864_v30 = vld [vmem:[#allocation15_spill] sm:$0xff]  ;;  %v9483_v12 = vpop.f32.mrb[168].mxu0 }
 0x23b   : > { %v4214_v3 = vmul.f32 0.2, %v4102_v45  ;;  %v4247_v34 = vmax.f32 %v4107_v11, %v4215_v10  ;;  %v1725_v46 = vmax.f32 %v1635_v2, %v1693_v33  ;;  %9581 = vmatprep.subr.bf16.mxu1 %v11098_v31  ;;  %v12866_v39 = vmax.f32 %v12864_v30, %v12865_v18  ;;  %v12867_v11 = vld [vmem:[#allocation16_spill] sm:$0xff]  ;;  %v12868_v10 = vld [vmem:[#allocation23_spill] sm:$0xff]  ;;  %v4114_v63 = vpop.f32.mrb[169].mxu0  ;;  %v12871_v30 = vld [vmem:[#allocation17_spill] sm:$0xff] }
 0x23c   : > { %v11093_v19 = vmax.f32 %v12863_v44, %v1724_v55  ;;  %v4248_v28 = vmax.f32 %v4110_v36, %v4216_v27  ;;  %v4245_v54 = vmax.f32 %v4099_v42, %v4213_v13  ;;  %v1723_v29 = vmax.f32 %v1627_v1, %v1691_v0  ;;  %v9243_v55 = vpop.f32.mrb[56].mxu1 }
 0x23d   : > { %v11104_v58 = vmax.f32 %v12866_v39, %v1722_v50  ;;  %v4246_v41 = vmax.f32 %v4102_v45, %v4214_v3  ;;  %v12869_v2 = vmax.f32 %v12867_v11, %v12868_v10  ;;  %v1648_v27 = vadd.f32 %v9243_v55, %v10543_v49  ;;  %v1639_v20 = vpop.f32.mrb[57].mxu1  ;;  %v12872_v50 = vld [vmem:[#allocation24_spill] sm:$0xff]  ;;  %v9484_v3 = vpop.f32.mrb[170].mxu0 }
 0x23e   : > { %v4276_v33 = vpack.c.bf16 %v4248_v28, %v4247_v34  ;;  %v4123_v44 = vadd.f32 %v10887_v47, %v9483_v12  ;;  %v12873_v18 = vmax.f32 %v12871_v30, %v12872_v50  ;;  %v1640_v1 = vadd.f32 %v10543_v49, %v1639_v20  ;;  %v9244_v0 = vpop.f32.mrb[58].mxu1  ;;  %9582 = vmatpush3.bf16.msra.mxu1 %v11098_v31  ;;  %v4117_v12 = vpop.f32.mrb[171].mxu0 }
 0x23f   : > { %v11109_v36 = vmax.f32 %v12869_v2, %v1725_v46  ;;  %v4275_v13 = vpack.c.bf16 %v4246_v41, %v4245_v54  ;;  %v4115_v45 = vadd.f32 %v10887_v47, %v4114_v63  ;;  %v1696_v34 = vmul.f32 0.2, %v1648_v27  ;;  %v1642_v55 = vpop.f32.mrb[59].mxu1 }
 0x240   : > { %v11116_v42 = vmax.f32 %v12873_v18, %v1723_v29  ;;  %v4219_v46 = vmul.f32 0.2, %v4123_v44  ;;  %v1651_v28 = vadd.f32 %v9244_v0, %v10543_v49  ;;  %v4126_v39 = vadd.f32 %v10887_v47, %v9484_v3  ;;  %v11126_v29 = vld [vmem:[%s12764_s3 + $0x10] sm:$0xff]  }
 0x241   : > { %12870 = vst [vmem:[#allocation4_spill] sm:$0xff] %v11109_v36  ;;  %12875 = vst [vmem:[#allocation7_spill] sm:$0xff] %v11126_v29  ;;  %9583 = vmatprep.subr.bf16.mxu1 %v11126_v29  ;;  %v1694_v63 = vmul.f32 0.2, %v1640_v1  ;;  %v4217_v20 = vmul.f32 0.2, %v4115_v45  ;;  %v1643_v54 = vadd.f32 %v10543_v49, %v1642_v55  ;;  %v4118_v41 = vadd.f32 %v10887_v47, %v4117_v12 }
 0x242   : > { %12874 = vst [vmem:[#allocation2_spill] sm:$0xff] %v11116_v42  ;;  %9517 = vmatprep.mubr.msk.bf16.mxu1 %vm785_vm2, %v4275_v13  ;;  %v1055_v11 = vmax.f32 %v10978_v62, %v11047_v5  ;;  %v1728_v10 = vmax.f32 %v1648_v27, %v1696_v34  ;;  %v1697_v2 = vmul.f32 0.2, %v1651_v28  ;;  %v4220_v30 = vmul.f32 0.2, %v4126_v39  ;;  %9584 = vmatpush3.bf16.msra.mxu1 %v11126_v29  ;;  %v12876_v49 = vld [vmem:[#allocation21_spill] sm:$0xff] }
 0x243   : > { %9518 = vmatmul.mubr.msk.bf16.gmra.mrb[164].mxu1 %vm785_vm2, %v4276_v33  ;;  %v11136_v50 = vmul.f32 0.2, %v11052_v51  ;;  %v1726_v18 = vmax.f32 %v1640_v1, %v1694_v63  ;;  %v1695_v0 = vmul.f32 0.2, %v1643_v54  ;;  %v4218_v3 = vmul.f32 0.2, %v4118_v41 }
 0x244   : > { %v12877_v55 = vld [vmem:[#allocation27_spill] sm:$0xff]  ;;  %v4251_v42 = vmax.f32 %v4123_v44, %v4219_v46  ;;  %v1729_v62 = vmax.f32 %v1651_v28, %v1697_v2  ;;  %v4252_v5 = vmax.f32 %v4126_v39, %v4220_v30  ;;  %v11147_v33 = vld [vmem:[%s12764_s3 + $0x18] sm:$0xff]   ;;  %v12879_v27 = vld [vmem:[#allocation26_spill] sm:$0xff]  ;;  %v4249_v29 = vmax.f32 %v4115_v45, %v4217_v20 }
 0x245   : > { %v12878_v12 = vmax.f32 %v12876_v49, %v12877_v55  ;;  %9585 = vmatprep.subr.bf16.mxu1 %v11147_v33  ;;  %v12880_v1 = vld [vmem:[#allocation28_spill] sm:$0xff]  ;;  %v1727_v36 = vmax.f32 %v1643_v54, %v1695_v0  ;;  %v4250_v49 = vmax.f32 %v4118_v41, %v4218_v3  ;;  %v9487_v55 = vpop.f32.mrb[172].mxu0  ;;  %v12882_v44 = vmax.f32 %v10867_v7, %v10892_v25  ;;  %v11163_v39 = vld [vmem:[%s12765_s4] ss:$0 sm:$0xff] }
 0x246   : > { %v12881_v34 = vmax.f32 %v12879_v27, %v12880_v1  ;;  %v4278_v28 = vpack.c.bf16 %v4252_v5, %v4251_v42  ;;  %v4139_v30 = vadd.f32 %v10887_v47, %v9487_v55  ;;  %v4130_v20 = vpop.f32.mrb[173].mxu0  ;;  %v12883_v54 = vmax.f32 %v10879_v52, %v10906_v59  ;;  %9586 = vmatpush3.bf16.msra.mxu1 %v11147_v33 }
 0x247   : > { %v11142_v13 = vmax.f32 %v12878_v12, %v1728_v10  ;;  %v9247_v10 = vpop.f32.mrb[60].mxu1  ;;  %v11158_v46 = vmax.f32 %v12882_v44, %v1729_v62  ;;  %v4277_v7 = vpack.c.bf16 %v4250_v49, %v4249_v29  ;;  %v4131_v42 = vadd.f32 %v10887_v47, %v4130_v20  ;;  %v9488_v0 = vpop.f32.mrb[174].mxu0  ;;  %9653 = vmatprep.subr.bf16.mxu1 %v12860_v35 }
 0x248   : > { %v11153_v63 = vmax.f32 %v12881_v34, %v1726_v18  ;;  %v1664_v2 = vadd.f32 %v11163_v39, %v9247_v10  ;;  %v1655_v45 = vpop.f32.mrb[61].mxu1  ;;  %v11170_v41 = vmax.f32 %v12883_v54, %v1727_v36  ;;  %v4223_v12 = vmul.f32 0.2, %v4139_v30  ;;  %v4133_v1 = vpop.f32.mrb[175].mxu0 }
 0x249   : > { %v1656_v25 = vadd.f32 %v11163_v39, %v1655_v45  ;;  %v9248_v18 = vpop.f32.mrb[62].mxu1  ;;  %v4142_v5 = vadd.f32 %v10887_v47, %v9488_v0  ;;  %v4221_v59 = vmul.f32 0.2, %v4131_v42  ;;  %v4134_v29 = vadd.f32 %v10887_v47, %v4133_v1  ;;  %9521 = vmatprep.mubr.msk.bf16.mxu1 %vm785_vm2, %v4277_v7  ;;  %v9491_v1 = vpop.f32.mrb[176].mxu0 }
 0x24a   : > { %12884 = vst [vmem:[#allocation3_spill] sm:$0xff] %v11170_v41  ;;  %v1700_v3 = vmul.f32 0.2, %v1664_v2  ;;  %v1667_v62 = vadd.f32 %v11163_v39, %v9248_v18  ;;  %v1658_v27 = vpop.f32.mrb[63].mxu1  ;;  %v1058_v34 = vmax.f32 %v11015_v48, %v11087_v16  ;;  %v1056_v44 = vmax.f32 %v11052_v51, %v11136_v50 }
 0x24b   : > { %v1698_v52 = vmul.f32 0.2, %v1656_v25  ;;  %v1659_v36 = vadd.f32 %v11163_v39, %v1658_v27  ;;  %v4224_v55 = vmul.f32 0.2, %v4142_v5  ;;  %9522 = vmatmul.mubr.msk.bf16.gmra.mrb[168].mxu1 %vm785_vm2, %v4278_v28  ;;  %v4222_v20 = vmul.f32 0.2, %v4134_v29 }
 0x24c   : > { %v1732_v49 = vmax.f32 %v1664_v2, %v1700_v3  ;;  %v1701_v10 = vmul.f32 0.2, %v1667_v62  ;;  %v12885_v54 = vmax.f32 %v10973_v37, %v11010_v43  ;;  %v4255_v7 = vmax.f32 %v4139_v30, %v4223_v12  ;;  %v9293_v28 = vpop.f32.mrb[64].mxu1  ;;  %v4146_v43 = vpop.f32.mrb[177].mxu0 }
 0x24d   : > { %v1730_v35 = vmax.f32 %v1656_v25, %v1698_v52  ;;  %v1699_v45 = vmul.f32 0.2, %v1659_v36  ;;  %v4256_v27 = vmax.f32 %v4142_v5, %v4224_v55  ;;  %v4253_v16 = vmax.f32 %v4131_v42, %v4221_v59  ;;  %v2250_v37 = vpop.f32.mrb[65].mxu1 }
 0x24e   : > { %v11189_v18 = vmax.f32 %v12885_v54, %v1732_v49  ;;  %v1733_v0 = vmax.f32 %v1667_v62, %v1701_v10  ;;  %v4254_v3 = vmax.f32 %v4134_v29, %v4222_v20  ;;  %v2259_v50 = vadd.f32 %v11163_v39, %v9293_v28  ;;  %v9294_v12 = vpop.f32.mrb[66].mxu1  ;;  %v9492_v62 = vpop.f32.mrb[178].mxu0 }
 0x24f   : > { %v11191_v48 = vmax.f32 %v1055_v11, %v1730_v35  ;;  %v1731_v2 = vmax.f32 %v1659_v36, %v1699_v45  ;;  %v4280_v51 = vpack.c.bf16 %v4256_v27, %v4255_v7  ;;  %v4155_v25 = vadd.f32 %v10887_v47, %v9491_v1  ;;  %v4149_v49 = vpop.f32.mrb[179].mxu0 }
 0x250   : > { %v11193_v41 = vmax.f32 %v1058_v34, %v1733_v0  ;;  %v4279_v30 = vpack.c.bf16 %v4254_v3, %v4253_v16  ;;  %v2251_v11 = vadd.f32 %v11163_v39, %v2250_v37  ;;  %v4147_v42 = vadd.f32 %v10887_v47, %v4146_v43  ;;  %v2253_v34 = vpop.f32.mrb[67].mxu1 }
 0x251   : > { %v11197_v52 = vmax.f32 %v1056_v44, %v1731_v2  ;;  %v2379_v5 = vmul.f32 0.2, %v2259_v50  ;;  %v4227_v59 = vmul.f32 0.2, %v4155_v25  ;;  %v2262_v36 = vadd.f32 %v11163_v39, %v9294_v12  ;;  %v9495_v12 = vpop.f32.mrb[180].mxu0 }
 0x252   : > { %v4158_v29 = vadd.f32 %v10887_v47, %v9492_v62  ;;  %v2377_v10 = vmul.f32 0.2, %v2251_v11  ;;  %v4225_v55 = vmul.f32 0.2, %v4147_v42  ;;  %v2254_v44 = vadd.f32 %v11163_v39, %v2253_v34  ;;  %9525 = vmatprep.mubr.msk.bf16.mxu1 %vm785_vm2, %v4279_v30 }
 0x253   : > { %v4150_v35 = vadd.f32 %v10887_v47, %v4149_v49  ;;  %v2411_v45 = vmax.f32 %v2259_v50, %v2379_v5  ;;  %v2380_v20 = vmul.f32 0.2, %v2262_v36  ;;  %9526 = vmatmul.mubr.msk.bf16.gmra.mrb[172].mxu1 %vm785_vm2, %v4280_v51  ;;  %v4259_v2 = vmax.f32 %v4155_v25, %v4227_v59  ;;  %v9297_v50 = vpop.f32.mrb[68].mxu1  ;;  %v4162_v25 = vpop.f32.mrb[181].mxu0 }
 0x254   : > { %v4228_v54 = vmul.f32 0.2, %v4158_v29  ;;  %v2409_v7 = vmax.f32 %v2251_v11, %v2377_v10  ;;  %v2378_v0 = vmul.f32 0.2, %v2254_v44  ;;  %v4257_v37 = vmax.f32 %v4147_v42, %v4225_v55  ;;  %v2266_v5 = vpop.f32.mrb[69].mxu1  ;;  %v9496_v34 = vpop.f32.mrb[182].mxu0 }
 0x255   : > { %v4226_v27 = vmul.f32 0.2, %v4150_v35  ;;  %v11208_v16 = vmax.f32 %v10911_v14, %v2411_v45  ;;  %v2412_v3 = vmax.f32 %v2262_v36, %v2380_v20  ;;  %v2275_v11 = vadd.f32 %v11163_v39, %v9297_v50 }
 0x256   : > { %v4260_v28 = vmax.f32 %v4158_v29, %v4228_v54  ;;  %v11211_v1 = vmax.f32 %v10916_v60, %v2409_v7  ;;  %v2410_v43 = vmax.f32 %v2254_v44, %v2378_v0  ;;  %v4171_v14 = vadd.f32 %v10887_v47, %v9495_v12  ;;  %v9298_v29 = vpop.f32.mrb[70].mxu1 }
 0x257   : > { %v4258_v30 = vmax.f32 %v4150_v35, %v4226_v27  ;;  %v11214_v62 = vmax.f32 %v10921_v57, %v2412_v3  ;;  %v2267_v42 = vadd.f32 %v11163_v39, %v2266_v5  ;;  %v4163_v36 = vadd.f32 %v10887_v47, %v4162_v25  ;;  %v2269_v44 = vpop.f32.mrb[71].mxu1  ;;  %v4165_v35 = vpop.f32.mrb[183].mxu0 }
 0x258   : > { %v4282_v51 = vpack.c.bf16 %v4260_v28, %v4259_v2  ;;  %v11219_v59 = vmax.f32 %v10928_v15, %v2410_v43  ;;  %v2383_v49 = vmul.f32 0.2, %v2275_v11  ;;  %v4231_v57 = vmul.f32 0.2, %v4171_v14 }
 0x259   : > { %v4281_v60 = vpack.c.bf16 %v4258_v30, %v4257_v37  ;;  %v2278_v10 = vadd.f32 %v11163_v39, %v9298_v29  ;;  %v4174_v55 = vadd.f32 %v10887_v47, %v9496_v34  ;;  %v2381_v45 = vmul.f32 0.2, %v2267_v42  ;;  %v9499_v29 = vpop.f32.mrb[184].mxu0 }
 0x25a   : > { %v4229_v20 = vmul.f32 0.2, %v4163_v36  ;;  %v2270_v15 = vadd.f32 %v11163_v39, %v2269_v44  ;;  %v4166_v54 = vadd.f32 %v10887_v47, %v4165_v35  ;;  %v2415_v7 = vmax.f32 %v2275_v11, %v2383_v49  ;;  %v9301_v11 = vpop.f32.mrb[72].mxu1 }
 0x25b   : > { %9529 = vmatprep.mubr.msk.bf16.mxu1 %vm785_vm2, %v4281_v60  ;;  %v2384_v0 = vmul.f32 0.2, %v2278_v10  ;;  %v4232_v27 = vmul.f32 0.2, %v4174_v55  ;;  %v2413_v2 = vmax.f32 %v2267_v42, %v2381_v45  ;;  %v4263_v43 = vmax.f32 %v4171_v14, %v4231_v57  ;;  %v2282_v49 = vpop.f32.mrb[73].mxu1  ;;  %v4178_v14 = vpop.f32.mrb[185].mxu0 }
 0x25c   : > { %9530 = vmatmul.mubr.msk.bf16.gmra.mrb[176].mxu1 %vm785_vm2, %v4282_v51  ;;  %v2382_v3 = vmul.f32 0.2, %v2270_v15  ;;  %v4230_v28 = vmul.f32 0.2, %v4166_v54  ;;  %v11230_v37 = vmax.f32 %v10945_v61, %v2415_v7  ;;  %v4261_v5 = vmax.f32 %v4163_v36, %v4229_v20  ;;  %v9500_v44 = vpop.f32.mrb[186].mxu0 }
 0x25d   : > { %v2416_v30 = vmax.f32 %v2278_v10, %v2384_v0  ;;  %v4264_v50 = vmax.f32 %v4174_v55, %v4232_v27  ;;  %v11233_v12 = vmax.f32 %v10950_v6, %v2413_v2  ;;  %v2291_v42 = vadd.f32 %v11163_v39, %v9301_v11  ;;  %v9302_v55 = vpop.f32.mrb[74].mxu1 }
 0x25e   : > { %v2414_v25 = vmax.f32 %v2270_v15, %v2382_v3  ;;  %v4262_v60 = vmax.f32 %v4166_v54, %v4230_v28  ;;  %v4187_v61 = vadd.f32 %v10887_v47, %v9499_v29  ;;  %v2283_v36 = vadd.f32 %v11163_v39, %v2282_v49  ;;  %v2285_v15 = vpop.f32.mrb[75].mxu1  ;;  %v4181_v54 = vpop.f32.mrb[187].mxu0 }
 0x25f   : > { %v11236_v34 = vmax.f32 %v10955_v17, %v2416_v30  ;;  %v4284_v51 = vpack.c.bf16 %v4264_v50, %v4263_v43  ;;  %v4179_v10 = vadd.f32 %v10887_v47, %v4178_v14  ;;  %v2387_v35 = vmul.f32 0.2, %v2291_v42 }
 0x260   : > { %v11241_v57 = vmax.f32 %v10962_v56, %v2414_v25  ;;  %v4283_v6 = vpack.c.bf16 %v4262_v60, %v4261_v5  ;;  %v4235_v17 = vmul.f32 0.2, %v4187_v61  ;;  %v2294_v45 = vadd.f32 %v11163_v39, %v9302_v55  ;;  %v9503_v55 = vpop.f32.mrb[188].mxu0 }
 0x261   : > { %v4190_v20 = vadd.f32 %v10887_v47, %v9500_v44  ;;  %v2385_v7 = vmul.f32 0.2, %v2283_v36  ;;  %v4233_v0 = vmul.f32 0.2, %v4179_v10  ;;  %v2286_v56 = vadd.f32 %v11163_v39, %v2285_v15 }
 0x262   : > { %v4182_v27 = vadd.f32 %v10887_v47, %v4181_v54  ;;  %9533 = vmatprep.mubr.msk.bf16.mxu1 %vm785_vm2, %v4283_v6  ;;  %v2419_v2 = vmax.f32 %v2291_v42, %v2387_v35  ;;  %v2388_v3 = vmul.f32 0.2, %v2294_v45  ;;  %v4267_v25 = vmax.f32 %v4187_v61, %v4235_v17  ;;  %v9305_v42 = vpop.f32.mrb[76].mxu1  ;;  %v4194_v61 = vpop.f32.mrb[189].mxu0 }
 0x263   : > { %v4236_v28 = vmul.f32 0.2, %v4190_v20  ;;  %v2417_v43 = vmax.f32 %v2283_v36, %v2385_v7  ;;  %v2386_v30 = vmul.f32 0.2, %v2286_v56  ;;  %v4265_v49 = vmax.f32 %v4179_v10, %v4233_v0  ;;  %v2298_v35 = vpop.f32.mrb[77].mxu1  ;;  %v9504_v15 = vpop.f32.mrb[190].mxu0 }
 0x264   : > { %9534 = vmatmul.mubr.msk.bf16.gmra.mrb[180].mxu1 %vm785_vm2, %v4284_v51  ;;  %v4234_v50 = vmul.f32 0.2, %v4182_v27  ;;  %v11252_v5 = vmax.f32 %v10983_v9, %v2419_v2  ;;  %v2420_v60 = vmax.f32 %v2294_v45, %v2388_v3  ;;  %v2307_v36 = vadd.f32 %v11163_v39, %v9305_v42 }
 0x265   : > { %v4268_v11 = vmax.f32 %v4190_v20, %v4236_v28  ;;  %v11255_v29 = vmax.f32 %v10988_v38, %v2417_v43  ;;  %v2418_v14 = vmax.f32 %v2286_v56, %v2386_v30  ;;  %v4203_v9 = vadd.f32 %v10887_v47, %v9503_v55  ;;  %v9306_v20 = vpop.f32.mrb[78].mxu1 }
 0x266   : > { %v4266_v6 = vmax.f32 %v4182_v27, %v4234_v50  ;;  %v11258_v44 = vmax.f32 %v10993_v8, %v2420_v60  ;;  %v2299_v10 = vadd.f32 %v11163_v39, %v2298_v35  ;;  %v4195_v45 = vadd.f32 %v10887_v47, %v4194_v61  ;;  %v2301_v56 = vpop.f32.mrb[79].mxu1  ;;  %v4197_v27 = vpop.f32.mrb[191].mxu0 }
 0x267   : > { %v4286_v51 = vpack.c.bf16 %v4268_v11, %v4267_v25  ;;  %v11263_v17 = vmax.f32 %v11000_v21, %v2418_v14  ;;  %v2391_v54 = vmul.f32 0.2, %v2307_v36  ;;  %v4239_v8 = vmul.f32 0.2, %v4203_v9 }
 0x268   : > { %v4285_v38 = vpack.c.bf16 %v4266_v6, %v4265_v49  ;;  %v2310_v7 = vadd.f32 %v11163_v39, %v9306_v20  ;;  %v4206_v0 = vadd.f32 %v10887_v47, %v9504_v15  ;;  %v2389_v2 = vmul.f32 0.2, %v2299_v10  ;;  %v9549_v20 = vpop.f32.mrb[192].mxu0 }
 0x269   : > { %v4237_v3 = vmul.f32 0.2, %v4195_v45  ;;  %v2302_v21 = vadd.f32 %v11163_v39, %v2301_v56  ;;  %v4198_v28 = vadd.f32 %v10887_v47, %v4197_v27  ;;  %v2423_v43 = vmax.f32 %v2307_v36, %v2391_v54  ;;  %v9309_v36 = vpop.f32.mrb[80].mxu1 }
 0x26a   : > { %9537 = vmatprep.mubr.msk.bf16.mxu1 %vm785_vm2, %v4285_v38  ;;  %v2392_v30 = vmul.f32 0.2, %v2310_v7  ;;  %v4240_v50 = vmul.f32 0.2, %v4206_v0  ;;  %v2421_v25 = vmax.f32 %v2299_v10, %v2389_v2  ;;  %v4271_v14 = vmax.f32 %v4203_v9, %v4239_v8  ;;  %v2314_v54 = vpop.f32.mrb[81].mxu1  ;;  %v4789_v9 = vpop.f32.mrb[193].mxu0 }
 0x26b   : > { %v2390_v60 = vmul.f32 0.2, %v2302_v21  ;;  %v4238_v11 = vmul.f32 0.2, %v4198_v28  ;;  %v11274_v49 = vmax.f32 %v11020_v40, %v2423_v43  ;;  %v4269_v35 = vmax.f32 %v4195_v45, %v4237_v3  ;;  %v9550_v56 = vpop.f32.mrb[194].mxu0 }
 0x26c   : > { %9538 = vmatmul.mubr.msk.bf16.gmra.mrb[184].mxu1 %vm785_vm2, %v4286_v51  ;;  %v2424_v6 = vmax.f32 %v2310_v7, %v2392_v30  ;;  %v4272_v42 = vmax.f32 %v4206_v0, %v4240_v50  ;;  %v11277_v55 = vmax.f32 %v11025_v4, %v2421_v25  ;;  %v2323_v10 = vadd.f32 %v11163_v39, %v9309_v36  ;;  %v11291_v7 = vld [vmem:[%s12763_s2] ss:$0 sm:$0xff]  ;;  %v9310_v0 = vpop.f32.mrb[82].mxu1 }
 0x26d   : > { %v2422_v61 = vmax.f32 %v2302_v21, %v2390_v60  ;;  %v4270_v38 = vmax.f32 %v4198_v28, %v4238_v11  ;;  %v4798_v40 = vadd.f32 %v10887_v47, %v9549_v20  ;;  %v2315_v45 = vadd.f32 %v11163_v39, %v2314_v54  ;;  %v4792_v21 = vpop.f32.mrb[195].mxu0 }
 0x26e   : > { %v11280_v15 = vmax.f32 %v11030_v53, %v2424_v6  ;;  %v4288_v51 = vpack.c.bf16 %v4272_v42, %v4271_v14  ;;  %v4790_v53 = vadd.f32 %v11291_v7, %v4789_v9  ;;  %v2395_v27 = vmul.f32 0.2, %v2323_v10 }
 0x26f   : > { %v11285_v8 = vmax.f32 %v11037_v32, %v2422_v61  ;;  %v4287_v4 = vpack.c.bf16 %v4270_v38, %v4269_v35  ;;  %v4918_v2 = vmul.f32 0.2, %v4798_v40  ;;  %v2326_v47 = vadd.f32 %v11163_v39, %v9310_v0  ;;  %v2317_v32 = vpop.f32.mrb[83].mxu1 }
 0x270   : > { %v4801_v3 = vadd.f32 %v11291_v7, %v9550_v56  ;;  %v2393_v28 = vmul.f32 0.2, %v2315_v45  ;;  %v4916_v43 = vmul.f32 0.2, %v4790_v53  ;;  %v2318_v30 = vadd.f32 %v11163_v39, %v2317_v32  ;;  %v9553_v0 = vpop.f32.mrb[196].mxu0 }
 0x271   : > { %v4793_v50 = vadd.f32 %v11291_v7, %v4792_v21  ;;  %9541 = vmatprep.mubr.msk.bf16.mxu1 %vm785_vm2, %v4287_v4  ;;  %v2427_v25 = vmax.f32 %v2323_v10, %v2395_v27  ;;  %v2396_v60 = vmul.f32 0.2, %v2326_v47  ;;  %v4950_v61 = vmax.f32 %v4798_v40, %v4918_v2  ;;  %v9313_v10 = vpop.f32.mrb[84].mxu1  ;;  %v4805_v40 = vpop.f32.mrb[197].mxu0 }
 0x272   : > { %v4919_v11 = vmul.f32 0.2, %v4801_v3  ;;  %v2425_v14 = vmax.f32 %v2315_v45, %v2393_v28  ;;  %v2394_v6 = vmul.f32 0.2, %v2318_v30  ;;  %v4948_v54 = vmax.f32 %v4790_v53, %v4916_v43  ;;  %v2330_v27 = vpop.f32.mrb[85].mxu1  ;;  %v9554_v32 = vpop.f32.mrb[198].mxu0 }
 0x273   : > { %v4917_v42 = vmul.f32 0.2, %v4793_v50  ;;  %v11301_v35 = vmax.f32 %v11057_v26, %v2427_v25  ;;  %v2428_v38 = vmax.f32 %v2326_v47, %v2396_v60  ;;  %v2339_v45 = vadd.f32 %v11163_v39, %v9313_v10 }
 0x274   : > { %9542 = vmatmul.mubr.msk.bf16.gmra.mrb[188].mxu1 %vm785_vm2, %v4288_v51  ;;  %v4951_v36 = vmax.f32 %v4801_v3, %v4919_v11  ;;  %v11304_v20 = vmax.f32 %v11062_v23, %v2425_v14  ;;  %v2426_v9 = vmax.f32 %v2318_v30, %v2394_v6  ;;  %v4814_v26 = vadd.f32 %v11291_v7, %v9553_v0  ;;  %v9314_v3 = vpop.f32.mrb[86].mxu1 }
 0x275   : > { %v4949_v4 = vmax.f32 %v4793_v50, %v4917_v42  ;;  %v11307_v56 = vmax.f32 %v11067_v22, %v2428_v38  ;;  %v2331_v53 = vadd.f32 %v11163_v39, %v2330_v27  ;;  %v4806_v47 = vadd.f32 %v11291_v7, %v4805_v40  ;;  %v2333_v30 = vpop.f32.mrb[87].mxu1  ;;  %v4808_v50 = vpop.f32.mrb[199].mxu0 }
 0x276   : > { %v4981_v51 = vpack.c.bf16 %v4951_v36, %v4950_v61  ;;  %v11312_v2 = vmax.f32 %v11074_v24, %v2426_v9  ;;  %v2399_v21 = vmul.f32 0.2, %v2339_v45  ;;  %v4922_v22 = vmul.f32 0.2, %v4814_v26 }
 0x277   : > { %v4980_v23 = vpack.c.bf16 %v4949_v4, %v4948_v54  ;;  %v2342_v28 = vadd.f32 %v11163_v39, %v9314_v3  ;;  %v4817_v43 = vadd.f32 %v11291_v7, %v9554_v32  ;;  %v2397_v25 = vmul.f32 0.2, %v2331_v53  ;;  %v9871_v54 = vld [vmem:[%s12764_s3] sm:$0xff]   ;;  %v12886_v3 = vld [vmem:[#allocation4_spill] sm:$0xff] }
 0x278   : > { %v4920_v60 = vmul.f32 0.2, %v4806_v47  ;;  %v2334_v24 = vadd.f32 %v11163_v39, %v2333_v30  ;;  %v4809_v11 = vadd.f32 %v11291_v7, %v4808_v50  ;;  %v2431_v14 = vmax.f32 %v2339_v45, %v2399_v21 }
 0x279   : > { %9587 = vmatprep.mubr.msk.bf16.mxu1 %vm785_vm2, %v4980_v23  ;;  %v2400_v6 = vmul.f32 0.2, %v2342_v28  ;;  %v4923_v42 = vmul.f32 0.2, %v4817_v43  ;;  %v2429_v61 = vmax.f32 %v2331_v53, %v2397_v25  ;;  %v4954_v4 = vmax.f32 %v4814_v26, %v4922_v22  ;;  %v9317_v23 = vpop.f32.mrb[88].mxu1  ;;  %v9557_v53 = vpop.f32.mrb[200].mxu0 }
 0x27a   : > { %v2398_v38 = vmul.f32 0.2, %v2334_v24  ;;  %v4921_v36 = vmul.f32 0.2, %v4809_v11  ;;  %v11326_v9 = vmax.f32 %v11093_v19, %v2431_v14  ;;  %v2355_v19 = vadd.f32 %v11163_v39, %v9317_v23  ;;  %v2346_v22 = vpop.f32.mrb[89].mxu1 }
 0x27b   : > { %v2432_v10 = vmax.f32 %v2342_v28, %v2400_v6  ;;  %v4955_v0 = vmax.f32 %v4817_v43, %v4923_v42  ;;  %v11330_v45 = vmax.f32 %v11104_v58, %v2429_v61  ;;  %v4830_v26 = vadd.f32 %v11291_v7, %v9557_v53  ;;  %v4821_v28 = vpop.f32.mrb[201].mxu0  ;;  %v12887_v43 = vld [vmem:[#allocation2_spill] sm:$0xff]  ;;  %v9318_v25 = vpop.f32.mrb[90].mxu1 }
 0x27c   : > { %9588 = vmatmul.mubr.msk.bf16.vlgmr.msra.gmra.mrb[192].mxu1 %vm785_vm2, %v4981_v51  ;;  %v4952_v51 = vmax.f32 %v4806_v47, %v4920_v60  ;;  %v2430_v27 = vmax.f32 %v2334_v24, %v2398_v38  ;;  %v4953_v40 = vmax.f32 %v4809_v11, %v4921_v36  ;;  %v2347_v47 = vadd.f32 %v11163_v39, %v2346_v22  ;;  %v9558_v60 = vpop.f32.mrb[202].mxu0  ;;  %v2349_v42 = vpop.f32.mrb[91].mxu1  ;;  %v12888_v38 = vld [vmem:[#allocation7_spill] sm:$0xff] }
 0x27d   : > { %9654 = vmatpush3.bf16.msra.mxu1 %v9871_v54  ;;  %v11333_v32 = vmax.f32 %v12886_v3, %v2432_v10  ;;  %v4983_v21 = vpack.c.bf16 %v4955_v0, %v4954_v4  ;;  %v4822_v50 = vadd.f32 %v11291_v7, %v4821_v28  ;;  %v2403_v24 = vmul.f32 0.2, %v2355_v19  ;;  %v4824_v61 = vpop.f32.mrb[203].mxu0 }
 0x27e   : > { %9655 = vmatprep.subr.bf16.mxu1 %v11098_v31  ;;  %v11338_v30 = vmax.f32 %v12887_v43, %v2430_v27  ;;  %v4982_v58 = vpack.c.bf16 %v4953_v40, %v4952_v51  ;;  %v4926_v11 = vmul.f32 0.2, %v4830_v26  ;;  %v2358_v14 = vadd.f32 %v11163_v39, %v9318_v25 }
 0x27f   : > { %v4833_v6 = vadd.f32 %v11291_v7, %v9558_v60  ;;  %v2401_v36 = vmul.f32 0.2, %v2347_v47  ;;  %v4924_v54 = vmul.f32 0.2, %v4822_v50  ;;  %v2350_v4 = vadd.f32 %v11163_v39, %v2349_v42 }
 0x280   : > { %v4825_v10 = vadd.f32 %v11291_v7, %v4824_v61  ;;  %9591 = vmatprep.mubr.msk.bf16.mxu1 %vm785_vm2, %v4982_v58  ;;  %v2435_v0 = vmax.f32 %v2355_v19, %v2403_v24  ;;  %v4958_v3 = vmax.f32 %v4830_v26, %v4926_v11 }
 0x281   : > { %9656 = vmatpush3.bf16.msra.mxu1 %v11098_v31  ;;  %v2404_v31 = vmul.f32 0.2, %v2358_v14  ;;  %v4927_v51 = vmul.f32 0.2, %v4833_v6  ;;  %v2433_v27 = vmax.f32 %v2347_v47, %v2401_v36  ;;  %v2402_v40 = vmul.f32 0.2, %v2350_v4 }
 0x282   : > { %9657 = vmatprep.subr.bf16.mxu1 %v12888_v38  ;;  %v4925_v23 = vmul.f32 0.2, %v4825_v10  ;;  %v11352_v53 = vmax.f32 %v11142_v13, %v2435_v0  ;;  %v4956_v19 = vmax.f32 %v4822_v50, %v4924_v54  ;;  %v9561_v47 = vpop.f32.mrb[204].mxu0 }
 0x283   : > { %v2436_v22 = vmax.f32 %v2358_v14, %v2404_v31  ;;  %v4959_v28 = vmax.f32 %v4833_v6, %v4927_v51  ;;  %v11356_v43 = vmax.f32 %v11153_v63, %v2433_v27  ;;  %v2434_v58 = vmax.f32 %v2350_v4, %v2402_v40  ;;  %v4837_v14 = vpop.f32.mrb[205].mxu0  ;;  %v12889_v6 = vld [vmem:[#allocation3_spill] sm:$0xff] }
 0x284   : > { %9592 = vmatmul.mubr.msk.bf16.gmra.mrb[196].mxu1 %vm785_vm2, %v4983_v21  ;;  %v4957_v25 = vmax.f32 %v4825_v10, %v4925_v23  ;;  %v9321_v21 = vpop.f32.mrb[92].mxu1  ;;  %v4846_v26 = vadd.f32 %v11291_v7, %v9561_v47  ;;  %v4838_v61 = vadd.f32 %v11291_v7, %v4837_v14  ;;  %v9562_v36 = vpop.f32.mrb[206].mxu0 }
 0x285   : > { %9658 = vmatpush3.bf16.msra.mxu1 %v12888_v38  ;;  %v11359_v60 = vmax.f32 %v11158_v46, %v2436_v22  ;;  %v4985_v24 = vpack.c.bf16 %v4959_v28, %v4958_v3  ;;  %v2371_v13 = vadd.f32 %v11163_v39, %v9321_v21  ;;  %v2362_v11 = vpop.f32.mrb[93].mxu1  ;;  %v11364_v42 = vmax.f32 %v12889_v6, %v2434_v58  ;;  %v4840_v31 = vpop.f32.mrb[207].mxu0 }
 0x286   : > { %9659 = vmatprep.subr.bf16.mxu1 %v11147_v33  ;;  %v4984_v63 = vpack.c.bf16 %v4957_v25, %v4956_v19  ;;  %v2363_v50 = vadd.f32 %v11163_v39, %v2362_v11  ;;  %v9322_v38 = vpop.f32.mrb[94].mxu1  ;;  %v4930_v54 = vmul.f32 0.2, %v4846_v26  ;;  %v4849_v10 = vadd.f32 %v11291_v7, %v9562_v36 }
 0x287   : > { %v2407_v46 = vmul.f32 0.2, %v2371_v13  ;;  %v2374_v4 = vadd.f32 %v11163_v39, %v9322_v38  ;;  %v2365_v0 = vpop.f32.mrb[95].mxu1  ;;  %v4928_v27 = vmul.f32 0.2, %v4838_v61  ;;  %v4841_v23 = vadd.f32 %v11291_v7, %v4840_v31 }
 0x288   : > { %v2405_v51 = vmul.f32 0.2, %v2363_v50  ;;  %v2366_v40 = vadd.f32 %v11163_v39, %v2365_v0  ;;  %9595 = vmatprep.mubr.msk.bf16.mxu1 %vm785_vm2, %v4984_v63  ;;  %v4931_v28 = vmul.f32 0.2, %v4849_v10  ;;  %v4962_v21 = vmax.f32 %v4846_v26, %v4930_v54  ;;  %v9565_v36 = vpop.f32.mrb[208].mxu0 }
 0x289   : > { %9660 = vmatpush3.bf16.msra.mxu1 %v11147_v33  ;;  %v2439_v3 = vmax.f32 %v2371_v13, %v2407_v46  ;;  %v2408_v22 = vmul.f32 0.2, %v2374_v4  ;;  %v4929_v58 = vmul.f32 0.2, %v4841_v23  ;;  %v4960_v6 = vmax.f32 %v4838_v61, %v4928_v27  ;;  %v9367_v13 = vpop.f32.mrb[96].mxu1  ;;  %v4853_v26 = vpop.f32.mrb[209].mxu0 }
 0x28a   : > { %v2437_v33 = vmax.f32 %v2363_v50, %v2405_v51  ;;  %v2406_v19 = vmul.f32 0.2, %v2366_v40  ;;  %v4963_v11 = vmax.f32 %v4849_v10, %v4931_v28  ;;  %v2966_v50 = vadd.f32 %v11163_v39, %v9367_v13  ;;  %v2957_v0 = vpop.f32.mrb[97].mxu1  ;;  %v9566_v31 = vpop.f32.mrb[210].mxu0 }
 0x28b   : > { %v11376_v25 = vmax.f32 %v11189_v18, %v2439_v3  ;;  %v2440_v47 = vmax.f32 %v2374_v4, %v2408_v22  ;;  %v4961_v63 = vmax.f32 %v4841_v23, %v4929_v58  ;;  %v4862_v18 = vadd.f32 %v11291_v7, %v9565_v36  ;;  %v9368_v10 = vpop.f32.mrb[98].mxu1  ;;  %v4856_v3 = vpop.f32.mrb[211].mxu0 }
 0x28c   : > { %9596 = vmatmul.mubr.msk.bf16.gmra.mrb[200].mxu1 %vm785_vm2, %v4985_v24  ;;  %v11379_v14 = vmax.f32 %v11191_v48, %v2437_v33  ;;  %v2438_v38 = vmax.f32 %v2366_v40, %v2406_v19  ;;  %v4987_v24 = vpack.c.bf16 %v4963_v11, %v4962_v21  ;;  %v2958_v61 = vadd.f32 %v11163_v39, %v2957_v0  ;;  %v2960_v23 = vpop.f32.mrb[99].mxu1 }
 0x28d   : > { %v11382_v46 = vmax.f32 %v11193_v41, %v2440_v47  ;;  %v4986_v48 = vpack.c.bf16 %v4961_v63, %v4960_v6  ;;  %v4854_v4 = vadd.f32 %v11291_v7, %v4853_v26  ;;  %v3086_v51 = vmul.f32 0.2, %v2966_v50 }
 0x28e   : > { %v11387_v54 = vmax.f32 %v11197_v52, %v2438_v38  ;;  %v4934_v41 = vmul.f32 0.2, %v4862_v18  ;;  %v2969_v27 = vadd.f32 %v11163_v39, %v9368_v10  ;;  %v4865_v40 = vadd.f32 %v11291_v7, %v9566_v31 }
 0x28f   : > { %v3084_v22 = vmul.f32 0.2, %v2958_v61  ;;  %v4932_v28 = vmul.f32 0.2, %v4854_v4  ;;  %v2961_v52 = vadd.f32 %v11163_v39, %v2960_v23  ;;  %v4857_v33 = vadd.f32 %v11291_v7, %v4856_v3  ;;  %9599 = vmatprep.mubr.msk.bf16.mxu1 %vm785_vm2, %v4986_v48 }
 0x290   : > { %v3118_v19 = vmax.f32 %v2966_v50, %v3086_v51  ;;  %v3087_v58 = vmul.f32 0.2, %v2969_v27  ;;  %v4935_v21 = vmul.f32 0.2, %v4865_v40  ;;  %v4966_v38 = vmax.f32 %v4862_v18, %v4934_v41  ;;  %v9371_v31 = vpop.f32.mrb[100].mxu1  ;;  %v9569_v23 = vpop.f32.mrb[212].mxu0 }
 0x291   : > { %v3116_v47 = vmax.f32 %v2958_v61, %v3084_v22  ;;  %v3085_v11 = vmul.f32 0.2, %v2961_v52  ;;  %v4933_v6 = vmul.f32 0.2, %v4857_v33  ;;  %v4964_v0 = vmax.f32 %v4854_v4, %v4932_v28  ;;  %v2973_v51 = vpop.f32.mrb[101].mxu1  ;;  %v4869_v18 = vpop.f32.mrb[213].mxu0 }
 0x292   : > { %v3119_v63 = vmax.f32 %v2969_v27, %v3087_v58  ;;  %v4967_v13 = vmax.f32 %v4865_v40, %v4935_v21  ;;  %v11398_v36 = vmax.f32 %v11208_v16, %v3118_v19  ;;  %v4878_v61 = vadd.f32 %v11291_v7, %v9569_v23  ;;  %v9372_v40 = vpop.f32.mrb[102].mxu1  ;;  %v9570_v3 = vpop.f32.mrb[214].mxu0 }
 0x293   : > { %v3117_v26 = vmax.f32 %v2961_v52, %v3085_v11  ;;  %v4965_v10 = vmax.f32 %v4857_v33, %v4933_v6  ;;  %v11401_v50 = vmax.f32 %v11211_v1, %v3116_v47  ;;  %v2974_v4 = vadd.f32 %v11163_v39, %v2973_v51  ;;  %v2976_v19 = vpop.f32.mrb[103].mxu1  ;;  %v4872_v58 = vpop.f32.mrb[215].mxu0 }
 0x294   : > { %9600 = vmatmul.mubr.msk.bf16.gmra.mrb[204].mxu1 %vm785_vm2, %v4987_v24  ;;  %v4989_v48 = vpack.c.bf16 %v4967_v13, %v4966_v38  ;;  %v2982_v24 = vadd.f32 %v11163_v39, %v9371_v31  ;;  %v11406_v41 = vmax.f32 %v11214_v62, %v3119_v63  ;;  %v4870_v27 = vadd.f32 %v11291_v7, %v4869_v18 }
 0x295   : > { %v4988_v16 = vpack.c.bf16 %v4965_v10, %v4964_v0  ;;  %v11411_v1 = vmax.f32 %v11219_v59, %v3117_v26  ;;  %v4938_v28 = vmul.f32 0.2, %v4878_v61  ;;  %v2985_v52 = vadd.f32 %v11163_v39, %v9372_v40 }
 0x296   : > { %v3090_v22 = vmul.f32 0.2, %v2982_v24  ;;  %v4881_v33 = vadd.f32 %v11291_v7, %v9570_v3  ;;  %v3088_v62 = vmul.f32 0.2, %v2974_v4  ;;  %v4936_v21 = vmul.f32 0.2, %v4870_v27 }
 0x297   : > { %v2977_v47 = vadd.f32 %v11163_v39, %v2976_v19  ;;  %v4873_v11 = vadd.f32 %v11291_v7, %v4872_v58  ;;  %9603 = vmatprep.mubr.msk.bf16.mxu1 %vm785_vm2, %v4988_v16  ;;  %v3091_v38 = vmul.f32 0.2, %v2985_v52  ;;  %v4970_v26 = vmax.f32 %v4878_v61, %v4938_v28 }
 0x298   : > { %v3122_v6 = vmax.f32 %v2982_v24, %v3090_v22  ;;  %v4939_v59 = vmul.f32 0.2, %v4881_v33  ;;  %v3120_v63 = vmax.f32 %v2974_v4, %v3088_v62  ;;  %v4968_v51 = vmax.f32 %v4870_v27, %v4936_v21  ;;  %v9375_v3 = vpop.f32.mrb[104].mxu1  ;;  %v9573_v19 = vpop.f32.mrb[216].mxu0 }
 0x299   : > { %v3089_v13 = vmul.f32 0.2, %v2977_v47  ;;  %v4937_v0 = vmul.f32 0.2, %v4873_v11  ;;  %v3123_v10 = vmax.f32 %v2985_v52, %v3091_v38  ;;  %v4894_v4 = vadd.f32 %v11291_v7, %v9573_v19  ;;  %v2989_v22 = vpop.f32.mrb[105].mxu1  ;;  %v4885_v61 = vpop.f32.mrb[217].mxu0 }
 0x29a   : > { %v4971_v31 = vmax.f32 %v4881_v33, %v4939_v59  ;;  %v11420_v23 = vmax.f32 %v11230_v37, %v3122_v6  ;;  %v11423_v24 = vmax.f32 %v11233_v12, %v3120_v63  ;;  %v2990_v27 = vadd.f32 %v11163_v39, %v2989_v22  ;;  %v9376_v33 = vpop.f32.mrb[106].mxu1  ;;  %v9574_v58 = vpop.f32.mrb[218].mxu0 }
 0x29b   : > { %v3121_v18 = vmax.f32 %v2977_v47, %v3089_v13  ;;  %v4969_v40 = vmax.f32 %v4873_v11, %v4937_v0  ;;  %v11428_v28 = vmax.f32 %v11236_v34, %v3123_v10  ;;  %v4886_v52 = vadd.f32 %v11291_v7, %v4885_v61  ;;  %v2992_v6 = vpop.f32.mrb[107].mxu1  ;;  %v4888_v38 = vpop.f32.mrb[219].mxu0 }
 0x29c   : > { %9604 = vmatmul.mubr.msk.bf16.gmra.mrb[208].mxu1 %vm785_vm2, %v4989_v48  ;;  %v4991_v16 = vpack.c.bf16 %v4971_v31, %v4970_v26  ;;  %v2998_v48 = vadd.f32 %v11163_v39, %v9375_v3  ;;  %v4942_v21 = vmul.f32 0.2, %v4894_v4  ;;  %v3001_v47 = vadd.f32 %v11163_v39, %v9376_v33 }
 0x29d   : > { %v4990_v37 = vpack.c.bf16 %v4969_v40, %v4968_v51  ;;  %v11433_v12 = vmax.f32 %v11241_v57, %v3121_v18  ;;  %v4897_v11 = vadd.f32 %v11291_v7, %v9574_v58  ;;  %v3092_v34 = vmul.f32 0.2, %v2990_v27 }
 0x29e   : > { %v3094_v62 = vmul.f32 0.2, %v2998_v48  ;;  %v4940_v59 = vmul.f32 0.2, %v4886_v52  ;;  %v2993_v63 = vadd.f32 %v11163_v39, %v2992_v6  ;;  %v4889_v13 = vadd.f32 %v11291_v7, %v4888_v38 }
 0x29f   : > { %9607 = vmatprep.mubr.msk.bf16.mxu1 %vm785_vm2, %v4990_v37  ;;  %v3095_v26 = vmul.f32 0.2, %v3001_v47  ;;  %v4943_v57 = vmul.f32 0.2, %v4897_v11  ;;  %v3124_v10 = vmax.f32 %v2990_v27, %v3092_v34  ;;  %v4974_v18 = vmax.f32 %v4894_v4, %v4942_v21 }
 0x2a0   : > { %v3126_v0 = vmax.f32 %v2998_v48, %v3094_v62  ;;  %v3093_v31 = vmul.f32 0.2, %v2993_v63  ;;  %v4941_v51 = vmul.f32 0.2, %v4889_v13  ;;  %v4972_v22 = vmax.f32 %v4886_v52, %v4940_v59  ;;  %v9379_v58 = vpop.f32.mrb[108].mxu1  ;;  %v9577_v6 = vpop.f32.mrb[220].mxu0 }
 0x2a1   : > { %v3127_v40 = vmax.f32 %v3001_v47, %v3095_v26  ;;  %v4975_v3 = vmax.f32 %v4897_v11, %v4943_v57  ;;  %v11445_v48 = vmax.f32 %v11255_v29, %v3124_v10  ;;  %v4910_v27 = vadd.f32 %v11291_v7, %v9577_v6  ;;  %v3005_v62 = vpop.f32.mrb[109].mxu1  ;;  %v4901_v4 = vpop.f32.mrb[221].mxu0 }
 0x2a2   : > { %v11442_v19 = vmax.f32 %v11252_v5, %v3126_v0  ;;  %v3125_v61 = vmax.f32 %v2993_v63, %v3093_v31  ;;  %v4973_v33 = vmax.f32 %v4889_v13, %v4941_v51  ;;  %v3006_v52 = vadd.f32 %v11163_v39, %v3005_v62  ;;  %v9380_v11 = vpop.f32.mrb[110].mxu1  ;;  %v9578_v38 = vpop.f32.mrb[222].mxu0 }
 0x2a3   : > { %v4993_v37 = vpack.c.bf16 %v4975_v3, %v4974_v18  ;;  %v11450_v21 = vmax.f32 %v11258_v44, %v3127_v40  ;;  %v4902_v47 = vadd.f32 %v11291_v7, %v4901_v4  ;;  %v4946_v59 = vmul.f32 0.2, %v4910_v27  ;;  %v3008_v0 = vpop.f32.mrb[111].mxu1  ;;  %v4904_v26 = vpop.f32.mrb[223].mxu0 }
 0x2a4   : > { %9608 = vmatmul.mubr.msk.bf16.gmra.mrb[212].mxu1 %vm785_vm2, %v4991_v16  ;;  %v3014_v16 = vadd.f32 %v11163_v39, %v9379_v58  ;;  %v4992_v5 = vpack.c.bf16 %v4973_v33, %v4972_v22  ;;  %v11455_v29 = vmax.f32 %v11263_v17, %v3125_v61  ;;  %v3017_v63 = vadd.f32 %v11163_v39, %v9380_v11 }
 0x2a5   : > { %v4913_v13 = vadd.f32 %v11291_v7, %v9578_v38  ;;  %v3096_v44 = vmul.f32 0.2, %v3006_v52  ;;  %v4944_v57 = vmul.f32 0.2, %v4902_v47  ;;  %v3009_v10 = vadd.f32 %v11163_v39, %v3008_v0 }
 0x2a6   : > { %v3098_v34 = vmul.f32 0.2, %v3014_v16  ;;  %v4905_v31 = vadd.f32 %v11291_v7, %v4904_v26  ;;  %9611 = vmatprep.mubr.msk.bf16.mxu1 %vm785_vm2, %v4992_v5  ;;  %v3099_v18 = vmul.f32 0.2, %v3017_v63  ;;  %v4978_v61 = vmax.f32 %v4910_v27, %v4946_v59 }
 0x2a7   : > { %v4947_v17 = vmul.f32 0.2, %v4913_v13  ;;  %v3128_v40 = vmax.f32 %v3006_v52, %v3096_v44  ;;  %v3097_v3 = vmul.f32 0.2, %v3009_v10  ;;  %v4976_v62 = vmax.f32 %v4902_v47, %v4944_v57 }
 0x2a8   : > { %v3130_v51 = vmax.f32 %v3014_v16, %v3098_v34  ;;  %v4945_v22 = vmul.f32 0.2, %v4905_v31  ;;  %v3131_v33 = vmax.f32 %v3017_v63, %v3099_v18  ;;  %v9383_v11 = vpop.f32.mrb[112].mxu1  ;;  %v9623_v38 = vpop.f32.mrb[224].mxu0 }
 0x2a9   : > { %v4979_v58 = vmax.f32 %v4913_v13, %v4947_v17  ;;  %v3129_v39 = vmax.f32 %v3009_v10, %v3097_v3  ;;  %v11467_v16 = vmax.f32 %v11277_v55, %v3128_v40  ;;  %v5505_v52 = vadd.f32 %v11291_v7, %v9623_v38  ;;  %v5496_v34 = vpop.f32.mrb[225].mxu0 }
 0x2aa   : > { %v11464_v6 = vmax.f32 %v11274_v49, %v3130_v51  ;;  %v4977_v4 = vmax.f32 %v4905_v31, %v4945_v22  ;;  %v3021_v49 = vpop.f32.mrb[113].mxu1  ;;  %v11477_v47 = vmax.f32 %v11280_v15, %v3131_v33  ;;  %v5497_v55 = vadd.f32 %v11291_v7, %v5496_v34  ;;  %v9624_v0 = vpop.f32.mrb[226].mxu0 }
 0x2ab   : > { %v4995_v5 = vpack.c.bf16 %v4979_v58, %v4978_v61  ;;  %v9384_v13 = vpop.f32.mrb[114].mxu1  ;;  %v11482_v26 = vmax.f32 %v11285_v8, %v3129_v39  ;;  %v5625_v57 = vmul.f32 0.2, %v5505_v52  ;;  %v5508_v31 = vadd.f32 %v11291_v7, %v9624_v0  ;;  %v5499_v18 = vpop.f32.mrb[227].mxu0 }
 0x2ac   : > { %9612 = vmatmul.mubr.msk.bf16.gmra.mrb[216].mxu1 %vm785_vm2, %v4993_v37  ;;  %v11472_v37 = vld [vmem:[%s12765_s4] ss:$0 sm:$0xff]  ;;  %v4994_v59 = vpack.c.bf16 %v4977_v4, %v4976_v62  ;;  %v3024_v51 = vpop.f32.mrb[115].mxu1  ;;  %v5623_v17 = vmul.f32 0.2, %v5497_v55  ;;  %v5500_v3 = vadd.f32 %v11291_v7, %v5499_v18 }
 0x2ad   : > { %v3030_v27 = vadd.f32 %v11472_v37, %v9383_v11  ;;  %v3022_v63 = vadd.f32 %v11472_v37, %v3021_v49  ;;  %v3033_v10 = vadd.f32 %v11472_v37, %v9384_v13  ;;  %v3025_v40 = vadd.f32 %v11472_v37, %v3024_v51 }
 0x2ae   : > { %9615 = vmatprep.mubr.msk.bf16.mxu1 %vm785_vm2, %v4994_v59  ;;  %v5626_v8 = vmul.f32 0.2, %v5508_v31  ;;  %v5624_v62 = vmul.f32 0.2, %v5500_v3  ;;  %v5657_v39 = vmax.f32 %v5505_v52, %v5625_v57  ;;  %v5655_v49 = vmax.f32 %v5497_v55, %v5623_v17 }
 0x2af   : > { %v3102_v44 = vmul.f32 0.2, %v3030_v27  ;;  %v3100_v15 = vmul.f32 0.2, %v3022_v63  ;;  %v3103_v61 = vmul.f32 0.2, %v3033_v10 }
 0x2b0   : > { %v3101_v58 = vmul.f32 0.2, %v3025_v40  ;;  %v5658_v11 = vmax.f32 %v5508_v31, %v5626_v8  ;;  %v5656_v13 = vmax.f32 %v5500_v3, %v5624_v62  ;;  %v9387_v0 = vpop.f32.mrb[116].mxu1  ;;  %v9627_v51 = vpop.f32.mrb[228].mxu0 }
 0x2b1   : > { %v3134_v22 = vmax.f32 %v3030_v27, %v3102_v44  ;;  %v3132_v33 = vmax.f32 %v3022_v63, %v3100_v15  ;;  %v3135_v4 = vmax.f32 %v3033_v10, %v3103_v61  ;;  %v5521_v63 = vadd.f32 %v11291_v7, %v9627_v51  ;;  %v3037_v44 = vpop.f32.mrb[117].mxu1  ;;  %v5512_v52 = vpop.f32.mrb[229].mxu0 }
 0x2b2   : > { %v3133_v34 = vmax.f32 %v3025_v40, %v3101_v58  ;;  %v5688_v59 = vpack.c.bf16 %v5658_v11, %v5657_v39  ;;  %v3038_v55 = vadd.f32 %v11472_v37, %v3037_v44  ;;  %v5513_v10 = vadd.f32 %v11291_v7, %v5512_v52  ;;  %v9388_v31 = vpop.f32.mrb[118].mxu1  ;;  %v9628_v18 = vpop.f32.mrb[230].mxu0 }
 0x2b3   : > { %v11491_v38 = vmax.f32 %v11301_v35, %v3134_v22  ;;  %v11494_v27 = vmax.f32 %v11304_v20, %v3132_v33  ;;  %v11499_v57 = vmax.f32 %v11307_v56, %v3135_v4  ;;  %v5687_v35 = vpack.c.bf16 %v5656_v13, %v5655_v49  ;;  %v3040_v22 = vpop.f32.mrb[119].mxu1  ;;  %v5515_v61 = vpop.f32.mrb[231].mxu0 }
 0x2b4   : > { %9616 = vmatmul.mubr.msk.bf16.gmra.mrb[220].mxu1 %vm785_vm2, %v4995_v5  ;;  %v3046_v5 = vadd.f32 %v11472_v37, %v9387_v0  ;;  %v11504_v20 = vmax.f32 %v11312_v2, %v3133_v34  ;;  %v5629_v17 = vmul.f32 0.2, %v5521_v63  ;;  %v3049_v40 = vadd.f32 %v11472_v37, %v9388_v31 }
 0x2b5   : > { %v5524_v3 = vadd.f32 %v11291_v7, %v9628_v18  ;;  %v3104_v56 = vmul.f32 0.2, %v3038_v55  ;;  %v5627_v8 = vmul.f32 0.2, %v5513_v10  ;;  %v3041_v33 = vadd.f32 %v11472_v37, %v3040_v22  ;;  %9661 = vmatprep.mubr.msk.bf16.mxu1 %vm785_vm2, %v5687_v35 }
 0x2b6   : > { %v3106_v15 = vmul.f32 0.2, %v3046_v5  ;;  %v5516_v58 = vadd.f32 %v11291_v7, %v5515_v61  ;;  %v5661_v39 = vmax.f32 %v5521_v63, %v5629_v17  ;;  %v3107_v2 = vmul.f32 0.2, %v3049_v40 }
 0x2b7   : > { %v5630_v4 = vmul.f32 0.2, %v5524_v3  ;;  %v3136_v11 = vmax.f32 %v3038_v55, %v3104_v56  ;;  %v5659_v49 = vmax.f32 %v5513_v10, %v5627_v8  ;;  %v3105_v34 = vmul.f32 0.2, %v3041_v33 }
 0x2b8   : > { %v3138_v62 = vmax.f32 %v3046_v5, %v3106_v15  ;;  %v5628_v13 = vmul.f32 0.2, %v5516_v58  ;;  %v3139_v0 = vmax.f32 %v3049_v40, %v3107_v2  ;;  %v9391_v18 = vpop.f32.mrb[120].mxu1  ;;  %v9631_v22 = vpop.f32.mrb[232].mxu0 }
 0x2b9   : > { %v5662_v51 = vmax.f32 %v5524_v3, %v5630_v4  ;;  %v3137_v52 = vmax.f32 %v3041_v33, %v3105_v34  ;;  %v11516_v5 = vmax.f32 %v11330_v45, %v3136_v11  ;;  %v3062_v35 = vadd.f32 %v11472_v37, %v9391_v18  ;;  %v3053_v55 = vpop.f32.mrb[121].mxu1  ;;  %v5528_v10 = vpop.f32.mrb[233].mxu0 }
 0x2ba   : > { %v11513_v44 = vmax.f32 %v11326_v9, %v3138_v62  ;;  %v5660_v31 = vmax.f32 %v5516_v58, %v5628_v13  ;;  %v11521_v15 = vmax.f32 %v11333_v32, %v3139_v0  ;;  %v3054_v9 = vadd.f32 %v11472_v37, %v3053_v55  ;;  %v9392_v3 = vpop.f32.mrb[122].mxu1  ;;  %v9632_v61 = vpop.f32.mrb[234].mxu0 }
 0x2bb   : > { %v5690_v63 = vpack.c.bf16 %v5662_v51, %v5661_v39  ;;  %v5529_v40 = vadd.f32 %v11291_v7, %v5528_v10  ;;  %v11526_v45 = vmax.f32 %v11338_v30, %v3137_v52  ;;  %v3110_v56 = vmul.f32 0.2, %v3062_v35  ;;  %v3056_v62 = vpop.f32.mrb[123].mxu1  ;;  %v5531_v39 = vpop.f32.mrb[235].mxu0 }
 0x2bc   : > { %9662 = vmatmul.mubr.msk.bf16.vlgmr.msra.gmra.mrb[224].mxu1 %vm785_vm2, %v5688_v59  ;;  %v5537_v59 = vadd.f32 %v11291_v7, %v9631_v22  ;;  %v5689_v17 = vpack.c.bf16 %v5660_v31, %v5659_v49  ;;  %v3065_v33 = vadd.f32 %v11472_v37, %v9392_v3  ;;  %v5540_v58 = vadd.f32 %v11291_v7, %v9632_v61 }
 0x2bd   : > { %v3108_v32 = vmul.f32 0.2, %v3054_v9  ;;  %v5631_v2 = vmul.f32 0.2, %v5529_v40  ;;  %v3057_v4 = vadd.f32 %v11472_v37, %v3056_v62  ;;  %v5532_v11 = vadd.f32 %v11291_v7, %v5531_v39 }
 0x2be   : > { %v5633_v8 = vmul.f32 0.2, %v5537_v59  ;;  %9665 = vmatprep.mubr.msk.bf16.mxu1 %vm785_vm2, %v5689_v17  ;;  %v3142_v49 = vmax.f32 %v3062_v35, %v3110_v56  ;;  %v3111_v30 = vmul.f32 0.2, %v3065_v33  ;;  %v5634_v13 = vmul.f32 0.2, %v5540_v58 }
 0x2bf   : > { %v3140_v0 = vmax.f32 %v3054_v9, %v3108_v32  ;;  %v5663_v51 = vmax.f32 %v5529_v40, %v5631_v2  ;;  %v3109_v52 = vmul.f32 0.2, %v3057_v4  ;;  %v5632_v31 = vmul.f32 0.2, %v5532_v11 }
 0x2c0   : > { %v5665_v34 = vmax.f32 %v5537_v59, %v5633_v8  ;;  %v3143_v18 = vmax.f32 %v3065_v33, %v3111_v30  ;;  %v5666_v22 = vmax.f32 %v5540_v58, %v5634_v13  ;;  %v11535_v55 = vmax.f32 %v11352_v53, %v3142_v49  ;;  %v9395_v61 = vpop.f32.mrb[124].mxu1  ;;  %v9635_v62 = vpop.f32.mrb[236].mxu0 }
 0x2c1   : > { %v3141_v10 = vmax.f32 %v3057_v4, %v3109_v52  ;;  %v5664_v3 = vmax.f32 %v5532_v11, %v5632_v31  ;;  %v11538_v35 = vmax.f32 %v11356_v43, %v3140_v0  ;;  %v3078_v17 = vadd.f32 %v11472_v37, %v9395_v61  ;;  %v3069_v9 = vpop.f32.mrb[125].mxu1  ;;  %v5544_v40 = vpop.f32.mrb[237].mxu0 }
 0x2c2   : > { %v5692_v59 = vpack.c.bf16 %v5666_v22, %v5665_v34  ;;  %v11543_v56 = vmax.f32 %v11359_v60, %v3143_v18  ;;  %v3070_v53 = vadd.f32 %v11472_v37, %v3069_v9  ;;  %v5545_v33 = vadd.f32 %v11291_v7, %v5544_v40  ;;  %v9396_v58 = vpop.f32.mrb[126].mxu1  ;;  %v9636_v39 = vpop.f32.mrb[238].mxu0 }
 0x2c3   : > { %v5691_v8 = vpack.c.bf16 %v5664_v3, %v5663_v51  ;;  %v11548_v43 = vmax.f32 %v11364_v42, %v3141_v10  ;;  %v3114_v32 = vmul.f32 0.2, %v3078_v17  ;;  %v3081_v4 = vadd.f32 %v11472_v37, %v9396_v58  ;;  %v3072_v49 = vpop.f32.mrb[127].mxu1  ;;  %v5547_v34 = vpop.f32.mrb[239].mxu0 }
 0x2c4   : > { %9666 = vmatmul.mubr.msk.bf16.gmra.mrb[228].mxu1 %vm785_vm2, %v5690_v63  ;;  %v5553_v63 = vadd.f32 %v11291_v7, %v9635_v62  ;;  %v5556_v11 = vadd.f32 %v11291_v7, %v9636_v39  ;;  %v3112_v60 = vmul.f32 0.2, %v3070_v53  ;;  %v5635_v30 = vmul.f32 0.2, %v5545_v33 }
 0x2c5   : > { %v3073_v13 = vadd.f32 %v11472_v37, %v3072_v49  ;;  %v5548_v0 = vadd.f32 %v11291_v7, %v5547_v34  ;;  %9669 = vmatprep.mubr.msk.bf16.mxu1 %vm785_vm2, %v5691_v8  ;;  %v3146_v51 = vmax.f32 %v3078_v17, %v3114_v32  ;;  %v3115_v42 = vmul.f32 0.2, %v3081_v4 }
 0x2c6   : > { %v5637_v2 = vmul.f32 0.2, %v5553_v63  ;;  %v5638_v31 = vmul.f32 0.2, %v5556_v11  ;;  %v3144_v18 = vmax.f32 %v3070_v53, %v3112_v60  ;;  %v5667_v22 = vmax.f32 %v5545_v33, %v5635_v30 }
 0x2c7   : > { %v3113_v10 = vmul.f32 0.2, %v3073_v13  ;;  %v5636_v3 = vmul.f32 0.2, %v5548_v0  ;;  %v3147_v61 = vmax.f32 %v3081_v4, %v3115_v42  ;;  %v11557_v9 = vmax.f32 %v11376_v25, %v3146_v51 }
 0x2c8   : > { %v5669_v52 = vmax.f32 %v5553_v63, %v5637_v2  ;;  %v5670_v62 = vmax.f32 %v5556_v11, %v5638_v31  ;;  %v9441_v39 = vpop.f32.mrb[128].mxu1  ;;  %v9639_v49 = vpop.f32.mrb[240].mxu0  ;;  %v11560_v17 = vmax.f32 %v11379_v14, %v3144_v18 }
 0x2c9   : > { %v3145_v40 = vmax.f32 %v3073_v13, %v3113_v10  ;;  %v5668_v58 = vmax.f32 %v5548_v0, %v5636_v3  ;;  %v3673_v8 = vadd.f32 %v11472_v37, %v9441_v39  ;;  %v3664_v53 = vpop.f32.mrb[129].mxu1  ;;  %v5560_v33 = vpop.f32.mrb[241].mxu0  ;;  %v11565_v32 = vmax.f32 %v11382_v46, %v3147_v61 }
 0x2ca   : > { %v5694_v63 = vpack.c.bf16 %v5670_v62, %v5669_v52  ;;  %v3665_v25 = vadd.f32 %v11472_v37, %v3664_v53  ;;  %v5561_v4 = vadd.f32 %v11291_v7, %v5560_v33  ;;  %v9442_v11 = vpop.f32.mrb[130].mxu1  ;;  %v9640_v34 = vpop.f32.mrb[242].mxu0 }
 0x2cb   : > { %v5693_v2 = vpack.c.bf16 %v5668_v58, %v5667_v22  ;;  %v11570_v14 = vmax.f32 %v11387_v54, %v3145_v40  ;;  %v3793_v60 = vmul.f32 0.2, %v3673_v8  ;;  %v3676_v13 = vadd.f32 %v11472_v37, %v9442_v11  ;;  %v3667_v51 = vpop.f32.mrb[131].mxu1  ;;  %v5563_v52 = vpop.f32.mrb[243].mxu0 }
 0x2cc   : > { %9670 = vmatmul.mubr.msk.bf16.gmra.mrb[232].mxu1 %vm785_vm2, %v5692_v59  ;;  %v5569_v59 = vadd.f32 %v11291_v7, %v9639_v49  ;;  %v5572_v0 = vadd.f32 %v11291_v7, %v9640_v34  ;;  %v3791_v46 = vmul.f32 0.2, %v3665_v25  ;;  %v5639_v42 = vmul.f32 0.2, %v5561_v4 }
 0x2cd   : > { %v3668_v31 = vadd.f32 %v11472_v37, %v3667_v51  ;;  %v5564_v18 = vadd.f32 %v11291_v7, %v5563_v52  ;;  %9673 = vmatprep.mubr.msk.bf16.mxu1 %vm785_vm2, %v5693_v2  ;;  %v3825_v22 = vmax.f32 %v3673_v8, %v3793_v60  ;;  %v3794_v54 = vmul.f32 0.2, %v3676_v13 }
 0x2ce   : > { %v5641_v30 = vmul.f32 0.2, %v5569_v59  ;;  %v5642_v3 = vmul.f32 0.2, %v5572_v0  ;;  %v3823_v61 = vmax.f32 %v3665_v25, %v3791_v46  ;;  %v5671_v62 = vmax.f32 %v5561_v4, %v5639_v42 }
 0x2cf   : > { %v3792_v40 = vmul.f32 0.2, %v3668_v31  ;;  %v5640_v58 = vmul.f32 0.2, %v5564_v18  ;;  %v11579_v39 = vmax.f32 %v11398_v36, %v3825_v22  ;;  %v3826_v49 = vmax.f32 %v3676_v13, %v3794_v54  ;;  %v11591_v36 = vld [vmem:[%s12763_s2] ss:$0 sm:$0xff] }
 0x2d0   : > { %v5673_v10 = vmax.f32 %v5569_v59, %v5641_v30  ;;  %v5674_v53 = vmax.f32 %v5572_v0, %v5642_v3  ;;  %v11582_v33 = vmax.f32 %v11401_v50, %v3823_v61  ;;  %v9445_v8 = vpop.f32.mrb[132].mxu1  ;;  %v9643_v59 = vpop.f32.mrb[244].mxu0 }
 0x2d1   : > { %v3824_v7 = vmax.f32 %v3668_v31, %v3792_v40  ;;  %v5672_v2 = vmax.f32 %v5564_v18, %v5640_v58  ;;  %v11585_v11 = vmax.f32 %v11406_v41, %v3826_v49  ;;  %v3689_v25 = vadd.f32 %v11472_v37, %v9445_v8  ;;  %v3680_v34 = vpop.f32.mrb[133].mxu1  ;;  %v5576_v50 = vpop.f32.mrb[245].mxu0 }
 0x2d2   : > { %v5585_v4 = vadd.f32 %v11591_v36, %v9643_v59  ;;  %v3681_v13 = vadd.f32 %v11472_v37, %v3680_v34  ;;  %v5577_v41 = vadd.f32 %v11591_v36, %v5576_v50  ;;  %v9446_v0 = vpop.f32.mrb[134].mxu1  ;;  %v9644_v51 = vpop.f32.mrb[246].mxu0 }
 0x2d3   : > { %v11595_v60 = vmax.f32 %v11411_v1, %v3824_v7  ;;  %v5695_v30 = vpack.c.bf16 %v5672_v2, %v5671_v62  ;;  %v3797_v52 = vmul.f32 0.2, %v3689_v25  ;;  %v3692_v42 = vadd.f32 %v11472_v37, %v9446_v0  ;;  %v3683_v18 = vpop.f32.mrb[135].mxu1  ;;  %v5579_v22 = vpop.f32.mrb[247].mxu0 }
 0x2d4   : > { %9674 = vmatmul.mubr.msk.bf16.gmra.mrb[236].mxu1 %vm785_vm2, %v5694_v63  ;;  %v5696_v63 = vpack.c.bf16 %v5674_v53, %v5673_v10  ;;  %v5645_v46 = vmul.f32 0.2, %v5585_v4  ;;  %v5588_v31 = vadd.f32 %v11591_v36, %v9644_v51  ;;  %v3795_v10 = vmul.f32 0.2, %v3681_v13 }
 0x2d5   : > { %v5643_v54 = vmul.f32 0.2, %v5577_v41  ;;  %v3684_v1 = vadd.f32 %v11472_v37, %v3683_v18  ;;  %v5580_v3 = vadd.f32 %v11591_v36, %v5579_v22  ;;  %9677 = vmatprep.mubr.msk.bf16.mxu1 %vm785_vm2, %v5695_v30  ;;  %v3829_v61 = vmax.f32 %v3689_v25, %v3797_v52 }
 0x2d6   : > { %v5677_v62 = vmax.f32 %v5585_v4, %v5645_v46  ;;  %v3798_v40 = vmul.f32 0.2, %v3692_v42  ;;  %v5646_v58 = vmul.f32 0.2, %v5588_v31  ;;  %v3827_v49 = vmax.f32 %v3681_v13, %v3795_v10 }
 0x2d7   : > { %v5675_v53 = vmax.f32 %v5577_v41, %v5643_v54  ;;  %v3796_v7 = vmul.f32 0.2, %v3684_v1  ;;  %v5644_v2 = vmul.f32 0.2, %v5580_v3  ;;  %v11606_v8 = vmax.f32 %v11420_v23, %v3829_v61 }
 0x2d8   : > { %v3830_v59 = vmax.f32 %v3692_v42, %v3798_v40  ;;  %v5678_v34 = vmax.f32 %v5588_v31, %v5646_v58  ;;  %v11609_v50 = vmax.f32 %v11423_v24, %v3827_v49  ;;  %v9449_v25 = vpop.f32.mrb[136].mxu1  ;;  %v9647_v4 = vpop.f32.mrb[248].mxu0  ;;  %v6024_v49 = vld [vmem:[%s12766_s5] sm:$0xff] }
 0x2d9   : > { %v3828_v0 = vmax.f32 %v3684_v1, %v3796_v7  ;;  %v5676_v30 = vmax.f32 %v5580_v3, %v5644_v2  ;;  %v3705_v13 = vadd.f32 %v11472_v37, %v9449_v25  ;;  %v5601_v41 = vadd.f32 %v11591_v36, %v9647_v4  ;;  %v3696_v52 = vpop.f32.mrb[137].mxu1  ;;  %v5592_v23 = vpop.f32.mrb[249].mxu0 }
 0x2da   : > { %v11612_v51 = vmax.f32 %v11428_v28, %v3830_v59  ;;  %v3697_v24 = vadd.f32 %v11472_v37, %v3696_v52  ;;  %v5593_v31 = vadd.f32 %v11591_v36, %v5592_v23  ;;  %v9450_v18 = vpop.f32.mrb[138].mxu1  ;;  %v9648_v22 = vpop.f32.mrb[250].mxu0 }
 0x2db   : > { %v11617_v46 = vmax.f32 %v11433_v12, %v3828_v0  ;;  %v5697_v42 = vpack.c.bf16 %v5676_v30, %v5675_v53  ;;  %v3801_v10 = vmul.f32 0.2, %v3705_v13  ;;  %v5649_v28 = vmul.f32 0.2, %v5601_v41  ;;  %v3699_v3 = vpop.f32.mrb[139].mxu1  ;;  %v5595_v61 = vpop.f32.mrb[251].mxu0 }
 0x2dc   : > { %9678 = vmatmul.mubr.msk.bf16.gmra.mrb[240].mxu1 %vm785_vm2, %v5696_v63  ;;  %v5698_v63 = vpack.c.bf16 %v5678_v34, %v5677_v62  ;;  %v3708_v54 = vadd.f32 %v11472_v37, %v9450_v18  ;;  %v5604_v1 = vadd.f32 %v11591_v36, %v9648_v22  ;;  %v3799_v62 = vmul.f32 0.2, %v3697_v24  ;;  %v6028_v53 = vld [vmem:[%s12766_s5 + $0x20] sm:$0xff] }
 0x2dd   : > { %v5647_v40 = vmul.f32 0.2, %v5593_v31  ;;  %v3700_v12 = vadd.f32 %v11472_v37, %v3699_v3  ;;  %v5596_v58 = vadd.f32 %v11591_v36, %v5595_v61  ;;  %9681 = vmatprep.mubr.msk.bf16.mxu1 %vm785_vm2, %v5697_v42  ;;  %v3833_v7 = vmax.f32 %v3705_v13, %v3801_v10 }
 0x2de   : > { %v5681_v2 = vmax.f32 %v5601_v41, %v5649_v28  ;;  %v3802_v59 = vmul.f32 0.2, %v3708_v54  ;;  %v5650_v34 = vmul.f32 0.2, %v5604_v1  ;;  %v3831_v0 = vmax.f32 %v3697_v24, %v3799_v62 }
 0x2df   : > { %v5679_v30 = vmax.f32 %v5593_v31, %v5647_v40  ;;  %v3800_v25 = vmul.f32 0.2, %v3700_v12  ;;  %v5648_v4 = vmul.f32 0.2, %v5596_v58  ;;  %v11634_v52 = vmax.f32 %v11442_v19, %v3833_v7 }
 0x2e0   : > { %v3834_v23 = vmax.f32 %v3708_v54, %v3802_v59  ;;  %v5682_v42 = vmax.f32 %v5604_v1, %v5650_v34  ;;  %v8737_v18 = vcombine.low %v6024_v49, %v6028_v53  ;;  %v11637_v22 = vmax.f32 %v11445_v48, %v3831_v0  ;;  %v9453_v41 = vpop.f32.mrb[140].mxu1  ;;  %v9651_v10 = vpop.f32.mrb[252].mxu0 }
 0x2e1   : > { %v3832_v3 = vmax.f32 %v3700_v12, %v3800_v25  ;;  %v5680_v13 = vmax.f32 %v5596_v58, %v5648_v4  ;;  %v8738_v28 = vcombine.high %v6024_v49, %v6028_v53  ;;  %v3721_v31 = vadd.f32 %v11472_v37, %v9453_v41  ;;  %v3712_v61 = vpop.f32.mrb[141].mxu1  ;;  %v5608_v54 = vpop.f32.mrb[253].mxu0  ;;  %v6025_v25 = vld [vmem:[%s12766_s5 + $0x8] sm:$0xff] }
 0x2e2   : > { %v5700_v24 = vpack.c.bf16 %v5682_v42, %v5681_v2  ;;  %v5617_v19 = vadd.f32 %v11591_v36, %v9651_v10  ;;  %v3713_v62 = vadd.f32 %v11472_v37, %v3712_v61  ;;  %v5609_v40 = vadd.f32 %v11591_v36, %v5608_v54  ;;  %v9454_v12 = vpop.f32.mrb[142].mxu1  ;;  %v9652_v58 = vpop.f32.mrb[254].mxu0  ;;  %v6029_v4 = vld [vmem:[%s12766_s5 + $0x28] sm:$0xff]  ;;  %v6036_v61 = vld [vmem:[%s12766_s5 + $0x60] sm:$0xff] }
 0x2e3   : > { %v11645_v1 = vmax.f32 %v11455_v29, %v3832_v3  ;;  %v5699_v48 = vpack.c.bf16 %v5680_v13, %v5679_v30  ;;  %6450 = vmatprep.subr.bf16.mxu0 %v8738_v28  ;;  %v3724_v53 = vadd.f32 %v11472_v37, %v9454_v12  ;;  %v5620_v7 = vadd.f32 %v11591_v36, %v9652_v58  ;;  %v3715_v2 = vpop.f32.mrb[143].mxu1  ;;  %v5611_v59 = vpop.f32.mrb[255].mxu0  ;;  %v6032_v28 = vld [vmem:[%s12766_s5 + $0x40] sm:$0xff] }
 0x2e4   : > { %9682 = vmatmul.mubr.msk.bf16.gmra.mrb[244].mxu1 %vm785_vm2, %v5698_v63  ;;  %v11640_v63 = vmax.f32 %v11450_v21, %v3834_v23  ;;  %v3805_v21 = vmul.f32 0.2, %v3721_v31  ;;  %v5653_v49 = vmul.f32 0.2, %v5617_v19  ;;  %6451 = vmatpush1.bf16.msra.mxu0 %v8737_v18  ;;  %v3803_v34 = vmul.f32 0.2, %v3713_v62 }
 0x2e5   : > { %v5651_v29 = vmul.f32 0.2, %v5609_v40  ;;  %v3716_v0 = vadd.f32 %v11472_v37, %v3715_v2  ;;  %v5612_v30 = vadd.f32 %v11591_v36, %v5611_v59  ;;  %9685 = vmatprep.mubr.msk.bf16.mxu1 %vm785_vm2, %v5699_v48  ;;  %v3806_v3 = vmul.f32 0.2, %v3724_v53 }
 0x2e6   : > { %v3837_v23 = vmax.f32 %v3721_v31, %v3805_v21  ;;  %v5685_v42 = vmax.f32 %v5617_v19, %v5653_v49  ;;  %v5654_v18 = vmul.f32 0.2, %v5620_v7  ;;  %v3835_v13 = vmax.f32 %v3713_v62, %v3803_v34  ;;  %v6033_v21 = vld [vmem:[%s12766_s5 + $0x48] sm:$0xff] }
 0x2e7   : > { %v5683_v41 = vmax.f32 %v5609_v40, %v5651_v29  ;;  %v3804_v10 = vmul.f32 0.2, %v3716_v0  ;;  %v5652_v36 = vmul.f32 0.2, %v5612_v30  ;;  %v3838_v31 = vmax.f32 %v3724_v53, %v3806_v3  ;;  %v6037_v49 = vld [vmem:[%s12766_s5 + $0x68] sm:$0xff] }
 0x2e8   : > { %v11668_v54 = vmax.f32 %v11464_v6, %v3837_v23  ;;  %v5686_v19 = vmax.f32 %v5620_v7, %v5654_v18  ;;  %v8739_v48 = vcombine.low %v6025_v25, %v6029_v4  ;;  %v9457_v12 = vpop.f32.mrb[144].mxu1  ;;  %v8740_v58 = vcombine.high %v6025_v25, %v6029_v4  ;;  %v6040_v25 = vld [vmem:[%s12766_s5 + $0x80] sm:$0xff]  ;;  %v6041_v4 = vld [vmem:[%s12766_s5 + $0x88] sm:$0xff] }
 0x2e9   : > { %v3836_v62 = vmax.f32 %v3716_v0, %v3804_v10  ;;  %v5684_v40 = vmax.f32 %v5612_v30, %v5652_v36  ;;  %v11680_v6 = vmax.f32 %v11477_v47, %v3838_v31  ;;  %v3737_v7 = vadd.f32 %v11472_v37, %v9457_v12  ;;  %v6044_v47 = vld [vmem:[%s12766_s5 + $0xa0] sm:$0xff] }
 0x2ea   : > { %v5702_v53 = vpack.c.bf16 %v5686_v19, %v5685_v42  ;;  %v8745_v2 = vcombine.low %v6032_v28, %v6036_v61  ;;  %6643 = vmatprep.subr.bf16.mxu1 %v8740_v58  ;;  %v8746_v30 = vcombine.high %v6032_v28, %v6036_v61  ;;  %v8747_v3 = vcombine.low %v6033_v21, %v6037_v49 }
 0x2eb   : > { %v11684_v59 = vmax.f32 %v11482_v26, %v3836_v62  ;;  %v5701_v34 = vpack.c.bf16 %v5684_v40, %v5683_v41  ;;  %v3809_v26 = vmul.f32 0.2, %v3737_v7  ;;  %6644 = vmatpush1.bf16.msra.mxu1 %v8739_v48  ;;  %v8748_v18 = vcombine.high %v6033_v21, %v6037_v49 }
 0x2ec   : > { %9686 = vmatmul.mubr.msk.bf16.gmra.mrb[248].mxu1 %vm785_vm2, %v5700_v24  ;;  %v11671_v24 = vmax.f32 %v11467_v16, %v3835_v13  ;;  %v3728_v16 = vpop.f32.mrb[145].mxu1  ;;  %v6045_v13 = vld [vmem:[%s12766_s5 + $0xa8] sm:$0xff]  ;;  %6452 = vmatprep.subr.bf16.mxu0 %v8746_v30  ;;  %v8754_v36 = vcombine.high %v6040_v25, %v6044_v47  ;;  %v8753_v62 = vcombine.low %v6040_v25, %v6044_v47 }
 0x2ed   : > { %v3729_v29 = vadd.f32 %v11472_v37, %v3728_v16  ;;  %v9458_v0 = vpop.f32.mrb[146].mxu1  ;;  %9689 = vmatprep.mubr.msk.bf16.mxu1 %vm785_vm2, %v5701_v34  ;;  %v3841_v28 = vmax.f32 %v3737_v7, %v3809_v26  ;;  %6645 = vmatprep.subr.bf16.mxu1 %v8748_v18  ;;  %v8756_v31 = vcombine.high %v6041_v4, %v6045_v13  ;;  %v6053_v26 = vld [vmem:[%s12766_s5 + $0xe8] sm:$0xff] }
 0x2ee   : > { %v3740_v23 = vadd.f32 %v11472_v37, %v9458_v0  ;;  %v3731_v42 = vpop.f32.mrb[147].mxu1  ;;  %6453 = vmatpush1.bf16.msra.mxu0 %v8745_v2  ;;  %v8755_v58 = vcombine.low %v6041_v4, %v6045_v13  ;;  %v6052_v0 = vld [vmem:[%s12766_s5 + $0xe0] sm:$0xff] }
 0x2ef   : > { %v3807_v41 = vmul.f32 0.2, %v3729_v29  ;;  %v3732_v10 = vadd.f32 %v11472_v37, %v3731_v42  ;;  %v11704_v40 = vmax.f32 %v11491_v38, %v3841_v28  ;;  %6646 = vmatpush1.bf16.msra.mxu1 %v8747_v3  ;;  %6454 = vmatprep.subr.bf16.mxu0 %v8754_v36 }
 0x2f0   : > { %v3810_v61 = vmul.f32 0.2, %v3740_v23  ;;  %6647 = vmatprep.subr.bf16.mxu1 %v8756_v31 }
 0x2f1   : > { %v3839_v19 = vmax.f32 %v3729_v29, %v3807_v41  ;;  %v3808_v48 = vmul.f32 0.2, %v3732_v10  ;;  %v9461_v7 = vpop.f32.mrb[148].mxu1 }
 0x2f2   : > { %v3842_v12 = vmax.f32 %v3740_v23, %v3810_v61  ;;  %v3753_v16 = vadd.f32 %v11472_v37, %v9461_v7  ;;  %v3744_v2 = vpop.f32.mrb[149].mxu1  ;;  %6455 = vmatpush1.bf16.msra.mxu0 %v8753_v62 }
 0x2f3   : > { %v11707_v21 = vmax.f32 %v11494_v27, %v3839_v19  ;;  %v3840_v49 = vmax.f32 %v3732_v10, %v3808_v48  ;;  %v3745_v38 = vadd.f32 %v11472_v37, %v3744_v2  ;;  %v9462_v29 = vpop.f32.mrb[150].mxu1  ;;  %v6048_v27 = vld [vmem:[%s12766_s5 + $0xc0] sm:$0xff]  ;;  %6648 = vmatpush1.bf16.msra.mxu1 %v8755_v58 }
 0x2f4   : > { %9690 = vmatmul.mubr.msk.bf16.gmra.mrb[252].mxu1 %vm785_vm2, %v5702_v53  ;;  %v11710_v53 = vmax.f32 %v11499_v57, %v3842_v12  ;;  %v6049_v57 = vld [vmem:[%s12766_s5 + $0xc8] sm:$0xff]  ;;  %v3813_v30 = vmul.f32 0.2, %v3753_v16  ;;  %v3747_v25 = vpop.f32.mrb[151].mxu1  ;;  %v8761_v47 = vcombine.low %v6048_v27, %v6052_v0  ;;  %v8762_v4 = vcombine.high %v6048_v27, %v6052_v0 }
 0x2f5   : > { %v11714_v34 = vmax.f32 %v11504_v20, %v3840_v49  ;;  %v3756_v20 = vadd.f32 %v11472_v37, %v9462_v29  ;;  %v3811_v23 = vmul.f32 0.2, %v3745_v38  ;;  %v3748_v42 = vadd.f32 %v11472_v37, %v3747_v25  ;;  %v6061_v0 = vld [vmem:[%s12766_s5 + $0x128] sm:$0xff] }
 0x2f6   : > { %v8763_v3 = vcombine.low %v6049_v57, %v6053_v26  ;;  %v8764_v18 = vcombine.high %v6049_v57, %v6053_v26  ;;  %v3845_v13 = vmax.f32 %v3753_v16, %v3813_v30  ;;  %6456 = vmatprep.subr.bf16.mxu0 %v8762_v4  ;;  %v6056_v16 = vld [vmem:[%s12766_s5 + $0x100] sm:$0xff] }
 0x2f7   : > { %v3814_v41 = vmul.f32 0.2, %v3756_v20  ;;  %v3843_v10 = vmax.f32 %v3745_v38, %v3811_v23  ;;  %v3812_v36 = vmul.f32 0.2, %v3748_v42  ;;  %6457 = vmatpush1.bf16.msra.mxu0 %v8761_v47 }
 0x2f8   : > { %6649 = vmatprep.subr.bf16.mxu1 %v8764_v18  ;;  %v11732_v28 = vmax.f32 %v11513_v44, %v3845_v13 }
 0x2f9   : > { %v3846_v61 = vmax.f32 %v3756_v20, %v3814_v41  ;;  %6650 = vmatpush1.bf16.msra.mxu1 %v8763_v3  ;;  %v11735_v31 = vmax.f32 %v11516_v5, %v3843_v10  ;;  %v3844_v19 = vmax.f32 %v3748_v42, %v3812_v36  ;;  %v6060_v5 = vld [vmem:[%s12766_s5 + $0x120] sm:$0xff] }
 0x2fa   : > { %v9465_v48 = vpop.f32.mrb[152].mxu1  ;;  %v8769_v29 = vcombine.low %v6056_v16, %v6060_v5  ;;  %v8770_v27 = vcombine.high %v6056_v16, %v6060_v5  ;;  %v6069_v5 = vld [vmem:[%s12766_s5 + $0x168] sm:$0xff] }
 0x2fb   : > { %v11738_v62 = vmax.f32 %v11521_v15, %v3846_v61  ;;  %v3769_v12 = vadd.f32 %v11472_v37, %v9465_v48  ;;  %v3760_v58 = vpop.f32.mrb[153].mxu1  ;;  %v11742_v49 = vmax.f32 %v11526_v45, %v3844_v19  ;;  %v6057_v15 = vld [vmem:[%s12766_s5 + $0x108] sm:$0xff] }
 0x2fc   : > { %v3761_v7 = vadd.f32 %v11472_v37, %v3760_v58  ;;  %v9466_v44 = vpop.f32.mrb[154].mxu1  ;;  %v8771_v20 = vcombine.low %v6057_v15, %v6061_v0  ;;  %v8772_v25 = vcombine.high %v6057_v15, %v6061_v0  ;;  %6458 = vmatprep.subr.bf16.mxu0 %v8770_v27 }
 0x2fd   : > { %v3817_v2 = vmul.f32 0.2, %v3769_v12  ;;  %v3772_v38 = vadd.f32 %v11472_v37, %v9466_v44  ;;  %v3763_v45 = vpop.f32.mrb[155].mxu1  ;;  %6459 = vmatpush1.bf16.msra.mxu0 %v8769_v29 }
 0x2fe   : > { %v3815_v57 = vmul.f32 0.2, %v3761_v7  ;;  %v3764_v30 = vadd.f32 %v11472_v37, %v3763_v45  ;;  %6651 = vmatprep.subr.bf16.mxu1 %v8772_v25 }
 0x2ff   : > { %v3849_v47 = vmax.f32 %v3769_v12, %v3817_v2  ;;  %v3818_v4 = vmul.f32 0.2, %v3772_v38  ;;  %6652 = vmatpush1.bf16.msra.mxu1 %v8771_v20  ;;  %v6064_v12 = vld [vmem:[%s12766_s5 + $0x140] sm:$0xff] }
 0x300   : > { %v3847_v26 = vmax.f32 %v3761_v7, %v3815_v57  ;;  %v3816_v23 = vmul.f32 0.2, %v3764_v30 }
 0x301   : > { %v11760_v42 = vmax.f32 %v11535_v55, %v3849_v47  ;;  %v3850_v3 = vmax.f32 %v3772_v38, %v3818_v4 }
 0x302   : > { %v11763_v18 = vmax.f32 %v11538_v35, %v3847_v26  ;;  %v3848_v13 = vmax.f32 %v3764_v30, %v3816_v23  ;;  %v6068_v35 = vld [vmem:[%s12766_s5 + $0x160] sm:$0xff] }
 0x303   : > { %v9469_v41 = vpop.f32.mrb[156].mxu1  ;;  %v11766_v10 = vmax.f32 %v11543_v56, %v3850_v3  ;;  %v6065_v56 = vld [vmem:[%s12766_s5 + $0x148] sm:$0xff]  ;;  %v8777_v44 = vcombine.low %v6064_v12, %v6068_v35  ;;  %v8778_v16 = vcombine.high %v6064_v12, %v6068_v35 }
 0x304   : > { %v3785_v36 = vadd.f32 %v11472_v37, %v9469_v41  ;;  %v3776_v61 = vpop.f32.mrb[157].mxu1  ;;  %v11770_v19 = vmax.f32 %v11548_v43, %v3848_v13  ;;  %v8779_v38 = vcombine.low %v6065_v56, %v6069_v5  ;;  %v8780_v45 = vcombine.high %v6065_v56, %v6069_v5  ;;  %v6077_v35 = vld [vmem:[%s12766_s5 + $0x1a8] sm:$0xff] }
 0x305   : > { %v3777_v48 = vadd.f32 %v11472_v37, %v3776_v61  ;;  %v9470_v55 = vpop.f32.mrb[158].mxu1  ;;  %6460 = vmatprep.subr.bf16.mxu0 %v8778_v16 }
 0x306   : > { %v3821_v58 = vmul.f32 0.2, %v3785_v36  ;;  %v3788_v7 = vadd.f32 %v11472_v37, %v9470_v55  ;;  %v3779_v43 = vpop.f32.mrb[159].mxu1  ;;  %6653 = vmatprep.subr.bf16.mxu1 %v8780_v45  ;;  %6461 = vmatpush1.bf16.msra.mxu0 %v8777_v44  ;;  %v6080_v45 = vld [vmem:[%s12766_s5 + $0x1c0] sm:$0xff] }
 0x307   : > { %v3819_v15 = vmul.f32 0.2, %v3777_v48  ;;  %v3780_v2 = vadd.f32 %v11472_v37, %v3779_v43  ;;  %6654 = vmatpush1.bf16.msra.mxu1 %v8779_v38 }
 0x308   : > { %v3853_v29 = vmax.f32 %v3785_v36, %v3821_v58  ;;  %v3822_v27 = vmul.f32 0.2, %v3788_v7  ;;  %v6072_v36 = vld [vmem:[%s12766_s5 + $0x180] sm:$0xff] }
 0x309   : > { %v3851_v0 = vmax.f32 %v3777_v48, %v3819_v15  ;;  %v3820_v57 = vmul.f32 0.2, %v3780_v2 }
 0x30a   : > { %v11788_v30 = vmax.f32 %v11557_v9, %v3853_v29  ;;  %v3854_v20 = vmax.f32 %v3788_v7, %v3822_v27  ;;  %v6081_v29 = vld [vmem:[%s12766_s5 + $0x1c8] sm:$0xff] }
 0x30b   : > { %v11791_v25 = vmax.f32 %v11560_v17, %v3851_v0  ;;  %v3852_v47 = vmax.f32 %v3780_v2, %v3820_v57  ;;  %v6076_v17 = vld [vmem:[%s12766_s5 + $0x1a0] sm:$0xff] }
 0x30c   : > { %v9515_v4 = vpop.f32.mrb[160].mxu1  ;;  %v11794_v26 = vmax.f32 %v11565_v32, %v3854_v20  ;;  %v6073_v32 = vld [vmem:[%s12766_s5 + $0x188] sm:$0xff]  ;;  %v8785_v55 = vcombine.low %v6072_v36, %v6076_v17  ;;  %v8786_v12 = vcombine.high %v6072_v36, %v6076_v17 }
 0x30d   : > { %v4380_v23 = vadd.f32 %v11472_v37, %v9515_v4  ;;  %v4371_v3 = vpop.f32.mrb[161].mxu1  ;;  %v11798_v13 = vmax.f32 %v11570_v14, %v3852_v47  ;;  %v8787_v7 = vcombine.low %v6073_v32, %v6077_v35  ;;  %v8788_v43 = vcombine.high %v6073_v32, %v6077_v35  ;;  %v6085_v20 = vld [vmem:[%s12766_s5 + $0x1e8] sm:$0xff]  ;;  %v11839_v4 = vld [vmem:[%s12765_s4] ss:$0 sm:$0xff] }
 0x30e   : > { %v4372_v41 = vadd.f32 %v11472_v37, %v4371_v3  ;;  %v9516_v9 = vpop.f32.mrb[162].mxu1  ;;  %6462 = vmatprep.subr.bf16.mxu0 %v8786_v12  ;;  %v8796_v32 = vcombine.high %v6081_v29, %v6085_v20 }
 0x30f   : > { %v4500_v61 = vmul.f32 0.2, %v4380_v23  ;;  %v4383_v48 = vadd.f32 %v11472_v37, %v9516_v9  ;;  %v4374_v14 = vpop.f32.mrb[163].mxu1  ;;  %6655 = vmatprep.subr.bf16.mxu1 %v8788_v43  ;;  %6463 = vmatpush1.bf16.msra.mxu0 %v8785_v55 }
 0x310   : > { %v4498_v56 = vmul.f32 0.2, %v4372_v41  ;;  %v4375_v58 = vadd.f32 %v11472_v37, %v4374_v14  ;;  %6656 = vmatpush1.bf16.msra.mxu1 %v8787_v7  ;;  %v6084_v37 = vld [vmem:[%s12766_s5 + $0x1e0] sm:$0xff] }
 0x311   : > { %v4532_v44 = vmax.f32 %v4380_v23, %v4500_v61  ;;  %v4501_v16 = vmul.f32 0.2, %v4383_v48  ;;  %v8794_v57 = vcombine.high %v6080_v45, %v6084_v37  ;;  %6657 = vmatprep.subr.bf16.mxu1 %v8796_v32 }
 0x312   : > { %v4530_v5 = vmax.f32 %v4372_v41, %v4498_v56  ;;  %v4499_v15 = vmul.f32 0.2, %v4375_v58  ;;  %v8795_v41 = vcombine.low %v6081_v29, %v6085_v20  ;;  %v9900_v56 = vmov 0  }
 0x313   : > { %v11816_v2 = vmax.f32 %v11579_v39, %v4532_v44  ;;  %v4533_v38 = vmax.f32 %v4383_v48, %v4501_v16  ;;  %6464 = vmatprep.subr.bf16.mxu0 %v8794_v57  ;;  %6482 = vmatprep.mubr.bf16.mxu0 %v9900_v56 }
 0x314   : > { %v11828_v27 = vmax.f32 %v11582_v33, %v4530_v5  ;;  %v4531_v0 = vmax.f32 %v4375_v58, %v4499_v15  ;;  %v8793_v33 = vcombine.low %v6080_v45, %v6084_v37  ;;  %6658 = vmatpush1.bf16.msra.mxu1 %v8795_v41  ;;  %6675 = vmatprep.mubr.bf16.mxu1 %v9900_v56 }
 0x315   : > { %v11834_v47 = vmax.f32 %v11585_v11, %v4533_v38 }
 0x316   : > { %v9519_v39 = vpop.f32.mrb[164].mxu1  ;;  %v11843_v9 = vmax.f32 %v11595_v60, %v4531_v0  ;;  %6465 = vmatpush1.bf16.msra.mxu0 %v8793_v33 }
 0x317   : > { %v4396_v23 = vadd.f32 %v11839_v4, %v9519_v39  ;;  %v4387_v3 = vpop.f32.mrb[165].mxu1 }
 0x318   : > { %v4388_v36 = vadd.f32 %v11839_v4, %v4387_v3  ;;  %v9520_v17 = vpop.f32.mrb[166].mxu1 }
 0x319   : > { %v4504_v11 = vmul.f32 0.2, %v4396_v23  ;;  %v4399_v61 = vadd.f32 %v11839_v4, %v9520_v17  ;;  %v4390_v48 = vpop.f32.mrb[167].mxu1  ;;  %v11888_v17 = vld [vmem:[%s12766_s5 + $0x38] sm:$0xff] }
 0x31a   : > { %v4502_v14 = vmul.f32 0.2, %v4388_v36  ;;  %v4391_v55 = vadd.f32 %v11839_v4, %v4390_v48 }
 0x31b   : > { %v4536_v12 = vmax.f32 %v4396_v23, %v4504_v11  ;;  %v4505_v35 = vmul.f32 0.2, %v4399_v61  ;;  %v11879_v23 = vld [vmem:[%s12766_s5 + $0x18] sm:$0xff] }
 0x31c   : > { %v4534_v60 = vmax.f32 %v4388_v36, %v4502_v14  ;;  %v4503_v58 = vmul.f32 0.2, %v4391_v55  ;;  %v8744_v48 = vcombine.high %v11879_v23, %v11888_v17 }
 0x31d   : > { %v11851_v7 = vmax.f32 %v11606_v8, %v4536_v12  ;;  %v4537_v43 = vmax.f32 %v4399_v61, %v4505_v35  ;;  %v8743_v61 = vcombine.low %v11879_v23, %v11888_v17 }
 0x31e   : > { %v11854_v44 = vmax.f32 %v11609_v50, %v4534_v60  ;;  %v4535_v16 = vmax.f32 %v4391_v55, %v4503_v58  ;;  %v9523_v5 = vpop.f32.mrb[168].mxu1  ;;  %7029 = vmatprep.subr.bf16.mxu1 %v8744_v48 }
 0x31f   : > { %v11857_v15 = vmax.f32 %v11612_v51, %v4537_v43  ;;  %v4412_v38 = vadd.f32 %v11839_v4, %v9523_v5  ;;  %v4403_v45 = vpop.f32.mrb[169].mxu1  ;;  %v11869_v51 = vld [vmem:[%s12766_s5 + $0x10] sm:$0xff] }
 0x320   : > { %v11861_v37 = vmax.f32 %v11617_v46, %v4535_v16  ;;  %v4404_v29 = vadd.f32 %v11839_v4, %v4403_v45  ;;  %v9524_v0 = vpop.f32.mrb[170].mxu1  ;;  %v11874_v46 = vld [vmem:[%s12766_s5 + $0x30] sm:$0xff] }
 0x321   : > { %v4508_v8 = vmul.f32 0.2, %v4412_v38  ;;  %v4415_v39 = vadd.f32 %v11839_v4, %v9524_v0  ;;  %v4406_v57 = vpop.f32.mrb[171].mxu1  ;;  %v8741_v41 = vcombine.low %v11869_v51, %v11874_v46  ;;  %v8742_v36 = vcombine.high %v11869_v51, %v11874_v46 }
 0x322   : > { %v4506_v50 = vmul.f32 0.2, %v4404_v29  ;;  %v4407_v20 = vadd.f32 %v11839_v4, %v4406_v57 }
 0x323   : > { %v4540_v3 = vmax.f32 %v4412_v38, %v4508_v8  ;;  %v4509_v33 = vmul.f32 0.2, %v4415_v39  ;;  %6836 = vmatprep.subr.bf16.mxu0 %v8742_v36 }
 0x324   : > { %v4538_v32 = vmax.f32 %v4404_v29, %v4506_v50  ;;  %v4507_v11 = vmul.f32 0.2, %v4407_v20 }
 0x325   : > { %v11895_v14 = vmax.f32 %v11634_v52, %v4540_v3  ;;  %v4541_v55 = vmax.f32 %v4415_v39, %v4509_v33 }
 0x326   : > { %v11898_v12 = vmax.f32 %v11637_v22, %v4538_v32  ;;  %v4539_v35 = vmax.f32 %v4407_v20, %v4507_v11  ;;  %v9527_v60 = vpop.f32.mrb[172].mxu1 }
 0x327   : > { %v11901_v58 = vmax.f32 %v11640_v63, %v4541_v55  ;;  %v4428_v43 = vadd.f32 %v11839_v4, %v9527_v60  ;;  %v4419_v16 = vpop.f32.mrb[173].mxu1 }
 0x328   : > { %v11905_v5 = vmax.f32 %v11645_v1, %v4539_v35  ;;  %v4420_v52 = vadd.f32 %v11839_v4, %v4419_v16  ;;  %v9528_v38 = vpop.f32.mrb[174].mxu1 }
 0x329   : > { %v4512_v45 = vmul.f32 0.2, %v4428_v43  ;;  %v4431_v29 = vadd.f32 %v11839_v4, %v9528_v38  ;;  %v4422_v22 = vpop.f32.mrb[175].mxu1 }
 0x32a   : > { %v4510_v0 = vmul.f32 0.2, %v4420_v52  ;;  %v4423_v8 = vadd.f32 %v11839_v4, %v4422_v22 }
 0x32b   : > { %v4544_v39 = vmax.f32 %v4428_v43, %v4512_v45  ;;  %v4513_v57 = vmul.f32 0.2, %v4431_v29 }
 0x32c   : > { %v4542_v63 = vmax.f32 %v4420_v52, %v4510_v0  ;;  %v4511_v50 = vmul.f32 0.2, %v4423_v8 }
 0x32d   : > { %v11911_v20 = vmax.f32 %v11668_v54, %v4544_v39  ;;  %v4545_v3 = vmax.f32 %v4431_v29, %v4513_v57 }
 0x32e   : > { %v11914_v1 = vmax.f32 %v11671_v24, %v4542_v63  ;;  %v4543_v33 = vmax.f32 %v4423_v8, %v4511_v50 }
 0x32f   : > { %v9531_v36 = vpop.f32.mrb[176].mxu1  ;;  %v11917_v32 = vmax.f32 %v11680_v6, %v4545_v3 }
 0x330   : > { %v4444_v11 = vadd.f32 %v11839_v4, %v9531_v36  ;;  %v4435_v48 = vpop.f32.mrb[177].mxu1  ;;  %v11921_v55 = vmax.f32 %v11684_v59, %v4543_v33 }
 0x331   : > { %v4436_v35 = vadd.f32 %v11839_v4, %v4435_v48  ;;  %v9532_v60 = vpop.f32.mrb[178].mxu1 }
 0x332   : > { %v4516_v54 = vmul.f32 0.2, %v4444_v11  ;;  %v4447_v43 = vadd.f32 %v11839_v4, %v9532_v60  ;;  %v4438_v16 = vpop.f32.mrb[179].mxu1 }
 0x333   : > { %v4514_v24 = vmul.f32 0.2, %v4436_v35  ;;  %v4439_v52 = vadd.f32 %v11839_v4, %v4438_v16 }
 0x334   : > { %v4548_v38 = vmax.f32 %v4444_v11, %v4516_v54  ;;  %v4517_v45 = vmul.f32 0.2, %v4447_v43 }
 0x335   : > { %v4546_v6 = vmax.f32 %v4436_v35, %v4514_v24  ;;  %v4515_v29 = vmul.f32 0.2, %v4439_v52 }
 0x336   : > { %v11927_v22 = vmax.f32 %v11704_v40, %v4548_v38  ;;  %v4549_v0 = vmax.f32 %v4447_v43, %v4517_v45 }
 0x337   : > { %v11930_v59 = vmax.f32 %v11707_v21, %v4546_v6  ;;  %v4547_v8 = vmax.f32 %v4439_v52, %v4515_v29  ;;  %v9535_v39 = vpop.f32.mrb[180].mxu1 }
 0x338   : > { %v11933_v57 = vmax.f32 %v11710_v53, %v4549_v0  ;;  %v4460_v63 = vadd.f32 %v11839_v4, %v9535_v39  ;;  %v4451_v50 = vpop.f32.mrb[181].mxu1 }
 0x339   : > { %v11937_v3 = vmax.f32 %v11714_v34, %v4547_v8  ;;  %v4452_v33 = vadd.f32 %v11839_v4, %v4451_v50  ;;  %v9536_v36 = vpop.f32.mrb[182].mxu1 }
 0x33a   : > { %v4520_v40 = vmul.f32 0.2, %v4460_v63  ;;  %v4463_v11 = vadd.f32 %v11839_v4, %v9536_v36  ;;  %v4454_v48 = vpop.f32.mrb[183].mxu1 }
 0x33b   : > { %v4518_v21 = vmul.f32 0.2, %v4452_v33  ;;  %v4455_v35 = vadd.f32 %v11839_v4, %v4454_v48 }
 0x33c   : > { %v4552_v60 = vmax.f32 %v4460_v63, %v4520_v40  ;;  %v4521_v54 = vmul.f32 0.2, %v4463_v11 }
 0x33d   : > { %v4550_v53 = vmax.f32 %v4452_v33, %v4518_v21  ;;  %v4519_v43 = vmul.f32 0.2, %v4455_v35 }
 0x33e   : > { %v11943_v16 = vmax.f32 %v11732_v28, %v4552_v60  ;;  %v4553_v24 = vmax.f32 %v4463_v11, %v4521_v54 }
 0x33f   : > { %v11946_v34 = vmax.f32 %v11735_v31, %v4550_v53  ;;  %v4551_v52 = vmax.f32 %v4455_v35, %v4519_v43  ;;  %v9539_v38 = vpop.f32.mrb[184].mxu1 }
 0x340   : > { %v11949_v45 = vmax.f32 %v11738_v62, %v4553_v24  ;;  %v4476_v6 = vadd.f32 %v11839_v4, %v9539_v38  ;;  %v4467_v29 = vpop.f32.mrb[185].mxu1 }
 0x341   : > { %v11953_v0 = vmax.f32 %v11742_v49, %v4551_v52  ;;  %v4468_v8 = vadd.f32 %v11839_v4, %v4467_v29  ;;  %v9540_v39 = vpop.f32.mrb[186].mxu1 }
 0x342   : > { %v4524_v28 = vmul.f32 0.2, %v4476_v6  ;;  %v4479_v63 = vadd.f32 %v11839_v4, %v9540_v39  ;;  %v4470_v50 = vpop.f32.mrb[187].mxu1 }
 0x343   : > { %v4522_v31 = vmul.f32 0.2, %v4468_v8  ;;  %v4471_v33 = vadd.f32 %v11839_v4, %v4470_v50 }
 0x344   : > { %v4556_v36 = vmax.f32 %v4476_v6, %v4524_v28  ;;  %v4525_v40 = vmul.f32 0.2, %v4479_v63 }
 0x345   : > { %v4554_v62 = vmax.f32 %v4468_v8, %v4522_v31  ;;  %v4523_v11 = vmul.f32 0.2, %v4471_v33 }
 0x346   : > { %v11959_v48 = vmax.f32 %v11760_v42, %v4556_v36  ;;  %v4557_v21 = vmax.f32 %v4479_v63, %v4525_v40 }
 0x347   : > { %v11962_v49 = vmax.f32 %v11763_v18, %v4554_v62  ;;  %v4555_v35 = vmax.f32 %v4471_v33, %v4523_v11  ;;  %v9543_v60 = vpop.f32.mrb[188].mxu1 }
 0x348   : > { %v11965_v54 = vmax.f32 %v11766_v10, %v4557_v21  ;;  %v4492_v53 = vadd.f32 %v11839_v4, %v9543_v60  ;;  %v4483_v43 = vpop.f32.mrb[189].mxu1 }
 0x349   : > { %v11969_v24 = vmax.f32 %v11770_v19, %v4555_v35  ;;  %v4484_v52 = vadd.f32 %v11839_v4, %v4483_v43  ;;  %v9544_v38 = vpop.f32.mrb[190].mxu1 }
 0x34a   : > { %v4528_v42 = vmul.f32 0.2, %v4492_v53  ;;  %v4495_v6 = vadd.f32 %v11839_v4, %v9544_v38  ;;  %v4486_v29 = vpop.f32.mrb[191].mxu1 }
 0x34b   : > { %v4526_v18 = vmul.f32 0.2, %v4484_v52  ;;  %v4487_v8 = vadd.f32 %v11839_v4, %v4486_v29 }
 0x34c   : > { %v4560_v39 = vmax.f32 %v4492_v53, %v4528_v42  ;;  %v4529_v28 = vmul.f32 0.2, %v4495_v6 }
 0x34d   : > { %v4558_v10 = vmax.f32 %v4484_v52, %v4526_v18  ;;  %v4527_v63 = vmul.f32 0.2, %v4487_v8 }
 0x34e   : > { %v11975_v50 = vmax.f32 %v11788_v30, %v4560_v39  ;;  %v4561_v31 = vmax.f32 %v4495_v6, %v4529_v28 }
 0x34f   : > { %v11978_v19 = vmax.f32 %v11791_v25, %v4558_v10  ;;  %v4559_v33 = vmax.f32 %v4487_v8, %v4527_v63  ;;  %v9589_v36 = vpop.f32.mrb[192].mxu1 }
 0x350   : > { %v11981_v40 = vmax.f32 %v11794_v26, %v4561_v31  ;;  %v5087_v62 = vadd.f32 %v11839_v4, %v9589_v36  ;;  %v5078_v11 = vpop.f32.mrb[193].mxu1 }
 0x351   : > { %v11985_v21 = vmax.f32 %v11798_v13, %v4559_v33  ;;  %v5079_v35 = vadd.f32 %v11839_v4, %v5078_v11  ;;  %v9590_v60 = vpop.f32.mrb[194].mxu1 }
 0x352   : > { %v5207_v30 = vmul.f32 0.2, %v5087_v62  ;;  %v5090_v53 = vadd.f32 %v11839_v4, %v9590_v60  ;;  %v5081_v43 = vpop.f32.mrb[195].mxu1 }
 0x353   : > { %v5205_v25 = vmul.f32 0.2, %v5079_v35  ;;  %v5082_v52 = vadd.f32 %v11839_v4, %v5081_v43 }
 0x354   : > { %v5239_v38 = vmax.f32 %v5087_v62, %v5207_v30  ;;  %v5208_v42 = vmul.f32 0.2, %v5090_v53 }
 0x355   : > { %v5237_v26 = vmax.f32 %v5079_v35, %v5205_v25  ;;  %v5206_v6 = vmul.f32 0.2, %v5082_v52 }
 0x356   : > { %v11991_v29 = vmax.f32 %v11816_v2, %v5239_v38  ;;  %v5240_v18 = vmax.f32 %v5090_v53, %v5208_v42 }
 0x357   : > { %v11994_v13 = vmax.f32 %v11828_v27, %v5237_v26  ;;  %v5238_v8 = vmax.f32 %v5082_v52, %v5206_v6  ;;  %v9593_v39 = vpop.f32.mrb[196].mxu1 }
 0x358   : > { %v11997_v28 = vmax.f32 %v11834_v47, %v5240_v18  ;;  %v5103_v10 = vadd.f32 %v11839_v4, %v9593_v39  ;;  %v5094_v63 = vpop.f32.mrb[197].mxu1 }
 0x359   : > { %v12001_v31 = vmax.f32 %v11843_v9, %v5238_v8  ;;  %v5095_v33 = vadd.f32 %v11839_v4, %v5094_v63  ;;  %v9594_v36 = vpop.f32.mrb[198].mxu1 }
 0x35a   : > { %v5211_v2 = vmul.f32 0.2, %v5103_v10  ;;  %v5106_v62 = vadd.f32 %v11839_v4, %v9594_v36  ;;  %v5097_v11 = vpop.f32.mrb[199].mxu1 }
 0x35b   : > { %v5209_v27 = vmul.f32 0.2, %v5095_v33  ;;  %v5098_v35 = vadd.f32 %v11839_v4, %v5097_v11 }
 0x35c   : > { %v5243_v60 = vmax.f32 %v5103_v10, %v5211_v2  ;;  %v5212_v30 = vmul.f32 0.2, %v5106_v62 }
 0x35d   : > { %v5241_v47 = vmax.f32 %v5095_v33, %v5209_v27  ;;  %v5210_v53 = vmul.f32 0.2, %v5098_v35 }
 0x35e   : > { %v12007_v43 = vmax.f32 %v11851_v7, %v5243_v60  ;;  %v5244_v25 = vmax.f32 %v5106_v62, %v5212_v30 }
 0x35f   : > { %v12010_v9 = vmax.f32 %v11854_v44, %v5241_v47  ;;  %v5242_v52 = vmax.f32 %v5098_v35, %v5210_v53  ;;  %v9597_v38 = vpop.f32.mrb[200].mxu1 }
 0x360   : > { %v12013_v42 = vmax.f32 %v11857_v15, %v5244_v25  ;;  %v5119_v26 = vadd.f32 %v11839_v4, %v9597_v38  ;;  %v5110_v6 = vpop.f32.mrb[201].mxu1 }
 0x361   : > { %v12017_v18 = vmax.f32 %v11861_v37, %v5242_v52  ;;  %v5111_v8 = vadd.f32 %v11839_v4, %v5110_v6  ;;  %v9598_v39 = vpop.f32.mrb[202].mxu1 }
 0x362   : > { %v5215_v7 = vmul.f32 0.2, %v5119_v26  ;;  %v5122_v10 = vadd.f32 %v11839_v4, %v9598_v39  ;;  %v5113_v63 = vpop.f32.mrb[203].mxu1 }
 0x363   : > { %v5213_v44 = vmul.f32 0.2, %v5111_v8  ;;  %v5114_v33 = vadd.f32 %v11839_v4, %v5113_v63 }
 0x364   : > { %v5247_v36 = vmax.f32 %v5119_v26, %v5215_v7  ;;  %v5216_v2 = vmul.f32 0.2, %v5122_v10 }
 0x365   : > { %v5245_v15 = vmax.f32 %v5111_v8, %v5213_v44  ;;  %v5214_v62 = vmul.f32 0.2, %v5114_v33 }
 0x366   : > { %v12023_v11 = vmax.f32 %v11895_v14, %v5247_v36  ;;  %v5248_v27 = vmax.f32 %v5122_v10, %v5216_v2 }
 0x367   : > { %v12026_v37 = vmax.f32 %v11898_v12, %v5245_v15  ;;  %v5246_v35 = vmax.f32 %v5114_v33, %v5214_v62  ;;  %v9601_v60 = vpop.f32.mrb[204].mxu1 }
 0x368   : > { %v12029_v30 = vmax.f32 %v11901_v58, %v5248_v27  ;;  %v5135_v47 = vadd.f32 %v11839_v4, %v9601_v60  ;;  %v5126_v53 = vpop.f32.mrb[205].mxu1 }
 0x369   : > { %v12033_v25 = vmax.f32 %v11905_v5, %v5246_v35  ;;  %v5127_v52 = vadd.f32 %v11839_v4, %v5126_v53  ;;  %v9602_v38 = vpop.f32.mrb[206].mxu1 }
 0x36a   : > { %v5219_v14 = vmul.f32 0.2, %v5135_v47  ;;  %v5138_v26 = vadd.f32 %v11839_v4, %v9602_v38  ;;  %v5129_v6 = vpop.f32.mrb[207].mxu1 }
 0x36b   : > { %v5217_v12 = vmul.f32 0.2, %v5127_v52  ;;  %v5130_v8 = vadd.f32 %v11839_v4, %v5129_v6 }
 0x36c   : > { %v5251_v39 = vmax.f32 %v5135_v47, %v5219_v14  ;;  %v5220_v7 = vmul.f32 0.2, %v5138_v26 }
 0x36d   : > { %v5249_v58 = vmax.f32 %v5127_v52, %v5217_v12  ;;  %v5218_v10 = vmul.f32 0.2, %v5130_v8 }
 0x36e   : > { %v12039_v63 = vmax.f32 %v11911_v20, %v5251_v39  ;;  %v5252_v44 = vmax.f32 %v5138_v26, %v5220_v7 }
 0x36f   : > { %v12042_v5 = vmax.f32 %v11914_v1, %v5249_v58  ;;  %v5250_v33 = vmax.f32 %v5130_v8, %v5218_v10  ;;  %v9605_v36 = vpop.f32.mrb[208].mxu1 }
 0x370   : > { %v12045_v2 = vmax.f32 %v11917_v32, %v5252_v44  ;;  %v5151_v15 = vadd.f32 %v11839_v4, %v9605_v36  ;;  %v5142_v62 = vpop.f32.mrb[209].mxu1 }
 0x371   : > { %v12049_v27 = vmax.f32 %v11921_v55, %v5250_v33  ;;  %v5143_v35 = vadd.f32 %v11839_v4, %v5142_v62  ;;  %v9606_v60 = vpop.f32.mrb[210].mxu1 }
 0x372   : > { %v5223_v20 = vmul.f32 0.2, %v5151_v15  ;;  %v5154_v47 = vadd.f32 %v11839_v4, %v9606_v60  ;;  %v5145_v53 = vpop.f32.mrb[211].mxu1 }
 0x373   : > { %v5221_v1 = vmul.f32 0.2, %v5143_v35  ;;  %v5146_v52 = vadd.f32 %v11839_v4, %v5145_v53 }
 0x374   : > { %v5255_v38 = vmax.f32 %v5151_v15, %v5223_v20  ;;  %v5224_v14 = vmul.f32 0.2, %v5154_v47 }
 0x375   : > { %v5253_v32 = vmax.f32 %v5143_v35, %v5221_v1  ;;  %v5222_v26 = vmul.f32 0.2, %v5146_v52 }
 0x376   : > { %v12055_v6 = vmax.f32 %v11927_v22, %v5255_v38  ;;  %v5256_v12 = vmax.f32 %v5154_v47, %v5224_v14 }
 0x377   : > { %v12058_v55 = vmax.f32 %v11930_v59, %v5253_v32  ;;  %v5254_v8 = vmax.f32 %v5146_v52, %v5222_v26  ;;  %v9609_v39 = vpop.f32.mrb[212].mxu1 }
 0x378   : > { %v12061_v7 = vmax.f32 %v11933_v57, %v5256_v12  ;;  %v5167_v58 = vadd.f32 %v11839_v4, %v9609_v39  ;;  %v5158_v10 = vpop.f32.mrb[213].mxu1 }
 0x379   : > { %v12065_v44 = vmax.f32 %v11937_v3, %v5254_v8  ;;  %v5159_v33 = vadd.f32 %v11839_v4, %v5158_v10  ;;  %v9610_v36 = vpop.f32.mrb[214].mxu1 }
 0x37a   : > { %v5227_v22 = vmul.f32 0.2, %v5167_v58  ;;  %v5170_v15 = vadd.f32 %v11839_v4, %v9610_v36  ;;  %v5161_v62 = vpop.f32.mrb[215].mxu1 }
 0x37b   : > { %v5225_v59 = vmul.f32 0.2, %v5159_v33  ;;  %v5162_v35 = vadd.f32 %v11839_v4, %v5161_v62 }
 0x37c   : > { %v5259_v60 = vmax.f32 %v5167_v58, %v5227_v22  ;;  %v5228_v20 = vmul.f32 0.2, %v5170_v15 }
 0x37d   : > { %v5257_v57 = vmax.f32 %v5159_v33, %v5225_v59  ;;  %v5226_v47 = vmul.f32 0.2, %v5162_v35 }
 0x37e   : > { %v12071_v53 = vmax.f32 %v11943_v16, %v5259_v60  ;;  %v5260_v1 = vmax.f32 %v5170_v15, %v5228_v20 }
 0x37f   : > { %v12074_v3 = vmax.f32 %v11946_v34, %v5257_v57  ;;  %v5258_v52 = vmax.f32 %v5162_v35, %v5226_v47  ;;  %v9613_v38 = vpop.f32.mrb[216].mxu1 }
 0x380   : > { %v12077_v14 = vmax.f32 %v11949_v45, %v5260_v1  ;;  %v5183_v32 = vadd.f32 %v11839_v4, %v9613_v38  ;;  %v5174_v26 = vpop.f32.mrb[217].mxu1 }
 0x381   : > { %v12081_v12 = vmax.f32 %v11953_v0, %v5258_v52  ;;  %v5175_v8 = vadd.f32 %v11839_v4, %v5174_v26  ;;  %v9614_v39 = vpop.f32.mrb[218].mxu1 }
 0x382   : > { %v5231_v16 = vmul.f32 0.2, %v5183_v32  ;;  %v5186_v58 = vadd.f32 %v11839_v4, %v9614_v39  ;;  %v5177_v10 = vpop.f32.mrb[219].mxu1 }
 0x383   : > { %v5229_v34 = vmul.f32 0.2, %v5175_v8  ;;  %v5178_v33 = vadd.f32 %v11839_v4, %v5177_v10 }
 0x384   : > { %v5263_v36 = vmax.f32 %v5183_v32, %v5231_v16  ;;  %v5232_v22 = vmul.f32 0.2, %v5186_v58 }
 0x385   : > { %v5261_v45 = vmax.f32 %v5175_v8, %v5229_v34  ;;  %v5230_v15 = vmul.f32 0.2, %v5178_v33 }
 0x386   : > { %v12087_v62 = vmax.f32 %v11959_v48, %v5263_v36  ;;  %v5264_v59 = vmax.f32 %v5186_v58, %v5232_v22 }
 0x387   : > { %v12090_v0 = vmax.f32 %v11962_v49, %v5261_v45  ;;  %v5262_v35 = vmax.f32 %v5178_v33, %v5230_v15  ;;  %v9617_v60 = vpop.f32.mrb[220].mxu1 }
 0x388   : > { %v12093_v20 = vmax.f32 %v11965_v54, %v5264_v59  ;;  %v5199_v57 = vadd.f32 %v11839_v4, %v9617_v60  ;;  %v5190_v47 = vpop.f32.mrb[221].mxu1 }
 0x389   : > { %v12097_v1 = vmax.f32 %v11969_v24, %v5262_v35  ;;  %v5191_v52 = vadd.f32 %v11839_v4, %v5190_v47  ;;  %v9618_v38 = vpop.f32.mrb[222].mxu1 }
 0x38a   : > { %v5235_v48 = vmul.f32 0.2, %v5199_v57  ;;  %v5202_v32 = vadd.f32 %v11839_v4, %v9618_v38  ;;  %v5193_v26 = vpop.f32.mrb[223].mxu1 }
 0x38b   : > { %v5233_v49 = vmul.f32 0.2, %v5191_v52  ;;  %v5194_v8 = vadd.f32 %v11839_v4, %v5193_v26 }
 0x38c   : > { %v5267_v39 = vmax.f32 %v5199_v57, %v5235_v48  ;;  %v5236_v16 = vmul.f32 0.2, %v5202_v32 }
 0x38d   : > { %v5265_v54 = vmax.f32 %v5191_v52, %v5233_v49  ;;  %v5234_v58 = vmul.f32 0.2, %v5194_v8 }
 0x38e   : > { %v12103_v10 = vmax.f32 %v11975_v50, %v5267_v39  ;;  %v5268_v34 = vmax.f32 %v5202_v32, %v5236_v16 }
 0x38f   : > { %v12106_v24 = vmax.f32 %v11978_v19, %v5265_v54  ;;  %v5266_v33 = vmax.f32 %v5194_v8, %v5234_v58  ;;  %v9663_v36 = vpop.f32.mrb[224].mxu1 }
 0x390   : > { %v12109_v22 = vmax.f32 %v11981_v40, %v5268_v34  ;;  %v5794_v45 = vadd.f32 %v11839_v4, %v9663_v36  ;;  %v5785_v15 = vpop.f32.mrb[225].mxu1  ;;  %v6034_v34 = vld [vmem:[%s12766_s5 + $0x50] sm:$0xff] }
 0x391   : > { %v12113_v59 = vmax.f32 %v11985_v21, %v5266_v33  ;;  %v5786_v35 = vadd.f32 %v11839_v4, %v5785_v15  ;;  %v9664_v60 = vpop.f32.mrb[226].mxu1 }
 0x392   : > { %v5914_v50 = vmul.f32 0.2, %v5794_v45  ;;  %v5797_v57 = vadd.f32 %v11839_v4, %v9664_v60  ;;  %v5788_v47 = vpop.f32.mrb[227].mxu1 }
 0x393   : > { %v5912_v19 = vmul.f32 0.2, %v5786_v35  ;;  %v5789_v52 = vadd.f32 %v11839_v4, %v5788_v47 }
 0x394   : > { %v5946_v38 = vmax.f32 %v5794_v45, %v5914_v50  ;;  %v5915_v48 = vmul.f32 0.2, %v5797_v57 }
 0x395   : > { %v5944_v40 = vmax.f32 %v5786_v35, %v5912_v19  ;;  %v5913_v32 = vmul.f32 0.2, %v5789_v52  ;;  %v12145_v19 = vld [vmem:[%s12766_s5 + $0x90] sm:$0xff] }
 0x396   : > { %v5978_v26 = vmax.f32 %v11991_v29, %v5946_v38  ;;  %v5947_v49 = vmax.f32 %v5797_v57, %v5915_v48  ;;  %v6038_v29 = vld [vmem:[%s12766_s5 + $0x70] sm:$0xff] }
 0x397   : > { %v5976_v21 = vmax.f32 %v11994_v13, %v5944_v40  ;;  %v5945_v8 = vmax.f32 %v5789_v52, %v5913_v32  ;;  %v9667_v39 = vpop.f32.mrb[228].mxu1  ;;  %v6035_v13 = vld [vmem:[%s12766_s5 + $0x58] sm:$0xff]  ;;  %v12150_v52 = vld [vmem:[%s12766_s5 + $0xb0] sm:$0xff]  ;;  %v8750_v40 = vcombine.high %v6034_v34, %v6038_v29 }
 0x398   : > { %v5979_v16 = vmax.f32 %v11997_v28, %v5947_v49  ;;  %v5810_v54 = vadd.f32 %v11839_v4, %v9667_v39  ;;  %v5801_v58 = vpop.f32.mrb[229].mxu1  ;;  %v6039_v28 = vld [vmem:[%s12766_s5 + $0x78] sm:$0xff]  ;;  %v8749_v39 = vcombine.low %v6034_v34, %v6038_v29  ;;  %v6054_v34 = vld [vmem:[%s12766_s5 + $0xf0] sm:$0xff] }
 0x399   : > { %v5977_v33 = vmax.f32 %v12001_v31, %v5945_v8  ;;  %v5802_v36 = vadd.f32 %v11839_v4, %v5801_v58  ;;  %v9668_v45 = vpop.f32.mrb[230].mxu1  ;;  %v8752_v32 = vcombine.high %v6035_v13, %v6039_v28  ;;  %v12160_v49 = vld [vmem:[%s12766_s5 + $0xb8] sm:$0xff] }
 0x39a   : > { %v12136_v15 = vpack.c.bf16 %v5979_v16, %v5978_v26  ;;  %v5918_v35 = vmul.f32 0.2, %v5810_v54  ;;  %v5813_v31 = vadd.f32 %v11839_v4, %v9668_v45  ;;  %v5804_v60 = vpop.f32.mrb[231].mxu1  ;;  %v12155_v26 = vld [vmem:[%s12766_s5 + $0x98] sm:$0xff]  ;;  %v8751_v16 = vcombine.low %v6035_v13, %v6039_v28 }
 0x39b   : > { %v12139_v50 = vpack.c.bf16 %v5977_v33, %v5976_v21  ;;  %v5916_v57 = vmul.f32 0.2, %v5802_v36  ;;  %v5805_v47 = vadd.f32 %v11839_v4, %v5804_v60  ;;  %v8758_v33 = vcombine.high %v12145_v19, %v12150_v52  ;;  %v6055_v29 = vld [vmem:[%s12766_s5 + $0xf8] sm:$0xff] }
 0x39c   : > { %v5950_v38 = vmax.f32 %v5810_v54, %v5918_v35  ;;  %v5919_v48 = vmul.f32 0.2, %v5813_v31  ;;  %v8757_v60 = vcombine.low %v12145_v19, %v12150_v52  ;;  %v12215_v19 = vld [vmem:[%s12766_s5 + $0x130] sm:$0xff] }
 0x39d   : > { %v5948_v21 = vmax.f32 %v5802_v36, %v5916_v57  ;;  %v5917_v8 = vmul.f32 0.2, %v5805_v47  ;;  %6483 = vmatmul.mubr.bf16.vlgmr.msra.gmra.mrb[0].mxu0 %v12139_v50  ;;  %6676 = vmatmul.mubr.bf16.vlgmr.msra.gmra.mrb[0].mxu1 %v12139_v50 }
 0x39e   : > { %v5982_v54 = vmax.f32 %v12007_v43, %v5950_v38  ;;  %v5951_v58 = vmax.f32 %v5813_v31, %v5919_v48  ;;  %6837 = vmatpush1.bf16.msra.mxu0 %v8741_v41  ;;  %7030 = vmatpush1.bf16.msra.mxu1 %v8743_v61  ;;  %v8760_v43 = vcombine.high %v12155_v26, %v12160_v49  ;;  %v12183_v41 = vld [vmem:[%s12766_s5 + $0xd0] sm:$0xff] }
 0x39f   : > { %v5980_v36 = vmax.f32 %v12010_v9, %v5948_v21  ;;  %v5949_v45 = vmax.f32 %v5805_v47, %v5917_v8  ;;  %v9671_v35 = vpop.f32.mrb[232].mxu1  ;;  %6492 = vmatprep.mubr.bf16.mxu0 %v9900_v56  ;;  %6685 = vmatprep.mubr.bf16.mxu1 %v9900_v56  ;;  %v8759_v48 = vcombine.low %v12155_v26, %v12160_v49  ;;  %v6059_v49 = vld [vmem:[%s12766_s5 + $0x118] sm:$0xff] }
 0x3a0   : > { %v5983_v51 = vmax.f32 %v12013_v42, %v5951_v58  ;;  %v5826_v46 = vadd.f32 %v11839_v4, %v9671_v35  ;;  %v5817_v23 = vpop.f32.mrb[233].mxu1  ;;  %6838 = vmatprep.subr.bf16.mxu0 %v8750_v40  ;;  %7031 = vmatprep.subr.bf16.mxu1 %v8752_v32  ;;  %v6051_v42 = vld [vmem:[%s12766_s5 + $0xd8] sm:$0xff]  ;;  %v8766_v21 = vcombine.high %v12183_v41, %v6054_v34 }
 0x3a1   : > { %v5981_v17 = vmax.f32 %v12017_v18, %v5949_v45  ;;  %v5818_v61 = vadd.f32 %v11839_v4, %v5817_v23  ;;  %v9672_v9 = vpop.f32.mrb[234].mxu1  ;;  %v8768_v8 = vcombine.high %v6051_v42, %v6055_v29  ;;  %v8765_v26 = vcombine.low %v12183_v41, %v6054_v34  ;;  %v6067_v34 = vld [vmem:[%s12766_s5 + $0x158] sm:$0xff] }
 0x3a2   : > { %v12196_v13 = vpack.c.bf16 %v5983_v51, %v5982_v54  ;;  %v5922_v28 = vmul.f32 0.2, %v5826_v46  ;;  %v5829_v18 = vadd.f32 %v11839_v4, %v9672_v9  ;;  %v5820_v31 = vpop.f32.mrb[235].mxu1  ;;  %6839 = vmatpush1.bf16.msra.mxu0 %v8749_v39  ;;  %7032 = vmatpush1.bf16.msra.mxu1 %v8751_v16  ;;  %v12210_v39 = vld [vmem:[%s12766_s5 + $0x110] sm:$0xff]  ;;  %v6063_v54 = vld [vmem:[%s12766_s5 + $0x138] sm:$0xff] }
 0x3a3   : > { %v12201_v57 = vpack.c.bf16 %v5981_v17, %v5980_v36  ;;  %v5920_v47 = vmul.f32 0.2, %v5818_v61  ;;  %v5821_v38 = vadd.f32 %v11839_v4, %v5820_v31  ;;  %6840 = vmatprep.subr.bf16.mxu0 %v8758_v33  ;;  %7033 = vmatprep.subr.bf16.mxu1 %v8760_v43  ;;  %v8767_v36 = vcombine.low %v6051_v42, %v6055_v29  ;;  %v12237_v17 = vld [vmem:[%s12766_s5 + $0x150] sm:$0xff]  ;;  %v6071_v42 = vld [vmem:[%s12766_s5 + $0x178] sm:$0xff] }
 0x3a4   : > { %v5954_v40 = vmax.f32 %v5826_v46, %v5922_v28  ;;  %v5923_v32 = vmul.f32 0.2, %v5829_v18  ;;  %v8774_v51 = vcombine.high %v12210_v39, %v12215_v19  ;;  %v8776_v41 = vcombine.high %v6059_v49, %v6063_v54 }
 0x3a5   : > { %v5952_v52 = vmax.f32 %v5818_v61, %v5920_v47  ;;  %v5921_v16 = vmul.f32 0.2, %v5821_v38  ;;  %6493 = vmatmul.mubr.bf16.gmra.mrb[4].mxu0 %v12136_v15  ;;  %6686 = vmatmul.mubr.bf16.gmra.mrb[4].mxu1 %v12136_v15  ;;  %v8773_v31 = vcombine.low %v12210_v39, %v12215_v19  ;;  %v6078_v39 = vld [vmem:[%s12766_s5 + $0x1b0] sm:$0xff] }
 0x3a6   : > { %v5986_v58 = vmax.f32 %v12023_v11, %v5954_v40  ;;  %v5955_v33 = vmax.f32 %v5829_v18, %v5923_v32  ;;  %6502 = vmatprep.mubr.bf16.mxu0 %v9900_v56  ;;  %6695 = vmatprep.mubr.bf16.mxu1 %v9900_v56 }
 0x3a7   : > { %v5984_v45 = vmax.f32 %v12026_v37, %v5952_v52  ;;  %v5953_v35 = vmax.f32 %v5821_v38, %v5921_v16  ;;  %v9675_v43 = vpop.f32.mrb[236].mxu1  ;;  %6841 = vmatpush1.bf16.msra.mxu0 %v8757_v60  ;;  %7034 = vmatpush1.bf16.msra.mxu1 %v8759_v48  ;;  %v8775_v48 = vcombine.low %v6059_v49, %v6063_v54  ;;  %v6074_v52 = vld [vmem:[%s12766_s5 + $0x190] sm:$0xff]  ;;  %v6075_v49 = vld [vmem:[%s12766_s5 + $0x198] sm:$0xff] }
 0x3a8   : > { %v5987_v46 = vmax.f32 %v12029_v30, %v5955_v33  ;;  %v5842_v23 = vadd.f32 %v11839_v4, %v9675_v43  ;;  %v5833_v11 = vpop.f32.mrb[237].mxu1  ;;  %6842 = vmatprep.subr.bf16.mxu0 %v8766_v21  ;;  %7035 = vmatprep.subr.bf16.mxu1 %v8768_v8  ;;  %v6070_v30 = vld [vmem:[%s12766_s5 + $0x170] sm:$0xff]  ;;  %v8784_v8 = vcombine.high %v6067_v34, %v6071_v42  ;;  %v6079_v54 = vld [vmem:[%s12766_s5 + $0x1b8] sm:$0xff] }
 0x3a9   : > { %v5985_v37 = vmax.f32 %v12033_v25, %v5953_v35  ;;  %v5834_v61 = vadd.f32 %v11839_v4, %v5833_v11  ;;  %v9676_v9 = vpop.f32.mrb[238].mxu1  ;;  %v8782_v21 = vcombine.high %v12237_v17, %v6070_v30 }
 0x3aa   : > { %v12250_v29 = vpack.c.bf16 %v5987_v46, %v5986_v58  ;;  %v5926_v28 = vmul.f32 0.2, %v5842_v23  ;;  %v5845_v25 = vadd.f32 %v11839_v4, %v9676_v9  ;;  %v5836_v18 = vpop.f32.mrb[239].mxu1  ;;  %v6087_v9 = vld [vmem:[%s12766_s5 + $0x1f8] sm:$0xff] }
 0x3ab   : > { %v12255_v60 = vpack.c.bf16 %v5985_v37, %v5984_v45  ;;  %v5924_v47 = vmul.f32 0.2, %v5834_v61  ;;  %v5837_v38 = vadd.f32 %v11839_v4, %v5836_v18  ;;  %6843 = vmatpush1.bf16.msra.mxu0 %v8765_v26  ;;  %7036 = vmatpush1.bf16.msra.mxu1 %v8767_v36  ;;  %v8781_v26 = vcombine.low %v12237_v17, %v6070_v30 }
 0x3ac   : > { %v5958_v40 = vmax.f32 %v5842_v23, %v5926_v28  ;;  %v5927_v32 = vmul.f32 0.2, %v5845_v25  ;;  %6844 = vmatprep.subr.bf16.mxu0 %v8774_v51  ;;  %7037 = vmatprep.subr.bf16.mxu1 %v8776_v41  ;;  %v8783_v36 = vcombine.low %v6067_v34, %v6071_v42  ;;  %v8790_v51 = vcombine.high %v6074_v52, %v6078_v39  ;;  %v6082_v41 = vld [vmem:[%s12766_s5 + $0x1d0] sm:$0xff] }
 0x3ad   : > { %v5956_v19 = vmax.f32 %v5834_v61, %v5924_v47  ;;  %v5925_v16 = vmul.f32 0.2, %v5837_v38  ;;  %6503 = vmatmul.mubr.bf16.gmra.mrb[8].mxu0 %v12201_v57  ;;  %6696 = vmatmul.mubr.bf16.gmra.mrb[8].mxu1 %v12201_v57  ;;  %v6086_v61 = vld [vmem:[%s12766_s5 + $0x1f0] sm:$0xff]  ;;  %v8789_v28 = vcombine.low %v6074_v52, %v6078_v39  ;;  %v8791_v47 = vcombine.low %v6075_v49, %v6079_v54 }
 0x3ae   : > { %v5990_v58 = vmax.f32 %v12039_v63, %v5958_v40  ;;  %v5959_v33 = vmax.f32 %v5845_v25, %v5927_v32  ;;  %6512 = vmatprep.mubr.bf16.mxu0 %v9900_v56  ;;  %6705 = vmatprep.mubr.bf16.mxu1 %v9900_v56  ;;  %v8792_v63 = vcombine.high %v6075_v49, %v6079_v54 }
 0x3af   : > { %v5988_v45 = vmax.f32 %v12042_v5, %v5956_v19  ;;  %v5957_v35 = vmax.f32 %v5837_v38, %v5925_v16  ;;  %v9679_v43 = vpop.f32.mrb[240].mxu1  ;;  %6845 = vmatpush1.bf16.msra.mxu0 %v8773_v31  ;;  %7038 = vmatpush1.bf16.msra.mxu1 %v8775_v48  ;;  %v8798_v40 = vcombine.high %v6082_v41, %v6086_v61 }
 0x3b0   : > { %v5991_v46 = vmax.f32 %v12045_v2, %v5959_v33  ;;  %v5858_v23 = vadd.f32 %v11839_v4, %v9679_v43  ;;  %v5849_v11 = vpop.f32.mrb[241].mxu1  ;;  %6846 = vmatprep.subr.bf16.mxu0 %v8782_v21  ;;  %7039 = vmatprep.subr.bf16.mxu1 %v8784_v8  ;;  %v6083_v2 = vld [vmem:[%s12766_s5 + $0x1d8] sm:$0xff] }
 0x3b1   : > { %v5989_v17 = vmax.f32 %v12049_v27, %v5957_v35  ;;  %v5850_v5 = vadd.f32 %v11839_v4, %v5849_v11  ;;  %v9680_v37 = vpop.f32.mrb[242].mxu1  ;;  %v8800_v32 = vcombine.high %v6083_v2, %v6087_v9  ;;  %v8799_v49 = vcombine.low %v6083_v2, %v6087_v9 }
 0x3b2   : > { %v12294_v30 = vpack.c.bf16 %v5991_v46, %v5990_v58  ;;  %v5930_v34 = vmul.f32 0.2, %v5858_v23  ;;  %v5861_v27 = vadd.f32 %v11839_v4, %v9680_v37  ;;  %v5852_v42 = vpop.f32.mrb[243].mxu1  ;;  %v12310_v58 = vld [vmem:[%s12765_s4] ss:$0 sm:$0xff] }
 0x3b3   : > { %v12297_v25 = vpack.c.bf16 %v5989_v17, %v5988_v45  ;;  %v5928_v18 = vmul.f32 0.2, %v5850_v5  ;;  %v5853_v31 = vadd.f32 %v11839_v4, %v5852_v42  ;;  %6847 = vmatpush1.bf16.msra.mxu0 %v8781_v26  ;;  %7040 = vmatpush1.bf16.msra.mxu1 %v8783_v36  ;;  %v8797_v4 = vcombine.low %v6082_v41, %v6086_v61 }
 0x3b4   : > { %v5962_v38 = vmax.f32 %v5858_v23, %v5930_v34  ;;  %v5931_v48 = vmul.f32 0.2, %v5861_v27  ;;  %6848 = vmatprep.subr.bf16.mxu0 %v8790_v51  ;;  %7041 = vmatprep.subr.bf16.mxu1 %v8792_v63 }
 0x3b5   : > { %v5960_v21 = vmax.f32 %v5850_v5, %v5928_v18  ;;  %v5929_v8 = vmul.f32 0.2, %v5853_v31  ;;  %6513 = vmatmul.mubr.bf16.gmra.mrb[12].mxu0 %v12196_v13  ;;  %6706 = vmatmul.mubr.bf16.gmra.mrb[12].mxu1 %v12196_v13 }
 0x3b6   : > { %v5994_v52 = vmax.f32 %v12055_v6, %v5962_v38  ;;  %v5963_v39 = vmax.f32 %v5861_v27, %v5931_v48  ;;  %6522 = vmatprep.mubr.bf16.mxu0 %v9900_v56  ;;  %6715 = vmatprep.mubr.bf16.mxu1 %v9900_v56 }
 0x3b7   : > { %v5992_v19 = vmax.f32 %v12058_v55, %v5960_v21  ;;  %v5961_v16 = vmax.f32 %v5853_v31, %v5929_v8  ;;  %v9683_v26 = vpop.f32.mrb[244].mxu1  ;;  %6849 = vmatpush1.bf16.msra.mxu0 %v8789_v28  ;;  %7042 = vmatpush1.bf16.msra.mxu1 %v8791_v47 }
 0x3b8   : > { %v5995_v54 = vmax.f32 %v12061_v7, %v5963_v39  ;;  %v5874_v6 = vadd.f32 %v12310_v58, %v9683_v26  ;;  %v5865_v33 = vpop.f32.mrb[245].mxu1  ;;  %6850 = vmatprep.subr.bf16.mxu0 %v8798_v40  ;;  %7043 = vmatprep.subr.bf16.mxu1 %v8800_v32 }
 0x3b9   : > { %v5993_v36 = vmax.f32 %v12065_v44, %v5961_v16  ;;  %v5866_v55 = vadd.f32 %v12310_v58, %v5865_v33  ;;  %v9684_v45 = vpop.f32.mrb[246].mxu1 }
 0x3ba   : > { %v12315_v35 = vpack.c.bf16 %v5995_v54, %v5994_v52  ;;  %v5934_v43 = vmul.f32 0.2, %v5874_v6  ;;  %v5877_v7 = vadd.f32 %v12310_v58, %v9684_v45  ;;  %v5868_v51 = vpop.f32.mrb[247].mxu1 }
 0x3bb   : > { %v12318_v46 = vpack.c.bf16 %v5993_v36, %v5992_v19  ;;  %v5932_v23 = vmul.f32 0.2, %v5866_v55  ;;  %v5869_v11 = vadd.f32 %v12310_v58, %v5868_v51  ;;  %6851 = vmatpush1.bf16.msra.mxu0 %v8797_v4  ;;  %7044 = vmatpush1.bf16.msra.mxu1 %v8799_v49 }
 0x3bc   : > { %v5966_v63 = vmax.f32 %v5874_v6, %v5934_v43  ;;  %v5935_v41 = vmul.f32 0.2, %v5877_v7 }
 0x3bd   : > { %v5964_v17 = vmax.f32 %v5866_v55, %v5932_v23  ;;  %v5933_v44 = vmul.f32 0.2, %v5869_v11  ;;  %6523 = vmatmul.mubr.bf16.gmra.mrb[16].mxu0 %v12255_v60  ;;  %6716 = vmatmul.mubr.bf16.gmra.mrb[16].mxu1 %v12255_v60 }
 0x3be   : > { %v5998_v5 = vmax.f32 %v12071_v53, %v5966_v63  ;;  %v5967_v37 = vmax.f32 %v5877_v7, %v5935_v41  ;;  %6532 = vmatprep.mubr.bf16.mxu0 %v9900_v56  ;;  %6725 = vmatprep.mubr.bf16.mxu1 %v9900_v56 }
 0x3bf   : > { %v5996_v61 = vmax.f32 %v12074_v3, %v5964_v17  ;;  %v5965_v2 = vmax.f32 %v5869_v11, %v5933_v44  ;;  %v9687_v9 = vpop.f32.mrb[248].mxu1 }
 0x3c0   : > { %v5999_v34 = vmax.f32 %v12077_v14, %v5967_v37  ;;  %v5890_v27 = vadd.f32 %v12310_v58, %v9687_v9  ;;  %v5881_v42 = vpop.f32.mrb[249].mxu1 }
 0x3c1   : > { %v5997_v28 = vmax.f32 %v12081_v12, %v5965_v2  ;;  %v5882_v18 = vadd.f32 %v12310_v58, %v5881_v42  ;;  %v9688_v31 = vpop.f32.mrb[250].mxu1 }
 0x3c2   : > { %v12331_v53 = vpack.c.bf16 %v5999_v34, %v5998_v5  ;;  %v5938_v47 = vmul.f32 0.2, %v5890_v27  ;;  %v5893_v38 = vadd.f32 %v12310_v58, %v9688_v31  ;;  %v5884_v48 = vpop.f32.mrb[251].mxu1 }
 0x3c3   : > { %v12334_v40 = vpack.c.bf16 %v5997_v28, %v5996_v61  ;;  %v5936_v3 = vmul.f32 0.2, %v5882_v18  ;;  %v5885_v32 = vadd.f32 %v12310_v58, %v5884_v48 }
 0x3c4   : > { %v5970_v14 = vmax.f32 %v5890_v27, %v5938_v47  ;;  %v5939_v21 = vmul.f32 0.2, %v5893_v38 }
 0x3c5   : > { %v5968_v8 = vmax.f32 %v5882_v18, %v5936_v3  ;;  %v5937_v52 = vmul.f32 0.2, %v5885_v32  ;;  %6533 = vmatmul.mubr.bf16.gmra.mrb[20].mxu0 %v12250_v29  ;;  %6726 = vmatmul.mubr.bf16.gmra.mrb[20].mxu1 %v12250_v29 }
 0x3c6   : > { %v6002_v12 = vmax.f32 %v12087_v62, %v5970_v14  ;;  %v5971_v39 = vmax.f32 %v5893_v38, %v5939_v21  ;;  %6542 = vmatprep.mubr.bf16.mxu0 %v9900_v56  ;;  %6735 = vmatprep.mubr.bf16.mxu1 %v9900_v56 }
 0x3c7   : > { %v6000_v4 = vmax.f32 %v12090_v0, %v5968_v8  ;;  %v5969_v19 = vmax.f32 %v5885_v32, %v5937_v52  ;;  %v9691_v16 = vpop.f32.mrb[252].mxu1 }
 0x3c8   : > { %v6003_v26 = vmax.f32 %v12093_v20, %v5971_v39  ;;  %v5906_v49 = vadd.f32 %v12310_v58, %v9691_v16  ;;  %v5897_v54 = vpop.f32.mrb[253].mxu1 }
 0x3c9   : > { %v6001_v6 = vmax.f32 %v12097_v1, %v5969_v19  ;;  %v5898_v33 = vadd.f32 %v12310_v58, %v5897_v54  ;;  %v9692_v36 = vpop.f32.mrb[254].mxu1 }
 0x3ca   : > { %v12347_v62 = vpack.c.bf16 %v6003_v26, %v6002_v12  ;;  %v5942_v55 = vmul.f32 0.2, %v5906_v49  ;;  %v5909_v45 = vadd.f32 %v12310_v58, %v9692_v36  ;;  %v5900_v43 = vpop.f32.mrb[255].mxu1 }
 0x3cb   : > { %v12350_v7 = vpack.c.bf16 %v6001_v6, %v6000_v4  ;;  %v5940_v0 = vmul.f32 0.2, %v5898_v33  ;;  %v5901_v51 = vadd.f32 %v12310_v58, %v5900_v43 }
 0x3cc   : > { %v5974_v20 = vmax.f32 %v5906_v49, %v5942_v55  ;;  %v5943_v23 = vmul.f32 0.2, %v5909_v45 }
 0x3cd   : > { %v5972_v11 = vmax.f32 %v5898_v33, %v5940_v0  ;;  %v5941_v63 = vmul.f32 0.2, %v5901_v51  ;;  %6543 = vmatmul.mubr.bf16.gmra.mrb[24].mxu0 %v12297_v25  ;;  %6736 = vmatmul.mubr.bf16.gmra.mrb[24].mxu1 %v12297_v25 }
 0x3ce   : > { %v6006_v1 = vmax.f32 %v12103_v10, %v5974_v20  ;;  %v5975_v41 = vmax.f32 %v5909_v45, %v5943_v23  ;;  %6552 = vmatprep.mubr.bf16.mxu0 %v9900_v56  ;;  %6745 = vmatprep.mubr.bf16.mxu1 %v9900_v56  ;;  %v6090_v10 = vlaneseq }
 0x3cf   : > { %v6004_v17 = vmax.f32 %v12106_v24, %v5972_v11  ;;  %v5973_v44 = vmax.f32 %v5901_v51, %v5941_v63 }
 0x3d0   : > { %v6007_v58 = vmax.f32 %v12109_v22, %v5975_v41  ;;  %v6091_v24 = vshrl.u32 %v6090_v10, 7 }
 0x3d1   : > { %v6005_v5 = vmax.f32 %v12113_v59, %v5973_v44 }
 0x3d2   : > { %v12361_v37 = vpack.c.bf16 %v6007_v58, %v6006_v1  ;;  %v6092_v22 = vsub.s32 0, %v6091_v24  ;;  %v6100_v59 = vsub.s32 2, %v6091_v24  ;;  %v6108_v27 = vsub.s32 4, %v6091_v24 }
 0x3d3   : > { %v12363_v61 = vpack.c.bf16 %v6005_v5, %v6004_v17  ;;  %v6116_v42 = vsub.s32 6, %v6091_v24  ;;  %v6112_v38 = vsub.s32 5, %v6091_v24  ;;  %v6120_v48 = vsub.s32 7, %v6091_v24 }
 0x3d5   : > { %6553 = vmatmul.mubr.bf16.gmra.mrb[28].mxu0 %v12294_v30  ;;  %6746 = vmatmul.mubr.bf16.gmra.mrb[28].mxu1 %v12294_v30 }
 0x3d6   : > { %6562 = vmatprep.mubr.bf16.mxu0 %v9900_v56  ;;  %6755 = vmatprep.mubr.bf16.mxu1 %v9900_v56 }
 0x3dd   : > { %6563 = vmatmul.mubr.bf16.gmra.mrb[32].mxu0 %v12318_v46  ;;  %6756 = vmatmul.mubr.bf16.gmra.mrb[32].mxu1 %v12318_v46 }
 0x3de   : > { %6572 = vmatprep.mubr.bf16.mxu0 %v9900_v56  ;;  %6765 = vmatprep.mubr.bf16.mxu1 %v9900_v56 }
 0x3e5   : > { %6573 = vmatmul.mubr.bf16.gmra.mrb[36].mxu0 %v12315_v35  ;;  %6766 = vmatmul.mubr.bf16.gmra.mrb[36].mxu1 %v12315_v35 }
 0x3e6   : > { %6582 = vmatprep.mubr.bf16.mxu0 %v9900_v56  ;;  %6775 = vmatprep.mubr.bf16.mxu1 %v9900_v56 }
 0x3ed   : > { %6583 = vmatmul.mubr.bf16.gmra.mrb[40].mxu0 %v12334_v40  ;;  %6776 = vmatmul.mubr.bf16.gmra.mrb[40].mxu1 %v12334_v40 }
 0x3ee   : > { %6592 = vmatprep.mubr.bf16.mxu0 %v9900_v56  ;;  %6785 = vmatprep.mubr.bf16.mxu1 %v9900_v56 }
 0x3f5   : > { %6593 = vmatmul.mubr.bf16.gmra.mrb[44].mxu0 %v12331_v53  ;;  %6786 = vmatmul.mubr.bf16.gmra.mrb[44].mxu1 %v12331_v53 }
 0x3f6   : > { %6602 = vmatprep.mubr.bf16.mxu0 %v9900_v56  ;;  %6795 = vmatprep.mubr.bf16.mxu1 %v9900_v56 }
 0x3fd   : > { %6603 = vmatmul.mubr.bf16.gmra.mrb[48].mxu0 %v12350_v7  ;;  %6796 = vmatmul.mubr.bf16.gmra.mrb[48].mxu1 %v12350_v7 }
 0x3fe   : > { %6612 = vmatprep.mubr.bf16.mxu0 %v9900_v56  ;;  %6805 = vmatprep.mubr.bf16.mxu1 %v9900_v56 }
 0x405   : > { %6613 = vmatmul.mubr.bf16.gmra.mrb[52].mxu0 %v12347_v62  ;;  %6806 = vmatmul.mubr.bf16.gmra.mrb[52].mxu1 %v12347_v62 }
 0x406   : > { %6622 = vmatprep.mubr.bf16.mxu0 %v9900_v56  ;;  %6815 = vmatprep.mubr.bf16.mxu1 %v9900_v56 }
 0x40d   : > { %6623 = vmatmul.mubr.bf16.gmra.mrb[56].mxu0 %v12363_v61  ;;  %6816 = vmatmul.mubr.bf16.gmra.mrb[56].mxu1 %v12363_v61 }
 0x40e   : > { %6632 = vmatprep.mubr.bf16.mxu0 %v9900_v56  ;;  %6825 = vmatprep.mubr.bf16.mxu1 %v9900_v56 }
 0x415   : > { %6633 = vmatmul.mubr.bf16.gmra.mrb[60].mxu0 %v12361_v37  ;;  %6826 = vmatmul.mubr.bf16.gmra.mrb[60].mxu1 %v12361_v37 }
 0x416   : > { %6868 = vmatprep.mubr.bf16.mxu0 %v9900_v56  ;;  %7061 = vmatprep.mubr.bf16.mxu1 %v9900_v56 }
 0x41d   : > { %6869 = vmatmul.mubr.bf16.vlgmr.msra.gmra.mrb[64].mxu0 %v12139_v50  ;;  %7062 = vmatmul.mubr.bf16.vlgmr.msra.gmra.mrb[64].mxu1 %v12139_v50  ;;  %v6096_v50 = vsub.s32 1, %v6091_v24 }
 0x41e   : > { %6878 = vmatprep.mubr.bf16.mxu0 %v9900_v56  ;;  %7071 = vmatprep.mubr.bf16.mxu1 %v9900_v56 }
 0x425   : > { %6879 = vmatmul.mubr.bf16.gmra.mrb[68].mxu0 %v12136_v15  ;;  %7072 = vmatmul.mubr.bf16.gmra.mrb[68].mxu1 %v12136_v15  ;;  %v6088_v15 = vld [vmem:[%s12767_s6] sm:$0xff] }
 0x426   : > { %6888 = vmatprep.mubr.bf16.mxu0 %v9900_v56  ;;  %7081 = vmatprep.mubr.bf16.mxu1 %v9900_v56  ;;  %v12466_v26 = vrot.slane %v6088_v15, %v6108_v27  ;;  %v12468_v49 = vrot.slane %v6088_v15, %v6116_v42  ;;  %v12472_v33 = vrot.slane %v6088_v15, %v6112_v38 }
 0x427   : > { %v12474_v36 = vrot.slane %v6088_v15, %v6120_v48 }
 0x42d   : > { %6889 = vmatmul.mubr.bf16.gmra.mrb[72].mxu0 %v12201_v57  ;;  %7082 = vmatmul.mubr.bf16.gmra.mrb[72].mxu1 %v12201_v57  ;;  %v12446_v57 = vrot.slane %v6088_v15, %v6092_v22 }
 0x42e   : > { %6898 = vmatprep.mubr.bf16.mxu0 %v9900_v56  ;;  %7091 = vmatprep.mubr.bf16.mxu1 %v9900_v56 }
 0x435   : > { %6899 = vmatmul.mubr.bf16.gmra.mrb[76].mxu0 %v12196_v13  ;;  %7092 = vmatmul.mubr.bf16.gmra.mrb[76].mxu1 %v12196_v13  ;;  %v6104_v13 = vsub.s32 3, %v6091_v24 }
 0x436   : > { %6908 = vmatprep.mubr.bf16.mxu0 %v9900_v56  ;;  %7101 = vmatprep.mubr.bf16.mxu1 %v9900_v56 }
 0x43d   : > { %6909 = vmatmul.mubr.bf16.gmra.mrb[80].mxu0 %v12255_v60  ;;  %7102 = vmatmul.mubr.bf16.gmra.mrb[80].mxu1 %v12255_v60  ;;  %v12450_v60 = vrot.slane %v6088_v15, %v6096_v50 }
 0x43e   : > { %6918 = vmatprep.mubr.bf16.mxu0 %v9900_v56  ;;  %7111 = vmatprep.mubr.bf16.mxu1 %v9900_v56 }
 0x445   : > { %6919 = vmatmul.mubr.bf16.gmra.mrb[84].mxu0 %v12250_v29  ;;  %7112 = vmatmul.mubr.bf16.gmra.mrb[84].mxu1 %v12250_v29  ;;  %v12448_v29 = vrot.slane %v6088_v15, %v6100_v59 }
 0x446   : > { %6928 = vmatprep.mubr.bf16.mxu0 %v9900_v56  ;;  %7121 = vmatprep.mubr.bf16.mxu1 %v9900_v56 }
 0x44d   : > { %6929 = vmatmul.mubr.bf16.gmra.mrb[88].mxu0 %v12297_v25  ;;  %7122 = vmatmul.mubr.bf16.gmra.mrb[88].mxu1 %v12297_v25 }
 0x44e   : > { %6938 = vmatprep.mubr.bf16.mxu0 %v9900_v56  ;;  %7131 = vmatprep.mubr.bf16.mxu1 %v9900_v56 }
 0x455   : > { %6939 = vmatmul.mubr.bf16.gmra.mrb[92].mxu0 %v12294_v30  ;;  %7132 = vmatmul.mubr.bf16.gmra.mrb[92].mxu1 %v12294_v30  ;;  %v12452_v30 = vrot.slane %v6088_v15, %v6104_v13 }
 0x456   : > { %6948 = vmatprep.mubr.bf16.mxu0 %v9900_v56  ;;  %7141 = vmatprep.mubr.bf16.mxu1 %v9900_v56 }
 0x45d   : > { %6949 = vmatmul.mubr.bf16.gmra.mrb[96].mxu0 %v12318_v46  ;;  %7142 = vmatmul.mubr.bf16.gmra.mrb[96].mxu1 %v12318_v46 }
 0x45e   : > { %6958 = vmatprep.mubr.bf16.mxu0 %v9900_v56  ;;  %7151 = vmatprep.mubr.bf16.mxu1 %v9900_v56 }
 0x465   : > { %6959 = vmatmul.mubr.bf16.gmra.mrb[100].mxu0 %v12315_v35  ;;  %7152 = vmatmul.mubr.bf16.gmra.mrb[100].mxu1 %v12315_v35 }
 0x466   : > { %6968 = vmatprep.mubr.bf16.mxu0 %v9900_v56  ;;  %7161 = vmatprep.mubr.bf16.mxu1 %v9900_v56 }
 0x46d   : > { %6969 = vmatmul.mubr.bf16.gmra.mrb[104].mxu0 %v12334_v40  ;;  %7162 = vmatmul.mubr.bf16.gmra.mrb[104].mxu1 %v12334_v40 }
 0x46e   : > { %6978 = vmatprep.mubr.bf16.mxu0 %v9900_v56  ;;  %7171 = vmatprep.mubr.bf16.mxu1 %v9900_v56 }
 0x470   : > { %v6484_v25 = vpop.f32.mrb[0].mxu0  ;;  %v6677_v35 = vpop.f32.mrb[0].mxu1 }
 0x471   : > { %v6485_v46 = vadd.f32 %v6484_v25, %v12446_v57  ;;  %v6678_v2 = vadd.f32 %v6677_v35, %v12448_v29  ;;  %v6486_v9 = vpop.f32.mrb[1].mxu0  ;;  %v6679_v34 = vpop.f32.mrb[1].mxu1 }
 0x472   : > { %v6487_v28 = vadd.f32 %v6486_v9, %v12450_v60  ;;  %v6680_v18 = vadd.f32 %v6679_v34, %v12452_v30  ;;  %v6488_v31 = vpop.f32.mrb[2].mxu0  ;;  %v6681_v47 = vpop.f32.mrb[2].mxu1 }
 0x473   : > { %v7222_v40 = vmul.f32 0.2, %v6485_v46  ;;  %v7224_v3 = vmul.f32 0.2, %v6678_v2  ;;  %v6489_v32 = vadd.f32 %v6488_v31, %v12446_v57  ;;  %v6682_v14 = vadd.f32 %v6681_v47, %v12448_v29  ;;  %v6490_v21 = vpop.f32.mrb[3].mxu0  ;;  %v6683_v8 = vpop.f32.mrb[3].mxu1 }
 0x474   : > { %v7223_v52 = vmul.f32 0.2, %v6487_v28  ;;  %v7225_v12 = vmul.f32 0.2, %v6680_v18  ;;  %v6491_v39 = vadd.f32 %v6490_v21, %v12450_v60  ;;  %v6684_v4 = vadd.f32 %v6683_v8, %v12452_v30 }
 0x475   : > { %v7230_v19 = vmul.f32 0.2, %v6489_v32  ;;  %v7232_v16 = vmul.f32 0.2, %v6682_v14  ;;  %6979 = vmatmul.mubr.bf16.gmra.mrb[108].mxu0 %v12331_v53  ;;  %7172 = vmatmul.mubr.bf16.gmra.mrb[108].mxu1 %v12331_v53  ;;  %v7478_v55 = vmax.f32 %v6485_v46, %v7222_v40  ;;  %v7480_v45 = vmax.f32 %v6678_v2, %v7224_v3 }
 0x476   : > { %v7231_v54 = vmul.f32 0.2, %v6491_v39  ;;  %v7233_v6 = vmul.f32 0.2, %v6684_v4  ;;  %6988 = vmatprep.mubr.bf16.mxu0 %v9900_v56  ;;  %7181 = vmatprep.mubr.bf16.mxu1 %v9900_v56  ;;  %v7479_v51 = vmax.f32 %v6487_v28, %v7223_v52  ;;  %v7481_v53 = vmax.f32 %v6680_v18, %v7225_v12 }
 0x477   : > { %v7486_v43 = vmax.f32 %v6489_v32, %v7230_v19  ;;  %v7488_v0 = vmax.f32 %v6682_v14, %v7232_v16 }
 0x478   : > { %v7487_v20 = vmax.f32 %v6491_v39, %v7231_v54  ;;  %v7489_v23 = vmax.f32 %v6684_v4, %v7233_v6  ;;  %v6494_v11 = vpop.f32.mrb[4].mxu0  ;;  %v6687_v63 = vpop.f32.mrb[4].mxu1 }
 0x479   : > { %v7734_v1 = vmax.f32 %v7478_v55, %v7486_v43  ;;  %v7796_v41 = vmax.f32 %v7480_v45, %v7488_v0  ;;  %v6495_v17 = vadd.f32 %v6494_v11, %v12446_v57  ;;  %v6688_v44 = vadd.f32 %v6687_v63, %v12448_v29  ;;  %v6496_v58 = vpop.f32.mrb[5].mxu0  ;;  %v6689_v5 = vpop.f32.mrb[5].mxu1 }
 0x47a   : > { %v7765_v10 = vmax.f32 %v7479_v51, %v7487_v20  ;;  %v7827_v24 = vmax.f32 %v7481_v53, %v7489_v23  ;;  %v6497_v22 = vadd.f32 %v6496_v58, %v12450_v60  ;;  %v6690_v59 = vadd.f32 %v6689_v5, %v12452_v30  ;;  %v6498_v15 = vpop.f32.mrb[6].mxu0  ;;  %v6691_v50 = vpop.f32.mrb[6].mxu1 }
 0x47b   : > { %v7238_v13 = vmul.f32 0.2, %v6495_v17  ;;  %v7240_v25 = vmul.f32 0.2, %v6688_v44  ;;  %v6499_v35 = vadd.f32 %v6498_v15, %v12446_v57  ;;  %v6692_v46 = vadd.f32 %v6691_v50, %v12448_v29  ;;  %v6500_v2 = vpop.f32.mrb[7].mxu0  ;;  %v6693_v9 = vpop.f32.mrb[7].mxu1 }
 0x47c   : > { %v7239_v34 = vmul.f32 0.2, %v6497_v22  ;;  %v7241_v27 = vmul.f32 0.2, %v6690_v59  ;;  %v6501_v42 = vadd.f32 %v6500_v2, %v12450_v60  ;;  %v6694_v28 = vadd.f32 %v6693_v9, %v12452_v30 }
 0x47d   : > { %v7494_v18 = vmax.f32 %v6495_v17, %v7238_v13  ;;  %v7496_v31 = vmax.f32 %v6688_v44, %v7240_v25  ;;  %v7246_v47 = vmul.f32 0.2, %v6499_v35  ;;  %v7248_v38 = vmul.f32 0.2, %v6692_v46  ;;  %6989 = vmatmul.mubr.bf16.gmra.mrb[112].mxu0 %v12350_v7  ;;  %7182 = vmatmul.mubr.bf16.gmra.mrb[112].mxu1 %v12350_v7 }
 0x47e   : > { %v7495_v48 = vmax.f32 %v6497_v22, %v7239_v34  ;;  %v7497_v40 = vmax.f32 %v6690_v59, %v7241_v27  ;;  %v7247_v3 = vmul.f32 0.2, %v6501_v42  ;;  %v7249_v32 = vmul.f32 0.2, %v6694_v28  ;;  %6998 = vmatprep.mubr.bf16.mxu0 %v9900_v56  ;;  %7191 = vmatprep.mubr.bf16.mxu1 %v9900_v56 }
 0x47f   : > { %v7735_v14 = vmax.f32 %v7734_v1, %v7494_v18  ;;  %v7797_v21 = vmax.f32 %v7796_v41, %v7496_v31  ;;  %v7502_v8 = vmax.f32 %v6499_v35, %v7246_v47  ;;  %v7504_v52 = vmax.f32 %v6692_v46, %v7248_v38 }
 0x480   : > { %v7766_v12 = vmax.f32 %v7765_v10, %v7495_v48  ;;  %v7828_v39 = vmax.f32 %v7827_v24, %v7497_v40  ;;  %v7503_v4 = vmax.f32 %v6501_v42, %v7247_v3  ;;  %v7505_v19 = vmax.f32 %v6694_v28, %v7249_v32  ;;  %v6504_v16 = vpop.f32.mrb[8].mxu0  ;;  %v6697_v54 = vpop.f32.mrb[8].mxu1 }
 0x481   : > { %v7736_v6 = vmax.f32 %v7735_v14, %v7502_v8  ;;  %v7798_v7 = vmax.f32 %v7797_v21, %v7504_v52  ;;  %v6505_v55 = vadd.f32 %v6504_v16, %v12446_v57  ;;  %v6698_v45 = vadd.f32 %v6697_v54, %v12448_v29  ;;  %v6506_v43 = vpop.f32.mrb[9].mxu0  ;;  %v6699_v0 = vpop.f32.mrb[9].mxu1 }
 0x482   : > { %v7767_v51 = vmax.f32 %v7766_v12, %v7503_v4  ;;  %v7829_v53 = vmax.f32 %v7828_v39, %v7505_v19  ;;  %v6507_v20 = vadd.f32 %v6506_v43, %v12450_v60  ;;  %v6700_v23 = vadd.f32 %v6699_v0, %v12452_v30  ;;  %v6508_v11 = vpop.f32.mrb[10].mxu0  ;;  %v6701_v63 = vpop.f32.mrb[10].mxu1 }
 0x483   : > { %v7254_v1 = vmul.f32 0.2, %v6505_v55  ;;  %v7256_v41 = vmul.f32 0.2, %v6698_v45  ;;  %v6509_v17 = vadd.f32 %v6508_v11, %v12446_v57  ;;  %v6702_v44 = vadd.f32 %v6701_v63, %v12448_v29  ;;  %v6510_v58 = vpop.f32.mrb[11].mxu0  ;;  %v6703_v5 = vpop.f32.mrb[11].mxu1 }
 0x484   : > { %v7255_v10 = vmul.f32 0.2, %v6507_v20  ;;  %v7257_v24 = vmul.f32 0.2, %v6700_v23  ;;  %v6511_v22 = vadd.f32 %v6510_v58, %v12450_v60  ;;  %v6704_v59 = vadd.f32 %v6703_v5, %v12452_v30 }
 0x485   : > { %v7510_v15 = vmax.f32 %v6505_v55, %v7254_v1  ;;  %v7512_v50 = vmax.f32 %v6698_v45, %v7256_v41  ;;  %v7262_v13 = vmul.f32 0.2, %v6509_v17  ;;  %v7264_v25 = vmul.f32 0.2, %v6702_v44  ;;  %6999 = vmatmul.mubr.bf16.gmra.mrb[116].mxu0 %v12347_v62  ;;  %7192 = vmatmul.mubr.bf16.gmra.mrb[116].mxu1 %v12347_v62 }
 0x486   : > { %v7511_v35 = vmax.f32 %v6507_v20, %v7255_v10  ;;  %v7513_v46 = vmax.f32 %v6700_v23, %v7257_v24  ;;  %v7263_v2 = vmul.f32 0.2, %v6511_v22  ;;  %v7265_v9 = vmul.f32 0.2, %v6704_v59  ;;  %7008 = vmatprep.mubr.bf16.mxu0 %v9900_v56  ;;  %7201 = vmatprep.mubr.bf16.mxu1 %v9900_v56 }
 0x487   : > { %v7737_v34 = vmax.f32 %v7736_v6, %v7510_v15  ;;  %v7799_v27 = vmax.f32 %v7798_v7, %v7512_v50  ;;  %v7518_v42 = vmax.f32 %v6509_v17, %v7262_v13  ;;  %v7520_v28 = vmax.f32 %v6702_v44, %v7264_v25 }
 0x488   : > { %v7768_v18 = vmax.f32 %v7767_v51, %v7511_v35  ;;  %v7830_v31 = vmax.f32 %v7829_v53, %v7513_v46  ;;  %v7519_v47 = vmax.f32 %v6511_v22, %v7263_v2  ;;  %v7521_v38 = vmax.f32 %v6704_v59, %v7265_v9  ;;  %v6514_v48 = vpop.f32.mrb[12].mxu0  ;;  %v6707_v40 = vpop.f32.mrb[12].mxu1 }
 0x489   : > { %v7738_v3 = vmax.f32 %v7737_v34, %v7518_v42  ;;  %v7800_v62 = vmax.f32 %v7799_v27, %v7520_v28  ;;  %v6515_v32 = vadd.f32 %v6514_v48, %v12446_v57  ;;  %v6708_v14 = vadd.f32 %v6707_v40, %v12448_v29  ;;  %v6516_v21 = vpop.f32.mrb[13].mxu0  ;;  %v6709_v8 = vpop.f32.mrb[13].mxu1 }
 0x48a   : > { %v7769_v52 = vmax.f32 %v7768_v18, %v7519_v47  ;;  %v7831_v12 = vmax.f32 %v7830_v31, %v7521_v38  ;;  %v6517_v39 = vadd.f32 %v6516_v21, %v12450_v60  ;;  %v6710_v4 = vadd.f32 %v6709_v8, %v12452_v30  ;;  %v6518_v19 = vpop.f32.mrb[14].mxu0  ;;  %v6711_v16 = vpop.f32.mrb[14].mxu1 }
 0x48b   : > { %v7270_v54 = vmul.f32 0.2, %v6515_v32  ;;  %v7272_v6 = vmul.f32 0.2, %v6708_v14  ;;  %v6519_v7 = vadd.f32 %v6518_v19, %v12446_v57  ;;  %v6712_v55 = vadd.f32 %v6711_v16, %v12448_v29  ;;  %v6520_v45 = vpop.f32.mrb[15].mxu0  ;;  %v6713_v43 = vpop.f32.mrb[15].mxu1 }
 0x48c   : > { %v7271_v0 = vmul.f32 0.2, %v6517_v39  ;;  %v7273_v51 = vmul.f32 0.2, %v6710_v4  ;;  %v6521_v53 = vadd.f32 %v6520_v45, %v12450_v60  ;;  %v6714_v20 = vadd.f32 %v6713_v43, %v12452_v30 }
 0x48d   : > { %v7526_v23 = vmax.f32 %v6515_v32, %v7270_v54  ;;  %v7528_v11 = vmax.f32 %v6708_v14, %v7272_v6  ;;  %v7278_v63 = vmul.f32 0.2, %v6519_v7  ;;  %v7280_v1 = vmul.f32 0.2, %v6712_v55  ;;  %7009 = vmatmul.mubr.bf16.gmra.mrb[120].mxu0 %v12363_v61  ;;  %7202 = vmatmul.mubr.bf16.gmra.mrb[120].mxu1 %v12363_v61 }
 0x48e   : > { %v7527_v41 = vmax.f32 %v6517_v39, %v7271_v0  ;;  %v7529_v17 = vmax.f32 %v6710_v4, %v7273_v51  ;;  %v7279_v44 = vmul.f32 0.2, %v6521_v53  ;;  %v7281_v58 = vmul.f32 0.2, %v6714_v20  ;;  %7018 = vmatprep.mubr.bf16.mxu0 %v9900_v56  ;;  %7211 = vmatprep.mubr.bf16.mxu1 %v9900_v56 }
 0x48f   : > { %v7739_v5 = vmax.f32 %v7738_v3, %v7526_v23  ;;  %v7801_v10 = vmax.f32 %v7800_v62, %v7528_v11  ;;  %v7534_v24 = vmax.f32 %v6519_v7, %v7278_v63  ;;  %v7536_v22 = vmax.f32 %v6712_v55, %v7280_v1 }
 0x490   : > { %v7770_v59 = vmax.f32 %v7769_v52, %v7527_v41  ;;  %v7832_v15 = vmax.f32 %v7831_v12, %v7529_v17  ;;  %v7535_v50 = vmax.f32 %v6521_v53, %v7279_v44  ;;  %v7537_v13 = vmax.f32 %v6714_v20, %v7281_v58  ;;  %v6524_v25 = vpop.f32.mrb[16].mxu0  ;;  %v6717_v35 = vpop.f32.mrb[16].mxu1 }
 0x491   : > { %v7740_v46 = vmax.f32 %v7739_v5, %v7534_v24  ;;  %v7802_v61 = vmax.f32 %v7801_v10, %v7536_v22  ;;  %v6525_v2 = vadd.f32 %v6524_v25, %v12446_v57  ;;  %v6718_v9 = vadd.f32 %v6717_v35, %v12448_v29  ;;  %v6526_v34 = vpop.f32.mrb[17].mxu0  ;;  %v6719_v27 = vpop.f32.mrb[17].mxu1 }
 0x492   : > { %v7771_v42 = vmax.f32 %v7770_v59, %v7535_v50  ;;  %v7833_v56 = vmax.f32 %v7832_v15, %v7537_v13  ;;  %v6527_v28 = vadd.f32 %v6526_v34, %v12450_v60  ;;  %v6720_v18 = vadd.f32 %v6719_v27, %v12452_v30  ;;  %v6528_v31 = vpop.f32.mrb[18].mxu0  ;;  %v6721_v47 = vpop.f32.mrb[18].mxu1 }
 0x493   : > { %v7286_v38 = vmul.f32 0.2, %v6525_v2  ;;  %v7288_v48 = vmul.f32 0.2, %v6718_v9  ;;  %v6529_v40 = vadd.f32 %v6528_v31, %v12446_v57  ;;  %v6722_v3 = vadd.f32 %v6721_v47, %v12448_v29  ;;  %v6530_v62 = vpop.f32.mrb[19].mxu0  ;;  %v6723_v32 = vpop.f32.mrb[19].mxu1 }
 0x494   : > { %v7287_v14 = vmul.f32 0.2, %v6527_v28  ;;  %v7289_v21 = vmul.f32 0.2, %v6720_v18  ;;  %v6531_v8 = vadd.f32 %v6530_v62, %v12450_v60  ;;  %v6724_v52 = vadd.f32 %v6723_v32, %v12452_v30 }
 0x495   : > { %v7542_v12 = vmax.f32 %v6525_v2, %v7286_v38  ;;  %v7544_v39 = vmax.f32 %v6718_v9, %v7288_v48  ;;  %v7294_v4 = vmul.f32 0.2, %v6529_v40  ;;  %v7296_v19 = vmul.f32 0.2, %v6722_v3  ;;  %7019 = vmatmul.mubr.bf16.gmra.mrb[124].mxu0 %v12361_v37  ;;  %7212 = vmatmul.mubr.bf16.gmra.mrb[124].mxu1 %v12361_v37 }
 0x496   : > { %v7543_v16 = vmax.f32 %v6527_v28, %v7287_v14  ;;  %v7545_v54 = vmax.f32 %v6720_v18, %v7289_v21  ;;  %v7295_v6 = vmul.f32 0.2, %v6531_v8  ;;  %v7297_v7 = vmul.f32 0.2, %v6724_v52 }
 0x497   : > { %v7741_v55 = vmax.f32 %v7740_v46, %v7542_v12  ;;  %v7803_v45 = vmax.f32 %v7802_v61, %v7544_v39  ;;  %v7550_v43 = vmax.f32 %v6529_v40, %v7294_v4  ;;  %v7552_v0 = vmax.f32 %v6722_v3, %v7296_v19 }
 0x498   : > { %v7772_v51 = vmax.f32 %v7771_v42, %v7543_v16  ;;  %v7834_v53 = vmax.f32 %v7833_v56, %v7545_v54  ;;  %v7551_v20 = vmax.f32 %v6531_v8, %v7295_v6  ;;  %v7553_v23 = vmax.f32 %v6724_v52, %v7297_v7  ;;  %v6534_v11 = vpop.f32.mrb[20].mxu0  ;;  %v6727_v63 = vpop.f32.mrb[20].mxu1 }
 0x499   : > { %v7742_v1 = vmax.f32 %v7741_v55, %v7550_v43  ;;  %v7804_v41 = vmax.f32 %v7803_v45, %v7552_v0  ;;  %v6535_v17 = vadd.f32 %v6534_v11, %v12446_v57  ;;  %v6728_v37 = vadd.f32 %v6727_v63, %v12448_v29  ;;  %v6536_v44 = vpop.f32.mrb[21].mxu0  ;;  %v6729_v58 = vpop.f32.mrb[21].mxu1 }
 0x49a   : > { %v7773_v5 = vmax.f32 %v7772_v51, %v7551_v20  ;;  %v7835_v10 = vmax.f32 %v7834_v53, %v7553_v23  ;;  %v6537_v24 = vadd.f32 %v6536_v44, %v12450_v60  ;;  %v6730_v22 = vadd.f32 %v6729_v58, %v12452_v30  ;;  %v6538_v59 = vpop.f32.mrb[22].mxu0  ;;  %v6731_v15 = vpop.f32.mrb[22].mxu1 }
 0x49b   : > { %v7302_v50 = vmul.f32 0.2, %v6535_v17  ;;  %v7304_v13 = vmul.f32 0.2, %v6728_v37  ;;  %v6539_v25 = vadd.f32 %v6538_v59, %v12446_v57  ;;  %v6732_v35 = vadd.f32 %v6731_v15, %v12448_v29  ;;  %v6540_v46 = vpop.f32.mrb[23].mxu0  ;;  %v6733_v61 = vpop.f32.mrb[23].mxu1 }
 0x49c   : > { %v7303_v2 = vmul.f32 0.2, %v6537_v24  ;;  %v7305_v9 = vmul.f32 0.2, %v6730_v22  ;;  %v6541_v34 = vadd.f32 %v6540_v46, %v12450_v60  ;;  %v6734_v27 = vadd.f32 %v6733_v61, %v12452_v30 }
 0x49d   : > { %v7558_v42 = vmax.f32 %v6535_v17, %v7302_v50  ;;  %v7560_v56 = vmax.f32 %v6728_v37, %v7304_v13  ;;  %v7310_v28 = vmul.f32 0.2, %v6539_v25  ;;  %v7312_v18 = vmul.f32 0.2, %v6732_v35 }
 0x49e   : > { %v7559_v31 = vmax.f32 %v6537_v24, %v7303_v2  ;;  %v7561_v47 = vmax.f32 %v6730_v22, %v7305_v9  ;;  %v7311_v38 = vmul.f32 0.2, %v6541_v34  ;;  %v7313_v48 = vmul.f32 0.2, %v6734_v27 }
 0x49f   : > { %v7743_v40 = vmax.f32 %v7742_v1, %v7558_v42  ;;  %v7805_v3 = vmax.f32 %v7804_v41, %v7560_v56  ;;  %v7566_v62 = vmax.f32 %v6539_v25, %v7310_v28  ;;  %v7568_v32 = vmax.f32 %v6732_v35, %v7312_v18 }
 0x4a0   : > { %v7774_v14 = vmax.f32 %v7773_v5, %v7559_v31  ;;  %v7836_v21 = vmax.f32 %v7835_v10, %v7561_v47  ;;  %v7567_v8 = vmax.f32 %v6541_v34, %v7311_v38  ;;  %v7569_v52 = vmax.f32 %v6734_v27, %v7313_v48  ;;  %v6544_v12 = vpop.f32.mrb[24].mxu0  ;;  %v6737_v39 = vpop.f32.mrb[24].mxu1 }
 0x4a1   : > { %v7744_v4 = vmax.f32 %v7743_v40, %v7566_v62  ;;  %v7806_v19 = vmax.f32 %v7805_v3, %v7568_v32  ;;  %v6545_v16 = vadd.f32 %v6544_v12, %v12446_v57  ;;  %v6738_v54 = vadd.f32 %v6737_v39, %v12448_v29  ;;  %v6546_v6 = vpop.f32.mrb[25].mxu0  ;;  %v6739_v7 = vpop.f32.mrb[25].mxu1 }
 0x4a2   : > { %v7775_v55 = vmax.f32 %v7774_v14, %v7567_v8  ;;  %v7837_v45 = vmax.f32 %v7836_v21, %v7569_v52  ;;  %v6547_v43 = vadd.f32 %v6546_v6, %v12450_v60  ;;  %v6740_v0 = vadd.f32 %v6739_v7, %v12452_v30  ;;  %v6548_v51 = vpop.f32.mrb[26].mxu0  ;;  %v6741_v53 = vpop.f32.mrb[26].mxu1 }
 0x4a3   : > { %v7318_v20 = vmul.f32 0.2, %v6545_v16  ;;  %v7320_v23 = vmul.f32 0.2, %v6738_v54  ;;  %v6549_v11 = vadd.f32 %v6548_v51, %v12446_v57  ;;  %v6742_v63 = vadd.f32 %v6741_v53, %v12448_v29  ;;  %v6550_v1 = vpop.f32.mrb[27].mxu0  ;;  %v6743_v41 = vpop.f32.mrb[27].mxu1 }
 0x4a4   : > { %v7319_v17 = vmul.f32 0.2, %v6547_v43  ;;  %v7321_v37 = vmul.f32 0.2, %v6740_v0  ;;  %v6551_v44 = vadd.f32 %v6550_v1, %v12450_v60  ;;  %v6744_v58 = vadd.f32 %v6743_v41, %v12452_v30 }
 0x4a5   : > { %v7574_v5 = vmax.f32 %v6545_v16, %v7318_v20  ;;  %v7576_v10 = vmax.f32 %v6738_v54, %v7320_v23  ;;  %v7326_v24 = vmul.f32 0.2, %v6549_v11  ;;  %v7328_v22 = vmul.f32 0.2, %v6742_v63 }
 0x4a6   : > { %v7575_v59 = vmax.f32 %v6547_v43, %v7319_v17  ;;  %v7577_v15 = vmax.f32 %v6740_v0, %v7321_v37  ;;  %v7327_v50 = vmul.f32 0.2, %v6551_v44  ;;  %v7329_v13 = vmul.f32 0.2, %v6744_v58 }
 0x4a7   : > { %v7745_v25 = vmax.f32 %v7744_v4, %v7574_v5  ;;  %v7807_v35 = vmax.f32 %v7806_v19, %v7576_v10  ;;  %v7582_v46 = vmax.f32 %v6549_v11, %v7326_v24  ;;  %v7584_v61 = vmax.f32 %v6742_v63, %v7328_v22 }
 0x4a8   : > { %v7776_v2 = vmax.f32 %v7775_v55, %v7575_v59  ;;  %v7838_v9 = vmax.f32 %v7837_v45, %v7577_v15  ;;  %v7583_v34 = vmax.f32 %v6551_v44, %v7327_v50  ;;  %v7585_v27 = vmax.f32 %v6744_v58, %v7329_v13  ;;  %v6554_v42 = vpop.f32.mrb[28].mxu0  ;;  %v6747_v56 = vpop.f32.mrb[28].mxu1 }
 0x4a9   : > { %v7746_v28 = vmax.f32 %v7745_v25, %v7582_v46  ;;  %v7808_v18 = vmax.f32 %v7807_v35, %v7584_v61  ;;  %v6555_v31 = vadd.f32 %v6554_v42, %v12446_v57  ;;  %v6748_v47 = vadd.f32 %v6747_v56, %v12448_v29  ;;  %v6556_v38 = vpop.f32.mrb[29].mxu0  ;;  %v6749_v48 = vpop.f32.mrb[29].mxu1 }
 0x4aa   : > { %v7777_v40 = vmax.f32 %v7776_v2, %v7583_v34  ;;  %v7839_v3 = vmax.f32 %v7838_v9, %v7585_v27  ;;  %v6557_v62 = vadd.f32 %v6556_v38, %v12450_v60  ;;  %v6750_v32 = vadd.f32 %v6749_v48, %v12452_v30  ;;  %v6558_v14 = vpop.f32.mrb[30].mxu0  ;;  %v6751_v21 = vpop.f32.mrb[30].mxu1 }
 0x4ab   : > { %v7334_v8 = vmul.f32 0.2, %v6555_v31  ;;  %v7336_v52 = vmul.f32 0.2, %v6748_v47  ;;  %v6559_v12 = vadd.f32 %v6558_v14, %v12446_v57  ;;  %v6752_v39 = vadd.f32 %v6751_v21, %v12448_v29  ;;  %v6560_v4 = vpop.f32.mrb[31].mxu0  ;;  %v6753_v19 = vpop.f32.mrb[31].mxu1 }
 0x4ac   : > { %v7335_v16 = vmul.f32 0.2, %v6557_v62  ;;  %v7337_v54 = vmul.f32 0.2, %v6750_v32  ;;  %v6561_v6 = vadd.f32 %v6560_v4, %v12450_v60  ;;  %v6754_v7 = vadd.f32 %v6753_v19, %v12452_v30 }
 0x4ad   : > { %v7590_v55 = vmax.f32 %v6555_v31, %v7334_v8  ;;  %v7592_v45 = vmax.f32 %v6748_v47, %v7336_v52  ;;  %v7342_v43 = vmul.f32 0.2, %v6559_v12  ;;  %v7344_v0 = vmul.f32 0.2, %v6752_v39 }
 0x4ae   : > { %v7591_v51 = vmax.f32 %v6557_v62, %v7335_v16  ;;  %v7593_v53 = vmax.f32 %v6750_v32, %v7337_v54  ;;  %v7343_v20 = vmul.f32 0.2, %v6561_v6  ;;  %v7345_v23 = vmul.f32 0.2, %v6754_v7 }
 0x4af   : > { %v7747_v11 = vmax.f32 %v7746_v28, %v7590_v55  ;;  %v7809_v63 = vmax.f32 %v7808_v18, %v7592_v45  ;;  %v7598_v1 = vmax.f32 %v6559_v12, %v7342_v43  ;;  %v7600_v41 = vmax.f32 %v6752_v39, %v7344_v0 }
 0x4b0   : > { %v7778_v17 = vmax.f32 %v7777_v40, %v7591_v51  ;;  %v7840_v37 = vmax.f32 %v7839_v3, %v7593_v53  ;;  %v7599_v44 = vmax.f32 %v6561_v6, %v7343_v20  ;;  %v7601_v58 = vmax.f32 %v6754_v7, %v7345_v23  ;;  %v6564_v5 = vpop.f32.mrb[32].mxu0  ;;  %v6757_v10 = vpop.f32.mrb[32].mxu1 }
 0x4b1   : > { %v7748_v24 = vmax.f32 %v7747_v11, %v7598_v1  ;;  %v7810_v22 = vmax.f32 %v7809_v63, %v7600_v41  ;;  %v6565_v59 = vadd.f32 %v6564_v5, %v12446_v57  ;;  %v6758_v15 = vadd.f32 %v6757_v10, %v12448_v29  ;;  %v6566_v50 = vpop.f32.mrb[33].mxu0  ;;  %v6759_v13 = vpop.f32.mrb[33].mxu1 }
 0x4b2   : > { %v7779_v25 = vmax.f32 %v7778_v17, %v7599_v44  ;;  %v7841_v35 = vmax.f32 %v7840_v37, %v7601_v58  ;;  %v6567_v46 = vadd.f32 %v6566_v50, %v12450_v60  ;;  %v6760_v61 = vadd.f32 %v6759_v13, %v12452_v30  ;;  %v6568_v2 = vpop.f32.mrb[34].mxu0  ;;  %v6761_v9 = vpop.f32.mrb[34].mxu1 }
 0x4b3   : > { %v7350_v34 = vmul.f32 0.2, %v6565_v59  ;;  %v7352_v27 = vmul.f32 0.2, %v6758_v15  ;;  %v6569_v42 = vadd.f32 %v6568_v2, %v12446_v57  ;;  %v6762_v56 = vadd.f32 %v6761_v9, %v12448_v29  ;;  %v6570_v28 = vpop.f32.mrb[35].mxu0  ;;  %v6763_v18 = vpop.f32.mrb[35].mxu1 }
 0x4b4   : > { %v7351_v31 = vmul.f32 0.2, %v6567_v46  ;;  %v7353_v47 = vmul.f32 0.2, %v6760_v61  ;;  %v6571_v38 = vadd.f32 %v6570_v28, %v12450_v60  ;;  %v6764_v48 = vadd.f32 %v6763_v18, %v12452_v30 }
 0x4b5   : > { %v7606_v40 = vmax.f32 %v6565_v59, %v7350_v34  ;;  %v7608_v3 = vmax.f32 %v6758_v15, %v7352_v27  ;;  %v7358_v62 = vmul.f32 0.2, %v6569_v42  ;;  %v7360_v32 = vmul.f32 0.2, %v6762_v56 }
 0x4b6   : > { %v7607_v14 = vmax.f32 %v6567_v46, %v7351_v31  ;;  %v7609_v21 = vmax.f32 %v6760_v61, %v7353_v47  ;;  %v7359_v8 = vmul.f32 0.2, %v6571_v38  ;;  %v7361_v52 = vmul.f32 0.2, %v6764_v48 }
 0x4b7   : > { %v7749_v12 = vmax.f32 %v7748_v24, %v7606_v40  ;;  %v7811_v39 = vmax.f32 %v7810_v22, %v7608_v3  ;;  %v7614_v4 = vmax.f32 %v6569_v42, %v7358_v62  ;;  %v7616_v19 = vmax.f32 %v6762_v56, %v7360_v32 }
 0x4b8   : > { %v7780_v16 = vmax.f32 %v7779_v25, %v7607_v14  ;;  %v7842_v54 = vmax.f32 %v7841_v35, %v7609_v21  ;;  %v7615_v6 = vmax.f32 %v6571_v38, %v7359_v8  ;;  %v7617_v7 = vmax.f32 %v6764_v48, %v7361_v52  ;;  %v6574_v55 = vpop.f32.mrb[36].mxu0  ;;  %v6767_v45 = vpop.f32.mrb[36].mxu1 }
 0x4b9   : > { %v7750_v43 = vmax.f32 %v7749_v12, %v7614_v4  ;;  %v7812_v0 = vmax.f32 %v7811_v39, %v7616_v19  ;;  %v6575_v51 = vadd.f32 %v6574_v55, %v12446_v57  ;;  %v6768_v53 = vadd.f32 %v6767_v45, %v12448_v29  ;;  %v6576_v20 = vpop.f32.mrb[37].mxu0  ;;  %v6769_v23 = vpop.f32.mrb[37].mxu1 }
 0x4ba   : > { %v7781_v11 = vmax.f32 %v7780_v16, %v7615_v6  ;;  %v7843_v63 = vmax.f32 %v7842_v54, %v7617_v7  ;;  %v6577_v1 = vadd.f32 %v6576_v20, %v12450_v60  ;;  %v6770_v41 = vadd.f32 %v6769_v23, %v12452_v30  ;;  %v6578_v17 = vpop.f32.mrb[38].mxu0  ;;  %v6771_v37 = vpop.f32.mrb[38].mxu1 }
 0x4bb   : > { %v7366_v44 = vmul.f32 0.2, %v6575_v51  ;;  %v7368_v58 = vmul.f32 0.2, %v6768_v53  ;;  %v6579_v5 = vadd.f32 %v6578_v17, %v12446_v57  ;;  %v6772_v10 = vadd.f32 %v6771_v37, %v12448_v29  ;;  %v6580_v24 = vpop.f32.mrb[39].mxu0  ;;  %v6773_v22 = vpop.f32.mrb[39].mxu1 }
 0x4bc   : > { %v7367_v59 = vmul.f32 0.2, %v6577_v1  ;;  %v7369_v15 = vmul.f32 0.2, %v6770_v41  ;;  %v6581_v50 = vadd.f32 %v6580_v24, %v12450_v60  ;;  %v6774_v13 = vadd.f32 %v6773_v22, %v12452_v30 }
 0x4bd   : > { %v7622_v25 = vmax.f32 %v6575_v51, %v7366_v44  ;;  %v7624_v35 = vmax.f32 %v6768_v53, %v7368_v58  ;;  %v7374_v46 = vmul.f32 0.2, %v6579_v5  ;;  %v7376_v61 = vmul.f32 0.2, %v6772_v10 }
 0x4be   : > { %v7623_v2 = vmax.f32 %v6577_v1, %v7367_v59  ;;  %v7625_v9 = vmax.f32 %v6770_v41, %v7369_v15  ;;  %v7375_v34 = vmul.f32 0.2, %v6581_v50  ;;  %v7377_v27 = vmul.f32 0.2, %v6774_v13 }
 0x4bf   : > { %v7751_v42 = vmax.f32 %v7750_v43, %v7622_v25  ;;  %v7813_v56 = vmax.f32 %v7812_v0, %v7624_v35  ;;  %v7630_v28 = vmax.f32 %v6579_v5, %v7374_v46  ;;  %v7632_v18 = vmax.f32 %v6772_v10, %v7376_v61 }
 0x4c0   : > { %v7782_v31 = vmax.f32 %v7781_v11, %v7623_v2  ;;  %v7844_v47 = vmax.f32 %v7843_v63, %v7625_v9  ;;  %v7631_v38 = vmax.f32 %v6581_v50, %v7375_v34  ;;  %v7633_v48 = vmax.f32 %v6774_v13, %v7377_v27  ;;  %v6584_v40 = vpop.f32.mrb[40].mxu0  ;;  %v6777_v3 = vpop.f32.mrb[40].mxu1 }
 0x4c1   : > { %v7752_v62 = vmax.f32 %v7751_v42, %v7630_v28  ;;  %v7814_v32 = vmax.f32 %v7813_v56, %v7632_v18  ;;  %v6585_v14 = vadd.f32 %v6584_v40, %v12446_v57  ;;  %v6778_v21 = vadd.f32 %v6777_v3, %v12448_v29  ;;  %v6586_v8 = vpop.f32.mrb[41].mxu0  ;;  %v6779_v52 = vpop.f32.mrb[41].mxu1 }
 0x4c2   : > { %v7783_v12 = vmax.f32 %v7782_v31, %v7631_v38  ;;  %v7845_v39 = vmax.f32 %v7844_v47, %v7633_v48  ;;  %v6587_v4 = vadd.f32 %v6586_v8, %v12450_v60  ;;  %v6780_v19 = vadd.f32 %v6779_v52, %v12452_v30  ;;  %v6588_v16 = vpop.f32.mrb[42].mxu0  ;;  %v6781_v54 = vpop.f32.mrb[42].mxu1 }
 0x4c3   : > { %v7382_v6 = vmul.f32 0.2, %v6585_v14  ;;  %v7384_v7 = vmul.f32 0.2, %v6778_v21  ;;  %v6589_v55 = vadd.f32 %v6588_v16, %v12446_v57  ;;  %v6782_v45 = vadd.f32 %v6781_v54, %v12448_v29  ;;  %v6590_v43 = vpop.f32.mrb[43].mxu0  ;;  %v6783_v0 = vpop.f32.mrb[43].mxu1 }
 0x4c4   : > { %v7383_v51 = vmul.f32 0.2, %v6587_v4  ;;  %v7385_v53 = vmul.f32 0.2, %v6780_v19  ;;  %v6591_v20 = vadd.f32 %v6590_v43, %v12450_v60  ;;  %v6784_v23 = vadd.f32 %v6783_v0, %v12452_v30 }
 0x4c5   : > { %v7638_v11 = vmax.f32 %v6585_v14, %v7382_v6  ;;  %v7640_v63 = vmax.f32 %v6778_v21, %v7384_v7  ;;  %v7390_v1 = vmul.f32 0.2, %v6589_v55  ;;  %v7392_v41 = vmul.f32 0.2, %v6782_v45 }
 0x4c6   : > { %v7639_v17 = vmax.f32 %v6587_v4, %v7383_v51  ;;  %v7641_v37 = vmax.f32 %v6780_v19, %v7385_v53  ;;  %v7391_v44 = vmul.f32 0.2, %v6591_v20  ;;  %v7393_v58 = vmul.f32 0.2, %v6784_v23 }
 0x4c7   : > { %v7753_v5 = vmax.f32 %v7752_v62, %v7638_v11  ;;  %v7815_v10 = vmax.f32 %v7814_v32, %v7640_v63  ;;  %v7646_v24 = vmax.f32 %v6589_v55, %v7390_v1  ;;  %v7648_v22 = vmax.f32 %v6782_v45, %v7392_v41 }
 0x4c8   : > { %v7784_v59 = vmax.f32 %v7783_v12, %v7639_v17  ;;  %v7846_v15 = vmax.f32 %v7845_v39, %v7641_v37  ;;  %v7647_v50 = vmax.f32 %v6591_v20, %v7391_v44  ;;  %v7649_v13 = vmax.f32 %v6784_v23, %v7393_v58  ;;  %v6594_v25 = vpop.f32.mrb[44].mxu0  ;;  %v6787_v35 = vpop.f32.mrb[44].mxu1 }
 0x4c9   : > { %v7754_v46 = vmax.f32 %v7753_v5, %v7646_v24  ;;  %v7816_v61 = vmax.f32 %v7815_v10, %v7648_v22  ;;  %v6595_v2 = vadd.f32 %v6594_v25, %v12446_v57  ;;  %v6788_v9 = vadd.f32 %v6787_v35, %v12448_v29  ;;  %v6596_v34 = vpop.f32.mrb[45].mxu0  ;;  %v6789_v27 = vpop.f32.mrb[45].mxu1 }
 0x4ca   : > { %v7785_v42 = vmax.f32 %v7784_v59, %v7647_v50  ;;  %v7847_v56 = vmax.f32 %v7846_v15, %v7649_v13  ;;  %v6597_v28 = vadd.f32 %v6596_v34, %v12450_v60  ;;  %v6790_v18 = vadd.f32 %v6789_v27, %v12452_v30  ;;  %v6598_v31 = vpop.f32.mrb[46].mxu0  ;;  %v6791_v47 = vpop.f32.mrb[46].mxu1 }
 0x4cb   : > { %v7398_v38 = vmul.f32 0.2, %v6595_v2  ;;  %v7400_v48 = vmul.f32 0.2, %v6788_v9  ;;  %v6599_v40 = vadd.f32 %v6598_v31, %v12446_v57  ;;  %v6792_v3 = vadd.f32 %v6791_v47, %v12448_v29  ;;  %v6600_v62 = vpop.f32.mrb[47].mxu0  ;;  %v6793_v32 = vpop.f32.mrb[47].mxu1 }
 0x4cc   : > { %v7399_v14 = vmul.f32 0.2, %v6597_v28  ;;  %v7401_v21 = vmul.f32 0.2, %v6790_v18  ;;  %v6601_v8 = vadd.f32 %v6600_v62, %v12450_v60  ;;  %v6794_v52 = vadd.f32 %v6793_v32, %v12452_v30 }
 0x4cd   : > { %v7654_v12 = vmax.f32 %v6595_v2, %v7398_v38  ;;  %v7656_v39 = vmax.f32 %v6788_v9, %v7400_v48  ;;  %v7406_v4 = vmul.f32 0.2, %v6599_v40  ;;  %v7408_v19 = vmul.f32 0.2, %v6792_v3 }
 0x4ce   : > { %v7655_v16 = vmax.f32 %v6597_v28, %v7399_v14  ;;  %v7657_v54 = vmax.f32 %v6790_v18, %v7401_v21  ;;  %v7407_v6 = vmul.f32 0.2, %v6601_v8  ;;  %v7409_v7 = vmul.f32 0.2, %v6794_v52 }
 0x4cf   : > { %v7755_v55 = vmax.f32 %v7754_v46, %v7654_v12  ;;  %v7817_v45 = vmax.f32 %v7816_v61, %v7656_v39  ;;  %v7662_v43 = vmax.f32 %v6599_v40, %v7406_v4  ;;  %v7664_v0 = vmax.f32 %v6792_v3, %v7408_v19 }
 0x4d0   : > { %v7786_v51 = vmax.f32 %v7785_v42, %v7655_v16  ;;  %v7848_v53 = vmax.f32 %v7847_v56, %v7657_v54  ;;  %v7663_v20 = vmax.f32 %v6601_v8, %v7407_v6  ;;  %v7665_v23 = vmax.f32 %v6794_v52, %v7409_v7  ;;  %v6604_v11 = vpop.f32.mrb[48].mxu0  ;;  %v6797_v63 = vpop.f32.mrb[48].mxu1 }
 0x4d1   : > { %v7756_v1 = vmax.f32 %v7755_v55, %v7662_v43  ;;  %v7818_v41 = vmax.f32 %v7817_v45, %v7664_v0  ;;  %v6605_v17 = vadd.f32 %v6604_v11, %v12446_v57  ;;  %v6798_v37 = vadd.f32 %v6797_v63, %v12448_v29  ;;  %v6606_v44 = vpop.f32.mrb[49].mxu0  ;;  %v6799_v58 = vpop.f32.mrb[49].mxu1 }
 0x4d2   : > { %v7787_v5 = vmax.f32 %v7786_v51, %v7663_v20  ;;  %v7849_v10 = vmax.f32 %v7848_v53, %v7665_v23  ;;  %v6607_v24 = vadd.f32 %v6606_v44, %v12450_v60  ;;  %v6800_v22 = vadd.f32 %v6799_v58, %v12452_v30  ;;  %v6608_v59 = vpop.f32.mrb[50].mxu0  ;;  %v6801_v15 = vpop.f32.mrb[50].mxu1 }
 0x4d3   : > { %v7414_v50 = vmul.f32 0.2, %v6605_v17  ;;  %v7416_v13 = vmul.f32 0.2, %v6798_v37  ;;  %v6609_v25 = vadd.f32 %v6608_v59, %v12446_v57  ;;  %v6802_v35 = vadd.f32 %v6801_v15, %v12448_v29  ;;  %v6610_v46 = vpop.f32.mrb[51].mxu0  ;;  %v6803_v61 = vpop.f32.mrb[51].mxu1 }
 0x4d4   : > { %v7415_v2 = vmul.f32 0.2, %v6607_v24  ;;  %v7417_v9 = vmul.f32 0.2, %v6800_v22  ;;  %v6611_v34 = vadd.f32 %v6610_v46, %v12450_v60  ;;  %v6804_v27 = vadd.f32 %v6803_v61, %v12452_v30 }
 0x4d5   : > { %v7670_v42 = vmax.f32 %v6605_v17, %v7414_v50  ;;  %v7672_v56 = vmax.f32 %v6798_v37, %v7416_v13  ;;  %v7422_v28 = vmul.f32 0.2, %v6609_v25  ;;  %v7424_v18 = vmul.f32 0.2, %v6802_v35 }
 0x4d6   : > { %v7671_v31 = vmax.f32 %v6607_v24, %v7415_v2  ;;  %v7673_v47 = vmax.f32 %v6800_v22, %v7417_v9  ;;  %v7423_v38 = vmul.f32 0.2, %v6611_v34  ;;  %v7425_v48 = vmul.f32 0.2, %v6804_v27 }
 0x4d7   : > { %v7757_v40 = vmax.f32 %v7756_v1, %v7670_v42  ;;  %v7819_v3 = vmax.f32 %v7818_v41, %v7672_v56  ;;  %v7678_v62 = vmax.f32 %v6609_v25, %v7422_v28  ;;  %v7680_v32 = vmax.f32 %v6802_v35, %v7424_v18 }
 0x4d8   : > { %v7788_v14 = vmax.f32 %v7787_v5, %v7671_v31  ;;  %v7850_v21 = vmax.f32 %v7849_v10, %v7673_v47  ;;  %v7679_v8 = vmax.f32 %v6611_v34, %v7423_v38  ;;  %v7681_v52 = vmax.f32 %v6804_v27, %v7425_v48  ;;  %v6614_v12 = vpop.f32.mrb[52].mxu0  ;;  %v6807_v39 = vpop.f32.mrb[52].mxu1 }
 0x4d9   : > { %v7758_v4 = vmax.f32 %v7757_v40, %v7678_v62  ;;  %v7820_v19 = vmax.f32 %v7819_v3, %v7680_v32  ;;  %v6615_v16 = vadd.f32 %v6614_v12, %v12446_v57  ;;  %v6808_v54 = vadd.f32 %v6807_v39, %v12448_v29  ;;  %v6616_v6 = vpop.f32.mrb[53].mxu0  ;;  %v6809_v7 = vpop.f32.mrb[53].mxu1 }
 0x4da   : > { %v7789_v55 = vmax.f32 %v7788_v14, %v7679_v8  ;;  %v7851_v45 = vmax.f32 %v7850_v21, %v7681_v52  ;;  %v6617_v43 = vadd.f32 %v6616_v6, %v12450_v60  ;;  %v6810_v0 = vadd.f32 %v6809_v7, %v12452_v30  ;;  %v6618_v51 = vpop.f32.mrb[54].mxu0  ;;  %v6811_v53 = vpop.f32.mrb[54].mxu1 }
 0x4db   : > { %v7430_v20 = vmul.f32 0.2, %v6615_v16  ;;  %v7432_v23 = vmul.f32 0.2, %v6808_v54  ;;  %v6619_v11 = vadd.f32 %v6618_v51, %v12446_v57  ;;  %v6812_v63 = vadd.f32 %v6811_v53, %v12448_v29  ;;  %v6620_v1 = vpop.f32.mrb[55].mxu0  ;;  %v6813_v41 = vpop.f32.mrb[55].mxu1 }
 0x4dc   : > { %v7431_v17 = vmul.f32 0.2, %v6617_v43  ;;  %v7433_v37 = vmul.f32 0.2, %v6810_v0  ;;  %v6621_v44 = vadd.f32 %v6620_v1, %v12450_v60  ;;  %v6814_v58 = vadd.f32 %v6813_v41, %v12452_v30 }
 0x4dd   : > { %v7686_v5 = vmax.f32 %v6615_v16, %v7430_v20  ;;  %v7688_v10 = vmax.f32 %v6808_v54, %v7432_v23  ;;  %v7438_v24 = vmul.f32 0.2, %v6619_v11  ;;  %v7440_v22 = vmul.f32 0.2, %v6812_v63 }
 0x4de   : > { %v7687_v59 = vmax.f32 %v6617_v43, %v7431_v17  ;;  %v7689_v15 = vmax.f32 %v6810_v0, %v7433_v37  ;;  %v7439_v50 = vmul.f32 0.2, %v6621_v44  ;;  %v7441_v13 = vmul.f32 0.2, %v6814_v58 }
 0x4df   : > { %v7759_v25 = vmax.f32 %v7758_v4, %v7686_v5  ;;  %v7821_v35 = vmax.f32 %v7820_v19, %v7688_v10  ;;  %v7694_v46 = vmax.f32 %v6619_v11, %v7438_v24  ;;  %v7696_v61 = vmax.f32 %v6812_v63, %v7440_v22 }
 0x4e0   : > { %v7790_v2 = vmax.f32 %v7789_v55, %v7687_v59  ;;  %v7852_v9 = vmax.f32 %v7851_v45, %v7689_v15  ;;  %v7695_v34 = vmax.f32 %v6621_v44, %v7439_v50  ;;  %v7697_v27 = vmax.f32 %v6814_v58, %v7441_v13  ;;  %v6624_v42 = vpop.f32.mrb[56].mxu0  ;;  %v6817_v56 = vpop.f32.mrb[56].mxu1 }
 0x4e1   : > { %v7760_v28 = vmax.f32 %v7759_v25, %v7694_v46  ;;  %v7822_v18 = vmax.f32 %v7821_v35, %v7696_v61  ;;  %v6625_v31 = vadd.f32 %v6624_v42, %v12446_v57  ;;  %v6818_v47 = vadd.f32 %v6817_v56, %v12448_v29  ;;  %v6626_v38 = vpop.f32.mrb[57].mxu0  ;;  %v6819_v48 = vpop.f32.mrb[57].mxu1 }
 0x4e2   : > { %v7791_v40 = vmax.f32 %v7790_v2, %v7695_v34  ;;  %v7853_v3 = vmax.f32 %v7852_v9, %v7697_v27  ;;  %v6627_v62 = vadd.f32 %v6626_v38, %v12450_v60  ;;  %v6820_v32 = vadd.f32 %v6819_v48, %v12452_v30  ;;  %v6628_v14 = vpop.f32.mrb[58].mxu0  ;;  %v6821_v21 = vpop.f32.mrb[58].mxu1 }
 0x4e3   : > { %v7446_v8 = vmul.f32 0.2, %v6625_v31  ;;  %v7448_v52 = vmul.f32 0.2, %v6818_v47  ;;  %v6629_v12 = vadd.f32 %v6628_v14, %v12446_v57  ;;  %v6822_v39 = vadd.f32 %v6821_v21, %v12448_v29  ;;  %v6630_v4 = vpop.f32.mrb[59].mxu0  ;;  %v6823_v19 = vpop.f32.mrb[59].mxu1 }
 0x4e4   : > { %v7447_v16 = vmul.f32 0.2, %v6627_v62  ;;  %v7449_v54 = vmul.f32 0.2, %v6820_v32  ;;  %v6631_v6 = vadd.f32 %v6630_v4, %v12450_v60  ;;  %v6824_v7 = vadd.f32 %v6823_v19, %v12452_v30 }
 0x4e5   : > { %v7702_v55 = vmax.f32 %v6625_v31, %v7446_v8  ;;  %v7704_v45 = vmax.f32 %v6818_v47, %v7448_v52  ;;  %v7454_v43 = vmul.f32 0.2, %v6629_v12  ;;  %v7456_v0 = vmul.f32 0.2, %v6822_v39 }
 0x4e6   : > { %v7703_v51 = vmax.f32 %v6627_v62, %v7447_v16  ;;  %v7705_v53 = vmax.f32 %v6820_v32, %v7449_v54  ;;  %v7455_v20 = vmul.f32 0.2, %v6631_v6  ;;  %v7457_v23 = vmul.f32 0.2, %v6824_v7 }
 0x4e7   : > { %v7761_v11 = vmax.f32 %v7760_v28, %v7702_v55  ;;  %v7823_v63 = vmax.f32 %v7822_v18, %v7704_v45  ;;  %v7710_v1 = vmax.f32 %v6629_v12, %v7454_v43  ;;  %v7712_v41 = vmax.f32 %v6822_v39, %v7456_v0 }
 0x4e8   : > { %v7792_v17 = vmax.f32 %v7791_v40, %v7703_v51  ;;  %v7854_v37 = vmax.f32 %v7853_v3, %v7705_v53  ;;  %v7711_v44 = vmax.f32 %v6631_v6, %v7455_v20  ;;  %v7713_v58 = vmax.f32 %v6824_v7, %v7457_v23  ;;  %v6634_v5 = vpop.f32.mrb[60].mxu0  ;;  %v6827_v10 = vpop.f32.mrb[60].mxu1 }
 0x4e9   : > { %v7762_v24 = vmax.f32 %v7761_v11, %v7710_v1  ;;  %v7824_v22 = vmax.f32 %v7823_v63, %v7712_v41  ;;  %v6635_v59 = vadd.f32 %v6634_v5, %v12446_v57  ;;  %v6828_v15 = vadd.f32 %v6827_v10, %v12448_v29  ;;  %v6636_v50 = vpop.f32.mrb[61].mxu0  ;;  %v6829_v13 = vpop.f32.mrb[61].mxu1 }
 0x4ea   : > { %v7793_v25 = vmax.f32 %v7792_v17, %v7711_v44  ;;  %v7855_v35 = vmax.f32 %v7854_v37, %v7713_v58  ;;  %v6637_v46 = vadd.f32 %v6636_v50, %v12450_v60  ;;  %v6830_v61 = vadd.f32 %v6829_v13, %v12452_v30  ;;  %v6638_v2 = vpop.f32.mrb[62].mxu0  ;;  %v6831_v9 = vpop.f32.mrb[62].mxu1 }
 0x4eb   : > { %v7462_v34 = vmul.f32 0.2, %v6635_v59  ;;  %v7464_v27 = vmul.f32 0.2, %v6828_v15  ;;  %v6639_v42 = vadd.f32 %v6638_v2, %v12446_v57  ;;  %v6832_v56 = vadd.f32 %v6831_v9, %v12448_v29  ;;  %v6640_v28 = vpop.f32.mrb[63].mxu0  ;;  %v6833_v18 = vpop.f32.mrb[63].mxu1 }
 0x4ec   : > { %v7463_v31 = vmul.f32 0.2, %v6637_v46  ;;  %v7465_v47 = vmul.f32 0.2, %v6830_v61  ;;  %v6641_v38 = vadd.f32 %v6640_v28, %v12450_v60  ;;  %v6834_v48 = vadd.f32 %v6833_v18, %v12452_v30 }
 0x4ed   : > { %v7718_v40 = vmax.f32 %v6635_v59, %v7462_v34  ;;  %v7720_v3 = vmax.f32 %v6828_v15, %v7464_v27  ;;  %v7470_v62 = vmul.f32 0.2, %v6639_v42  ;;  %v7472_v32 = vmul.f32 0.2, %v6832_v56 }
 0x4ee   : > { %v7719_v14 = vmax.f32 %v6637_v46, %v7463_v31  ;;  %v7721_v21 = vmax.f32 %v6830_v61, %v7465_v47  ;;  %v7471_v8 = vmul.f32 0.2, %v6641_v38  ;;  %v7473_v52 = vmul.f32 0.2, %v6834_v48 }
 0x4ef   : > { %v7763_v57 = vmax.f32 %v7762_v24, %v7718_v40  ;;  %v7825_v12 = vmax.f32 %v7824_v22, %v7720_v3  ;;  %v7726_v29 = vmax.f32 %v6639_v42, %v7470_v62  ;;  %v7728_v39 = vmax.f32 %v6832_v56, %v7472_v32 }
 0x4f0   : > { %v7794_v4 = vmax.f32 %v7793_v25, %v7719_v14  ;;  %v7856_v19 = vmax.f32 %v7855_v35, %v7721_v21  ;;  %v7727_v60 = vmax.f32 %v6641_v38, %v7471_v8  ;;  %v7729_v30 = vmax.f32 %v6834_v48, %v7473_v52  ;;  %v6870_v16 = vpop.f32.mrb[64].mxu0  ;;  %v7063_v54 = vpop.f32.mrb[64].mxu1 }
 0x4f1   : > { %v7764_v6 = vmax.f32 %v7763_v57, %v7726_v29  ;;  %v7826_v7 = vmax.f32 %v7825_v12, %v7728_v39  ;;  %v6871_v55 = vadd.f32 %v6870_v16, %v12466_v26  ;;  %v7064_v45 = vadd.f32 %v7063_v54, %v12468_v49  ;;  %v6872_v43 = vpop.f32.mrb[65].mxu0  ;;  %v7065_v0 = vpop.f32.mrb[65].mxu1 }
 0x4f2   : > { %v7795_v51 = vmax.f32 %v7794_v4, %v7727_v60  ;;  %v7857_v53 = vmax.f32 %v7856_v19, %v7729_v30  ;;  %v6873_v20 = vadd.f32 %v6872_v43, %v12472_v33  ;;  %v7066_v23 = vadd.f32 %v7065_v0, %v12474_v36  ;;  %v6874_v11 = vpop.f32.mrb[66].mxu0  ;;  %v7067_v63 = vpop.f32.mrb[66].mxu1 }
 0x4f3   : > { %7986 = vst [vmem:[%s12614_s21] sm:$0xff] %v7764_v6  ;;  %7988 = vst [vmem:[%s12614_s21 + $0x10] sm:$0xff] %v7826_v7  ;;  %v7226_v1 = vmul.f32 0.2, %v6871_v55  ;;  %v7228_v41 = vmul.f32 0.2, %v7064_v45  ;;  %v6875_v17 = vadd.f32 %v6874_v11, %v12466_v26  ;;  %v7068_v37 = vadd.f32 %v7067_v63, %v12468_v49  ;;  %v6876_v44 = vpop.f32.mrb[67].mxu0 }
 0x4f4   : > { %v7069_v58 = vpop.f32.mrb[67].mxu1  ;;  %7987 = vst [vmem:[%s12614_s21 + $0x8] sm:$0xff] %v7795_v51  ;;  %7989 = vst [vmem:[%s12614_s21 + $0x18] sm:$0xff] %v7857_v53  ;;  %v7227_v5 = vmul.f32 0.2, %v6873_v20  ;;  %v6877_v24 = vadd.f32 %v6876_v44, %v12472_v33 }
 0x4f5   : > { %v7229_v10 = vmul.f32 0.2, %v7066_v23  ;;  %v7070_v22 = vadd.f32 %v7069_v58, %v12474_v36  ;;  %v7234_v59 = vmul.f32 0.2, %v6875_v17  ;;  %v7236_v15 = vmul.f32 0.2, %v7068_v37 }
 0x4f6   : > { %v7235_v50 = vmul.f32 0.2, %v6877_v24  ;;  %v7482_v25 = vmax.f32 %v6871_v55, %v7226_v1  ;;  %v7484_v35 = vmax.f32 %v7064_v45, %v7228_v41  ;;  %v7483_v2 = vmax.f32 %v6873_v20, %v7227_v5 }
 0x4f7   : > { %v7237_v13 = vmul.f32 0.2, %v7070_v22  ;;  %v7490_v46 = vmax.f32 %v6875_v17, %v7234_v59  ;;  %v7492_v61 = vmax.f32 %v7068_v37, %v7236_v15  ;;  %v7485_v9 = vmax.f32 %v7066_v23, %v7229_v10 }
 0x4f8   : > { %v7491_v34 = vmax.f32 %v6877_v24, %v7235_v50  ;;  %v6880_v42 = vpop.f32.mrb[68].mxu0  ;;  %v7073_v56 = vpop.f32.mrb[68].mxu1 }
 0x4f9   : > { %v7493_v27 = vmax.f32 %v7070_v22, %v7237_v13  ;;  %v7858_v28 = vmax.f32 %v7482_v25, %v7490_v46  ;;  %v7920_v18 = vmax.f32 %v7484_v35, %v7492_v61  ;;  %v6881_v31 = vadd.f32 %v6880_v42, %v12466_v26  ;;  %v6882_v38 = vpop.f32.mrb[69].mxu0  ;;  %v7075_v48 = vpop.f32.mrb[69].mxu1 }
 0x4fa   : > { %v7074_v47 = vadd.f32 %v7073_v56, %v12468_v49  ;;  %v7889_v40 = vmax.f32 %v7483_v2, %v7491_v34  ;;  %v6883_v62 = vadd.f32 %v6882_v38, %v12472_v33  ;;  %v7076_v32 = vadd.f32 %v7075_v48, %v12474_v36  ;;  %v6884_v14 = vpop.f32.mrb[70].mxu0  ;;  %v7077_v21 = vpop.f32.mrb[70].mxu1 }
 0x4fb   : > { %v7951_v3 = vmax.f32 %v7485_v9, %v7493_v27  ;;  %v7242_v8 = vmul.f32 0.2, %v6881_v31  ;;  %v6885_v57 = vadd.f32 %v6884_v14, %v12466_v26  ;;  %v7078_v12 = vadd.f32 %v7077_v21, %v12468_v49  ;;  %v6886_v29 = vpop.f32.mrb[71].mxu0  ;;  %v7079_v39 = vpop.f32.mrb[71].mxu1 }
 0x4fc   : > { %v7244_v52 = vmul.f32 0.2, %v7074_v47  ;;  %v7243_v4 = vmul.f32 0.2, %v6883_v62  ;;  %v7245_v19 = vmul.f32 0.2, %v7076_v32  ;;  %v6887_v60 = vadd.f32 %v6886_v29, %v12472_v33 }
 0x4fd   : > { %v7080_v30 = vadd.f32 %v7079_v39, %v12474_v36  ;;  %v7498_v16 = vmax.f32 %v6881_v31, %v7242_v8  ;;  %v7250_v6 = vmul.f32 0.2, %v6885_v57  ;;  %v7252_v7 = vmul.f32 0.2, %v7078_v12 }
 0x4fe   : > { %v7500_v54 = vmax.f32 %v7074_v47, %v7244_v52  ;;  %v7499_v55 = vmax.f32 %v6883_v62, %v7243_v4  ;;  %v7501_v45 = vmax.f32 %v7076_v32, %v7245_v19  ;;  %v7251_v43 = vmul.f32 0.2, %v6887_v60 }
 0x4ff   : > { %v7253_v0 = vmul.f32 0.2, %v7080_v30  ;;  %v7859_v51 = vmax.f32 %v7858_v28, %v7498_v16  ;;  %v7506_v20 = vmax.f32 %v6885_v57, %v7250_v6  ;;  %v7508_v23 = vmax.f32 %v7078_v12, %v7252_v7 }
 0x500   : > { %v7921_v53 = vmax.f32 %v7920_v18, %v7500_v54  ;;  %v7890_v11 = vmax.f32 %v7889_v40, %v7499_v55  ;;  %v7952_v63 = vmax.f32 %v7951_v3, %v7501_v45  ;;  %v7507_v1 = vmax.f32 %v6887_v60, %v7251_v43  ;;  %v6890_v17 = vpop.f32.mrb[72].mxu0  ;;  %v7083_v37 = vpop.f32.mrb[72].mxu1 }
 0x501   : > { %v7509_v41 = vmax.f32 %v7080_v30, %v7253_v0  ;;  %v7860_v44 = vmax.f32 %v7859_v51, %v7506_v20  ;;  %v6891_v5 = vadd.f32 %v6890_v17, %v12466_v26  ;;  %v7084_v10 = vadd.f32 %v7083_v37, %v12468_v49  ;;  %v6892_v24 = vpop.f32.mrb[73].mxu0  ;;  %v7085_v22 = vpop.f32.mrb[73].mxu1 }
 0x502   : > { %v7922_v58 = vmax.f32 %v7921_v53, %v7508_v23  ;;  %v7891_v59 = vmax.f32 %v7890_v11, %v7507_v1  ;;  %v6893_v50 = vadd.f32 %v6892_v24, %v12472_v33  ;;  %v7086_v13 = vadd.f32 %v7085_v22, %v12474_v36  ;;  %v6894_v25 = vpop.f32.mrb[74].mxu0  ;;  %v7087_v35 = vpop.f32.mrb[74].mxu1 }
 0x503   : > { %v7953_v15 = vmax.f32 %v7952_v63, %v7509_v41  ;;  %v7258_v46 = vmul.f32 0.2, %v6891_v5  ;;  %v7260_v61 = vmul.f32 0.2, %v7084_v10  ;;  %v6895_v2 = vadd.f32 %v6894_v25, %v12466_v26  ;;  %v6896_v34 = vpop.f32.mrb[75].mxu0  ;;  %v7089_v27 = vpop.f32.mrb[75].mxu1 }
 0x504   : > { %v7088_v9 = vadd.f32 %v7087_v35, %v12468_v49  ;;  %v7259_v42 = vmul.f32 0.2, %v6893_v50  ;;  %v7261_v56 = vmul.f32 0.2, %v7086_v13  ;;  %v6897_v28 = vadd.f32 %v6896_v34, %v12472_v33 }
 0x505   : > { %v7090_v18 = vadd.f32 %v7089_v27, %v12474_v36  ;;  %v7514_v31 = vmax.f32 %v6891_v5, %v7258_v46  ;;  %v7516_v47 = vmax.f32 %v7084_v10, %v7260_v61  ;;  %v7266_v38 = vmul.f32 0.2, %v6895_v2 }
 0x506   : > { %v7268_v48 = vmul.f32 0.2, %v7088_v9  ;;  %v7515_v40 = vmax.f32 %v6893_v50, %v7259_v42  ;;  %v7517_v3 = vmax.f32 %v7086_v13, %v7261_v56  ;;  %v7267_v62 = vmul.f32 0.2, %v6897_v28 }
 0x507   : > { %v7269_v32 = vmul.f32 0.2, %v7090_v18  ;;  %v7861_v14 = vmax.f32 %v7860_v44, %v7514_v31  ;;  %v7923_v21 = vmax.f32 %v7922_v58, %v7516_v47  ;;  %v7522_v8 = vmax.f32 %v6895_v2, %v7266_v38 }
 0x508   : > { %v7524_v52 = vmax.f32 %v7088_v9, %v7268_v48  ;;  %v7892_v57 = vmax.f32 %v7891_v59, %v7515_v40  ;;  %v7954_v12 = vmax.f32 %v7953_v15, %v7517_v3  ;;  %v7523_v29 = vmax.f32 %v6897_v28, %v7267_v62  ;;  %v6900_v4 = vpop.f32.mrb[76].mxu0  ;;  %v7093_v19 = vpop.f32.mrb[76].mxu1 }
 0x509   : > { %v7525_v39 = vmax.f32 %v7090_v18, %v7269_v32  ;;  %v7862_v60 = vmax.f32 %v7861_v14, %v7522_v8  ;;  %v6901_v16 = vadd.f32 %v6900_v4, %v12466_v26  ;;  %v7094_v54 = vadd.f32 %v7093_v19, %v12468_v49  ;;  %v6902_v6 = vpop.f32.mrb[77].mxu0  ;;  %v7095_v7 = vpop.f32.mrb[77].mxu1 }
 0x50a   : > { %v7924_v30 = vmax.f32 %v7923_v21, %v7524_v52  ;;  %v7893_v55 = vmax.f32 %v7892_v57, %v7523_v29  ;;  %v6903_v43 = vadd.f32 %v6902_v6, %v12472_v33  ;;  %v7096_v0 = vadd.f32 %v7095_v7, %v12474_v36  ;;  %v6904_v51 = vpop.f32.mrb[78].mxu0  ;;  %v7097_v53 = vpop.f32.mrb[78].mxu1 }
 0x50b   : > { %v7955_v45 = vmax.f32 %v7954_v12, %v7525_v39  ;;  %v7274_v20 = vmul.f32 0.2, %v6901_v16  ;;  %v7276_v23 = vmul.f32 0.2, %v7094_v54  ;;  %v6905_v11 = vadd.f32 %v6904_v51, %v12466_v26  ;;  %v6906_v1 = vpop.f32.mrb[79].mxu0  ;;  %v7099_v41 = vpop.f32.mrb[79].mxu1 }
 0x50c   : > { %v7098_v63 = vadd.f32 %v7097_v53, %v12468_v49  ;;  %v7275_v17 = vmul.f32 0.2, %v6903_v43  ;;  %v7277_v37 = vmul.f32 0.2, %v7096_v0  ;;  %v6907_v44 = vadd.f32 %v6906_v1, %v12472_v33 }
 0x50d   : > { %v7100_v58 = vadd.f32 %v7099_v41, %v12474_v36  ;;  %v7530_v5 = vmax.f32 %v6901_v16, %v7274_v20  ;;  %v7532_v10 = vmax.f32 %v7094_v54, %v7276_v23  ;;  %v7282_v24 = vmul.f32 0.2, %v6905_v11 }
 0x50e   : > { %v7284_v22 = vmul.f32 0.2, %v7098_v63  ;;  %v7531_v59 = vmax.f32 %v6903_v43, %v7275_v17  ;;  %v7533_v15 = vmax.f32 %v7096_v0, %v7277_v37  ;;  %v7283_v50 = vmul.f32 0.2, %v6907_v44 }
 0x50f   : > { %v7285_v13 = vmul.f32 0.2, %v7100_v58  ;;  %v7863_v25 = vmax.f32 %v7862_v60, %v7530_v5  ;;  %v7925_v35 = vmax.f32 %v7924_v30, %v7532_v10  ;;  %v7538_v46 = vmax.f32 %v6905_v11, %v7282_v24 }
 0x510   : > { %v7540_v61 = vmax.f32 %v7098_v63, %v7284_v22  ;;  %v7894_v2 = vmax.f32 %v7893_v55, %v7531_v59  ;;  %v7956_v9 = vmax.f32 %v7955_v45, %v7533_v15  ;;  %v7539_v34 = vmax.f32 %v6907_v44, %v7283_v50  ;;  %v6910_v42 = vpop.f32.mrb[80].mxu0  ;;  %v7103_v56 = vpop.f32.mrb[80].mxu1 }
 0x511   : > { %v7541_v27 = vmax.f32 %v7100_v58, %v7285_v13  ;;  %v7864_v28 = vmax.f32 %v7863_v25, %v7538_v46  ;;  %v6911_v31 = vadd.f32 %v6910_v42, %v12466_v26  ;;  %v7104_v47 = vadd.f32 %v7103_v56, %v12468_v49  ;;  %v6912_v38 = vpop.f32.mrb[81].mxu0  ;;  %v7105_v48 = vpop.f32.mrb[81].mxu1 }
 0x512   : > { %v7926_v18 = vmax.f32 %v7925_v35, %v7540_v61  ;;  %v7895_v40 = vmax.f32 %v7894_v2, %v7539_v34  ;;  %v6913_v62 = vadd.f32 %v6912_v38, %v12472_v33  ;;  %v7106_v32 = vadd.f32 %v7105_v48, %v12474_v36  ;;  %v6914_v14 = vpop.f32.mrb[82].mxu0  ;;  %v7107_v21 = vpop.f32.mrb[82].mxu1 }
 0x513   : > { %v7957_v3 = vmax.f32 %v7956_v9, %v7541_v27  ;;  %v7290_v8 = vmul.f32 0.2, %v6911_v31  ;;  %v7292_v52 = vmul.f32 0.2, %v7104_v47  ;;  %v6915_v57 = vadd.f32 %v6914_v14, %v12466_v26  ;;  %v6916_v29 = vpop.f32.mrb[83].mxu0  ;;  %v7109_v39 = vpop.f32.mrb[83].mxu1 }
 0x514   : > { %v7108_v12 = vadd.f32 %v7107_v21, %v12468_v49  ;;  %v7291_v4 = vmul.f32 0.2, %v6913_v62  ;;  %v7293_v19 = vmul.f32 0.2, %v7106_v32  ;;  %v6917_v60 = vadd.f32 %v6916_v29, %v12472_v33 }
 0x515   : > { %v7110_v30 = vadd.f32 %v7109_v39, %v12474_v36  ;;  %v7546_v16 = vmax.f32 %v6911_v31, %v7290_v8  ;;  %v7548_v54 = vmax.f32 %v7104_v47, %v7292_v52  ;;  %v7298_v6 = vmul.f32 0.2, %v6915_v57 }
 0x516   : > { %v7300_v7 = vmul.f32 0.2, %v7108_v12  ;;  %v7547_v55 = vmax.f32 %v6913_v62, %v7291_v4  ;;  %v7549_v45 = vmax.f32 %v7106_v32, %v7293_v19  ;;  %v7299_v43 = vmul.f32 0.2, %v6917_v60 }
 0x517   : > { %v7301_v0 = vmul.f32 0.2, %v7110_v30  ;;  %v7865_v51 = vmax.f32 %v7864_v28, %v7546_v16  ;;  %v7927_v53 = vmax.f32 %v7926_v18, %v7548_v54  ;;  %v7554_v20 = vmax.f32 %v6915_v57, %v7298_v6 }
 0x518   : > { %v7556_v23 = vmax.f32 %v7108_v12, %v7300_v7  ;;  %v7896_v11 = vmax.f32 %v7895_v40, %v7547_v55  ;;  %v7958_v63 = vmax.f32 %v7957_v3, %v7549_v45  ;;  %v7555_v1 = vmax.f32 %v6917_v60, %v7299_v43  ;;  %v6920_v17 = vpop.f32.mrb[84].mxu0  ;;  %v7113_v37 = vpop.f32.mrb[84].mxu1 }
 0x519   : > { %v7557_v41 = vmax.f32 %v7110_v30, %v7301_v0  ;;  %v7866_v44 = vmax.f32 %v7865_v51, %v7554_v20  ;;  %v6921_v5 = vadd.f32 %v6920_v17, %v12466_v26  ;;  %v7114_v10 = vadd.f32 %v7113_v37, %v12468_v49  ;;  %v6922_v24 = vpop.f32.mrb[85].mxu0  ;;  %v7115_v22 = vpop.f32.mrb[85].mxu1 }
 0x51a   : > { %v7928_v58 = vmax.f32 %v7927_v53, %v7556_v23  ;;  %v7897_v59 = vmax.f32 %v7896_v11, %v7555_v1  ;;  %v6923_v50 = vadd.f32 %v6922_v24, %v12472_v33  ;;  %v7116_v13 = vadd.f32 %v7115_v22, %v12474_v36  ;;  %v6924_v25 = vpop.f32.mrb[86].mxu0  ;;  %v7117_v35 = vpop.f32.mrb[86].mxu1 }
 0x51b   : > { %v7959_v15 = vmax.f32 %v7958_v63, %v7557_v41  ;;  %v7306_v46 = vmul.f32 0.2, %v6921_v5  ;;  %v7308_v61 = vmul.f32 0.2, %v7114_v10  ;;  %v6925_v2 = vadd.f32 %v6924_v25, %v12466_v26  ;;  %v6926_v34 = vpop.f32.mrb[87].mxu0  ;;  %v7119_v27 = vpop.f32.mrb[87].mxu1 }
 0x51c   : > { %v7118_v9 = vadd.f32 %v7117_v35, %v12468_v49  ;;  %v7307_v42 = vmul.f32 0.2, %v6923_v50  ;;  %v7309_v56 = vmul.f32 0.2, %v7116_v13  ;;  %v6927_v28 = vadd.f32 %v6926_v34, %v12472_v33 }
 0x51d   : > { %v7120_v18 = vadd.f32 %v7119_v27, %v12474_v36  ;;  %v7562_v31 = vmax.f32 %v6921_v5, %v7306_v46  ;;  %v7564_v47 = vmax.f32 %v7114_v10, %v7308_v61  ;;  %v7314_v38 = vmul.f32 0.2, %v6925_v2 }
 0x51e   : > { %v7316_v48 = vmul.f32 0.2, %v7118_v9  ;;  %v7563_v40 = vmax.f32 %v6923_v50, %v7307_v42  ;;  %v7565_v3 = vmax.f32 %v7116_v13, %v7309_v56  ;;  %v7315_v62 = vmul.f32 0.2, %v6927_v28 }
 0x51f   : > { %v7317_v32 = vmul.f32 0.2, %v7120_v18  ;;  %v7867_v14 = vmax.f32 %v7866_v44, %v7562_v31  ;;  %v7929_v21 = vmax.f32 %v7928_v58, %v7564_v47  ;;  %v7570_v8 = vmax.f32 %v6925_v2, %v7314_v38 }
 0x520   : > { %v7572_v52 = vmax.f32 %v7118_v9, %v7316_v48  ;;  %v7898_v57 = vmax.f32 %v7897_v59, %v7563_v40  ;;  %v7960_v12 = vmax.f32 %v7959_v15, %v7565_v3  ;;  %v7571_v29 = vmax.f32 %v6927_v28, %v7315_v62  ;;  %v6930_v4 = vpop.f32.mrb[88].mxu0  ;;  %v7123_v19 = vpop.f32.mrb[88].mxu1 }
 0x521   : > { %v7573_v39 = vmax.f32 %v7120_v18, %v7317_v32  ;;  %v7868_v60 = vmax.f32 %v7867_v14, %v7570_v8  ;;  %v6931_v16 = vadd.f32 %v6930_v4, %v12466_v26  ;;  %v7124_v54 = vadd.f32 %v7123_v19, %v12468_v49  ;;  %v6932_v6 = vpop.f32.mrb[89].mxu0  ;;  %v7125_v7 = vpop.f32.mrb[89].mxu1 }
 0x522   : > { %v7930_v30 = vmax.f32 %v7929_v21, %v7572_v52  ;;  %v7899_v55 = vmax.f32 %v7898_v57, %v7571_v29  ;;  %v6933_v43 = vadd.f32 %v6932_v6, %v12472_v33  ;;  %v7126_v0 = vadd.f32 %v7125_v7, %v12474_v36  ;;  %v6934_v51 = vpop.f32.mrb[90].mxu0  ;;  %v7127_v53 = vpop.f32.mrb[90].mxu1 }
 0x523   : > { %v7961_v45 = vmax.f32 %v7960_v12, %v7573_v39  ;;  %v7322_v20 = vmul.f32 0.2, %v6931_v16  ;;  %v7324_v23 = vmul.f32 0.2, %v7124_v54  ;;  %v6935_v11 = vadd.f32 %v6934_v51, %v12466_v26  ;;  %v6936_v1 = vpop.f32.mrb[91].mxu0  ;;  %v7129_v41 = vpop.f32.mrb[91].mxu1 }
 0x524   : > { %v7128_v63 = vadd.f32 %v7127_v53, %v12468_v49  ;;  %v7323_v17 = vmul.f32 0.2, %v6933_v43  ;;  %v7325_v37 = vmul.f32 0.2, %v7126_v0  ;;  %v6937_v44 = vadd.f32 %v6936_v1, %v12472_v33 }
 0x525   : > { %v7130_v58 = vadd.f32 %v7129_v41, %v12474_v36  ;;  %v7578_v5 = vmax.f32 %v6931_v16, %v7322_v20  ;;  %v7580_v10 = vmax.f32 %v7124_v54, %v7324_v23  ;;  %v7330_v24 = vmul.f32 0.2, %v6935_v11 }
 0x526   : > { %v7332_v22 = vmul.f32 0.2, %v7128_v63  ;;  %v7579_v59 = vmax.f32 %v6933_v43, %v7323_v17  ;;  %v7581_v15 = vmax.f32 %v7126_v0, %v7325_v37  ;;  %v7331_v50 = vmul.f32 0.2, %v6937_v44 }
 0x527   : > { %v7333_v13 = vmul.f32 0.2, %v7130_v58  ;;  %v7869_v25 = vmax.f32 %v7868_v60, %v7578_v5  ;;  %v7931_v35 = vmax.f32 %v7930_v30, %v7580_v10  ;;  %v7586_v46 = vmax.f32 %v6935_v11, %v7330_v24 }
 0x528   : > { %v7588_v61 = vmax.f32 %v7128_v63, %v7332_v22  ;;  %v7900_v2 = vmax.f32 %v7899_v55, %v7579_v59  ;;  %v7962_v9 = vmax.f32 %v7961_v45, %v7581_v15  ;;  %v7587_v34 = vmax.f32 %v6937_v44, %v7331_v50  ;;  %v6940_v42 = vpop.f32.mrb[92].mxu0  ;;  %v7133_v56 = vpop.f32.mrb[92].mxu1 }
 0x529   : > { %v7589_v27 = vmax.f32 %v7130_v58, %v7333_v13  ;;  %v7870_v28 = vmax.f32 %v7869_v25, %v7586_v46  ;;  %v6941_v31 = vadd.f32 %v6940_v42, %v12466_v26  ;;  %v7134_v47 = vadd.f32 %v7133_v56, %v12468_v49  ;;  %v6942_v38 = vpop.f32.mrb[93].mxu0  ;;  %v7135_v48 = vpop.f32.mrb[93].mxu1 }
 0x52a   : > { %v7932_v18 = vmax.f32 %v7931_v35, %v7588_v61  ;;  %v7901_v40 = vmax.f32 %v7900_v2, %v7587_v34  ;;  %v6943_v62 = vadd.f32 %v6942_v38, %v12472_v33  ;;  %v7136_v32 = vadd.f32 %v7135_v48, %v12474_v36  ;;  %v6944_v14 = vpop.f32.mrb[94].mxu0  ;;  %v7137_v21 = vpop.f32.mrb[94].mxu1 }
 0x52b   : > { %v7963_v3 = vmax.f32 %v7962_v9, %v7589_v27  ;;  %v7338_v8 = vmul.f32 0.2, %v6941_v31  ;;  %v7340_v52 = vmul.f32 0.2, %v7134_v47  ;;  %v6945_v57 = vadd.f32 %v6944_v14, %v12466_v26  ;;  %v6946_v29 = vpop.f32.mrb[95].mxu0  ;;  %v7139_v39 = vpop.f32.mrb[95].mxu1 }
 0x52c   : > { %v7138_v12 = vadd.f32 %v7137_v21, %v12468_v49  ;;  %v7339_v4 = vmul.f32 0.2, %v6943_v62  ;;  %v7341_v19 = vmul.f32 0.2, %v7136_v32  ;;  %v6947_v60 = vadd.f32 %v6946_v29, %v12472_v33 }
 0x52d   : > { %v7140_v30 = vadd.f32 %v7139_v39, %v12474_v36  ;;  %v7594_v16 = vmax.f32 %v6941_v31, %v7338_v8  ;;  %v7596_v54 = vmax.f32 %v7134_v47, %v7340_v52  ;;  %v7346_v6 = vmul.f32 0.2, %v6945_v57 }
 0x52e   : > { %v7348_v7 = vmul.f32 0.2, %v7138_v12  ;;  %v7595_v55 = vmax.f32 %v6943_v62, %v7339_v4  ;;  %v7597_v45 = vmax.f32 %v7136_v32, %v7341_v19  ;;  %v7347_v43 = vmul.f32 0.2, %v6947_v60 }
 0x52f   : > { %v7349_v0 = vmul.f32 0.2, %v7140_v30  ;;  %v7871_v51 = vmax.f32 %v7870_v28, %v7594_v16  ;;  %v7933_v53 = vmax.f32 %v7932_v18, %v7596_v54  ;;  %v7602_v20 = vmax.f32 %v6945_v57, %v7346_v6 }
 0x530   : > { %v7604_v23 = vmax.f32 %v7138_v12, %v7348_v7  ;;  %v7902_v11 = vmax.f32 %v7901_v40, %v7595_v55  ;;  %v7964_v63 = vmax.f32 %v7963_v3, %v7597_v45  ;;  %v7603_v1 = vmax.f32 %v6947_v60, %v7347_v43  ;;  %v6950_v17 = vpop.f32.mrb[96].mxu0  ;;  %v7143_v37 = vpop.f32.mrb[96].mxu1 }
 0x531   : > { %v7605_v41 = vmax.f32 %v7140_v30, %v7349_v0  ;;  %v7872_v44 = vmax.f32 %v7871_v51, %v7602_v20  ;;  %v6951_v5 = vadd.f32 %v6950_v17, %v12466_v26  ;;  %v7144_v10 = vadd.f32 %v7143_v37, %v12468_v49  ;;  %v6952_v24 = vpop.f32.mrb[97].mxu0  ;;  %v7145_v22 = vpop.f32.mrb[97].mxu1 }
 0x532   : > { %v7934_v58 = vmax.f32 %v7933_v53, %v7604_v23  ;;  %v7903_v59 = vmax.f32 %v7902_v11, %v7603_v1  ;;  %v6953_v50 = vadd.f32 %v6952_v24, %v12472_v33  ;;  %v7146_v13 = vadd.f32 %v7145_v22, %v12474_v36  ;;  %v6954_v25 = vpop.f32.mrb[98].mxu0  ;;  %v7147_v35 = vpop.f32.mrb[98].mxu1 }
 0x533   : > { %v7965_v15 = vmax.f32 %v7964_v63, %v7605_v41  ;;  %v7354_v46 = vmul.f32 0.2, %v6951_v5  ;;  %v7356_v61 = vmul.f32 0.2, %v7144_v10  ;;  %v6955_v2 = vadd.f32 %v6954_v25, %v12466_v26  ;;  %v6956_v34 = vpop.f32.mrb[99].mxu0  ;;  %v7149_v27 = vpop.f32.mrb[99].mxu1 }
 0x534   : > { %v7148_v9 = vadd.f32 %v7147_v35, %v12468_v49  ;;  %v7355_v42 = vmul.f32 0.2, %v6953_v50  ;;  %v7357_v56 = vmul.f32 0.2, %v7146_v13  ;;  %v6957_v28 = vadd.f32 %v6956_v34, %v12472_v33 }
 0x535   : > { %v7150_v18 = vadd.f32 %v7149_v27, %v12474_v36  ;;  %v7610_v31 = vmax.f32 %v6951_v5, %v7354_v46  ;;  %v7612_v47 = vmax.f32 %v7144_v10, %v7356_v61  ;;  %v7362_v38 = vmul.f32 0.2, %v6955_v2 }
 0x536   : > { %v7364_v48 = vmul.f32 0.2, %v7148_v9  ;;  %v7611_v40 = vmax.f32 %v6953_v50, %v7355_v42  ;;  %v7613_v3 = vmax.f32 %v7146_v13, %v7357_v56  ;;  %v7363_v62 = vmul.f32 0.2, %v6957_v28 }
 0x537   : > { %v7365_v32 = vmul.f32 0.2, %v7150_v18  ;;  %v7873_v14 = vmax.f32 %v7872_v44, %v7610_v31  ;;  %v7935_v21 = vmax.f32 %v7934_v58, %v7612_v47  ;;  %v7618_v8 = vmax.f32 %v6955_v2, %v7362_v38 }
 0x538   : > { %v7620_v52 = vmax.f32 %v7148_v9, %v7364_v48  ;;  %v7904_v57 = vmax.f32 %v7903_v59, %v7611_v40  ;;  %v7966_v12 = vmax.f32 %v7965_v15, %v7613_v3  ;;  %v7619_v29 = vmax.f32 %v6957_v28, %v7363_v62  ;;  %v6960_v4 = vpop.f32.mrb[100].mxu0  ;;  %v7153_v19 = vpop.f32.mrb[100].mxu1 }
 0x539   : > { %v7621_v39 = vmax.f32 %v7150_v18, %v7365_v32  ;;  %v7874_v60 = vmax.f32 %v7873_v14, %v7618_v8  ;;  %v6961_v16 = vadd.f32 %v6960_v4, %v12466_v26  ;;  %v7154_v54 = vadd.f32 %v7153_v19, %v12468_v49  ;;  %v6962_v6 = vpop.f32.mrb[101].mxu0  ;;  %v7155_v7 = vpop.f32.mrb[101].mxu1 }
 0x53a   : > { %v7936_v30 = vmax.f32 %v7935_v21, %v7620_v52  ;;  %v7905_v55 = vmax.f32 %v7904_v57, %v7619_v29  ;;  %v6963_v43 = vadd.f32 %v6962_v6, %v12472_v33  ;;  %v7156_v0 = vadd.f32 %v7155_v7, %v12474_v36  ;;  %v6964_v51 = vpop.f32.mrb[102].mxu0  ;;  %v7157_v53 = vpop.f32.mrb[102].mxu1 }
 0x53b   : > { %v7967_v45 = vmax.f32 %v7966_v12, %v7621_v39  ;;  %v7370_v20 = vmul.f32 0.2, %v6961_v16  ;;  %v7372_v23 = vmul.f32 0.2, %v7154_v54  ;;  %v6965_v11 = vadd.f32 %v6964_v51, %v12466_v26  ;;  %v6966_v1 = vpop.f32.mrb[103].mxu0  ;;  %v7159_v41 = vpop.f32.mrb[103].mxu1 }
 0x53c   : > { %v7158_v63 = vadd.f32 %v7157_v53, %v12468_v49  ;;  %v7371_v17 = vmul.f32 0.2, %v6963_v43  ;;  %v7373_v37 = vmul.f32 0.2, %v7156_v0  ;;  %v6967_v44 = vadd.f32 %v6966_v1, %v12472_v33 }
 0x53d   : > { %v7160_v58 = vadd.f32 %v7159_v41, %v12474_v36  ;;  %v7626_v5 = vmax.f32 %v6961_v16, %v7370_v20  ;;  %v7628_v10 = vmax.f32 %v7154_v54, %v7372_v23  ;;  %v7378_v24 = vmul.f32 0.2, %v6965_v11 }
 0x53e   : > { %v7380_v22 = vmul.f32 0.2, %v7158_v63  ;;  %v7627_v59 = vmax.f32 %v6963_v43, %v7371_v17  ;;  %v7629_v15 = vmax.f32 %v7156_v0, %v7373_v37  ;;  %v7379_v50 = vmul.f32 0.2, %v6967_v44 }
 0x53f   : > { %v7381_v13 = vmul.f32 0.2, %v7160_v58  ;;  %v7875_v25 = vmax.f32 %v7874_v60, %v7626_v5  ;;  %v7937_v35 = vmax.f32 %v7936_v30, %v7628_v10  ;;  %v7634_v46 = vmax.f32 %v6965_v11, %v7378_v24 }
 0x540   : > { %v7636_v61 = vmax.f32 %v7158_v63, %v7380_v22  ;;  %v7906_v2 = vmax.f32 %v7905_v55, %v7627_v59  ;;  %v7968_v9 = vmax.f32 %v7967_v45, %v7629_v15  ;;  %v7635_v34 = vmax.f32 %v6967_v44, %v7379_v50  ;;  %v6970_v42 = vpop.f32.mrb[104].mxu0  ;;  %v7163_v56 = vpop.f32.mrb[104].mxu1 }
 0x541   : > { %v7637_v27 = vmax.f32 %v7160_v58, %v7381_v13  ;;  %v7876_v28 = vmax.f32 %v7875_v25, %v7634_v46  ;;  %v6971_v31 = vadd.f32 %v6970_v42, %v12466_v26  ;;  %v7164_v47 = vadd.f32 %v7163_v56, %v12468_v49  ;;  %v6972_v38 = vpop.f32.mrb[105].mxu0  ;;  %v7165_v48 = vpop.f32.mrb[105].mxu1 }
 0x542   : > { %v7938_v18 = vmax.f32 %v7937_v35, %v7636_v61  ;;  %v7907_v40 = vmax.f32 %v7906_v2, %v7635_v34  ;;  %v6973_v62 = vadd.f32 %v6972_v38, %v12472_v33  ;;  %v7166_v32 = vadd.f32 %v7165_v48, %v12474_v36  ;;  %v6974_v14 = vpop.f32.mrb[106].mxu0  ;;  %v7167_v21 = vpop.f32.mrb[106].mxu1 }
 0x543   : > { %v7969_v3 = vmax.f32 %v7968_v9, %v7637_v27  ;;  %v7386_v8 = vmul.f32 0.2, %v6971_v31  ;;  %v7388_v52 = vmul.f32 0.2, %v7164_v47  ;;  %v6975_v57 = vadd.f32 %v6974_v14, %v12466_v26  ;;  %v6976_v29 = vpop.f32.mrb[107].mxu0  ;;  %v7169_v39 = vpop.f32.mrb[107].mxu1 }
 0x544   : > { %v7168_v12 = vadd.f32 %v7167_v21, %v12468_v49  ;;  %v7387_v4 = vmul.f32 0.2, %v6973_v62  ;;  %v7389_v19 = vmul.f32 0.2, %v7166_v32  ;;  %v6977_v60 = vadd.f32 %v6976_v29, %v12472_v33 }
 0x545   : > { %v7170_v30 = vadd.f32 %v7169_v39, %v12474_v36  ;;  %v7642_v16 = vmax.f32 %v6971_v31, %v7386_v8  ;;  %v7644_v54 = vmax.f32 %v7164_v47, %v7388_v52  ;;  %v7394_v6 = vmul.f32 0.2, %v6975_v57 }
 0x546   : > { %v7396_v7 = vmul.f32 0.2, %v7168_v12  ;;  %v7643_v55 = vmax.f32 %v6973_v62, %v7387_v4  ;;  %v7645_v45 = vmax.f32 %v7166_v32, %v7389_v19  ;;  %v7395_v43 = vmul.f32 0.2, %v6977_v60 }
 0x547   : > { %v7397_v0 = vmul.f32 0.2, %v7170_v30  ;;  %v7877_v51 = vmax.f32 %v7876_v28, %v7642_v16  ;;  %v7939_v53 = vmax.f32 %v7938_v18, %v7644_v54  ;;  %v7650_v20 = vmax.f32 %v6975_v57, %v7394_v6 }
 0x548   : > { %v7652_v23 = vmax.f32 %v7168_v12, %v7396_v7  ;;  %v7908_v11 = vmax.f32 %v7907_v40, %v7643_v55  ;;  %v7970_v63 = vmax.f32 %v7969_v3, %v7645_v45  ;;  %v7651_v1 = vmax.f32 %v6977_v60, %v7395_v43  ;;  %v6980_v17 = vpop.f32.mrb[108].mxu0  ;;  %v7173_v37 = vpop.f32.mrb[108].mxu1 }
 0x549   : > { %v7653_v41 = vmax.f32 %v7170_v30, %v7397_v0  ;;  %v7878_v44 = vmax.f32 %v7877_v51, %v7650_v20  ;;  %v6981_v5 = vadd.f32 %v6980_v17, %v12466_v26  ;;  %v7174_v10 = vadd.f32 %v7173_v37, %v12468_v49  ;;  %v6982_v24 = vpop.f32.mrb[109].mxu0  ;;  %v7175_v22 = vpop.f32.mrb[109].mxu1 }
 0x54a   : > { %v7940_v58 = vmax.f32 %v7939_v53, %v7652_v23  ;;  %v7909_v59 = vmax.f32 %v7908_v11, %v7651_v1  ;;  %v6983_v50 = vadd.f32 %v6982_v24, %v12472_v33  ;;  %v7176_v13 = vadd.f32 %v7175_v22, %v12474_v36  ;;  %v6984_v25 = vpop.f32.mrb[110].mxu0  ;;  %v7177_v35 = vpop.f32.mrb[110].mxu1 }
 0x54b   : > { %v7971_v15 = vmax.f32 %v7970_v63, %v7653_v41  ;;  %v7402_v46 = vmul.f32 0.2, %v6981_v5  ;;  %v7404_v61 = vmul.f32 0.2, %v7174_v10  ;;  %v6985_v2 = vadd.f32 %v6984_v25, %v12466_v26  ;;  %v6986_v34 = vpop.f32.mrb[111].mxu0  ;;  %v7179_v27 = vpop.f32.mrb[111].mxu1 }
 0x54c   : > { %v7178_v9 = vadd.f32 %v7177_v35, %v12468_v49  ;;  %v7403_v42 = vmul.f32 0.2, %v6983_v50  ;;  %v7405_v56 = vmul.f32 0.2, %v7176_v13  ;;  %v6987_v28 = vadd.f32 %v6986_v34, %v12472_v33 }
 0x54d   : > { %v7180_v18 = vadd.f32 %v7179_v27, %v12474_v36  ;;  %v7658_v31 = vmax.f32 %v6981_v5, %v7402_v46  ;;  %v7660_v47 = vmax.f32 %v7174_v10, %v7404_v61  ;;  %v7410_v38 = vmul.f32 0.2, %v6985_v2 }
 0x54e   : > { %v7412_v48 = vmul.f32 0.2, %v7178_v9  ;;  %v7659_v40 = vmax.f32 %v6983_v50, %v7403_v42  ;;  %v7661_v3 = vmax.f32 %v7176_v13, %v7405_v56  ;;  %v7411_v62 = vmul.f32 0.2, %v6987_v28 }
 0x54f   : > { %v7413_v32 = vmul.f32 0.2, %v7180_v18  ;;  %v7879_v14 = vmax.f32 %v7878_v44, %v7658_v31  ;;  %v7941_v21 = vmax.f32 %v7940_v58, %v7660_v47  ;;  %v7666_v8 = vmax.f32 %v6985_v2, %v7410_v38 }
 0x550   : > { %v7668_v52 = vmax.f32 %v7178_v9, %v7412_v48  ;;  %v7910_v57 = vmax.f32 %v7909_v59, %v7659_v40  ;;  %v7972_v12 = vmax.f32 %v7971_v15, %v7661_v3  ;;  %v7667_v29 = vmax.f32 %v6987_v28, %v7411_v62  ;;  %v6990_v4 = vpop.f32.mrb[112].mxu0  ;;  %v7183_v19 = vpop.f32.mrb[112].mxu1 }
 0x551   : > { %v7669_v39 = vmax.f32 %v7180_v18, %v7413_v32  ;;  %v7880_v60 = vmax.f32 %v7879_v14, %v7666_v8  ;;  %v6991_v16 = vadd.f32 %v6990_v4, %v12466_v26  ;;  %v7184_v54 = vadd.f32 %v7183_v19, %v12468_v49  ;;  %v6992_v6 = vpop.f32.mrb[113].mxu0  ;;  %v7185_v7 = vpop.f32.mrb[113].mxu1 }
 0x552   : > { %v7942_v30 = vmax.f32 %v7941_v21, %v7668_v52  ;;  %v7911_v55 = vmax.f32 %v7910_v57, %v7667_v29  ;;  %v6993_v43 = vadd.f32 %v6992_v6, %v12472_v33  ;;  %v7186_v0 = vadd.f32 %v7185_v7, %v12474_v36  ;;  %v6994_v51 = vpop.f32.mrb[114].mxu0  ;;  %v7187_v53 = vpop.f32.mrb[114].mxu1 }
 0x553   : > { %v7973_v45 = vmax.f32 %v7972_v12, %v7669_v39  ;;  %v7418_v20 = vmul.f32 0.2, %v6991_v16  ;;  %v7420_v23 = vmul.f32 0.2, %v7184_v54  ;;  %v6995_v11 = vadd.f32 %v6994_v51, %v12466_v26  ;;  %v6996_v1 = vpop.f32.mrb[115].mxu0  ;;  %v7189_v41 = vpop.f32.mrb[115].mxu1 }
 0x554   : > { %v7188_v63 = vadd.f32 %v7187_v53, %v12468_v49  ;;  %v7419_v17 = vmul.f32 0.2, %v6993_v43  ;;  %v7421_v37 = vmul.f32 0.2, %v7186_v0  ;;  %v6997_v44 = vadd.f32 %v6996_v1, %v12472_v33 }
 0x555   : > { %v7190_v58 = vadd.f32 %v7189_v41, %v12474_v36  ;;  %v7674_v5 = vmax.f32 %v6991_v16, %v7418_v20  ;;  %v7676_v10 = vmax.f32 %v7184_v54, %v7420_v23  ;;  %v7426_v24 = vmul.f32 0.2, %v6995_v11 }
 0x556   : > { %v7428_v22 = vmul.f32 0.2, %v7188_v63  ;;  %v7675_v59 = vmax.f32 %v6993_v43, %v7419_v17  ;;  %v7677_v15 = vmax.f32 %v7186_v0, %v7421_v37  ;;  %v7427_v50 = vmul.f32 0.2, %v6997_v44 }
 0x557   : > { %v7429_v13 = vmul.f32 0.2, %v7190_v58  ;;  %v7881_v25 = vmax.f32 %v7880_v60, %v7674_v5  ;;  %v7943_v35 = vmax.f32 %v7942_v30, %v7676_v10  ;;  %v7682_v46 = vmax.f32 %v6995_v11, %v7426_v24 }
 0x558   : > { %v7684_v61 = vmax.f32 %v7188_v63, %v7428_v22  ;;  %v7912_v2 = vmax.f32 %v7911_v55, %v7675_v59  ;;  %v7974_v9 = vmax.f32 %v7973_v45, %v7677_v15  ;;  %v7683_v34 = vmax.f32 %v6997_v44, %v7427_v50  ;;  %v7000_v42 = vpop.f32.mrb[116].mxu0  ;;  %v7193_v56 = vpop.f32.mrb[116].mxu1 }
 0x559   : > { %v7685_v27 = vmax.f32 %v7190_v58, %v7429_v13  ;;  %v7882_v28 = vmax.f32 %v7881_v25, %v7682_v46  ;;  %v7001_v31 = vadd.f32 %v7000_v42, %v12466_v26  ;;  %v7194_v47 = vadd.f32 %v7193_v56, %v12468_v49  ;;  %v7002_v38 = vpop.f32.mrb[117].mxu0  ;;  %v7195_v48 = vpop.f32.mrb[117].mxu1 }
 0x55a   : > { %v7944_v18 = vmax.f32 %v7943_v35, %v7684_v61  ;;  %v7913_v40 = vmax.f32 %v7912_v2, %v7683_v34  ;;  %v7003_v62 = vadd.f32 %v7002_v38, %v12472_v33  ;;  %v7196_v32 = vadd.f32 %v7195_v48, %v12474_v36  ;;  %v7004_v14 = vpop.f32.mrb[118].mxu0  ;;  %v7197_v21 = vpop.f32.mrb[118].mxu1 }
 0x55b   : > { %v7975_v3 = vmax.f32 %v7974_v9, %v7685_v27  ;;  %v7434_v8 = vmul.f32 0.2, %v7001_v31  ;;  %v7436_v52 = vmul.f32 0.2, %v7194_v47  ;;  %v7005_v57 = vadd.f32 %v7004_v14, %v12466_v26  ;;  %v7006_v29 = vpop.f32.mrb[119].mxu0  ;;  %v7199_v39 = vpop.f32.mrb[119].mxu1 }
 0x55c   : > { %v7198_v12 = vadd.f32 %v7197_v21, %v12468_v49  ;;  %v7435_v4 = vmul.f32 0.2, %v7003_v62  ;;  %v7437_v19 = vmul.f32 0.2, %v7196_v32  ;;  %v7007_v60 = vadd.f32 %v7006_v29, %v12472_v33 }
 0x55d   : > { %v7200_v30 = vadd.f32 %v7199_v39, %v12474_v36  ;;  %v7690_v16 = vmax.f32 %v7001_v31, %v7434_v8  ;;  %v7692_v54 = vmax.f32 %v7194_v47, %v7436_v52  ;;  %v7442_v6 = vmul.f32 0.2, %v7005_v57 }
 0x55e   : > { %v7444_v7 = vmul.f32 0.2, %v7198_v12  ;;  %v7691_v55 = vmax.f32 %v7003_v62, %v7435_v4  ;;  %v7693_v45 = vmax.f32 %v7196_v32, %v7437_v19  ;;  %v7443_v43 = vmul.f32 0.2, %v7007_v60 }
 0x55f   : > { %v7445_v0 = vmul.f32 0.2, %v7200_v30  ;;  %v7883_v51 = vmax.f32 %v7882_v28, %v7690_v16  ;;  %v7945_v53 = vmax.f32 %v7944_v18, %v7692_v54  ;;  %v7698_v20 = vmax.f32 %v7005_v57, %v7442_v6 }
 0x560   : > { %v7700_v23 = vmax.f32 %v7198_v12, %v7444_v7  ;;  %v7914_v11 = vmax.f32 %v7913_v40, %v7691_v55  ;;  %v7976_v63 = vmax.f32 %v7975_v3, %v7693_v45  ;;  %v7699_v1 = vmax.f32 %v7007_v60, %v7443_v43  ;;  %v7010_v17 = vpop.f32.mrb[120].mxu0  ;;  %v7203_v37 = vpop.f32.mrb[120].mxu1 }
 0x561   : > { %v7701_v41 = vmax.f32 %v7200_v30, %v7445_v0  ;;  %v7884_v44 = vmax.f32 %v7883_v51, %v7698_v20  ;;  %v7011_v5 = vadd.f32 %v7010_v17, %v12466_v26  ;;  %v7204_v10 = vadd.f32 %v7203_v37, %v12468_v49  ;;  %v7012_v24 = vpop.f32.mrb[121].mxu0  ;;  %v7205_v22 = vpop.f32.mrb[121].mxu1 }
 0x562   : > { %v7946_v58 = vmax.f32 %v7945_v53, %v7700_v23  ;;  %v7915_v59 = vmax.f32 %v7914_v11, %v7699_v1  ;;  %v7013_v50 = vadd.f32 %v7012_v24, %v12472_v33  ;;  %v7206_v13 = vadd.f32 %v7205_v22, %v12474_v36  ;;  %v7014_v25 = vpop.f32.mrb[122].mxu0  ;;  %v7207_v35 = vpop.f32.mrb[122].mxu1 }
 0x563   : > { %v7977_v15 = vmax.f32 %v7976_v63, %v7701_v41  ;;  %v7450_v46 = vmul.f32 0.2, %v7011_v5  ;;  %v7452_v61 = vmul.f32 0.2, %v7204_v10  ;;  %v7015_v2 = vadd.f32 %v7014_v25, %v12466_v26  ;;  %v7016_v34 = vpop.f32.mrb[123].mxu0  ;;  %v7209_v27 = vpop.f32.mrb[123].mxu1 }
 0x564   : > { %v7208_v9 = vadd.f32 %v7207_v35, %v12468_v49  ;;  %v7451_v42 = vmul.f32 0.2, %v7013_v50  ;;  %v7453_v56 = vmul.f32 0.2, %v7206_v13  ;;  %v7017_v28 = vadd.f32 %v7016_v34, %v12472_v33 }
 0x565   : > { %v7210_v18 = vadd.f32 %v7209_v27, %v12474_v36  ;;  %v7706_v31 = vmax.f32 %v7011_v5, %v7450_v46  ;;  %v7708_v47 = vmax.f32 %v7204_v10, %v7452_v61  ;;  %v7458_v38 = vmul.f32 0.2, %v7015_v2 }
 0x566   : > { %v7460_v48 = vmul.f32 0.2, %v7208_v9  ;;  %v7707_v40 = vmax.f32 %v7013_v50, %v7451_v42  ;;  %v7709_v3 = vmax.f32 %v7206_v13, %v7453_v56  ;;  %v7459_v62 = vmul.f32 0.2, %v7017_v28 }
 0x567   : > { %v7461_v32 = vmul.f32 0.2, %v7210_v18  ;;  %v7885_v14 = vmax.f32 %v7884_v44, %v7706_v31  ;;  %v7947_v21 = vmax.f32 %v7946_v58, %v7708_v47  ;;  %v7714_v8 = vmax.f32 %v7015_v2, %v7458_v38 }
 0x568   : > { %v7716_v52 = vmax.f32 %v7208_v9, %v7460_v48  ;;  %v7916_v57 = vmax.f32 %v7915_v59, %v7707_v40  ;;  %v7978_v12 = vmax.f32 %v7977_v15, %v7709_v3  ;;  %v7715_v29 = vmax.f32 %v7017_v28, %v7459_v62  ;;  %v7020_v4 = vpop.f32.mrb[124].mxu0  ;;  %v7213_v19 = vpop.f32.mrb[124].mxu1 }
 0x569   : > { %v7717_v39 = vmax.f32 %v7210_v18, %v7461_v32  ;;  %v7886_v60 = vmax.f32 %v7885_v14, %v7714_v8  ;;  %v7021_v16 = vadd.f32 %v7020_v4, %v12466_v26  ;;  %v7214_v54 = vadd.f32 %v7213_v19, %v12468_v49  ;;  %v7022_v6 = vpop.f32.mrb[125].mxu0  ;;  %v7215_v7 = vpop.f32.mrb[125].mxu1 }
 0x56a   : > { %v7948_v30 = vmax.f32 %v7947_v21, %v7716_v52  ;;  %v7917_v55 = vmax.f32 %v7916_v57, %v7715_v29  ;;  %v7023_v43 = vadd.f32 %v7022_v6, %v12472_v33  ;;  %v7216_v0 = vadd.f32 %v7215_v7, %v12474_v36  ;;  %v7024_v51 = vpop.f32.mrb[126].mxu0  ;;  %v7217_v53 = vpop.f32.mrb[126].mxu1 }
 0x56b   : > { %v7979_v45 = vmax.f32 %v7978_v12, %v7717_v39  ;;  %v7466_v20 = vmul.f32 0.2, %v7021_v16  ;;  %v7468_v23 = vmul.f32 0.2, %v7214_v54  ;;  %v7025_v11 = vadd.f32 %v7024_v51, %v12466_v26  ;;  %v7026_v1 = vpop.f32.mrb[127].mxu0  ;;  %v7219_v41 = vpop.f32.mrb[127].mxu1 }
 0x56c   : > { %v7218_v63 = vadd.f32 %v7217_v53, %v12468_v49  ;;  %v7467_v17 = vmul.f32 0.2, %v7023_v43  ;;  %v7469_v37 = vmul.f32 0.2, %v7216_v0  ;;  %v7027_v44 = vadd.f32 %v7026_v1, %v12472_v33 }
 0x56d   : > { %v7220_v58 = vadd.f32 %v7219_v41, %v12474_v36  ;;  %v7722_v5 = vmax.f32 %v7021_v16, %v7466_v20  ;;  %v7724_v10 = vmax.f32 %v7214_v54, %v7468_v23  ;;  %v7474_v24 = vmul.f32 0.2, %v7025_v11 }
 0x56e   : > { %v7476_v22 = vmul.f32 0.2, %v7218_v63  ;;  %v7723_v59 = vmax.f32 %v7023_v43, %v7467_v17  ;;  %v7725_v15 = vmax.f32 %v7216_v0, %v7469_v37  ;;  %v7475_v50 = vmul.f32 0.2, %v7027_v44 }
 0x56f   : > { %v7477_v26 = vmul.f32 0.2, %v7220_v58  ;;  %v7887_v49 = vmax.f32 %v7886_v60, %v7722_v5  ;;  %v7949_v13 = vmax.f32 %v7948_v30, %v7724_v10  ;;  %v7730_v25 = vmax.f32 %v7025_v11, %v7474_v24 }
 0x570   : > { %v7732_v35 = vmax.f32 %v7218_v63, %v7476_v22  ;;  %v7918_v46 = vmax.f32 %v7917_v55, %v7723_v59  ;;  %v7980_v33 = vmax.f32 %v7979_v45, %v7725_v15  ;;  %v7731_v61 = vmax.f32 %v7027_v44, %v7475_v50 }
 0x571   : > { %v7733_v36 = vmax.f32 %v7220_v58, %v7477_v26  ;;  %v7888_v2 = vmax.f32 %v7887_v49, %v7730_v25 }
 0x572   : > { %v7950_v9 = vmax.f32 %v7949_v13, %v7732_v35  ;;  %v7919_v34 = vmax.f32 %v7918_v46, %v7731_v61 }
 0x573   : > { %v7981_v27 = vmax.f32 %v7980_v33, %v7733_v36  ;;  %7990 = vst [vmem:[%s12614_s21 + $0x20] sm:$0xff] %v7888_v2 }
 0x574   : > { %7992 = vst [vmem:[%s12614_s21 + $0x30] sm:$0xff] %v7950_v9  ;;  %7991 = vst [vmem:[%s12614_s21 + $0x28] sm:$0xff] %v7919_v34 }
 0x575   : > { %7993 = vst [vmem:[%s12614_s21 + $0x38] sm:$0xff] %v7981_v27 }
 0x576 PF: > { %s17_s26 = sadd.s32 1, %s9898_s26   ;;  %s12890_s24 = smov %s9894_s25 }
 0x577   : > { %p14_p5 = scmp.ge.s32.totalorder %s17_s26, 4   ;;  %s12891_s25 = smov %s12893_s27 }
 0x579   :  { %16 = sbr.rel (!%p14_p5) target bundleno = 2 (0x2), region = 93 }

</bundles_post_ra>
